<compile_context>
chip_gen: v5e
topology: v5e:2x2
jax: 0.10.0
libtpu: 0.0.40
codegen_flags: <defaults>
</compile_context>

<pallas_src>
import jax
import jax.numpy as jnp
from jax import lax
from jax.experimental import pallas as pl
from jax.experimental.pallas import tpu as pltpu

EPS = 1e-5  # nn.InstanceNorm2d default eps
HIGHEST = jax.lax.Precision.HIGHEST  # wrapper / reference only (never in-kernel)


def adain_resblock_kernel(x_ref, mod_ref, w1_ref, b1_ref, w2_ref, b2_ref,
                          sw1_ref, sw2_ref, o_ref, pad_ref, h_ref):
    H, W, C = x_ref.shape
    C3 = 3 * C
    RH = 8 if H % 8 == 0 else H          # H-rows per chunk (matmul M = RH * W)
    NC = H // RH                          # chunks per sample
    f32 = jnp.float32
    bf16 = jnp.bfloat16
    inv_hw = 1.0 / float(H * W)

    # Zero only the two H-halo rows of the im2col scratch (outer-dim, aligned
    # stores). Rows 1..H are fully rewritten before every conv; the W halo is
    # handled with rolls + masks, so there is no misaligned interior store.
    pad_ref[0, :, :] = jnp.zeros((W, C3), pad_ref.dtype)
    pad_ref[H + 1, :, :] = jnp.zeros((W, C3), pad_ref.dtype)

    # W-boundary masks for the rolled (kw=0 / kw=2) taps. Hoisted out of loops.
    wcol = lax.broadcasted_iota(jnp.int32, (RH, W, C), 1)
    is_w0 = wcol == 0
    is_wL = wcol == W - 1

    # Precomputed AdaIN modulation [gamma1 | beta1 | gamma2 | beta2]: (1, 4C).
    mod = mod_ref[...].astype(f32)
    g1, be1 = mod[:, 0 * C:1 * C], mod[:, 1 * C:2 * C]
    g2, be2 = mod[:, 2 * C:3 * C], mod[:, 3 * C:4 * C]

    def stats(src_ref):
        """Per-channel mean / biased var over (H, W), accumulated per H-chunk."""
        s = jnp.zeros((1, C), f32)
        ss = jnp.zeros((1, C), f32)
        for hc in range(NC):
            t = src_ref[hc * RH:(hc + 1) * RH, :, :].astype(f32)
            s = s + jnp.sum(t, axis=(0, 1), keepdims=True).reshape(1, C)
            ss = ss + jnp.sum(t * t, axis=(0, 1), keepdims=True).reshape(1, C)
        mean = s * inv_hw
        var = ss * inv_hw - mean * mean   # biased variance, like torch InstanceNorm2d
        return mean, var

    def adain_silu_im2col(src_ref, gamma, beta):
        """IN -> affine -> SiLU, then write bf16 im2col rows [a(w-1)|a(w)|a(w+1)]
        into pad_ref rows 1..H, chunked over H to bound vreg pressure."""
        mean, var = stats(src_ref)
        rstd = lax.rsqrt(var + EPS)
        scale = ((1.0 + gamma) * rstd).reshape(1, 1, C)
        shift = (beta - (1.0 + gamma) * mean * rstd).reshape(1, 1, C)
        for hc in range(NC):
            h0 = hc * RH
            a = src_ref[h0:h0 + RH, :, :].astype(f32) * scale + shift
            a = a * jax.nn.sigmoid(a)                                  # SiLU (f32)
            left = jnp.where(is_w0, 0.0, pltpu.roll(a, shift=1, axis=1))
            right = jnp.where(is_wL, 0.0, pltpu.roll(a, shift=W - 1, axis=1))
            cat = jnp.concatenate(
                [left.astype(bf16), a.astype(bf16), right.astype(bf16)],
                axis=-1)                                               # (RH, W, 3C)
            pad_ref[h0 + 1:h0 + 1 + RH, :, :] = cat

    def conv3x3(w_ref, b_ref):
        """'same' 3x3 conv from the im2col scratch: per H-chunk, three
        (RH*W, 3C) @ (3C, C) matmuls (one per kh) with a contiguous accumulate
        chain; result (+bias) is written to the f32 stage buffer h_ref."""
        bias = b_ref[...].astype(f32).reshape(1, 1, C)
        for hc in range(NC):
            h0 = hc * RH
            acc = jnp.dot(pad_ref[h0:h0 + RH, :, :].reshape(RH * W, C3),
                          w_ref[0], preferred_element_type=f32)
            acc = acc + jnp.dot(pad_ref[h0 + 1:h0 + 1 + RH, :, :].reshape(RH * W, C3),
                                w_ref[1], preferred_element_type=f32)
            acc = acc + jnp.dot(pad_ref[h0 + 2:h0 + 2 + RH, :, :].reshape(RH * W, C3),
                                w_ref[2], preferred_element_type=f32)
            h_ref[h0:h0 + RH, :, :] = acc.reshape(RH, W, C) + bias

    # norm1 + actv1 + conv1          (x_ref -> pad_ref -> h_ref)
    adain_silu_im2col(x_ref, g1, be1)
    conv3x3(w1_ref, b1_ref)

    # norm2 + actv2 + conv2          (h_ref -> pad_ref -> h_ref; h1 fully consumed
    # by the stats / im2col reads before conv2 overwrites it)
    adain_silu_im2col(h_ref, g2, be2)
    conv3x3(w2_ref, b2_ref)

    # Squeeze-and-Excitation: global avg pool -> fc -> SiLU -> fc -> sigmoid.
    pooled = jnp.zeros((1, C), f32)
    for hc in range(NC):
        pooled = pooled + jnp.sum(h_ref[hc * RH:(hc + 1) * RH, :, :],
                                  axis=(0, 1), keepdims=True).reshape(1, C)
    pooled = pooled * inv_hw
    y = jnp.dot(pooled.astype(bf16), sw1_ref[...], preferred_element_type=f32)
    y = y * jax.nn.sigmoid(y)                                          # SiLU
    y = jnp.dot(y.astype(bf16), sw2_ref[...], preferred_element_type=f32)
    y = jax.nn.sigmoid(y).reshape(1, 1, C)

    # Epilogue: SE channel scaling + residual. x is re-read here (never kept live).
    for hc in range(NC):
        h0 = hc * RH
        out = h_ref[h0:h0 + RH, :, :] * y + x_ref[h0:h0 + RH, :, :].astype(f32)
        o_ref[h0:h0 + RH, :, :] = out.astype(o_ref.dtype)


def adain_residual_block(x_nchw, z, params):
    """x_nchw: (B, C, H, W), z: (B, latent_dim). Returns (B, C, H, W)."""
    B, C, H, W = x_nchw.shape
    Cr = params["se_w1"].shape[1]

    x = jnp.transpose(x_nchw, (0, 2, 3, 1))   # NCHW -> NHWC (channels on lanes)

    # AdaIN modulation precomputed once in XLA (no M=1 matmuls in-kernel).
    zf = z.astype(jnp.float32)
    mod = jnp.concatenate(
        [jnp.dot(zf, params["fc1_w"], precision=HIGHEST) + params["fc1_b"],
         jnp.dot(zf, params["fc2_w"], precision=HIGHEST) + params["fc2_b"]],
        axis=-1).reshape(B, 1, 4 * C)

    # bf16 matmul operands (default-precision MXU truncates f32 -> bf16 anyway).
    w1 = params["conv1_w3"].astype(jnp.bfloat16)   # (3, 3C, C), rows ordered (kw, ci)
    w2 = params["conv2_w3"].astype(jnp.bfloat16)
    sw1 = params["se_w1"].astype(jnp.bfloat16)
    sw2 = params["se_w2"].astype(jnp.bfloat16)

    def rep(shape):
        return pl.BlockSpec(shape, lambda b, _n=len(shape): (0,) * _n)

    grid_spec = pltpu.PrefetchScalarGridSpec(
        num_scalar_prefetch=0,
        grid=(B,),                                   # one sample per grid step
        in_specs=[
            pl.BlockSpec((None, H, W, C), lambda b: (b, 0, 0, 0)),   # x
            pl.BlockSpec((None, 1, 4 * C), lambda b: (b, 0, 0)),     # AdaIN modulation
            rep((3, 3 * C, C)), rep((1, C)),                         # conv1 w / b
            rep((3, 3 * C, C)), rep((1, C)),                         # conv2 w / b
            rep((C, Cr)), rep((Cr, C)),                              # SE fc1 / fc2
        ],
        out_specs=pl.BlockSpec((None, H, W, C), lambda b: (b, 0, 0, 0)),
        scratch_shapes=[
            pltpu.VMEM((H + 2, W, 3 * C), jnp.bfloat16),   # im2col rows, H-halo only
            pltpu.VMEM((H, W, C), jnp.float32),            # conv-output stage buffer
        ],
    )

    out_nhwc = pl.pallas_call(
        adain_resblock_kernel,
        out_shape=jax.ShapeDtypeStruct((B, H, W, C), x.dtype),
        grid_spec=grid_spec,
        compiler_params=pltpu.CompilerParams(dimension_semantics=("parallel",)),
    )(x, mod, w1, params["conv1_b"], w2, params["conv2_b"], sw1, sw2)

    return jnp.transpose(out_nhwc, (0, 3, 1, 2))   # back to NCHW


def reference_forward(x_nchw, z, params):
    """Pure-JAX reference mirroring the PyTorch forward (full f32 precision)."""
    x = jnp.transpose(x_nchw, (0, 2, 3, 1)).astype(jnp.float32)  # NHWC
    C = x.shape[-1]

    def adain(t, fc_w, fc_b):
        h = jnp.dot(z.astype(jnp.float32), fc_w, precision=HIGHEST) + fc_b  # (B, 2C)
        gamma = h[:, :C][:, None, None, :]
        beta = h[:, C:][:, None, None, :]
        mean = jnp.mean(t, axis=(1, 2), keepdims=True)
        var = jnp.mean((t - mean) ** 2, axis=(1, 2), keepdims=True)
        tn = (t - mean) / jnp.sqrt(var + EPS)
        return (1.0 + gamma) * tn + beta

    def silu(v):
        return v * jax.nn.sigmoid(v)

    def conv(t, w_oihw, bias):
        out = lax.conv_general_dilated(
            t, jnp.transpose(w_oihw, (2, 3, 1, 0)), window_strides=(1, 1),
            padding="SAME", dimension_numbers=("NHWC", "HWIO", "NHWC"),
            precision=HIGHEST)
        return out + bias  # bias: (1, C), broadcasts over channels

    out = silu(adain(x, params["fc1_w"], params["fc1_b"]))
    out = conv(out, params["conv1_w"], params["conv1_b"])
    out = silu(adain(out, params["fc2_w"], params["fc2_b"]))
    out = conv(out, params["conv2_w"], params["conv2_b"])
    pooled = jnp.mean(out, axis=(1, 2))                               # (B, C)
    y = silu(jnp.dot(pooled, params["se_w1"], precision=HIGHEST))
    y = jax.nn.sigmoid(jnp.dot(y, params["se_w2"], precision=HIGHEST))
    out = out * y[:, None, None, :] + x
    return jnp.transpose(out, (0, 3, 1, 2))


if __name__ == "__main__":
    B, C, H, W = 4, 32, 16, 16   # features = 32 (SE reduction 16 -> hidden 2)
    L = 8                        # latent_dim / style_dim
    Cr = C // 16

    key = jax.random.PRNGKey(0)
    ks = jax.random.split(key, 12)

    def nrm(k, shape, scale):
        return jax.random.normal(k, shape, dtype=jnp.float32) * scale

    params = {
        "fc1_w": nrm(ks[0], (L, 2 * C), 1.0 / (L ** 0.5)),
        "fc1_b": nrm(ks[1], (1, 2 * C), 0.1),
        "fc2_w": nrm(ks[2], (L, 2 * C), 1.0 / (L ** 0.5)),
        "fc2_b": nrm(ks[3], (1, 2 * C), 0.1),
        "conv1_w": nrm(ks[4], (C, C, 3, 3), 1.0 / ((9 * C) ** 0.5)),
        "conv1_b": nrm(ks[5], (1, C), 0.1),
        "conv2_w": nrm(ks[6], (C, C, 3, 3), 1.0 / ((9 * C) ** 0.5)),
        "conv2_b": nrm(ks[7], (1, C), 0.1),
        "se_w1": nrm(ks[8], (C, Cr), 1.0 / (C ** 0.5)),   # Linear(C, C//16, bias=False)
        "se_w2": nrm(ks[9], (Cr, C), 1.0 / (Cr ** 0.5)),  # Linear(C//16, C, bias=False)
    }
    # PyTorch (Cout, Cin, kh, kw) -> (kh, kw*Cin + ci, Cout): one (3C, C) weight
    # per kh, matching the lane order of the in-kernel [w-1 | w | w+1] im2col rows.
    params["conv1_w3"] = jnp.transpose(params["conv1_w"], (2, 3, 1, 0)).reshape(3, 3 * C, C)
    params["conv2_w3"] = jnp.transpose(params["conv2_w"], (2, 3, 1, 0)).reshape(3, 3 * C, C)

    x = jax.random.normal(ks[10], (B, C, H, W), dtype=jnp.float32)
    z = jax.random.normal(ks[11], (B, L), dtype=jnp.float32)

    out = adain_residual_block(x, z, params)
    out = jax.block_until_ready(out)

    ref = reference_forward(x, z, params)
    # Kernel matmuls use bf16 operands with f32 accumulation (same numerics as
    # default-precision MXU) vs a HIGHEST-precision f32 reference, so compare
    # with a normalized (rel+abs) metric.
    err = float(jnp.max(jnp.abs(out - ref) / (1.0 + jnp.abs(ref))))
    assert out.shape == (B, C, H, W)
    assert err < 5e-2, f"normalized max err {err}"
    print("KERNEL_OK")
</pallas_src>

<mosaic_0001>
module attributes {stable_mosaic.version = 11 : i64} {
  func.func @adain_resblock_kernel(%arg0: i32, %arg1: memref<1x16x16x32xf32, #tpu.memory_space<vmem>>, %arg2: memref<1x1x128xf32, #tpu.memory_space<vmem>>, %arg3: memref<3x96x32xbf16, #tpu.memory_space<vmem>>, %arg4: memref<1x32xf32, #tpu.memory_space<vmem>>, %arg5: memref<3x96x32xbf16, #tpu.memory_space<vmem>>, %arg6: memref<1x32xf32, #tpu.memory_space<vmem>>, %arg7: memref<32x2xbf16, #tpu.memory_space<vmem>>, %arg8: memref<2x32xbf16, #tpu.memory_space<vmem>>, %arg9: memref<1x16x16x32xf32, #tpu.memory_space<vmem>>, %arg10: memref<18x16x96xbf16, #tpu.memory_space<vmem>>, %arg11: memref<16x16x32xf32, #tpu.memory_space<vmem>>) attributes {dimension_semantics = [#tpu.dimension_semantics<parallel>], iteration_bounds = array<i64: 4>, scalar_prefetch = 0 : i64, scratch_operands = 2 : i64, tpu.core_type = #tpu.core_type<tc>, window_params = [{transform_indices = @transform_0, window_bounds = array<i64: 1, 16, 16, 32>}, {transform_indices = @transform_1, window_bounds = array<i64: 1, 1, 128>}, {pipeline_mode = #tpu.pipeline_mode<synchronous>, transform_indices = @transform_2, window_bounds = array<i64: 3, 96, 32>}, {pipeline_mode = #tpu.pipeline_mode<synchronous>, transform_indices = @transform_3, window_bounds = array<i64: 1, 32>}, {pipeline_mode = #tpu.pipeline_mode<synchronous>, transform_indices = @transform_4, window_bounds = array<i64: 3, 96, 32>}, {pipeline_mode = #tpu.pipeline_mode<synchronous>, transform_indices = @transform_5, window_bounds = array<i64: 1, 32>}, {pipeline_mode = #tpu.pipeline_mode<synchronous>, transform_indices = @transform_6, window_bounds = array<i64: 32, 2>}, {pipeline_mode = #tpu.pipeline_mode<synchronous>, transform_indices = @transform_7, window_bounds = array<i64: 2, 32>}, {transform_indices = @transform_8, window_bounds = array<i64: 1, 16, 16, 32>}]} {
    %cst = arith.constant 0.000000e+00 : bf16
    %0 = vector.broadcast %cst : bf16 to vector<16x96xbf16>
    %c0 = arith.constant 0 : index
    %c0_0 = arith.constant 0 : index
    %c0_1 = arith.constant 0 : index
    %1 = vector.load %arg10[%c0, %c0_0, %c0_1] : memref<18x16x96xbf16, #tpu.memory_space<vmem>>, vector<1x16x96xbf16>
    %2 = vector.shape_cast %1 : vector<1x16x96xbf16> to vector<16x96xbf16>
    %3 = vector.shape_cast %0 : vector<16x96xbf16> to vector<1x16x96xbf16>
    tpu.vector_store %arg10[%c0, %c0_0, %c0_1], %3 {strides = array<i32>} : memref<18x16x96xbf16, #tpu.memory_space<vmem>>, vector<1x16x96xbf16>,
    %cst_2 = arith.constant 0.000000e+00 : bf16
    %4 = vector.broadcast %cst_2 : bf16 to vector<16x96xbf16>
    %c17 = arith.constant 17 : index
    %c0_3 = arith.constant 0 : index
    %c0_4 = arith.constant 0 : index
    %5 = vector.load %arg10[%c17, %c0_3, %c0_4] : memref<18x16x96xbf16, #tpu.memory_space<vmem>>, vector<1x16x96xbf16>
    %6 = vector.shape_cast %5 : vector<1x16x96xbf16> to vector<16x96xbf16>
    %7 = vector.shape_cast %4 : vector<16x96xbf16> to vector<1x16x96xbf16>
    tpu.vector_store %arg10[%c17, %c0_3, %c0_4], %7 {strides = array<i32>} : memref<18x16x96xbf16, #tpu.memory_space<vmem>>, vector<1x16x96xbf16>,
    %8 = tpu.iota {dimensions = array<i32: 1>} : vector<8x16x32xi32>
    %c0_i32 = arith.constant 0 : i32
    %9 = vector.broadcast %c0_i32 : i32 to vector<8x16x32xi32>
    %10 = arith.cmpi eq, %8, %9 : vector<8x16x32xi32>
    %c15_i32 = arith.constant 15 : i32
    %11 = vector.broadcast %c15_i32 : i32 to vector<8x16x32xi32>
    %12 = arith.cmpi eq, %8, %11 : vector<8x16x32xi32>
    %c0_5 = arith.constant 0 : index
    %c0_6 = arith.constant 0 : index
    %c0_7 = arith.constant 0 : index
    %13 = vector.load %arg2[%c0_5, %c0_6, %c0_7] : memref<1x1x128xf32, #tpu.memory_space<vmem>>, vector<1x1x128xf32>
    %14 = vector.shape_cast %13 : vector<1x1x128xf32> to vector<1x128xf32>
    %15 = vector.extract_strided_slice %14 {offsets = [0, 0], sizes = [1, 32], strides = [1, 1]} : vector<1x128xf32> to vector<1x32xf32>
    %16 = vector.extract_strided_slice %14 {offsets = [0, 32], sizes = [1, 32], strides = [1, 1]} : vector<1x128xf32> to vector<1x32xf32>
    %17 = vector.extract_strided_slice %14 {offsets = [0, 64], sizes = [1, 32], strides = [1, 1]} : vector<1x128xf32> to vector<1x32xf32>
    %18 = vector.extract_strided_slice %14 {offsets = [0, 96], sizes = [1, 32], strides = [1, 1]} : vector<1x128xf32> to vector<1x32xf32>
    %cst_8 = arith.constant 0.000000e+00 : f32
    %19 = vector.broadcast %cst_8 : f32 to vector<1x32xf32>
    %cst_9 = arith.constant 0.000000e+00 : f32
    %20 = vector.broadcast %cst_9 : f32 to vector<1x32xf32>
    %c0_10 = arith.constant 0 : index
    %c0_11 = arith.constant 0 : index
    %c0_12 = arith.constant 0 : index
    %c0_13 = arith.constant 0 : index
    %21 = vector.load %arg1[%c0_10, %c0_11, %c0_12, %c0_13] : memref<1x16x16x32xf32, #tpu.memory_space<vmem>>, vector<1x8x16x32xf32>
    %22 = vector.shape_cast %21 : vector<1x8x16x32xf32> to vector<8x16x32xf32>
    %cst_14 = arith.constant dense<0.000000e+00> : vector<32xf32>
    %23 = vector.multi_reduction <add>, %22, %cst_14 [0, 1] : vector<8x16x32xf32> to vector<32xf32>
    %24 = vector.shape_cast %23 : vector<32xf32> to vector<1x1x32xf32>
    %25 = vector.shape_cast %24 : vector<1x1x32xf32> to vector<1x32xf32>
    %26 = arith.addf %19, %25 : vector<1x32xf32>
    %27 = arith.mulf %22, %22 : vector<8x16x32xf32>
    %cst_15 = arith.constant dense<0.000000e+00> : vector<32xf32>
    %28 = vector.multi_reduction <add>, %27, %cst_15 [0, 1] : vector<8x16x32xf32> to vector<32xf32>
    %29 = vector.shape_cast %28 : vector<32xf32> to vector<1x1x32xf32>
    %30 = vector.shape_cast %29 : vector<1x1x32xf32> to vector<1x32xf32>
    %31 = arith.addf %20, %30 : vector<1x32xf32>
    %c0_16 = arith.constant 0 : index
    %c8 = arith.constant 8 : index
    %c0_17 = arith.constant 0 : index
    %c0_18 = arith.constant 0 : index
    %32 = vector.load %arg1[%c0_16, %c8, %c0_17, %c0_18] : memref<1x16x16x32xf32, #tpu.memory_space<vmem>>, vector<1x8x16x32xf32>
    %33 = vector.shape_cast %32 : vector<1x8x16x32xf32> to vector<8x16x32xf32>
    %cst_19 = arith.constant dense<0.000000e+00> : vector<32xf32>
    %34 = vector.multi_reduction <add>, %33, %cst_19 [0, 1] : vector<8x16x32xf32> to vector<32xf32>
    %35 = vector.shape_cast %34 : vector<32xf32> to vector<1x1x32xf32>
    %36 = vector.shape_cast %35 : vector<1x1x32xf32> to vector<1x32xf32>
    %37 = arith.addf %26, %36 : vector<1x32xf32>
    %38 = arith.mulf %33, %33 : vector<8x16x32xf32>
    %cst_20 = arith.constant dense<0.000000e+00> : vector<32xf32>
    %39 = vector.multi_reduction <add>, %38, %cst_20 [0, 1] : vector<8x16x32xf32> to vector<32xf32>
    %40 = vector.shape_cast %39 : vector<32xf32> to vector<1x1x32xf32>
    %41 = vector.shape_cast %40 : vector<1x1x32xf32> to vector<1x32xf32>
    %42 = arith.addf %31, %41 : vector<1x32xf32>
    %cst_21 = arith.constant 3.906250e-03 : f32
    %43 = vector.broadcast %cst_21 : f32 to vector<1x32xf32>
    %44 = arith.mulf %37, %43 : vector<1x32xf32>
    %cst_22 = arith.constant 3.906250e-03 : f32
    %45 = vector.broadcast %cst_22 : f32 to vector<1x32xf32>
    %46 = arith.mulf %42, %45 : vector<1x32xf32>
    %47 = arith.mulf %44, %44 : vector<1x32xf32>
    %48 = arith.subf %46, %47 : vector<1x32xf32>
    %cst_23 = arith.constant 9.99999974E-6 : f32
    %49 = vector.broadcast %cst_23 : f32 to vector<1x32xf32>
    %50 = arith.addf %48, %49 : vector<1x32xf32>
    %51 = math.rsqrt %50 : vector<1x32xf32>
    %cst_24 = arith.constant 1.000000e+00 : f32
    %52 = vector.broadcast %cst_24 : f32 to vector<1x32xf32>
    %53 = arith.addf %52, %15 : vector<1x32xf32>
    %54 = arith.mulf %53, %51 : vector<1x32xf32>
    %55 = vector.shape_cast %54 : vector<1x32xf32> to vector<1x1x32xf32>
    %cst_25 = arith.constant 1.000000e+00 : f32
    %56 = vector.broadcast %cst_25 : f32 to vector<1x32xf32>
    %57 = arith.addf %56, %15 : vector<1x32xf32>
    %58 = arith.mulf %57, %44 : vector<1x32xf32>
    %59 = arith.mulf %58, %51 : vector<1x32xf32>
    %60 = arith.subf %16, %59 : vector<1x32xf32>
    %61 = vector.shape_cast %60 : vector<1x32xf32> to vector<1x1x32xf32>
    %c0_26 = arith.constant 0 : index
    %c0_27 = arith.constant 0 : index
    %c0_28 = arith.constant 0 : index
    %c0_29 = arith.constant 0 : index
    %62 = vector.load %arg1[%c0_26, %c0_27, %c0_28, %c0_29] : memref<1x16x16x32xf32, #tpu.memory_space<vmem>>, vector<1x8x16x32xf32>
    %63 = vector.shape_cast %62 : vector<1x8x16x32xf32> to vector<8x16x32xf32>
    %64 = vector.broadcast %55 : vector<1x1x32xf32> to vector<8x16x32xf32>
    %65 = arith.mulf %63, %64 : vector<8x16x32xf32>
    %66 = vector.broadcast %61 : vector<1x1x32xf32> to vector<8x16x32xf32>
    %67 = arith.addf %65, %66 : vector<8x16x32xf32>
    %68 = arith.negf %67 : vector<8x16x32xf32>
    %69 = math.exp %68 : vector<8x16x32xf32>
    %cst_30 = arith.constant 1.000000e+00 : f32
    %70 = vector.broadcast %cst_30 : f32 to vector<8x16x32xf32>
    %71 = arith.addf %70, %69 : vector<8x16x32xf32>
    %72 = arith.divf %70, %71 : vector<8x16x32xf32>
    %73 = arith.mulf %67, %72 : vector<8x16x32xf32>
    %c1_i32 = arith.constant 1 : i32
    %74 = tpu.dynamic_rotate %73 by %c1_i32 dim 1 : vector<8x16x32xf32>, i32 -> vector<8x16x32xf32>
    %cst_31 = arith.constant 0.000000e+00 : f32
    %75 = vector.broadcast %cst_31 : f32 to vector<8x16x32xf32>
    %76 = arith.select %10, %75, %74 : vector<8x16x32xi1>, vector<8x16x32xf32>
    %c15_i32_32 = arith.constant 15 : i32
    %77 = tpu.dynamic_rotate %73 by %c15_i32_32 dim 1 : vector<8x16x32xf32>, i32 -> vector<8x16x32xf32>
    %cst_33 = arith.constant 0.000000e+00 : f32
    %78 = vector.broadcast %cst_33 : f32 to vector<8x16x32xf32>
    %79 = arith.select %12, %78, %77 : vector<8x16x32xi1>, vector<8x16x32xf32>
    %80 = arith.truncf %76 : vector<8x16x32xf32> to vector<8x16x32xbf16>
    %81 = arith.truncf %73 : vector<8x16x32xf32> to vector<8x16x32xbf16>
    %82 = arith.truncf %79 : vector<8x16x32xf32> to vector<8x16x32xbf16>
    %83 = tpu.concatenate %80, %81, %82 in 2 : vector<8x16x32xbf16>, vector<8x16x32xbf16>, vector<8x16x32xbf16> -> vector<8x16x96xbf16>
    %c1 = arith.constant 1 : index
    %c0_34 = arith.constant 0 : index
    %c0_35 = arith.constant 0 : index
    %84 = vector.load %arg10[%c1, %c0_34, %c0_35] : memref<18x16x96xbf16, #tpu.memory_space<vmem>>, vector<8x16x96xbf16>
    tpu.vector_store %arg10[%c1, %c0_34, %c0_35], %83 {strides = array<i32>} : memref<18x16x96xbf16, #tpu.memory_space<vmem>>, vector<8x16x96xbf16>,
    %c0_36 = arith.constant 0 : index
    %c8_37 = arith.constant 8 : index
    %c0_38 = arith.constant 0 : index
    %c0_39 = arith.constant 0 : index
    %85 = vector.load %arg1[%c0_36, %c8_37, %c0_38, %c0_39] : memref<1x16x16x32xf32, #tpu.memory_space<vmem>>, vector<1x8x16x32xf32>
    %86 = vector.shape_cast %85 : vector<1x8x16x32xf32> to vector<8x16x32xf32>
    %87 = vector.broadcast %55 : vector<1x1x32xf32> to vector<8x16x32xf32>
    %88 = arith.mulf %86, %87 : vector<8x16x32xf32>
    %89 = vector.broadcast %61 : vector<1x1x32xf32> to vector<8x16x32xf32>
    %90 = arith.addf %88, %89 : vector<8x16x32xf32>
    %91 = arith.negf %90 : vector<8x16x32xf32>
    %92 = math.exp %91 : vector<8x16x32xf32>
    %cst_40 = arith.constant 1.000000e+00 : f32
    %93 = vector.broadcast %cst_40 : f32 to vector<8x16x32xf32>
    %94 = arith.addf %93, %92 : vector<8x16x32xf32>
    %95 = arith.divf %93, %94 : vector<8x16x32xf32>
    %96 = arith.mulf %90, %95 : vector<8x16x32xf32>
    %c1_i32_41 = arith.constant 1 : i32
    %97 = tpu.dynamic_rotate %96 by %c1_i32_41 dim 1 : vector<8x16x32xf32>, i32 -> vector<8x16x32xf32>
    %cst_42 = arith.constant 0.000000e+00 : f32
    %98 = vector.broadcast %cst_42 : f32 to vector<8x16x32xf32>
    %99 = arith.select %10, %98, %97 : vector<8x16x32xi1>, vector<8x16x32xf32>
    %c15_i32_43 = arith.constant 15 : i32
    %100 = tpu.dynamic_rotate %96 by %c15_i32_43 dim 1 : vector<8x16x32xf32>, i32 -> vector<8x16x32xf32>
    %cst_44 = arith.constant 0.000000e+00 : f32
    %101 = vector.broadcast %cst_44 : f32 to vector<8x16x32xf32>
    %102 = arith.select %12, %101, %100 : vector<8x16x32xi1>, vector<8x16x32xf32>
    %103 = arith.truncf %99 : vector<8x16x32xf32> to vector<8x16x32xbf16>
    %104 = arith.truncf %96 : vector<8x16x32xf32> to vector<8x16x32xbf16>
    %105 = arith.truncf %102 : vector<8x16x32xf32> to vector<8x16x32xbf16>
    %106 = tpu.concatenate %103, %104, %105 in 2 : vector<8x16x32xbf16>, vector<8x16x32xbf16>, vector<8x16x32xbf16> -> vector<8x16x96xbf16>
    %c9 = arith.constant 9 : index
    %c0_45 = arith.constant 0 : index
    %c0_46 = arith.constant 0 : index
    %107 = vector.load %arg10[%c9, %c0_45, %c0_46] : memref<18x16x96xbf16, #tpu.memory_space<vmem>>, vector<8x16x96xbf16>
    tpu.vector_store %arg10[%c9, %c0_45, %c0_46], %106 {strides = array<i32>} : memref<18x16x96xbf16, #tpu.memory_space<vmem>>, vector<8x16x96xbf16>,
    %c0_47 = arith.constant 0 : index
    %c0_48 = arith.constant 0 : index
    %108 = vector.load %arg4[%c0_47, %c0_48] : memref<1x32xf32, #tpu.memory_space<vmem>>, vector<1x32xf32>
    %109 = vector.shape_cast %108 : vector<1x32xf32> to vector<1x1x32xf32>
    %c0_49 = arith.constant 0 : index
    %c0_50 = arith.constant 0 : index
    %c0_51 = arith.constant 0 : index
    %110 = vector.load %arg10[%c0_49, %c0_50, %c0_51] : memref<18x16x96xbf16, #tpu.memory_space<vmem>>, vector<8x16x96xbf16>
    %111 = vector.shape_cast %110 : vector<8x16x96xbf16> to vector<128x96xbf16>
    %c0_52 = arith.constant 0 : index
    %c0_53 = arith.constant 0 : index
    %c0_54 = arith.constant 0 : index
    %112 = vector.load %arg3[%c0_52, %c0_53, %c0_54] : memref<3x96x32xbf16, #tpu.memory_space<vmem>>, vector<1x96x32xbf16>
    %113 = vector.shape_cast %112 : vector<1x96x32xbf16> to vector<96x32xbf16>
    %cst_55 = arith.constant dense<0.000000e+00> : vector<128x32xf32>
    %114 = tpu.matmul %111, %113, %cst_55 {dimension_numbers = #tpu.dot_dimension_numbers<[1], [0], [0], [1], [0, 0, 1, 1], [], []>} : vector<128x96xbf16>, vector<96x32xbf16>, vector<128x32xf32> -> vector<128x32xf32>
    %c1_56 = arith.constant 1 : index
    %c0_57 = arith.constant 0 : index
    %c0_58 = arith.constant 0 : index
    %115 = vector.load %arg10[%c1_56, %c0_57, %c0_58] : memref<18x16x96xbf16, #tpu.memory_space<vmem>>, vector<8x16x96xbf16>
    %116 = vector.shape_cast %115 : vector<8x16x96xbf16> to vector<128x96xbf16>
    %c1_59 = arith.constant 1 : index
    %c0_60 = arith.constant 0 : index
    %c0_61 = arith.constant 0 : index
    %117 = vector.load %arg3[%c1_59, %c0_60, %c0_61] : memref<3x96x32xbf16, #tpu.memory_space<vmem>>, vector<1x96x32xbf16>
    %118 = vector.shape_cast %117 : vector<1x96x32xbf16> to vector<96x32xbf16>
    %cst_62 = arith.constant dense<0.000000e+00> : vector<128x32xf32>
    %119 = tpu.matmul %116, %118, %cst_62 {dimension_numbers = #tpu.dot_dimension_numbers<[1], [0], [0], [1], [0, 0, 1, 1], [], []>} : vector<128x96xbf16>, vector<96x32xbf16>, vector<128x32xf32> -> vector<128x32xf32>
    %120 = arith.addf %114, %119 : vector<128x32xf32>
    %c2 = arith.constant 2 : index
    %c0_63 = arith.constant 0 : index
    %c0_64 = arith.constant 0 : index
    %121 = vector.load %arg10[%c2, %c0_63, %c0_64] : memref<18x16x96xbf16, #tpu.memory_space<vmem>>, vector<8x16x96xbf16>
    %122 = vector.shape_cast %121 : vector<8x16x96xbf16> to vector<128x96xbf16>
    %c2_65 = arith.constant 2 : index
    %c0_66 = arith.constant 0 : index
    %c0_67 = arith.constant 0 : index
    %123 = vector.load %arg3[%c2_65, %c0_66, %c0_67] : memref<3x96x32xbf16, #tpu.memory_space<vmem>>, vector<1x96x32xbf16>
    %124 = vector.shape_cast %123 : vector<1x96x32xbf16> to vector<96x32xbf16>
    %cst_68 = arith.constant dense<0.000000e+00> : vector<128x32xf32>
    %125 = tpu.matmul %122, %124, %cst_68 {dimension_numbers = #tpu.dot_dimension_numbers<[1], [0], [0], [1], [0, 0, 1, 1], [], []>} : vector<128x96xbf16>, vector<96x32xbf16>, vector<128x32xf32> -> vector<128x32xf32>
    %126 = arith.addf %120, %125 : vector<128x32xf32>
    %127 = vector.shape_cast %126 : vector<128x32xf32> to vector<8x16x32xf32>
    %128 = vector.broadcast %109 : vector<1x1x32xf32> to vector<8x16x32xf32>
    %129 = arith.addf %127, %128 : vector<8x16x32xf32>
    %c0_69 = arith.constant 0 : index
    %c0_70 = arith.constant 0 : index
    %c0_71 = arith.constant 0 : index
    %130 = vector.load %arg11[%c0_69, %c0_70, %c0_71] : memref<16x16x32xf32, #tpu.memory_space<vmem>>, vector<8x16x32xf32>
    tpu.vector_store %arg11[%c0_69, %c0_70, %c0_71], %129 {strides = array<i32>} : memref<16x16x32xf32, #tpu.memory_space<vmem>>, vector<8x16x32xf32>,
    %c8_72 = arith.constant 8 : index
    %c0_73 = arith.constant 0 : index
    %c0_74 = arith.constant 0 : index
    %131 = vector.load %arg10[%c8_72, %c0_73, %c0_74] : memref<18x16x96xbf16, #tpu.memory_space<vmem>>, vector<8x16x96xbf16>
    %132 = vector.shape_cast %131 : vector<8x16x96xbf16> to vector<128x96xbf16>
    %c0_75 = arith.constant 0 : index
    %c0_76 = arith.constant 0 : index
    %c0_77 = arith.constant 0 : index
    %133 = vector.load %arg3[%c0_75, %c0_76, %c0_77] : memref<3x96x32xbf16, #tpu.memory_space<vmem>>, vector<1x96x32xbf16>
    %134 = vector.shape_cast %133 : vector<1x96x32xbf16> to vector<96x32xbf16>
    %cst_78 = arith.constant dense<0.000000e+00> : vector<128x32xf32>
    %135 = tpu.matmul %132, %134, %cst_78 {dimension_numbers = #tpu.dot_dimension_numbers<[1], [0], [0], [1], [0, 0, 1, 1], [], []>} : vector<128x96xbf16>, vector<96x32xbf16>, vector<128x32xf32> -> vector<128x32xf32>
    %c9_79 = arith.constant 9 : index
    %c0_80 = arith.constant 0 : index
    %c0_81 = arith.constant 0 : index
    %136 = vector.load %arg10[%c9_79, %c0_80, %c0_81] : memref<18x16x96xbf16, #tpu.memory_space<vmem>>, vector<8x16x96xbf16>
    %137 = vector.shape_cast %136 : vector<8x16x96xbf16> to vector<128x96xbf16>
    %c1_82 = arith.constant 1 : index
    %c0_83 = arith.constant 0 : index
    %c0_84 = arith.constant 0 : index
    %138 = vector.load %arg3[%c1_82, %c0_83, %c0_84] : memref<3x96x32xbf16, #tpu.memory_space<vmem>>, vector<1x96x32xbf16>
    %139 = vector.shape_cast %138 : vector<1x96x32xbf16> to vector<96x32xbf16>
    %cst_85 = arith.constant dense<0.000000e+00> : vector<128x32xf32>
    %140 = tpu.matmul %137, %139, %cst_85 {dimension_numbers = #tpu.dot_dimension_numbers<[1], [0], [0], [1], [0, 0, 1, 1], [], []>} : vector<128x96xbf16>, vector<96x32xbf16>, vector<128x32xf32> -> vector<128x32xf32>
    %141 = arith.addf %135, %140 : vector<128x32xf32>
    %c10 = arith.constant 10 : index
    %c0_86 = arith.constant 0 : index
    %c0_87 = arith.constant 0 : index
    %142 = vector.load %arg10[%c10, %c0_86, %c0_87] : memref<18x16x96xbf16, #tpu.memory_space<vmem>>, vector<8x16x96xbf16>
    %143 = vector.shape_cast %142 : vector<8x16x96xbf16> to vector<128x96xbf16>
    %c2_88 = arith.constant 2 : index
    %c0_89 = arith.constant 0 : index
    %c0_90 = arith.constant 0 : index
    %144 = vector.load %arg3[%c2_88, %c0_89, %c0_90] : memref<3x96x32xbf16, #tpu.memory_space<vmem>>, vector<1x96x32xbf16>
    %145 = vector.shape_cast %144 : vector<1x96x32xbf16> to vector<96x32xbf16>
    %cst_91 = arith.constant dense<0.000000e+00> : vector<128x32xf32>
    %146 = tpu.matmul %143, %145, %cst_91 {dimension_numbers = #tpu.dot_dimension_numbers<[1], [0], [0], [1], [0, 0, 1, 1], [], []>} : vector<128x96xbf16>, vector<96x32xbf16>, vector<128x32xf32> -> vector<128x32xf32>
    %147 = arith.addf %141, %146 : vector<128x32xf32>
    %148 = vector.shape_cast %147 : vector<128x32xf32> to vector<8x16x32xf32>
    %149 = vector.broadcast %109 : vector<1x1x32xf32> to vector<8x16x32xf32>
    %150 = arith.addf %148, %149 : vector<8x16x32xf32>
    %c8_92 = arith.constant 8 : index
    %c0_93 = arith.constant 0 : index
    %c0_94 = arith.constant 0 : index
    %151 = vector.load %arg11[%c8_92, %c0_93, %c0_94] : memref<16x16x32xf32, #tpu.memory_space<vmem>>, vector<8x16x32xf32>
    tpu.vector_store %arg11[%c8_92, %c0_93, %c0_94], %150 {strides = array<i32>} : memref<16x16x32xf32, #tpu.memory_space<vmem>>, vector<8x16x32xf32>,
    %cst_95 = arith.constant 0.000000e+00 : f32
    %152 = vector.broadcast %cst_95 : f32 to vector<1x32xf32>
    %cst_96 = arith.constant 0.000000e+00 : f32
    %153 = vector.broadcast %cst_96 : f32 to vector<1x32xf32>
    %c0_97 = arith.constant 0 : index
    %c0_98 = arith.constant 0 : index
    %c0_99 = arith.constant 0 : index
    %154 = vector.load %arg11[%c0_97, %c0_98, %c0_99] : memref<16x16x32xf32, #tpu.memory_space<vmem>>, vector<8x16x32xf32>
    %cst_100 = arith.constant dense<0.000000e+00> : vector<32xf32>
    %155 = vector.multi_reduction <add>, %154, %cst_100 [0, 1] : vector<8x16x32xf32> to vector<32xf32>
    %156 = vector.shape_cast %155 : vector<32xf32> to vector<1x1x32xf32>
    %157 = vector.shape_cast %156 : vector<1x1x32xf32> to vector<1x32xf32>
    %158 = arith.addf %152, %157 : vector<1x32xf32>
    %159 = arith.mulf %154, %154 : vector<8x16x32xf32>
    %cst_101 = arith.constant dense<0.000000e+00> : vector<32xf32>
    %160 = vector.multi_reduction <add>, %159, %cst_101 [0, 1] : vector<8x16x32xf32> to vector<32xf32>
    %161 = vector.shape_cast %160 : vector<32xf32> to vector<1x1x32xf32>
    %162 = vector.shape_cast %161 : vector<1x1x32xf32> to vector<1x32xf32>
    %163 = arith.addf %153, %162 : vector<1x32xf32>
    %c8_102 = arith.constant 8 : index
    %c0_103 = arith.constant 0 : index
    %c0_104 = arith.constant 0 : index
    %164 = vector.load %arg11[%c8_102, %c0_103, %c0_104] : memref<16x16x32xf32, #tpu.memory_space<vmem>>, vector<8x16x32xf32>
    %cst_105 = arith.constant dense<0.000000e+00> : vector<32xf32>
    %165 = vector.multi_reduction <add>, %164, %cst_105 [0, 1] : vector<8x16x32xf32> to vector<32xf32>
    %166 = vector.shape_cast %165 : vector<32xf32> to vector<1x1x32xf32>
    %167 = vector.shape_cast %166 : vector<1x1x32xf32> to vector<1x32xf32>
    %168 = arith.addf %158, %167 : vector<1x32xf32>
    %169 = arith.mulf %164, %164 : vector<8x16x32xf32>
    %cst_106 = arith.constant dense<0.000000e+00> : vector<32xf32>
    %170 = vector.multi_reduction <add>, %169, %cst_106 [0, 1] : vector<8x16x32xf32> to vector<32xf32>
    %171 = vector.shape_cast %170 : vector<32xf32> to vector<1x1x32xf32>
    %172 = vector.shape_cast %171 : vector<1x1x32xf32> to vector<1x32xf32>
    %173 = arith.addf %163, %172 : vector<1x32xf32>
    %cst_107 = arith.constant 3.906250e-03 : f32
    %174 = vector.broadcast %cst_107 : f32 to vector<1x32xf32>
    %175 = arith.mulf %168, %174 : vector<1x32xf32>
    %cst_108 = arith.constant 3.906250e-03 : f32
    %176 = vector.broadcast %cst_108 : f32 to vector<1x32xf32>
    %177 = arith.mulf %173, %176 : vector<1x32xf32>
    %178 = arith.mulf %175, %175 : vector<1x32xf32>
    %179 = arith.subf %177, %178 : vector<1x32xf32>
    %cst_109 = arith.constant 9.99999974E-6 : f32
    %180 = vector.broadcast %cst_109 : f32 to vector<1x32xf32>
    %181 = arith.addf %179, %180 : vector<1x32xf32>
    %182 = math.rsqrt %181 : vector<1x32xf32>
    %cst_110 = arith.constant 1.000000e+00 : f32
    %183 = vector.broadcast %cst_110 : f32 to vector<1x32xf32>
    %184 = arith.addf %183, %17 : vector<1x32xf32>
    %185 = arith.mulf %184, %182 : vector<1x32xf32>
    %186 = vector.shape_cast %185 : vector<1x32xf32> to vector<1x1x32xf32>
    %cst_111 = arith.constant 1.000000e+00 : f32
    %187 = vector.broadcast %cst_111 : f32 to vector<1x32xf32>
    %188 = arith.addf %187, %17 : vector<1x32xf32>
    %189 = arith.mulf %188, %175 : vector<1x32xf32>
    %190 = arith.mulf %189, %182 : vector<1x32xf32>
    %191 = arith.subf %18, %190 : vector<1x32xf32>
    %192 = vector.shape_cast %191 : vector<1x32xf32> to vector<1x1x32xf32>
    %c0_112 = arith.constant 0 : index
    %c0_113 = arith.constant 0 : index
    %c0_114 = arith.constant 0 : index
    %193 = vector.load %arg11[%c0_112, %c0_113, %c0_114] : memref<16x16x32xf32, #tpu.memory_space<vmem>>, vector<8x16x32xf32>
    %194 = vector.broadcast %186 : vector<1x1x32xf32> to vector<8x16x32xf32>
    %195 = arith.mulf %193, %194 : vector<8x16x32xf32>
    %196 = vector.broadcast %192 : vector<1x1x32xf32> to vector<8x16x32xf32>
    %197 = arith.addf %195, %196 : vector<8x16x32xf32>
    %198 = arith.negf %197 : vector<8x16x32xf32>
    %199 = math.exp %198 : vector<8x16x32xf32>
    %cst_115 = arith.constant 1.000000e+00 : f32
    %200 = vector.broadcast %cst_115 : f32 to vector<8x16x32xf32>
    %201 = arith.addf %200, %199 : vector<8x16x32xf32>
    %202 = arith.divf %200, %201 : vector<8x16x32xf32>
    %203 = arith.mulf %197, %202 : vector<8x16x32xf32>
    %c1_i32_116 = arith.constant 1 : i32
    %204 = tpu.dynamic_rotate %203 by %c1_i32_116 dim 1 : vector<8x16x32xf32>, i32 -> vector<8x16x32xf32>
    %cst_117 = arith.constant 0.000000e+00 : f32
    %205 = vector.broadcast %cst_117 : f32 to vector<8x16x32xf32>
    %206 = arith.select %10, %205, %204 : vector<8x16x32xi1>, vector<8x16x32xf32>
    %c15_i32_118 = arith.constant 15 : i32
    %207 = tpu.dynamic_rotate %203 by %c15_i32_118 dim 1 : vector<8x16x32xf32>, i32 -> vector<8x16x32xf32>
    %cst_119 = arith.constant 0.000000e+00 : f32
    %208 = vector.broadcast %cst_119 : f32 to vector<8x16x32xf32>
    %209 = arith.select %12, %208, %207 : vector<8x16x32xi1>, vector<8x16x32xf32>
    %210 = arith.truncf %206 : vector<8x16x32xf32> to vector<8x16x32xbf16>
    %211 = arith.truncf %203 : vector<8x16x32xf32> to vector<8x16x32xbf16>
    %212 = arith.truncf %209 : vector<8x16x32xf32> to vector<8x16x32xbf16>
    %213 = tpu.concatenate %210, %211, %212 in 2 : vector<8x16x32xbf16>, vector<8x16x32xbf16>, vector<8x16x32xbf16> -> vector<8x16x96xbf16>
    %c1_120 = arith.constant 1 : index
    %c0_121 = arith.constant 0 : index
    %c0_122 = arith.constant 0 : index
    %214 = vector.load %arg10[%c1_120, %c0_121, %c0_122] : memref<18x16x96xbf16, #tpu.memory_space<vmem>>, vector<8x16x96xbf16>
    tpu.vector_store %arg10[%c1_120, %c0_121, %c0_122], %213 {strides = array<i32>} : memref<18x16x96xbf16, #tpu.memory_space<vmem>>, vector<8x16x96xbf16>,
    %c8_123 = arith.constant 8 : index
    %c0_124 = arith.constant 0 : index
    %c0_125 = arith.constant 0 : index
    %215 = vector.load %arg11[%c8_123, %c0_124, %c0_125] : memref<16x16x32xf32, #tpu.memory_space<vmem>>, vector<8x16x32xf32>
    %216 = vector.broadcast %186 : vector<1x1x32xf32> to vector<8x16x32xf32>
    %217 = arith.mulf %215, %216 : vector<8x16x32xf32>
    %218 = vector.broadcast %192 : vector<1x1x32xf32> to vector<8x16x32xf32>
    %219 = arith.addf %217, %218 : vector<8x16x32xf32>
    %220 = arith.negf %219 : vector<8x16x32xf32>
    %221 = math.exp %220 : vector<8x16x32xf32>
    %cst_126 = arith.constant 1.000000e+00 : f32
    %222 = vector.broadcast %cst_126 : f32 to vector<8x16x32xf32>
    %223 = arith.addf %222, %221 : vector<8x16x32xf32>
    %224 = arith.divf %222, %223 : vector<8x16x32xf32>
    %225 = arith.mulf %219, %224 : vector<8x16x32xf32>
    %c1_i32_127 = arith.constant 1 : i32
    %226 = tpu.dynamic_rotate %225 by %c1_i32_127 dim 1 : vector<8x16x32xf32>, i32 -> vector<8x16x32xf32>
    %cst_128 = arith.constant 0.000000e+00 : f32
    %227 = vector.broadcast %cst_128 : f32 to vector<8x16x32xf32>
    %228 = arith.select %10, %227, %226 : vector<8x16x32xi1>, vector<8x16x32xf32>
    %c15_i32_129 = arith.constant 15 : i32
    %229 = tpu.dynamic_rotate %225 by %c15_i32_129 dim 1 : vector<8x16x32xf32>, i32 -> vector<8x16x32xf32>
    %cst_130 = arith.constant 0.000000e+00 : f32
    %230 = vector.broadcast %cst_130 : f32 to vector<8x16x32xf32>
    %231 = arith.select %12, %230, %229 : vector<8x16x32xi1>, vector<8x16x32xf32>
    %232 = arith.truncf %228 : vector<8x16x32xf32> to vector<8x16x32xbf16>
    %233 = arith.truncf %225 : vector<8x16x32xf32> to vector<8x16x32xbf16>
    %234 = arith.truncf %231 : vector<8x16x32xf32> to vector<8x16x32xbf16>
    %235 = tpu.concatenate %232, %233, %234 in 2 : vector<8x16x32xbf16>, vector<8x16x32xbf16>, vector<8x16x32xbf16> -> vector<8x16x96xbf16>
    %c9_131 = arith.constant 9 : index
    %c0_132 = arith.constant 0 : index
    %c0_133 = arith.constant 0 : index
    %236 = vector.load %arg10[%c9_131, %c0_132, %c0_133] : memref<18x16x96xbf16, #tpu.memory_space<vmem>>, vector<8x16x96xbf16>
    tpu.vector_store %arg10[%c9_131, %c0_132, %c0_133], %235 {strides = array<i32>} : memref<18x16x96xbf16, #tpu.memory_space<vmem>>, vector<8x16x96xbf16>,
    %c0_134 = arith.constant 0 : index
    %c0_135 = arith.constant 0 : index
    %237 = vector.load %arg6[%c0_134, %c0_135] : memref<1x32xf32, #tpu.memory_space<vmem>>, vector<1x32xf32>
    %238 = vector.shape_cast %237 : vector<1x32xf32> to vector<1x1x32xf32>
    %c0_136 = arith.constant 0 : index
    %c0_137 = arith.constant 0 : index
    %c0_138 = arith.constant 0 : index
    %239 = vector.load %arg10[%c0_136, %c0_137, %c0_138] : memref<18x16x96xbf16, #tpu.memory_space<vmem>>, vector<8x16x96xbf16>
    %240 = vector.shape_cast %239 : vector<8x16x96xbf16> to vector<128x96xbf16>
    %c0_139 = arith.constant 0 : index
    %c0_140 = arith.constant 0 : index
    %c0_141 = arith.constant 0 : index
    %241 = vector.load %arg5[%c0_139, %c0_140, %c0_141] : memref<3x96x32xbf16, #tpu.memory_space<vmem>>, vector<1x96x32xbf16>
    %242 = vector.shape_cast %241 : vector<1x96x32xbf16> to vector<96x32xbf16>
    %cst_142 = arith.constant dense<0.000000e+00> : vector<128x32xf32>
    %243 = tpu.matmul %240, %242, %cst_142 {dimension_numbers = #tpu.dot_dimension_numbers<[1], [0], [0], [1], [0, 0, 1, 1], [], []>} : vector<128x96xbf16>, vector<96x32xbf16>, vector<128x32xf32> -> vector<128x32xf32>
    %c1_143 = arith.constant 1 : index
    %c0_144 = arith.constant 0 : index
    %c0_145 = arith.constant 0 : index
    %244 = vector.load %arg10[%c1_143, %c0_144, %c0_145] : memref<18x16x96xbf16, #tpu.memory_space<vmem>>, vector<8x16x96xbf16>
    %245 = vector.shape_cast %244 : vector<8x16x96xbf16> to vector<128x96xbf16>
    %c1_146 = arith.constant 1 : index
    %c0_147 = arith.constant 0 : index
    %c0_148 = arith.constant 0 : index
    %246 = vector.load %arg5[%c1_146, %c0_147, %c0_148] : memref<3x96x32xbf16, #tpu.memory_space<vmem>>, vector<1x96x32xbf16>
    %247 = vector.shape_cast %246 : vector<1x96x32xbf16> to vector<96x32xbf16>
    %cst_149 = arith.constant dense<0.000000e+00> : vector<128x32xf32>
    %248 = tpu.matmul %245, %247, %cst_149 {dimension_numbers = #tpu.dot_dimension_numbers<[1], [0], [0], [1], [0, 0, 1, 1], [], []>} : vector<128x96xbf16>, vector<96x32xbf16>, vector<128x32xf32> -> vector<128x32xf32>
    %249 = arith.addf %243, %248 : vector<128x32xf32>
    %c2_150 = arith.constant 2 : index
    %c0_151 = arith.constant 0 : index
    %c0_152 = arith.constant 0 : index
    %250 = vector.load %arg10[%c2_150, %c0_151, %c0_152] : memref<18x16x96xbf16, #tpu.memory_space<vmem>>, vector<8x16x96xbf16>
    %251 = vector.shape_cast %250 : vector<8x16x96xbf16> to vector<128x96xbf16>
    %c2_153 = arith.constant 2 : index
    %c0_154 = arith.constant 0 : index
    %c0_155 = arith.constant 0 : index
    %252 = vector.load %arg5[%c2_153, %c0_154, %c0_155] : memref<3x96x32xbf16, #tpu.memory_space<vmem>>, vector<1x96x32xbf16>
    %253 = vector.shape_cast %252 : vector<1x96x32xbf16> to vector<96x32xbf16>
    %cst_156 = arith.constant dense<0.000000e+00> : vector<128x32xf32>
    %254 = tpu.matmul %251, %253, %cst_156 {dimension_numbers = #tpu.dot_dimension_numbers<[1], [0], [0], [1], [0, 0, 1, 1], [], []>} : vector<128x96xbf16>, vector<96x32xbf16>, vector<128x32xf32> -> vector<128x32xf32>
    %255 = arith.addf %249, %254 : vector<128x32xf32>
    %256 = vector.shape_cast %255 : vector<128x32xf32> to vector<8x16x32xf32>
    %257 = vector.broadcast %238 : vector<1x1x32xf32> to vector<8x16x32xf32>
    %258 = arith.addf %256, %257 : vector<8x16x32xf32>
    %c0_157 = arith.constant 0 : index
    %c0_158 = arith.constant 0 : index
    %c0_159 = arith.constant 0 : index
    %259 = vector.load %arg11[%c0_157, %c0_158, %c0_159] : memref<16x16x32xf32, #tpu.memory_space<vmem>>, vector<8x16x32xf32>
    tpu.vector_store %arg11[%c0_157, %c0_158, %c0_159], %258 {strides = array<i32>} : memref<16x16x32xf32, #tpu.memory_space<vmem>>, vector<8x16x32xf32>,
    %c8_160 = arith.constant 8 : index
    %c0_161 = arith.constant 0 : index
    %c0_162 = arith.constant 0 : index
    %260 = vector.load %arg10[%c8_160, %c0_161, %c0_162] : memref<18x16x96xbf16, #tpu.memory_space<vmem>>, vector<8x16x96xbf16>
    %261 = vector.shape_cast %260 : vector<8x16x96xbf16> to vector<128x96xbf16>
    %c0_163 = arith.constant 0 : index
    %c0_164 = arith.constant 0 : index
    %c0_165 = arith.constant 0 : index
    %262 = vector.load %arg5[%c0_163, %c0_164, %c0_165] : memref<3x96x32xbf16, #tpu.memory_space<vmem>>, vector<1x96x32xbf16>
    %263 = vector.shape_cast %262 : vector<1x96x32xbf16> to vector<96x32xbf16>
    %cst_166 = arith.constant dense<0.000000e+00> : vector<128x32xf32>
    %264 = tpu.matmul %261, %263, %cst_166 {dimension_numbers = #tpu.dot_dimension_numbers<[1], [0], [0], [1], [0, 0, 1, 1], [], []>} : vector<128x96xbf16>, vector<96x32xbf16>, vector<128x32xf32> -> vector<128x32xf32>
    %c9_167 = arith.constant 9 : index
    %c0_168 = arith.constant 0 : index
    %c0_169 = arith.constant 0 : index
    %265 = vector.load %arg10[%c9_167, %c0_168, %c0_169] : memref<18x16x96xbf16, #tpu.memory_space<vmem>>, vector<8x16x96xbf16>
    %266 = vector.shape_cast %265 : vector<8x16x96xbf16> to vector<128x96xbf16>
    %c1_170 = arith.constant 1 : index
    %c0_171 = arith.constant 0 : index
    %c0_172 = arith.constant 0 : index
    %267 = vector.load %arg5[%c1_170, %c0_171, %c0_172] : memref<3x96x32xbf16, #tpu.memory_space<vmem>>, vector<1x96x32xbf16>
    %268 = vector.shape_cast %267 : vector<1x96x32xbf16> to vector<96x32xbf16>
    %cst_173 = arith.constant dense<0.000000e+00> : vector<128x32xf32>
    %269 = tpu.matmul %266, %268, %cst_173 {dimension_numbers = #tpu.dot_dimension_numbers<[1], [0], [0], [1], [0, 0, 1, 1], [], []>} : vector<128x96xbf16>, vector<96x32xbf16>, vector<128x32xf32> -> vector<128x32xf32>
    %270 = arith.addf %264, %269 : vector<128x32xf32>
    %c10_174 = arith.constant 10 : index
    %c0_175 = arith.constant 0 : index
    %c0_176 = arith.constant 0 : index
    %271 = vector.load %arg10[%c10_174, %c0_175, %c0_176] : memref<18x16x96xbf16, #tpu.memory_space<vmem>>, vector<8x16x96xbf16>
    %272 = vector.shape_cast %271 : vector<8x16x96xbf16> to vector<128x96xbf16>
    %c2_177 = arith.constant 2 : index
    %c0_178 = arith.constant 0 : index
    %c0_179 = arith.constant 0 : index
    %273 = vector.load %arg5[%c2_177, %c0_178, %c0_179] : memref<3x96x32xbf16, #tpu.memory_space<vmem>>, vector<1x96x32xbf16>
    %274 = vector.shape_cast %273 : vector<1x96x32xbf16> to vector<96x32xbf16>
    %cst_180 = arith.constant dense<0.000000e+00> : vector<128x32xf32>
    %275 = tpu.matmul %272, %274, %cst_180 {dimension_numbers = #tpu.dot_dimension_numbers<[1], [0], [0], [1], [0, 0, 1, 1], [], []>} : vector<128x96xbf16>, vector<96x32xbf16>, vector<128x32xf32> -> vector<128x32xf32>
    %276 = arith.addf %270, %275 : vector<128x32xf32>
    %277 = vector.shape_cast %276 : vector<128x32xf32> to vector<8x16x32xf32>
    %278 = vector.broadcast %238 : vector<1x1x32xf32> to vector<8x16x32xf32>
    %279 = arith.addf %277, %278 : vector<8x16x32xf32>
    %c8_181 = arith.constant 8 : index
    %c0_182 = arith.constant 0 : index
    %c0_183 = arith.constant 0 : index
    %280 = vector.load %arg11[%c8_181, %c0_182, %c0_183] : memref<16x16x32xf32, #tpu.memory_space<vmem>>, vector<8x16x32xf32>
    tpu.vector_store %arg11[%c8_181, %c0_182, %c0_183], %279 {strides = array<i32>} : memref<16x16x32xf32, #tpu.memory_space<vmem>>, vector<8x16x32xf32>,
    %cst_184 = arith.constant 0.000000e+00 : f32
    %281 = vector.broadcast %cst_184 : f32 to vector<1x32xf32>
    %c0_185 = arith.constant 0 : index
    %c0_186 = arith.constant 0 : index
    %c0_187 = arith.constant 0 : index
    %282 = vector.load %arg11[%c0_185, %c0_186, %c0_187] : memref<16x16x32xf32, #tpu.memory_space<vmem>>, vector<8x16x32xf32>
    %cst_188 = arith.constant dense<0.000000e+00> : vector<32xf32>
    %283 = vector.multi_reduction <add>, %282, %cst_188 [0, 1] : vector<8x16x32xf32> to vector<32xf32>
    %284 = vector.shape_cast %283 : vector<32xf32> to vector<1x1x32xf32>
    %285 = vector.shape_cast %284 : vector<1x1x32xf32> to vector<1x32xf32>
    %286 = arith.addf %281, %285 : vector<1x32xf32>
    %c8_189 = arith.constant 8 : index
    %c0_190 = arith.constant 0 : index
    %c0_191 = arith.constant 0 : index
    %287 = vector.load %arg11[%c8_189, %c0_190, %c0_191] : memref<16x16x32xf32, #tpu.memory_space<vmem>>, vector<8x16x32xf32>
    %cst_192 = arith.constant dense<0.000000e+00> : vector<32xf32>
    %288 = vector.multi_reduction <add>, %287, %cst_192 [0, 1] : vector<8x16x32xf32> to vector<32xf32>
    %289 = vector.shape_cast %288 : vector<32xf32> to vector<1x1x32xf32>
    %290 = vector.shape_cast %289 : vector<1x1x32xf32> to vector<1x32xf32>
    %291 = arith.addf %286, %290 : vector<1x32xf32>
    %cst_193 = arith.constant 3.906250e-03 : f32
    %292 = vector.broadcast %cst_193 : f32 to vector<1x32xf32>
    %293 = arith.mulf %291, %292 : vector<1x32xf32>
    %294 = arith.truncf %293 : vector<1x32xf32> to vector<1x32xbf16>
    %c0_194 = arith.constant 0 : index
    %c0_195 = arith.constant 0 : index
    %295 = vector.load %arg7[%c0_194, %c0_195] : memref<32x2xbf16, #tpu.memory_space<vmem>>, vector<32x2xbf16>
    %cst_196 = arith.constant dense<0.000000e+00> : vector<1x2xf32>
    %296 = tpu.matmul %294, %295, %cst_196 {dimension_numbers = #tpu.dot_dimension_numbers<[1], [0], [0], [1], [0, 0, 1, 1], [], []>} : vector<1x32xbf16>, vector<32x2xbf16>, vector<1x2xf32> -> vector<1x2xf32>
    %297 = arith.negf %296 : vector<1x2xf32>
    %298 = math.exp %297 : vector<1x2xf32>
    %cst_197 = arith.constant 1.000000e+00 : f32
    %299 = vector.broadcast %cst_197 : f32 to vector<1x2xf32>
    %300 = arith.addf %299, %298 : vector<1x2xf32>
    %301 = arith.divf %299, %300 : vector<1x2xf32>
    %302 = arith.mulf %296, %301 : vector<1x2xf32>
    %303 = arith.truncf %302 : vector<1x2xf32> to vector<1x2xbf16>
    %c0_198 = arith.constant 0 : index
    %c0_199 = arith.constant 0 : index
    %304 = vector.load %arg8[%c0_198, %c0_199] : memref<2x32xbf16, #tpu.memory_space<vmem>>, vector<2x32xbf16>
    %cst_200 = arith.constant dense<0.000000e+00> : vector<1x32xf32>
    %305 = tpu.matmul %303, %304, %cst_200 {dimension_numbers = #tpu.dot_dimension_numbers<[1], [0], [0], [1], [0, 0, 1, 1], [], []>} : vector<1x2xbf16>, vector<2x32xbf16>, vector<1x32xf32> -> vector<1x32xf32>
    %306 = arith.negf %305 : vector<1x32xf32>
    %307 = math.exp %306 : vector<1x32xf32>
    %cst_201 = arith.constant 1.000000e+00 : f32
    %308 = vector.broadcast %cst_201 : f32 to vector<1x32xf32>
    %309 = arith.addf %308, %307 : vector<1x32xf32>
    %310 = arith.divf %308, %309 : vector<1x32xf32>
    %311 = vector.shape_cast %310 : vector<1x32xf32> to vector<1x1x32xf32>
    %c0_202 = arith.constant 0 : index
    %c0_203 = arith.constant 0 : index
    %c0_204 = arith.constant 0 : index
    %312 = vector.load %arg11[%c0_202, %c0_203, %c0_204] : memref<16x16x32xf32, #tpu.memory_space<vmem>>, vector<8x16x32xf32>
    %313 = vector.broadcast %311 : vector<1x1x32xf32> to vector<8x16x32xf32>
    %314 = arith.mulf %312, %313 : vector<8x16x32xf32>
    %c0_205 = arith.constant 0 : index
    %c0_206 = arith.constant 0 : index
    %c0_207 = arith.constant 0 : index
    %c0_208 = arith.constant 0 : index
    %315 = vector.load %arg1[%c0_205, %c0_206, %c0_207, %c0_208] : memref<1x16x16x32xf32, #tpu.memory_space<vmem>>, vector<1x8x16x32xf32>
    %316 = vector.shape_cast %315 : vector<1x8x16x32xf32> to vector<8x16x32xf32>
    %317 = arith.addf %314, %316 : vector<8x16x32xf32>
    %c0_209 = arith.constant 0 : index
    %c0_210 = arith.constant 0 : index
    %c0_211 = arith.constant 0 : index
    %c0_212 = arith.constant 0 : index
    %318 = vector.load %arg9[%c0_209, %c0_210, %c0_211, %c0_212] : memref<1x16x16x32xf32, #tpu.memory_space<vmem>>, vector<1x8x16x32xf32>
    %319 = vector.shape_cast %318 : vector<1x8x16x32xf32> to vector<8x16x32xf32>
    %320 = vector.shape_cast %317 : vector<8x16x32xf32> to vector<1x8x16x32xf32>
    tpu.vector_store %arg9[%c0_209, %c0_210, %c0_211, %c0_212], %320 {strides = array<i32>} : memref<1x16x16x32xf32, #tpu.memory_space<vmem>>, vector<1x8x16x32xf32>,
    %c8_213 = arith.constant 8 : index
    %c0_214 = arith.constant 0 : index
    %c0_215 = arith.constant 0 : index
    %321 = vector.load %arg11[%c8_213, %c0_214, %c0_215] : memref<16x16x32xf32, #tpu.memory_space<vmem>>, vector<8x16x32xf32>
    %322 = vector.broadcast %311 : vector<1x1x32xf32> to vector<8x16x32xf32>
    %323 = arith.mulf %321, %322 : vector<8x16x32xf32>
    %c0_216 = arith.constant 0 : index
    %c8_217 = arith.constant 8 : index
    %c0_218 = arith.constant 0 : index
    %c0_219 = arith.constant 0 : index
    %324 = vector.load %arg1[%c0_216, %c8_217, %c0_218, %c0_219] : memref<1x16x16x32xf32, #tpu.memory_space<vmem>>, vector<1x8x16x32xf32>
    %325 = vector.shape_cast %324 : vector<1x8x16x32xf32> to vector<8x16x32xf32>
    %326 = arith.addf %323, %325 : vector<8x16x32xf32>
    %c0_220 = arith.constant 0 : index
    %c8_221 = arith.constant 8 : index
    %c0_222 = arith.constant 0 : index
    %c0_223 = arith.constant 0 : index
    %327 = vector.load %arg9[%c0_220, %c8_221, %c0_222, %c0_223] : memref<1x16x16x32xf32, #tpu.memory_space<vmem>>, vector<1x8x16x32xf32>
    %328 = vector.shape_cast %327 : vector<1x8x16x32xf32> to vector<8x16x32xf32>
    %329 = vector.shape_cast %326 : vector<8x16x32xf32> to vector<1x8x16x32xf32>
    tpu.vector_store %arg9[%c0_220, %c8_221, %c0_222, %c0_223], %329 {strides = array<i32>} : memref<1x16x16x32xf32, #tpu.memory_space<vmem>>, vector<1x8x16x32xf32>,
    return
  }
  func.func @transform_0(%arg0: i32) -> (i32, i32, i32, i32) {
    %c0_i32 = arith.constant 0 : i32
    %c0_i32_0 = arith.constant 0 : i32
    %c0_i32_1 = arith.constant 0 : i32
    %c0_i32_2 = arith.constant 0 : i32
    return %arg0, %c0_i32, %c0_i32_0, %c0_i32_1 : i32, i32, i32, i32
  }
  func.func @transform_1(%arg0: i32) -> (i32, i32, i32) {
    %c0_i32 = arith.constant 0 : i32
    %c0_i32_0 = arith.constant 0 : i32
    %c0_i32_1 = arith.constant 0 : i32
    return %arg0, %c0_i32, %c0_i32_0 : i32, i32, i32
  }
  func.func @transform_2(%arg0: i32) -> (i32, i32, i32) {
    %c0_i32 = arith.constant 0 : i32
    %c0_i32_0 = arith.constant 0 : i32
    %c0_i32_1 = arith.constant 0 : i32
    %c0_i32_2 = arith.constant 0 : i32
    return %c0_i32, %c0_i32_0, %c0_i32_1 : i32, i32, i32
  }
  func.func @transform_3(%arg0: i32) -> (i32, i32) {
    %c0_i32 = arith.constant 0 : i32
    %c0_i32_0 = arith.constant 0 : i32
    %c0_i32_1 = arith.constant 0 : i32
    return %c0_i32, %c0_i32_0 : i32, i32
  }
  func.func @transform_4(%arg0: i32) -> (i32, i32, i32) {
    %c0_i32 = arith.constant 0 : i32
    %c0_i32_0 = arith.constant 0 : i32
    %c0_i32_1 = arith.constant 0 : i32
    %c0_i32_2 = arith.constant 0 : i32
    return %c0_i32, %c0_i32_0, %c0_i32_1 : i32, i32, i32
  }
  func.func @transform_5(%arg0: i32) -> (i32, i32) {
    %c0_i32 = arith.constant 0 : i32
    %c0_i32_0 = arith.constant 0 : i32
    %c0_i32_1 = arith.constant 0 : i32
    return %c0_i32, %c0_i32_0 : i32, i32
  }
  func.func @transform_6(%arg0: i32) -> (i32, i32) {
    %c0_i32 = arith.constant 0 : i32
    %c0_i32_0 = arith.constant 0 : i32
    %c0_i32_1 = arith.constant 0 : i32
    return %c0_i32, %c0_i32_0 : i32, i32
  }
  func.func @transform_7(%arg0: i32) -> (i32, i32) {
    %c0_i32 = arith.constant 0 : i32
    %c0_i32_0 = arith.constant 0 : i32
    %c0_i32_1 = arith.constant 0 : i32
    return %c0_i32, %c0_i32_0 : i32, i32
  }
  func.func @transform_8(%arg0: i32) -> (i32, i32, i32, i32) {
    %c0_i32 = arith.constant 0 : i32
    %c0_i32_0 = arith.constant 0 : i32
    %c0_i32_1 = arith.constant 0 : i32
    %c0_i32_2 = arith.constant 0 : i32
    return %arg0, %c0_i32, %c0_i32_0, %c0_i32_1 : i32, i32, i32, i32
  }
}

</mosaic_0001>

<bundles_post_ra>
// kernel: tpu_custom_call.1
= control target key start
LH: loop header
LB: loop body
LE: loop exit
PB: predicated region body
PF: predicated region fallthrough
CT: control target
= control target key end

     0   :  { %13 = vsyncpa [#allocation5], 0  ;;  %s12260_s0 = inlined_call_operand.hbm [shape: f32[4,16,16,32], index: 0, kind: input, shape index: {}]   ;;  %s12261_s1 = inlined_call_operand.vmem [shape: f32[4,1,128], index: 1, kind: input, shape index: {}]   ;;  %s12262_s2 = inlined_call_operand.vmem [shape: bf16[3,96,32], index: 2, kind: input, shape index: {}]   ;;  %s12263_s3 = inlined_call_operand.vmem [shape: f32[1,32], index: 3, kind: input, shape index: {}]   ;;  %s12264_s4 = inlined_call_operand.vmem [shape: bf16[3,96,32], index: 4, kind: input, shape index: {}]   ;;  %s12265_s5 = inlined_call_operand.vmem [shape: f32[1,32], index: 5, kind: input, shape index: {}]   ;;  %s12266_s6 = inlined_call_operand.vmem [shape: bf16[32,2], index: 6, kind: input, shape index: {}]   ;;  %s12267_s7 = inlined_call_operand.vmem [shape: bf16[2,32], index: 7, kind: input, shape index: {}]   ;;  %s12268_s8 = inlined_call_operand.hbm [shape: f32[4,16,16,32], index: 8, kind: output, shape index: {}]  }
   0x1   :  { %15 = vsyncpa [#allocation5 + $0x1], 0 }
   0x2   :  { %16 = vsyncpa [#allocation6], 0 }
   0x3   :  { %18 = vsyncpa [#allocation6 + $0x1], 0  ;;  %s8389_s27 = smov 0   ;;  %s8391_s28 = smov 0  }
   0x4   :  { %s8393_s29 = smov 0   ;;  %s8395_s30 = smov 0  }
   0x5 LB: > { %12284 = sst [smem:[#allocation10_spill]] %s8330_s29  ;;  %s8410_s9 = sadd.s32 4294967295, %s8334_s30   ;;  %s8334_s30 = sphi %s8395_s30, %s12715_s30   ;;  %s8330_s29 = sphi %s8393_s29, %s12712_s29   ;;  %s8326_s28 = sphi %s8391_s28, %s12714_s28   ;;  %s8322_s27 = sphi %s8389_s27, %s12713_s27  }
   0x6   : > { %s6720_s10 = sadd.s32 4294967294, %s8334_s30   ;;  %s8414_s11 = sadd.s32 1, %s8334_s30  }
   0x7   : > { %s31_s12 = sadd.s32 1, %s8330_s29  ;;  %s28_s13 = ssub.s32 %s8334_s30, %s8414_s11 }
   0x8   : > { %p38_p0 = scmp.ne.s32.totalorder %s8330_s29, %s8326_s28  ;;  %p29_p1 = scmp.eq.s32.totalorder %s28_s13, 0 }
   0x9   : > { %p39_p2 = scmp.eq.s32.totalorder %s8334_s30, 0  ;;  %p44_p3 = scmp.ne.s32.totalorder %s8326_s28, %s8322_s27 }
   0xa   : > { %p45_p4 = scmp.eq.s32.totalorder %s8410_s9, 0  ;;  %p220_p7 = scmp.eq.s32.totalorder %s8410_s9, 3 }
   0xb   : > { %s8426_s14 = scalar_select %p29_p1, %s8330_s29, %s31_s12  }
   0xc   : > { %p8428_p5 = por %p39_p2, %p38_p0  ;;  %p8432_p6 = por %p45_p4, %p44_p3 }
   0xd   : > { %12285 = sst [smem:[#allocation11_spill]] %s8426_s14  ;;  %p226_p8 = scmp.eq.s32.totalorder %s6720_s10, 3 }
   0xe   : > { %p7922_p9 = scmp.lt.s32.totalorder %s8334_s30, 4  ;;  %p8438_p10 = por %p220_p7, %p38_p0 }
   0xf   : > { %p8442_p11 = por %p226_p8, %p44_p3  ;;  %s264_s19 = sand.u32 1, %s8330_s29  }
  0x10   : > { %s7738_s20 = sshll.u32 %s8334_s30, 8  ;;  %s6723_s21 = sshll.u32 %s264_s19, 8 }
  0x11   : > { %s273_s24 = scalar_lea.hbm %s12260_s0, %s7738_s20  ;;  %s268_s26 = scalar_lea.vmem [#allocation4], %s6723_s21 }
  0x12   : > { %s274_s25 = sshll.u32 %s273_s24, 4  ;;  %s276_s12 = sshll.u32 %s268_s26, 4  ;;  %s275_s25 = int_to_ptr.hbm [resolvable:$true] %s274_s25  ;;  %s277_s12 = int_to_ptr.vmem [resolvable:$true] %s276_s12 }
  0x13   : > { %p8453_p12 = pnand %p7922_p9, %p8428_p5  ;;  %p6726_p13 = scmp.ge.s32.totalorder %s8334_s30, 1 }
  0x14   : > { %p290_p0 = scmp.lt.s32.totalorder %s8334_s30, 5  ;;  %s265_s13 = scalar_lea.sflag [#allocation5], %s264_s19 }
  0x15   : > { %s8238_s14 = sshra.s32 %s275_s25, 4  ;;  %p8242_p2 = pneg %p8453_p12  ;;  %s8239_s14 = int_to_ptr.hbm [resolvable:$true] %s8238_s14 }
  0x16   : > { %s8240_s29 = scalar_lea.hbm %s8239_s14, 256  ;;  %s8245_s15 = scalar_lea.hbm %s12260_s0, 1024 }
  0x17   : > { %p8241_p1 = scmp.ne.s32.totalorder %s8239_s14, %s8240_s29  ;;  %p8246_p5 = scmp.lt.s32.totalorder %s8239_s14, %s12260_s0 }
  0x18   : > { %p8247_p7 = scmp.lt.s32.totalorder %s8245_s15, %s8240_s29 }
  0x19   : > { %p8243_p3 = pnand %p8242_p2, %p8241_p1 }
  0x1a   : > { %p8248_p8 = por %p8247_p7, %p8246_p5 }
  0x1b   : > { %p8244_p4 = pneg %p8243_p3 }
  0x1d   : > { %p8249_p9 = pnand %p8248_p8, %p8244_p4 }
  0x1f   : > { %8252 = shalt.err (!%p8249_p9)
}
  0x20   : > { %s8336_s19 = smov 128   ;;  %s8337_s24 = smov 8  }
  0x21   : > { %7917 = dma.hbm_to_vmem [thread:$0]  (!%p8453_p12), %s275_s25, 4096, %s277_s12, %s265_s13, %s8336_s19, %s8336_s19, %s8337_s24  }
  0x22   : > { %p291_p1 = pnand %p6726_p13, %p290_p0 }
  0x24   : > { %294 = sbr.rel (%p291_p1) target bundleno = 2394 (0x95a), region = 52 }
  0x29   : > { %s8474_s26 = sand.u32 1, %s8326_s28  }
  0x2a   : > { %s6727_s29 = sshll.u32 %s8474_s26, 8  ;;  %s297_s14 = scalar_lea.sflag [#allocation5], %s8474_s26 }
  0x2b   : > { %s8480_s20 = scalar_lea.vmem [#allocation4], %s6727_s29 }
  0x2c   : > { %8313 = dma.done.wait (%p8432_p6), %s297_s14, 4096  }
  0x2d   : > { %8315 = vsyncadd (%p8432_p6), %s297_s14, 4294963200  ;;  %vm12270_vm0 = vcmask 261120   ;;  %v8487_v0 = vld [vmem:[%s8480_s20] sm:$0xff]  ;;  %v8490_v1 = vld [vmem:[%s8480_s20 + $0x8] sm:$0xff]  ;;  %p337_p6 = scmp.lt.s32.totalorder %s8410_s9, 3  ;;  %s8338_s13 = smov 32  }
  0x2e   : > { %v8493_v2 = vld [vmem:[%s8480_s20 + $0x10] sm:$0xff]  ;;  %v8496_v3 = vld [vmem:[%s8480_s20 + $0x18] sm:$0xff]  ;;  %v372_v4 = vsel %vm12270_vm0, %v8487_v0, 0.0  ;;  %v373_v5 = vsel %vm12270_vm0, %v8490_v1, 0.0  ;;  %v8503_v6 = vld [vmem:[%s8480_s20 + $0x20] sm:$0xff]  ;;  %v410_v15 = vmul.f32 %v8487_v0, %v8487_v0  ;;  %v411_v16 = vmul.f32 %v8490_v1, %v8490_v1  ;;  %s8339_s21 = smov 96  }
  0x2f   : > { %v374_v7 = vadd.f32 %v373_v5, %v372_v4  ;;  %v375_v8 = vsel %vm12270_vm0, %v8493_v2, 0.0  ;;  %v377_v9 = vsel %vm12270_vm0, %v8496_v3, 0.0  ;;  %v8510_v10 = vld [vmem:[%s8480_s20 + $0x28] sm:$0xff]  ;;  %v379_v12 = vsel %vm12270_vm0, %v8503_v6, 0.0  ;;  %v8515_v13 = vld [vmem:[%s8480_s20 + $0x30] sm:$0xff]  ;;  %v8526_v19 = vld [vmem:[%s8480_s20 + $0x38] sm:$0xff] }
  0x30   : > { %v412_v17 = vmul.f32 %v8493_v2, %v8493_v2  ;;  %v381_v18 = vsel %vm12270_vm0, %v8510_v10, 0.0  ;;  %v413_v21 = vmul.f32 %v8496_v3, %v8496_v3  ;;  %v383_v22 = vsel %vm12270_vm0, %v8515_v13, 0.0  ;;  %v8535_v24 = vld [vmem:[%s8480_s20 + $0x40] sm:$0xff]  ;;  %v364_v25 = vld [vmem:[%s8480_s20 + $0x48] sm:$0xff]  ;;  %v8542_v30 = vld [vmem:[%s8480_s20 + $0x50] sm:$0xff]  ;;  %s338_s16 = scalar_select %p337_p6, %s8410_s9, 3 }
  0x31   : > { %v376_v11 = vadd.f32 %v375_v8, %v374_v7  ;;  %v414_v23 = vmul.f32 %v8503_v6, %v8503_v6  ;;  %v426_v27 = vsel %vm12270_vm0, %v410_v15, 0.0  ;;  %v427_v28 = vsel %vm12270_vm0, %v411_v16, 0.0  ;;  %v6729_v36 = vld [vmem:[%s8480_s20 + $0x80] sm:$0xff]  ;;  %v6730_v37 = vld [vmem:[%s8480_s20 + $0x88] sm:$0xff]  ;;  %v6731_v41 = vld [vmem:[%s8480_s20 + $0x90] sm:$0xff]  ;;  %s8340_s15 = smov 64  }
  0x32   : > { %v429_v29 = vsel %vm12270_vm0, %v412_v17, 0.0  ;;  %v385_v31 = vsel %vm12270_vm0, %v8526_v19, 0.0  ;;  %v428_v32 = vadd.f32 %v427_v28, %v426_v27  ;;  %v415_v34 = vmul.f32 %v8510_v10, %v8510_v10  ;;  %v8556_v42 = vld [vmem:[%s8480_s20 + $0x58] sm:$0xff]  ;;  %v8559_v43 = vld [vmem:[%s8480_s20 + $0x60] sm:$0xff]  ;;  %v8572_v53 = vld [vmem:[%s8480_s20 + $0x68] sm:$0xff]  ;;  %s8657_s10 = scalar_lea.vmem %s12261_s1, %s338_s16  ;;  %s12091_s24 = scalar_lea.vmem [#allocation7], %s6727_s29 }
  0x33   : > { %v378_v14 = vadd.f32 %v377_v9, %v376_v11  ;;  %v431_v35 = vsel %vm12270_vm0, %v413_v21, 0.0  ;;  %v387_v38 = vsel %vm12270_vm0, %v8535_v24, 0.0  ;;  %v389_v39 = vsel %vm12270_vm0, %v364_v25, 0.0  ;;  %v6732_v48 = vld [vmem:[%s8480_s20 + $0x98] sm:$0xff]  ;;  %v6733_v56 = vld [vmem:[%s8480_s20 + $0xa0] sm:$0xff]  ;;  %v369_v59 = vld [vmem:[%s8480_s20 + $0x70] sm:$0xff] }
  0x34   : > { %v430_v40 = vadd.f32 %v429_v29, %v428_v32  ;;  %v391_v45 = vsel %vm12270_vm0, %v8542_v30, 0.0  ;;  %v416_v46 = vmul.f32 %v8515_v13, %v8515_v13  ;;  %v433_v47 = vsel %vm12270_vm0, %v414_v23, 0.0  ;;  %v8584_v4 = vld [vmem:[%s8480_s20 + $0x78] sm:$0xff]  ;;  %v6734_v9 = vld [vmem:[%s8480_s20 + $0xa8] sm:$0xff]  ;;  %v6735_v21 = vld [vmem:[%s8480_s20 + $0xb0] sm:$0xff]  ;;  %s7909_s29 = sshll.u32 %s8410_s9, 8 }
  0x35   : > { %v380_v20 = vadd.f32 %v379_v12, %v378_v14  ;;  %v417_v49 = vmul.f32 %v8526_v19, %v8526_v19  ;;  %v481_v51 = vsel %vm12270_vm0, %v6729_v36, 0.0  ;;  %v482_v52 = vsel %vm12270_vm0, %v6730_v37, 0.0  ;;  %v6736_v32 = vld [vmem:[%s8480_s20 + $0xb8] sm:$0xff]  ;;  %s6634_s16 = scalar_lea.hbm %s12268_s8, %s7909_s29  ;;  %s6635_s25 = sshll.u32 %s12091_s24, 4  ;;  %s6636_s25 = int_to_ptr.vmem [resolvable:$true] %s6635_s25 }
  0x36   : > { %v432_v50 = vadd.f32 %v431_v35, %v430_v40  ;;  %v435_v55 = vsel %vm12270_vm0, %v415_v34, 0.0  ;;  %v483_v57 = vadd.f32 %v482_v52, %v481_v51  ;;  %v484_v58 = vsel %vm12270_vm0, %v6731_v41, 0.0  ;;  %s6637_s12 = sshll.u32 %s6634_s16, 4  ;;  %s8288_s19 = scalar_lea.hbm %s12268_s8, 1024  ;;  %s6638_s12 = int_to_ptr.hbm [resolvable:$true] %s6637_s12 }
  0x37   : > { %v382_v26 = vadd.f32 %v381_v18, %v380_v20  ;;  %v393_v60 = vsel %vm12270_vm0, %v8556_v42, 0.0  ;;  %v395_v61 = vsel %vm12270_vm0, %v8559_v43, 0.0  ;;  %v486_v63 = vsel %vm12270_vm0, %v6732_v48, 0.0 }
  0x38   : > { %v434_v62 = vadd.f32 %v433_v47, %v432_v50  ;;  %v418_v7 = vmul.f32 %v8535_v24, %v8535_v24  ;;  %v437_v8 = vsel %vm12270_vm0, %v416_v46, 0.0  ;;  %v485_v11 = vadd.f32 %v484_v58, %v483_v57  ;;  %v6738_v57 = vld [vmem:[%s8480_s20 + $0xc8] sm:$0xff] }
  0x39   : > { %v384_v33 = vadd.f32 %v383_v22, %v382_v26  ;;  %v397_v12 = vsel %vm12270_vm0, %v8572_v53, 0.0  ;;  %v419_v14 = vmul.f32 %v364_v25, %v364_v25  ;;  %v488_v16 = vsel %vm12270_vm0, %v6733_v56, 0.0 }
  0x3a   : > { %v436_v15 = vadd.f32 %v435_v55, %v434_v62  ;;  %v399_v18 = vsel %vm12270_vm0, %v369_v59, 0.0  ;;  %v439_v20 = vsel %vm12270_vm0, %v417_v49, 0.0  ;;  %v487_v22 = vadd.f32 %v486_v63, %v485_v11 }
  0x3b   : > { %v386_v44 = vadd.f32 %v385_v31, %v384_v33  ;;  %v401_v23 = vsel %vm12270_vm0, %v8584_v4, 0.0  ;;  %v420_v26 = vmul.f32 %v8542_v30, %v8542_v30  ;;  %v490_v25 = vsel %vm12270_vm0, %v6734_v9, 0.0 }
  0x3c   : > { %v438_v27 = vadd.f32 %v437_v8, %v436_v15  ;;  %v421_v29 = vmul.f32 %v8556_v42, %v8556_v42  ;;  %v441_v31 = vsel %vm12270_vm0, %v418_v7, 0.0  ;;  %v489_v33 = vadd.f32 %v488_v16, %v487_v22  ;;  %v6740_v15 = vld [vmem:[%s8480_s20 + $0xd8] sm:$0xff] }
  0x3d   : > { %v388_v54 = vadd.f32 %v387_v38, %v386_v44  ;;  %v422_v34 = vmul.f32 %v8559_v43, %v8559_v43  ;;  %v443_v38 = vsel %vm12270_vm0, %v419_v14, 0.0  ;;  %v6737_v44 = vld [vmem:[%s8480_s20 + $0xc0] sm:$0xff]  ;;  %v519_v46 = vmul.f32 %v6729_v36, %v6729_v36 }
  0x3e   : > { %v440_v35 = vadd.f32 %v439_v20, %v438_v27  ;;  %v520_v47 = vmul.f32 %v6730_v37, %v6730_v37  ;;  %v423_v49 = vmul.f32 %v8572_v53, %v8572_v53  ;;  %v494_v51 = vsel %vm12270_vm0, %v6736_v32, 0.0  ;;  %v6739_v37 = vld [vmem:[%s8480_s20 + $0xd0] sm:$0xff] }
  0x3f   : > { %v390_v5 = vadd.f32 %v389_v39, %v388_v54  ;;  %v492_v39 = vsel %vm12270_vm0, %v6735_v21, 0.0  ;;  %v521_v52 = vmul.f32 %v6731_v41, %v6731_v41  ;;  %v424_v54 = vmul.f32 %v369_v59, %v369_v59 }
  0x40   : > { %v442_v50 = vadd.f32 %v441_v31, %v440_v35  ;;  %v445_v55 = vsel %vm12270_vm0, %v420_v26, 0.0  ;;  %v447_v63 = vsel %vm12270_vm0, %v421_v29, 0.0  ;;  %v496_v36 = vsel %vm12270_vm0, %v6737_v44, 0.0 }
  0x41   : > { %v392_v17 = vadd.f32 %v391_v45, %v390_v5  ;;  %v491_v45 = vadd.f32 %v490_v25, %v489_v33  ;;  %v523_v7 = vmul.f32 %v6733_v56, %v6733_v56  ;;  %v535_v8 = vsel %vm12270_vm0, %v519_v46, 0.0 }
  0x42   : > { %v444_v62 = vadd.f32 %v443_v38, %v442_v50  ;;  %v536_v41 = vsel %vm12270_vm0, %v520_v47, 0.0  ;;  %v498_v11 = vsel %vm12270_vm0, %v6738_v57, 0.0  ;;  %v500_v26 = vsel %vm12270_vm0, %v6739_v37, 0.0 }
  0x43   : > { %v394_v28 = vadd.f32 %v393_v60, %v392_v17  ;;  %v493_v58 = vadd.f32 %v492_v39, %v491_v45  ;;  %v522_v60 = vmul.f32 %v6732_v48, %v6732_v48  ;;  %v537_v14 = vadd.f32 %v536_v41, %v535_v8 }
  0x44   : > { %v446_v59 = vadd.f32 %v445_v55, %v444_v62  ;;  %v538_v48 = vsel %vm12270_vm0, %v521_v52, 0.0  ;;  %v524_v17 = vmul.f32 %v6734_v9, %v6734_v9  ;;  %v451_v25 = vsel %vm12270_vm0, %v423_v49, 0.0 }
  0x45   : > { %v396_v40 = vadd.f32 %v395_v61, %v394_v28  ;;  %v495_v5 = vadd.f32 %v494_v51, %v493_v58  ;;  %v540_v20 = vsel %vm12270_vm0, %v522_v60, 0.0  ;;  %v539_v27 = vadd.f32 %v538_v48, %v537_v14  ;;  %v6741_v28 = vld [vmem:[%s8480_s20 + $0xe0] sm:$0xff]  ;;  %v6743_v51 = vld [vmem:[%s8480_s20 + $0xf0] sm:$0xff] }
  0x46   : > { %v448_v22 = vadd.f32 %v447_v63, %v446_v59  ;;  %v525_v31 = vmul.f32 %v6735_v21, %v6735_v21  ;;  %v542_v33 = vsel %vm12270_vm0, %v523_v7, 0.0  ;;  %v502_v35 = vsel %vm12270_vm0, %v6740_v15, 0.0 }
  0x47   : > { %v398_v61 = vadd.f32 %v397_v12, %v396_v40  ;;  %v449_v12 = vsel %vm12270_vm0, %v422_v34, 0.0  ;;  %v497_v16 = vadd.f32 %v496_v36, %v495_v5  ;;  %v541_v38 = vadd.f32 %v540_v20, %v539_v27 }
  0x48   : > { %v450_v34 = vadd.f32 %v449_v12, %v448_v22  ;;  %v425_v9 = vmul.f32 %v8584_v4, %v8584_v4  ;;  %v526_v40 = vmul.f32 %v6736_v32, %v6736_v32  ;;  %v544_v45 = vsel %vm12270_vm0, %v524_v17, 0.0 }
  0x49   : > { %v400_v56 = vadd.f32 %v399_v18, %v398_v61  ;;  %v499_v29 = vadd.f32 %v498_v11, %v497_v16  ;;  %v6742_v18 = vld [vmem:[%s8480_s20 + $0xe8] sm:$0xff]  ;;  %v504_v49 = vsel %vm12270_vm0, %v6741_v28, 0.0  ;;  %v543_v21 = vadd.f32 %v542_v33, %v541_v38  ;;  %v6744_v61 = vld [vmem:[%s8480_s20 + $0xf8] sm:$0xff] }
  0x4a   : > { %v452_v47 = vadd.f32 %v451_v25, %v450_v34  ;;  %v453_v50 = vsel %vm12270_vm0, %v424_v54, 0.0  ;;  %v527_v55 = vmul.f32 %v6737_v44, %v6737_v44  ;;  %v546_v58 = vsel %vm12270_vm0, %v525_v31, 0.0 }
  0x4b   : > { %v501_v39 = vadd.f32 %v500_v26, %v499_v29  ;;  %v402_v46 = vadd.f32 %v401_v23, %v400_v56  ;;  %v506_v4 = vsel %vm12270_vm0, %v6742_v18, 0.0  ;;  %v545_v60 = vadd.f32 %v544_v45, %v543_v21 }
  0x4c   : > { %v528_v32 = vmul.f32 %v6738_v57, %v6738_v57  ;;  %v548_v63 = vsel %vm12270_vm0, %v526_v40, 0.0  ;;  %v454_v36 = vadd.f32 %v453_v50, %v452_v47  ;;  %v508_v5 = vsel %vm12270_vm0, %v6743_v51, 0.0 }
  0x4d   : > { %v503_v52 = vadd.f32 %v502_v35, %v501_v39  ;;  %v403_v23 = vrot.slane %v402_v46, 4  ;;  %v547_v7 = vadd.f32 %v546_v58, %v545_v60  ;;  %v455_v54 = vsel %vm12270_vm0, %v425_v9, 0.0 }
  0x4e   : > { %v529_v41 = vmul.f32 %v6739_v37, %v6739_v37  ;;  %v550_v44 = vsel %vm12270_vm0, %v527_v55, 0.0  ;;  %v510_v59 = vsel %vm12270_vm0, %v6744_v61, 0.0  ;;  %v530_v48 = vmul.f32 %v6740_v15, %v6740_v15 }
  0x4f   : > { %v505_v62 = vadd.f32 %v504_v49, %v503_v52  ;;  %v549_v11 = vadd.f32 %v548_v63, %v547_v7  ;;  %v552_v57 = vsel %vm12270_vm0, %v528_v32, 0.0  ;;  %v404_v12 = vadd.f32 %v403_v23, %v402_v46 }
  0x50   : > { %v456_v16 = vadd.f32 %v455_v54, %v454_v36  ;;  %v531_v56 = vmul.f32 %v6741_v28, %v6741_v28  ;;  %v554_v22 = vsel %vm12270_vm0, %v529_v41, 0.0  ;;  %v532_v25 = vmul.f32 %v6742_v18, %v6742_v18 }
  0x51   : > { %v507_v8 = vadd.f32 %v506_v4, %v505_v62  ;;  %v551_v17 = vadd.f32 %v550_v44, %v549_v11  ;;  %v556_v37 = vsel %vm12270_vm0, %v530_v48, 0.0  ;;  %v405_v29 = vrot.slane %v404_v12, 2 }
  0x52   : > { %v457_v31 = vrot.slane %v456_v16, 4  ;;  %v533_v35 = vmul.f32 %v6743_v51, %v6743_v51  ;;  %v558_v15 = vsel %vm12270_vm0, %v531_v56, 0.0  ;;  %v534_v39 = vmul.f32 %v6744_v61, %v6744_v61 }
  0x53   : > { %v509_v14 = vadd.f32 %v508_v5, %v507_v8  ;;  %v553_v26 = vadd.f32 %v552_v57, %v551_v17  ;;  %v560_v40 = vsel %vm12270_vm0, %v532_v25, 0.0  ;;  %v406_v28 = vadd.f32 %v405_v29, %v404_v12  ;;  %v354_v12 = vld [vmem:[%s8657_s10] sm:$0x1] }
  0x54   : > { %v458_v45 = vadd.f32 %v457_v31, %v456_v16  ;;  %v562_v18 = vsel %vm12270_vm0, %v533_v35, 0.0  ;;  %v564_v21 = vsel %vm12270_vm0, %v534_v39, 0.0 }
  0x55   : > { %v511_v20 = vadd.f32 %v510_v59, %v509_v14  ;;  %v555_v33 = vadd.f32 %v554_v22, %v553_v26  ;;  %v407_v50 = vrot.slane %v406_v28, 1 }
  0x56   : > { %v459_v52 = vrot.slane %v458_v45, 2 }
  0x57   : > { %v512_v27 = vrot.slane %v511_v20, 4  ;;  %v557_v38 = vadd.f32 %v556_v37, %v555_v33  ;;  %v408_v4 = vadd.f32 %v407_v50, %v406_v28 }
  0x58   : > { %v460_v60 = vadd.f32 %v459_v52, %v458_v45 }
  0x59   : > { %v513_v34 = vadd.f32 %v512_v27, %v511_v20  ;;  %v559_v46 = vadd.f32 %v558_v15, %v557_v38  ;;  %v8660_v20 = vadd.f32 1.0, %v354_v12 }
  0x5a   : > { %v461_v63 = vrot.slane %v460_v60, 1 }
  0x5b   : > { %v514_v9 = vrot.slane %v513_v34, 2  ;;  %v561_v49 = vadd.f32 %v560_v40, %v559_v46  ;;  %12291 = vst [vmem:[#allocation12_spill] sm:$0xff] %v8660_v20 }
  0x5c   : > { %v462_v7 = vadd.f32 %v461_v63, %v460_v60 }
  0x5d   : > { %v515_v47 = vadd.f32 %v514_v9, %v513_v34  ;;  %v563_v51 = vadd.f32 %v562_v18, %v561_v49 }
  0x5f   : > { %v516_v55 = vrot.slane %v515_v47, 1  ;;  %v565_v58 = vadd.f32 %v564_v21, %v563_v51 }
  0x61   : > { %v517_v61 = vadd.f32 %v516_v55, %v515_v47  ;;  %v566_v62 = vrot.slane %v565_v58, 4 }
  0x63   : > { %v567_v32 = vadd.f32 %v566_v62, %v565_v58  ;;  %v518_v23 = vadd.f32 %v517_v61, %v408_v4 }
  0x65   : > { %v568_v36 = vrot.slane %v567_v32, 2  ;;  %v573_v8 = vmul.f32 0.00390625, %v518_v23 }
  0x67   : > { %v569_v5 = vadd.f32 %v568_v36, %v567_v32  ;;  %v575_v59 = vmul.f32 %v573_v8, %v573_v8  ;;  %v590_v26 = vmul.f32 %v8660_v20, %v573_v8 }
  0x69   : > { %v570_v54 = vrot.slane %v569_v5, 1 }
  0x6b   : > { %v571_v41 = vadd.f32 %v570_v54, %v569_v5  ;;  %v347_v5 = vlaneseq }
  0x6d   : > { %v572_v44 = vadd.f32 %v571_v41, %v462_v7 }
  0x6f   : > { %v574_v11 = vmul.f32 0.00390625, %v572_v44 }
  0x71   : > { %v576_v14 = vsub.f32 %v574_v11, %v575_v59 }
  0x73   : > { %v577_v48 = vadd.f32 1e-05, %v576_v14 }
  0x75   : > { %7966 = vrsqrt.f32 %v577_v48  ;;  %vm584_vm1 = vweird.f32 %v577_v48 }
  0x7b   : > { %v7967_v57 = vpop.eup %7966 }
  0x7c   : > { %v579_v16 = vmul.f32 %v7967_v57, %v577_v48  ;;  %vm585_vm2 = vweird.f32 %v7967_v57 }
  0x7d   : > { %vm586_vm3 = vmor %vm584_vm1, %vm585_vm2 }
  0x7e   : > { %v580_v17 = vmul.f32 %v7967_v57, %v579_v16 }
  0x80   : > { %v581_v56 = vmul.f32 0.5, %v580_v17 }
  0x82   : > { %v582_v22 = vsub.f32 1.5, %v581_v56 }
  0x84   : > { %v583_v27 = vmul.f32 %v7967_v57, %v582_v22 }
  0x86   : > { %v587_v25 = vsel %vm586_vm3, %v7967_v57, %v583_v27 }
  0x87   : > { %v591_v37 = vmul.f32 %v590_v26, %v587_v25  ;;  %v589_v34 = vmul.f32 %v8660_v20, %v587_v25 }
  0x89   : > { %593 = vrot.lane.b32.xlu0 %v591_v37, %s8338_s13  ;;  %v8665_v35 = vperm.slane %v589_v34, 0 }
  0x8b   : > { %v604_v15 = vmul.f32 %v8665_v35, %v8503_v6  ;;  %v605_v38 = vmul.f32 %v8665_v35, %v8510_v10  ;;  %v602_v9 = vmul.f32 %v8665_v35, %v8493_v2  ;;  %v603_v39 = vmul.f32 %v8665_v35, %v8496_v3 }
  0x8c   : > { %v600_v40 = vmul.f32 %v8665_v35, %v8487_v0  ;;  %v601_v28 = vmul.f32 %v8665_v35, %v8490_v1  ;;  %v606_v21 = vmul.f32 %v8665_v35, %v8515_v13  ;;  %v607_v52 = vmul.f32 %v8665_v35, %v8526_v19 }
  0x8d   : > { %v610_v58 = vmul.f32 %v8665_v35, %v8542_v30  ;;  %v611_v19 = vmul.f32 %v8665_v35, %v8556_v42  ;;  %v8755_v17 = vmul.f32 %v8665_v35, %v8559_v43 }
  0xfb   : > { %v594_v29 = vpop.permute.xlu0 %593 }
  0xfc   : > { %v596_v31 = vsub.f32 %v354_v12, %v594_v29  ;;  %v8747_v12 = vshrl.u32 %v347_v5, 7 }
  0xfe   : > { %v617_v33 = vperm.slane %v596_v31, 0 }
 0x100   : > { %618 = vrot.lane.b32.xlu0 %v617_v33, %s8339_s21  ;;  %s8282_s21 = sshra.s32 %s6638_s12, 4  ;;  %s8283_s21 = int_to_ptr.hbm [resolvable:$true] %s8282_s21 }
 0x101   : > { %s8284_s22 = scalar_lea.hbm %s8283_s21, 256  ;;  %p8289_p2 = scmp.lt.s32.totalorder %s8283_s21, %s12268_s8 }
 0x102   : > { %p8285_p12 = scmp.ne.s32.totalorder %s8283_s21, %s8284_s22  ;;  %p8290_p3 = scmp.lt.s32.totalorder %s8288_s19, %s8284_s22 }
 0x104   : > { %p8286_p13 = pnand %p8285_p12, %p8438_p10  ;;  %p8291_p4 = por %p8290_p3, %p8289_p2 }
 0x106   : > { %p8287_p0 = pneg %p8286_p13 }
 0x108   : > { %p8292_p5 = pnand %p8291_p4, %p8287_p0 }
 0x172   : > { %v8679_v45 = vpop.permute.xlu0 %618 }
 0x173   : > { %v8682_v46 = vadd.f32 %v8679_v45, %v604_v15  ;;  %v8685_v6 = vadd.f32 %v8679_v45, %v605_v38  ;;  %v8688_v10 = vadd.f32 %v8679_v45, %v602_v9  ;;  %v8691_v2 = vadd.f32 %v8679_v45, %v603_v39 }
 0x174   : > { %v8694_v3 = vadd.f32 %v8679_v45, %v600_v40  ;;  %v8697_v0 = vadd.f32 %v8679_v45, %v601_v28  ;;  %v8710_v51 = vadd.f32 %v8679_v45, %v606_v21  ;;  %v8715_v13 = vadd.f32 %v8679_v45, %v607_v52 }
 0x175   : > { %v6749_v1 = vmul.f32 -1.442695, %v8682_v46  ;;  %v6750_v47 = vmul.f32 -1.442695, %v8685_v6  ;;  %v6747_v18 = vmul.f32 -1.442695, %v8688_v10  ;;  %v8723_v32 = vadd.f32 %v8679_v45, %v610_v58 }
 0x176   : > { %v6748_v49 = vmul.f32 -1.442695, %v8691_v2  ;;  %v6745_v50 = vmul.f32 -1.442695, %v8694_v3  ;;  %v6746_v55 = vmul.f32 -1.442695, %v8697_v0  ;;  %v8731_v42 = vadd.f32 %v8679_v45, %v611_v19 }
 0x177   : > { %7968 = vpow2.f32 %v6749_v1  ;;  %v6751_v62 = vmul.f32 -1.442695, %v8710_v51  ;;  %v6752_v30 = vmul.f32 -1.442695, %v8715_v13  ;;  %v8738_v44 = vmul.f32 -1.442695, %v8723_v32 }
 0x178   : > { %7970 = vpow2.f32 %v6750_v47 }
 0x179   : > { %7972 = vpow2.f32 %v6747_v18 }
 0x17a   : > { %7974 = vpow2.f32 %v6748_v49 }
 0x17b   : > { %7976 = vpow2.f32 %v6745_v50 }
 0x17c   : > { %7978 = vpow2.f32 %v6746_v55 }
 0x17d   : > { %v7969_v4 = vpop.eup %7968 }
 0x17e   : > { %v7971_v60 = vpop.eup %7970  ;;  %v8719_v61 = vadd.f32 1.0, %v7969_v4 }
 0x17f   : > { %v7973_v63 = vpop.eup %7972  ;;  %v8725_v23 = vadd.f32 1.0, %v7971_v60 }
 0x180   : > { %v7975_v36 = vpop.eup %7974  ;;  %7980 = vrcp.f32 %v8719_v61  ;;  %v8733_v8 = vadd.f32 1.0, %v7973_v63  ;;  %v770_v59 = vand.u32 2147483647, %v8719_v61  ;;  %v772_v11 = vand.u32 2147483648, %v8719_v61 }
 0x181   : > { %v7977_v7 = vpop.eup %7976  ;;  %7982 = vrcp.f32 %v8725_v23  ;;  %v8735_v41 = vadd.f32 1.0, %v7975_v36  ;;  %v785_v48 = vand.u32 2147483647, %v8725_v23  ;;  %v787_v57 = vand.u32 2147483648, %v8725_v23 }
 0x182   : > { %v7979_v54 = vpop.eup %7978  ;;  %7984 = vpow2.f32 %v6751_v62  ;;  %v8742_v14 = vadd.f32 1.0, %v7977_v7  ;;  %vm766_vm4 = vweird.f32 %v8719_v61  ;;  %vm781_vm5 = vweird.f32 %v8725_v23 }
 0x183   : > { %7986 = vpow2.f32 %v6752_v30  ;;  %v8751_v16 = vadd.f32 1.0, %v7979_v54  ;;  %v742_v22 = vand.u32 2147483648, %v8733_v8  ;;  %v757_v26 = vand.u32 2147483648, %v8735_v41 }
 0x184   : > { %7988 = vrcp.f32 %v8733_v8  ;;  %vm8762_vm6 = vcmp.eq.f32.partialorder %v770_v59, 8.507059e+37  ;;  %v773_v29 = vor.u32 1.1754944e-38, %v772_v11  ;;  %v740_v43 = vand.u32 2147483647, %v8733_v8 }
 0x185   : > { %7990 = vrcp.f32 %v8735_v41  ;;  %vm8768_vm7 = vcmp.eq.f32.partialorder %v785_v48, 8.507059e+37  ;;  %v788_v15 = vor.u32 1.1754944e-38, %v787_v57  ;;  %v755_v38 = vand.u32 2147483647, %v8735_v41 }
 0x186   : > { %v7981_v56 = vpop.eup %7980  ;;  %7992 = vrcp.f32 %v8742_v14  ;;  %v712_v9 = vand.u32 2147483648, %v8742_v14  ;;  %vm736_vm8 = vweird.f32 %v8733_v8  ;;  %v710_v28 = vand.u32 2147483647, %v8742_v14 }
 0x187   : > { %v7983_v27 = vpop.eup %7982  ;;  %v762_v25 = vmul.f32 %v7981_v56, %v8719_v61  ;;  %7994 = vrcp.f32 %v8751_v16  ;;  %vm767_vm9 = vweird.f32 %v7981_v56  ;;  %v743_v18 = vor.u32 1.1754944e-38, %v742_v22 }
 0x188   : > { %v7985_v31 = vpop.eup %7984  ;;  %v777_v33 = vmul.f32 %v7983_v27, %v8725_v23  ;;  %v758_v49 = vor.u32 1.1754944e-38, %v757_v26  ;;  %vm782_vm11 = vweird.f32 %v7983_v27  ;;  %vm8781_vm12 = vcmp.eq.f32.partialorder %v740_v43, 8.507059e+37  ;;  %vm768_vm2 = vmor %vm766_vm4, %vm767_vm9 }
 0x189   : > { %v8774_v39 = vpop.eup %7986  ;;  %v763_v40 = vsub.f32 1.0, %v762_v25  ;;  %v725_v58 = vand.u32 2147483647, %v8751_v16  ;;  %vm8788_vm14 = vcmp.eq.f32.partialorder %v755_v38, 8.507059e+37  ;;  %v713_v63 = vor.u32 1.1754944e-38, %v712_v9  ;;  %vm783_vm10 = vmor %vm781_vm5, %vm782_vm11 }
 0x18a   : > { %v7989_v1 = vpop.eup %7988  ;;  %v778_v47 = vsub.f32 1.0, %v777_v33  ;;  %v727_v30 = vand.u32 2147483648, %v8751_v16  ;;  %vm8794_vm1 = vcmp.eq.f32.partialorder %v710_v28, 8.507059e+37  ;;  %vm721_vm13 = vweird.f32 %v8751_v16 }
 0x18b   : > { %v7991_v21 = vpop.eup %7990  ;;  %v764_v50 = vmul.f32 %v7981_v56, %v763_v40  ;;  %v732_v52 = vmul.f32 %v7989_v1, %v8733_v8  ;;  %vm737_vm15 = vweird.f32 %v7989_v1  ;;  %v8805_v25 = vadd.f32 1.0, %v7985_v31 }
 0x18c   : > { %v7993_v4 = vpop.eup %7992  ;;  %v779_v19 = vmul.f32 %v7983_v27, %v778_v47  ;;  %v747_v60 = vmul.f32 %v7991_v21, %v8735_v41  ;;  %vm752_vm3 = vweird.f32 %v7991_v21  ;;  %vm738_vm4 = vmor %vm736_vm8, %vm737_vm15  ;;  %vm12303_vm8 = vweird.f32 %v8742_v14 }
 0x18d   : > { %v765_v36 = vadd.f32 %v7981_v56, %v764_v50  ;;  %v733_v5 = vsub.f32 1.0, %v732_v52  ;;  %v702_v7 = vmul.f32 %v7993_v4, %v8742_v14  ;;  %vm707_vm0 = vweird.f32 %v7993_v4  ;;  %v7995_v48 = vpop.eup %7994 }
 0x18e   : > { %v780_v59 = vadd.f32 %v7983_v27, %v779_v19  ;;  %v748_v11 = vsub.f32 1.0, %v747_v60  ;;  %v717_v38 = vmul.f32 %v7995_v48, %v8751_v16  ;;  %vm722_vm5 = vweird.f32 %v7995_v48  ;;  %vm708_vm9 = vmor %vm12303_vm8, %vm707_vm0 }
 0x18f   : > { %v769_v57 = vsel %vm768_vm2, %v7981_v56, %v765_v36  ;;  %v734_v22 = vmul.f32 %v7989_v1, %v733_v5  ;;  %v703_v26 = vsub.f32 1.0, %v702_v7  ;;  %7996 = vrcp.f32 %v8805_v25  ;;  %vm723_vm0 = vmor %vm721_vm13, %vm722_vm5 }
 0x190   : > { %v774_v61 = vsel %vm8762_vm6, %v773_v29, %v769_v57  ;;  %v784_v43 = vsel %vm783_vm10, %v7983_v27, %v780_v59  ;;  %v749_v33 = vmul.f32 %v7991_v21, %v748_v11  ;;  %v718_v27 = vsub.f32 1.0, %v717_v38 }
 0x191   : > { %v789_v9 = vsel %vm8768_vm7, %v788_v15, %v784_v43  ;;  %v8813_v56 = vmul.f32 %v774_v61, %v8682_v46  ;;  %v735_v40 = vadd.f32 %v7989_v1, %v734_v22  ;;  %v704_v23 = vmul.f32 %v7993_v4, %v703_v26 }
 0x192   : > { %v8816_v28 = vmul.f32 %v789_v9, %v8685_v6  ;;  %v750_v37 = vadd.f32 %v7991_v21, %v749_v33  ;;  %vm12302_vm6 = vweird.f32 %v8735_v41  ;;  %v719_v15 = vmul.f32 %v7995_v48, %v718_v27 }
 0x193   : > { %v1075_v29 = vpack.c.bf16 %v8813_v56, %v8813_v56  ;;  %v739_v31 = vsel %vm738_vm4, %v7989_v1, %v735_v40  ;;  %vm753_vm7 = vmor %vm12302_vm6, %vm752_vm3  ;;  %v705_v46 = vadd.f32 %v7993_v4, %v704_v23  ;;  %v8853_v55 = vadd.f32 1.0, %v8774_v39 }
 0x194   : > { %v1076_v6 = vpack.c.bf16 %v8816_v28, %v8816_v28  ;;  %v744_v8 = vsel %vm8781_vm12, %v743_v18, %v739_v31  ;;  %v754_v34 = vsel %vm753_vm7, %v7991_v21, %v750_v37  ;;  %v720_v21 = vadd.f32 %v7995_v48, %v719_v15 }
 0x195   : > { %v1163_v1 = vunpack.c.l.b16 %v1075_v29  ;;  %v759_v41 = vsel %vm8788_vm14, %v758_v49, %v754_v34  ;;  %v8837_v47 = vmul.f32 %v744_v8, %v8688_v10  ;;  %v709_v50 = vsel %vm708_vm9, %v7993_v4, %v705_v46  ;;  %v7997_v62 = vpop.eup %7996 }
 0x196   : > { %v1164_v52 = vunpack.c.l.b16 %v1076_v6  ;;  %v8840_v19 = vmul.f32 %v759_v41, %v8691_v2  ;;  %v714_v18 = vsel %vm8794_vm1, %v713_v63, %v709_v50  ;;  %v728_v49 = vor.u32 1.1754944e-38, %v727_v30 }
 0x197   : > { %v1073_v14 = vpack.c.bf16 %v8837_v47, %v8837_v47  ;;  %v8850_v10 = vmul.f32 %v714_v18, %v8694_v3  ;;  %v724_v60 = vsel %vm723_vm0, %v7995_v48, %v720_v21  ;;  %vm726_vm10 = vcmp.eq.f32.partialorder %v725_v58, 8.507059e+37 }
 0x198   : > { %v1177_v2 = vpack.c.b16 %v1164_v52, %v1163_v1  ;;  %v1074_v4 = vpack.c.bf16 %v8840_v19, %v8840_v19  ;;  %v729_v36 = vsel %vm726_vm10, %v728_v49, %v724_v60  ;;  %v8862_v3 = vadd.s32 8, %v8747_v12 }
 0x199   : > { %v1161_v63 = vunpack.c.l.b16 %v1073_v14  ;;  %v1071_v30 = vpack.c.bf16 %v8850_v10, %v8850_v10  ;;  %v8866_v5 = vmul.f32 %v729_v36, %v8697_v0  ;;  %v792_v7 = vmul.f32 %v7997_v62, %v8805_v25 }
 0x19a   : > { %1187 = vrot.lane.b32.xlu0 %v1177_v2, %s8338_s13  ;;  %v1162_v39 = vunpack.c.l.b16 %v1074_v4  ;;  %7998 = vpow2.f32 %v8738_v44  ;;  %v800_v16 = vand.u32 2147483647, %v8805_v25  ;;  %v802_v58 = vand.u32 2147483648, %v8805_v25 }
 0x19b   : > { %8000 = vrcp.f32 %v8853_v55  ;;  %v6756_v54 = vmul.f32 -1.442695, %v8731_v42  ;;  %v1072_v11 = vpack.c.bf16 %v8866_v5, %v8866_v5  ;;  %v1159_v48 = vunpack.c.l.b16 %v1071_v30 }
 0x19c   : > { %v1176_v59 = vpack.c.b16 %v1162_v39, %v1161_v63  ;;  %v793_v57 = vsub.f32 1.0, %v792_v7  ;;  %vm12276_vm11 = vcmp.eq.s32.totalorder %v8862_v3, 15  ;;  %vm796_vm12 = vweird.f32 %v8805_v25 }
 0x19d   : > { %v8880_v0 = vmul.f32 %v8665_v35, %v8572_v53  ;;  %v8884_v44 = vadd.f32 %v8679_v45, %v8755_v17  ;;  %v1160_v22 = vunpack.c.l.b16 %v1072_v11  ;;  %vm797_vm13 = vweird.f32 %v7997_v62 }
 0x19e   : > { %1185 = vrot.lane.b32.xlu2 %v1176_v59, %s8338_s13  ;;  %v794_v26 = vmul.f32 %v7997_v62, %v793_v57  ;;  %vm8887_vm14 = vcmp.eq.f32.partialorder %v800_v16, 8.507059e+37  ;;  %v803_v43 = vor.u32 1.1754944e-38, %v802_v58  ;;  %vm1022_vm15 = vcmp.lt.s32.totalorder %v8747_v12, 7  ;;  %vm798_vm1 = vmor %vm796_vm12, %vm797_vm13 }
 0x19f   : > { %v1007_v33 = vrot.slane %v8837_v47, 1  ;;  %v1015_v53 = vrot.slane %v8840_v19, 1  ;;  %v1175_v9 = vpack.c.b16 %v1160_v22, %v1159_v48  ;;  %v815_v40 = vand.u32 2147483647, %v8853_v55 }
 0x1a0   : > { %v7999_v38 = vpop.eup %7998  ;;  %v795_v17 = vadd.f32 %v7997_v62, %v794_v26  ;;  %v1006_v23 = vrot.slane %v8850_v10, 1  ;;  %v1014_v31 = vrot.slane %v8866_v5, 1  ;;  %8002 = vpow2.f32 %v6756_v54 }
 0x1a1   : > { %v8001_v37 = vpop.eup %8000  ;;  %v1024_v27 = vsel %vm1022_vm15, %v1007_v33, %v1015_v53  ;;  %v1032_v29 = vsel %vm1022_vm15, %v1015_v53, %v1007_v33  ;;  %1183 = vrot.lane.b32.xlu1 %v1175_v9, %s8338_s13  ;;  %v817_v8 = vand.u32 2147483648, %v8853_v55  ;;  %v8919_v4 = vadd.f32 1.0, %v7999_v38 }
 0x1a2   : > { %v799_v46 = vsel %vm798_vm1, %v7997_v62, %v795_v17  ;;  %v807_v6 = vmul.f32 %v8001_v37, %v8853_v55  ;;  %v1042_v25 = vsel %vm12276_vm11, 0.0, %v1032_v29  ;;  %v1089_v15 = vpack.c.bf16 %v1024_v27, %v1024_v27 }
 0x1a3   : > { %v804_v34 = vsel %vm8887_vm14, %v803_v43, %v799_v46  ;;  %v1090_v1 = vpack.c.bf16 %v1042_v25, %v1042_v25  ;;  %v1023_v41 = vsel %vm1022_vm15, %v1006_v23, %v1014_v31  ;;  %v1031_v18 = vsel %vm1022_vm15, %v1014_v31, %v1006_v23 }
 0x1a4   : > { %v808_v50 = vsub.f32 1.0, %v807_v6  ;;  %v8913_v52 = vmul.f32 %v804_v34, %v8710_v51  ;;  %v1087_v21 = vpack.c.bf16 %v1023_v41, %v1023_v41  ;;  %v1217_v14 = vunpack.c.l.b16 %v1089_v15 }
 0x1a5   : > { %v1218_v49 = vunpack.c.l.b16 %v1090_v1  ;;  %v1040_v2 = vsel %vm12276_vm11, 0.0, %v1031_v18  ;;  %vm812_vm2 = vweird.f32 %v8001_v37  ;;  %vm811_vm3 = vweird.f32 %v8853_v55 }
 0x1a6   : > { %v809_v60 = vmul.f32 %v8001_v37, %v808_v50  ;;  %v1088_v62 = vpack.c.bf16 %v1040_v2, %v1040_v2  ;;  %v1215_v63 = vunpack.c.l.b16 %v1087_v21  ;;  %v8003_v36 = vpop.eup %8002  ;;  %vm8922_vm4 = vcmp.eq.f32.partialorder %v815_v40, 8.507059e+37  ;;  %vm813_vm5 = vmor %vm811_vm3, %vm812_vm2 }
 0x1a7   : > { %v1232_v30 = vpack.c.b16 %v1218_v49, %v1217_v14  ;;  %8004 = vrcp.f32 %v8919_v4  ;;  %v8927_v16 = vadd.f32 1.0, %v8003_v36  ;;  %v862_v58 = vand.u32 2147483648, %v8919_v4  ;;  %v6761_v36 = vld [vmem:[%s8480_s20 + $0x80] sm:$0xff] }
 0x1a8   : > { %v810_v39 = vadd.f32 %v8001_v37, %v809_v60  ;;  %v1216_v7 = vunpack.c.l.b16 %v1088_v62  ;;  %v818_v54 = vor.u32 1.1754944e-38, %v817_v8  ;;  %v1077_v55 = vpack.c.bf16 %v8913_v52, %v8913_v52 }
 0x1a9   : > { %1241 = vrot.lane.b32.xlu2 %v1232_v30, %s8340_s15  ;;  %v1008_v59 = vrot.slane %v8813_v56, 1  ;;  %v1016_v11 = vrot.slane %v8816_v28, 1  ;;  %v860_v22 = vand.u32 2147483647, %v8919_v4  ;;  %8006 = vrcp.f32 %v8927_v16 }
 0x1aa   : > { %v814_v48 = vsel %vm813_vm5, %v8001_v37, %v810_v39  ;;  %v1231_v57 = vpack.c.b16 %v1216_v7, %v1215_v63  ;;  %v1009_v61 = vrot.slane %v8913_v52, 1  ;;  %v863_v43 = vor.u32 1.1754944e-38, %v862_v58  ;;  %v6762_v7 = vld [vmem:[%s8480_s20 + $0x88] sm:$0xff] }
 0x1ab   : > { %v819_v26 = vsel %vm8922_vm4, %v818_v54, %v814_v48  ;;  %v8942_v33 = vadd.f32 %v8679_v45, %v8880_v0  ;;  %vm856_vm6 = vweird.f32 %v8919_v4  ;;  %v875_v38 = vand.u32 2147483647, %v8927_v16 }
 0x1ac   : > { %v8945_v53 = vmul.f32 %v819_v26, %v8715_v13  ;;  %1239 = vrot.lane.b32.xlu1 %v1231_v57, %s8340_s15  ;;  %v1025_v9 = vsel %vm1022_vm15, %v1008_v59, %v1016_v11  ;;  %v1033_v17 = vsel %vm1022_vm15, %v1016_v11, %v1008_v59  ;;  %v877_v23 = vand.u32 2147483648, %v8927_v16  ;;  %v8234_v11 = vld [vmem:[%s8480_s20 + $0x48] sm:$0xff] }
 0x1ad   : > { %v8005_v40 = vpop.eup %8004  ;;  %v1165_v0 = vunpack.c.l.b16 %v1077_v55  ;;  %v1044_v13 = vsel %vm12276_vm11, 0.0, %v1033_v17  ;;  %v1091_v37 = vpack.c.bf16 %v1025_v9, %v1025_v9  ;;  %vm8959_vm8 = vcmp.eq.f32.partialorder %v860_v22, 8.507059e+37 }
 0x1ae   : > { %v1017_v27 = vrot.slane %v8945_v53, 1  ;;  %v852_v29 = vmul.f32 %v8005_v40, %v8919_v4  ;;  %vm857_vm7 = vweird.f32 %v8005_v40  ;;  %v1078_v46 = vpack.c.bf16 %v8945_v53, %v8945_v53 }
 0x1af   : > { %v1092_v6 = vpack.c.bf16 %v1044_v13, %v1044_v13  ;;  %v1219_v8 = vunpack.c.l.b16 %v1091_v37  ;;  %v6757_v25 = vmul.f32 -1.442695, %v8884_v44  ;;  %v6758_v34 = vmul.f32 -1.442695, %v8942_v33  ;;  %v8007_v15 = vpop.eup %8006  ;;  %vm858_vm0 = vmor %vm856_vm6, %vm857_vm7 }
 0x1b0   : > { %v1026_v1 = vsel %vm1022_vm15, %v1009_v61, %v1017_v27  ;;  %v1034_v41 = vsel %vm1022_vm15, %v1017_v27, %v1009_v61  ;;  %v853_v50 = vsub.f32 1.0, %v852_v29  ;;  %v1166_v18 = vunpack.c.l.b16 %v1078_v46  ;;  %v6763_v46 = vld [vmem:[%s8480_s20 + $0x90] sm:$0xff] }
 0x1b1   : > { %v1046_v21 = vsel %vm12276_vm11, 0.0, %v1034_v41  ;;  %v1093_v14 = vpack.c.bf16 %v1026_v1, %v1026_v1  ;;  %v867_v49 = vmul.f32 %v8007_v15, %v8927_v16  ;;  %vm872_vm9 = vweird.f32 %v8007_v15 }
 0x1b2   : > { %v1094_v2 = vpack.c.bf16 %v1046_v21, %v1046_v21  ;;  %v854_v60 = vmul.f32 %v8005_v40, %v853_v50  ;;  %v1178_v62 = vpack.c.b16 %v1166_v18, %v1165_v0  ;;  %v1220_v63 = vunpack.c.l.b16 %v1092_v6 }
 0x1b3   : > { %v1221_v51 = vunpack.c.l.b16 %v1093_v14  ;;  %v868_v30 = vsub.f32 1.0, %v867_v49  ;;  %8008 = vpow2.f32 %v6757_v25  ;;  %v608_v39 = vmul.f32 %v8665_v35, %v8535_v24 }
 0x1b4   : > { %v1222_v58 = vunpack.c.l.b16 %v1094_v2  ;;  %v855_v54 = vadd.f32 %v8005_v40, %v854_v60  ;;  %1189 = vrot.lane.b32.xlu2 %v1178_v62, %s8338_s13  ;;  %v1233_v55 = vpack.c.b16 %v1220_v63, %v1219_v8  ;;  %8010 = vpow2.f32 %v6758_v34  ;;  %v6764_v34 = vld [vmem:[%s8480_s20 + $0x98] sm:$0xff] }
 0x1b5   : > { %v869_v59 = vmul.f32 %v8007_v15, %v868_v30  ;;  %v609_v48 = vmul.f32 %v8234_v11, %v8665_v35  ;;  %v8985_v57 = vadd.f32 %v8679_v45, %v608_v39  ;;  %v1385_v24 = vmul.f32 %v6761_v36, %v8665_v35  ;;  %v8235_v36 = vld [vmem:[%s8480_s20 + $0x78] sm:$0xff] }
 0x1b6   : > { %v1234_v22 = vpack.c.b16 %v1222_v58, %v1221_v51  ;;  %v859_v26 = vsel %vm858_vm0, %v8005_v40, %v855_v54  ;;  %vm871_vm10 = vweird.f32 %v8927_v16  ;;  %1243 = vrot.lane.b32.xlu1 %v1233_v55, %s8340_s15  ;;  %v1386_v61 = vmul.f32 %v6762_v7, %v8665_v35 }
 0x1b7   : > { %v864_v4 = vsel %vm8959_vm8, %v863_v43, %v859_v26  ;;  %v870_v9 = vadd.f32 %v8007_v15, %v869_v59  ;;  %v8994_v17 = vadd.f32 %v8679_v45, %v609_v48  ;;  %v6753_v0 = vmul.f32 -1.442695, %v8985_v57  ;;  %vm873_vm12 = vmor %vm871_vm10, %vm872_vm9 }
 0x1b8   : > { %1245 = vrot.lane.b32.xlu0 %v1234_v22, %s8340_s15  ;;  %v878_v40 = vor.u32 1.1754944e-38, %v877_v23  ;;  %v9000_v13 = vmul.f32 %v864_v4, %v8723_v32  ;;  %v9003_v37 = vadd.f32 %v1385_v24, %v8679_v45  ;;  %v9006_v43 = vadd.f32 %v1386_v61, %v8679_v45 }
 0x1b9   : > { %v8009_v27 = vpop.eup %8008  ;;  %v874_v29 = vsel %vm873_vm12, %v8007_v15, %v870_v9  ;;  %vm876_vm13 = vcmp.eq.f32.partialorder %v875_v38, 8.507059e+37  ;;  %8012 = vpow2.f32 %v6753_v0  ;;  %v6754_v31 = vmul.f32 -1.442695, %v8994_v17 }
 0x1ba   : > { %v8011_v6 = vpop.eup %8010  ;;  %v879_v23 = vsel %vm876_vm13, %v878_v40, %v874_v29  ;;  %v1081_v32 = vpack.c.bf16 %v9000_v13, %v9000_v13  ;;  %v9014_v8 = vadd.f32 1.0, %v8009_v27  ;;  %v6777_v25 = vmul.f32 -1.442695, %v9003_v37 }
 0x1bb   : > { %v9019_v1 = vmul.f32 %v879_v23, %v8731_v42  ;;  %v9021_v15 = vadd.f32 1.0, %v8011_v6  ;;  %8014 = vpow2.f32 %v6754_v31  ;;  %v6778_v16 = vmul.f32 -1.442695, %v9006_v43 }
 0x1bc   : > { %8016 = vrcp.f32 %v9014_v8  ;;  %v1387_v38 = vmul.f32 %v6763_v46, %v8665_v35  ;;  %v1169_v50 = vunpack.c.l.b16 %v1081_v32  ;;  %v1388_v18 = vmul.f32 %v6764_v34, %v8665_v35 }
 0x1bd   : > { %v1082_v41 = vpack.c.bf16 %v9019_v1, %v9019_v1  ;;  %8018 = vrcp.f32 %v9021_v15  ;;  %v890_v14 = vand.u32 2147483647, %v9014_v8  ;;  %v892_v49 = vand.u32 2147483648, %v9014_v8 }
 0x1be   : > { %8020 = vpow2.f32 %v6777_v25  ;;  %v905_v2 = vand.u32 2147483647, %v9021_v15  ;;  %v9036_v62 = vadd.f32 %v1387_v38, %v8679_v45  ;;  %v9040_v51 = vmul.f32 %v8235_v36, %v8665_v35 }
 0x1bf   : > { %v8013_v42 = vpop.eup %8012  ;;  %v1170_v21 = vunpack.c.l.b16 %v1082_v41  ;;  %8022 = vpow2.f32 %v6778_v16  ;;  %v907_v39 = vand.u32 2147483648, %v9021_v15  ;;  %v9044_v7 = vadd.f32 %v1388_v18, %v8679_v45 }
 0x1c0   : > { %v9033_v60 = vadd.f32 1.0, %v8013_v42  ;;  %vm886_vm14 = vweird.f32 %v9014_v8  ;;  %vm901_vm1 = vweird.f32 %v9021_v15  ;;  %vm9053_vm2 = vcmp.eq.f32.partialorder %v890_v14, 8.507059e+37 }
 0x1c1   : > { %v8015_v63 = vpop.eup %8014  ;;  %v1180_v30 = vpack.c.b16 %v1170_v21, %v1169_v50  ;;  %v893_v48 = vor.u32 1.1754944e-38, %v892_v49  ;;  %v1011_v24 = vrot.slane %v9000_v13, 1  ;;  %v1019_v22 = vrot.slane %v9019_v1, 1 }
 0x1c2   : > { %v8017_v58 = vpop.eup %8016  ;;  %v9048_v54 = vadd.f32 1.0, %v8015_v63  ;;  %8024 = vrcp.f32 %v9033_v60  ;;  %vm9060_vm3 = vcmp.eq.f32.partialorder %v905_v2, 8.507059e+37  ;;  %v832_v9 = vand.u32 2147483648, %v9033_v60 }
 0x1c3   : > { %v8019_v55 = vpop.eup %8018  ;;  %1193 = vrot.lane.b32.xlu0 %v1180_v30, %s8338_s13  ;;  %v882_v59 = vmul.f32 %v8017_v58, %v9014_v8  ;;  %v9067_v0 = vmul.f32 -1.442695, %v9036_v62  ;;  %v908_v29 = vor.u32 1.1754944e-38, %v907_v39  ;;  %v830_v31 = vand.u32 2147483647, %v9033_v60 }
 0x1c4   : > { %v8021_v26 = vpop.eup %8020  ;;  %v897_v61 = vmul.f32 %v8019_v55, %v9021_v15  ;;  %8026 = vrcp.f32 %v9048_v54  ;;  %v9071_v46 = vmul.f32 -1.442695, %v9044_v7  ;;  %vm887_vm4 = vweird.f32 %v8017_v58 }
 0x1c5   : > { %v8023_v40 = vpop.eup %8022  ;;  %v883_v27 = vsub.f32 1.0, %v882_v59  ;;  %v9073_v23 = vadd.f32 1.0, %v8021_v26  ;;  %vm826_vm5 = vweird.f32 %v9033_v60  ;;  %v845_v34 = vand.u32 2147483647, %v9048_v54  ;;  %vm888_vm9 = vmor %vm886_vm14, %vm887_vm4 }
 0x1c6   : > { %v898_v6 = vsub.f32 1.0, %v897_v61  ;;  %v9075_v32 = vadd.f32 1.0, %v8023_v40  ;;  %v847_v16 = vand.u32 2147483648, %v9048_v54  ;;  %v9082_v38 = vsel %vm1022_vm15, %v1011_v24, %v1019_v22 }
 0x1c7   : > { %v884_v25 = vmul.f32 %v8017_v58, %v883_v27  ;;  %vm902_vm6 = vweird.f32 %v8019_v55  ;;  %v833_v18 = vor.u32 1.1754944e-38, %v832_v9  ;;  %8028 = vrcp.f32 %v9073_v23 }
 0x1c8   : > { %v8025_v41 = vpop.eup %8024  ;;  %v899_v50 = vmul.f32 %v8019_v55, %v898_v6  ;;  %vm9086_vm7 = vcmp.eq.f32.partialorder %v830_v31, 8.507059e+37  ;;  %vm841_vm8 = vweird.f32 %v9048_v54  ;;  %v1036_v49 = vsel %vm1022_vm15, %v1019_v22, %v1011_v24  ;;  %vm903_vm0 = vmor %vm901_vm1, %vm902_vm6 }
 0x1c9   : > { %v885_v42 = vadd.f32 %v8017_v58, %v884_v25  ;;  %v822_v21 = vmul.f32 %v8025_v41, %v9033_v60  ;;  %v1492_v36 = vand.u32 2147483648, %v9073_v23  ;;  %8030 = vrcp.f32 %v9075_v32 }
 0x1ca   : > { %v8027_v2 = vpop.eup %8026  ;;  %v900_v63 = vadd.f32 %v8019_v55, %v899_v50  ;;  %v1097_v30 = vpack.c.bf16 %v9082_v38, %v9082_v38  ;;  %vm9104_vm10 = vcmp.eq.f32.partialorder %v845_v34, 8.507059e+37  ;;  %v848_v8 = vor.u32 1.1754944e-38, %v847_v16 }
 0x1cb   : > { %v889_v39 = vsel %vm888_vm9, %v8017_v58, %v885_v42  ;;  %v823_v59 = vsub.f32 1.0, %v822_v21  ;;  %v837_v24 = vmul.f32 %v8027_v2, %v9048_v54  ;;  %vm827_vm12 = vweird.f32 %v8025_v41 }
 0x1cc   : > { %v894_v26 = vsel %vm9053_vm2, %v893_v48, %v889_v39  ;;  %v904_v61 = vsel %vm903_vm0, %v8019_v55, %v900_v63  ;;  %v1490_v9 = vand.u32 2147483647, %v9073_v23  ;;  %vm842_vm13 = vweird.f32 %v8027_v2  ;;  %vm828_vm1 = vmor %vm826_vm5, %vm827_vm12 }
 0x1cd   : > { %v909_v58 = vsel %vm9060_vm3, %v908_v29, %v904_v61  ;;  %v9114_v15 = vmul.f32 %v894_v26, %v8884_v44  ;;  %v824_v40 = vmul.f32 %v8025_v41, %v823_v59  ;;  %v838_v27 = vsub.f32 1.0, %v837_v24  ;;  %v8029_v31 = vpop.eup %8028  ;;  %vm843_vm4 = vmor %vm841_vm8, %vm842_vm13 }
 0x1ce   : > { %v9117_v6 = vmul.f32 %v909_v58, %v8942_v33  ;;  %vm1486_vm14 = vweird.f32 %v9073_v23  ;;  %v1493_v11 = vor.u32 1.1754944e-38, %v1492_v36  ;;  %v1482_v4 = vmul.f32 %v8029_v31, %v9073_v23 }
 0x1cf   : > { %v1012_v55 = vrot.slane %v9114_v15, 1  ;;  %v825_v48 = vadd.f32 %v8025_v41, %v824_v40  ;;  %v839_v25 = vmul.f32 %v8027_v2, %v838_v27  ;;  %v8031_v29 = vpop.eup %8030  ;;  %vm9126_vm2 = vcmp.eq.f32.partialorder %v1490_v9, 8.507059e+37 }
 0x1d0   : > { %v1020_v44 = vrot.slane %v9117_v6, 1  ;;  %vm1501_vm3 = vweird.f32 %v9075_v32  ;;  %v1505_v34 = vand.u32 2147483647, %v9075_v32  ;;  %v1507_v16 = vand.u32 2147483648, %v9075_v32 }
 0x1d1   : > { %v9135_v50 = vsel %vm12276_vm11, 0.0, %v1036_v49  ;;  %v829_v42 = vsel %vm828_vm1, %v8025_v41, %v825_v48  ;;  %v840_v21 = vadd.f32 %v8027_v2, %v839_v25  ;;  %v1483_v63 = vsub.f32 1.0, %v1482_v4 }
 0x1d2   : > { %v1497_v60 = vmul.f32 %v8031_v29, %v9075_v32  ;;  %v1029_v36 = vsel %vm1022_vm15, %v1012_v55, %v1020_v44  ;;  %v1037_v39 = vsel %vm1022_vm15, %v1020_v44, %v1012_v55  ;;  %v834_v59 = vsel %vm9086_vm7, %v833_v18, %v829_v42 }
 0x1d3   : > { %vm1487_vm5 = vweird.f32 %v8029_v31  ;;  %v1052_v41 = vsel %vm12276_vm11, 0.0, %v1037_v39  ;;  %v1099_v49 = vpack.c.bf16 %v1029_v36, %v1029_v36  ;;  %v844_v24 = vsel %vm843_vm4, %v8027_v2, %v840_v21 }
 0x1d4   : > { %v9150_v26 = vmul.f32 %v834_v59, %v8985_v57  ;;  %v1100_v61 = vpack.c.bf16 %v1052_v41, %v1052_v41  ;;  %v849_v9 = vsel %vm9104_vm10, %v848_v8, %v844_v24  ;;  %v1484_v58 = vmul.f32 %v8029_v31, %v1483_v63  ;;  %vm1488_vm7 = vmor %vm1486_vm14, %vm1487_vm5 }
 0x1d5   : > { %v1498_v14 = vsub.f32 1.0, %v1497_v60  ;;  %v1227_v18 = vunpack.c.l.b16 %v1099_v49  ;;  %v9155_v40 = vmul.f32 %v849_v9, %v8994_v17  ;;  %vm1502_vm6 = vweird.f32 %v8031_v29  ;;  %v6767_v49 = vld [vmem:[%s8480_s20 + $0xb0] sm:$0xff]  ;;  %v6768_v9 = vld [vmem:[%s8480_s20 + $0xb8] sm:$0xff] }
 0x1d6   : > { %v1010_v54 = vrot.slane %v9150_v26, 1  ;;  %v1079_v27 = vpack.c.bf16 %v9150_v26, %v9150_v26  ;;  %v1228_v55 = vunpack.c.l.b16 %v1100_v61  ;;  %v1485_v2 = vadd.f32 %v8029_v31, %v1484_v58  ;;  %vm1503_vm9 = vmor %vm1501_vm3, %vm1502_vm6  ;;  %v6769_v58 = vld [vmem:[%s8480_s20 + $0xc0] sm:$0xff] }
 0x1d7   : > { %v1499_v48 = vmul.f32 %v8031_v29, %v1498_v14  ;;  %v1018_v57 = vrot.slane %v9155_v40, 1  ;;  %v1080_v22 = vpack.c.bf16 %v9155_v40, %v9155_v40  ;;  %vm9166_vm8 = vcmp.eq.f32.partialorder %v1505_v34, 8.507059e+37 }
 0x1d8   : > { %v1167_v8 = vunpack.c.l.b16 %v1079_v27  ;;  %v1237_v25 = vpack.c.b16 %v1228_v55, %v1227_v18  ;;  %v1489_v4 = vsel %vm1488_vm7, %v8029_v31, %v1485_v2  ;;  %v1508_v42 = vor.u32 1.1754944e-38, %v1507_v16  ;;  %v8236_v27 = vld [vmem:[%s8480_s20 + $0x70] sm:$0xff] }
 0x1d9   : > { %v1500_v44 = vadd.f32 %v8031_v29, %v1499_v48  ;;  %v1027_v21 = vsel %vm1022_vm15, %v1010_v54, %v1018_v57  ;;  %v1035_v63 = vsel %vm1022_vm15, %v1018_v57, %v1010_v54  ;;  %v1168_v60 = vunpack.c.l.b16 %v1080_v22  ;;  %v6770_v48 = vld [vmem:[%s8480_s20 + $0xc8] sm:$0xff] }
 0x1da   : > { %v1494_v23 = vsel %vm9126_vm2, %v1493_v11, %v1489_v4  ;;  %1251 = vrot.lane.b32.xlu0 %v1237_v25, %s8340_s15  ;;  %v1048_v31 = vsel %vm12276_vm11, 0.0, %v1035_v63  ;;  %v1095_v34 = vpack.c.bf16 %v1027_v21, %v1027_v21  ;;  %v1083_v32 = vpack.c.bf16 %v9114_v15, %v9114_v15 }
 0x1db   : > { %v1504_v16 = vsel %vm1503_vm9, %v8031_v29, %v1500_v44  ;;  %v9182_v36 = vmul.f32 %v1494_v23, %v9003_v37  ;;  %v1096_v39 = vpack.c.bf16 %v1048_v31, %v1048_v31  ;;  %v1179_v59 = vpack.c.b16 %v1168_v60, %v1167_v8 }
 0x1dc   : > { %v1509_v11 = vsel %vm9166_vm8, %v1508_v42, %v1504_v16  ;;  %v1223_v33 = vunpack.c.l.b16 %v1095_v34  ;;  %v1098_v37 = vpack.c.bf16 %v9135_v50, %v9135_v50  ;;  %v1084_v61 = vpack.c.bf16 %v9117_v6, %v9117_v6  ;;  %v6766_v42 = vld [vmem:[%s8480_s20 + $0xa8] sm:$0xff] }
 0x1dd   : > { %12322 = vst [vmem:[#allocation13_spill] sm:$0xff] %v9182_v36  ;;  %v9189_v41 = vmul.f32 %v1509_v11, %v9006_v43  ;;  %v1849_v29 = vpack.c.bf16 %v9182_v36, %v9182_v36  ;;  %v1224_v24 = vunpack.c.l.b16 %v1096_v39  ;;  %1191 = vrot.lane.b32.xlu1 %v1179_v59, %s8338_s13  ;;  %v1225_v43 = vunpack.c.l.b16 %v1097_v30 }
 0x1de   : > { %8032 = vpow2.f32 %v9067_v0  ;;  %v1226_v18 = vunpack.c.l.b16 %v1098_v37  ;;  %v614_v55 = vmul.f32 %v8236_v27, %v8665_v35  ;;  %v9212_v38 = vadd.f32 %v8679_v45, %v9040_v51  ;;  %v6765_v51 = vld [vmem:[%s8480_s20 + $0xa0] sm:$0xff] }
 0x1df   : > { %12323 = vst [vmem:[#allocation14_spill] sm:$0xff] %v9189_v41  ;;  %v1850_v14 = vpack.c.bf16 %v9189_v41, %v9189_v41  ;;  %v1937_v50 = vunpack.c.l.b16 %v1849_v29  ;;  %8034 = vpow2.f32 %v9071_v46  ;;  %v1235_v54 = vpack.c.b16 %v1224_v24, %v1223_v33 }
 0x1e0   : > { %v1391_v0 = vmul.f32 %v6767_v49, %v8665_v35  ;;  %v1392_v2 = vmul.f32 %v6768_v9, %v8665_v35  ;;  %v1393_v57 = vmul.f32 %v6769_v58, %v8665_v35  ;;  %v9220_v46 = vadd.f32 %v8679_v45, %v614_v55 }
 0x1e1   : > { %v1938_v30 = vunpack.c.l.b16 %v1850_v14  ;;  %1247 = vrot.lane.b32.xlu2 %v1235_v54, %s8340_s15  ;;  %v6760_v22 = vmul.f32 -1.442695, %v9212_v38  ;;  %v1171_v25 = vunpack.c.l.b16 %v1083_v32  ;;  %v1172_v4 = vunpack.c.l.b16 %v1084_v61  ;;  %v6773_v54 = vld [vmem:[%s8480_s20 + $0xe0] sm:$0xff] }
 0x1e2   : > { %v9224_v8 = vadd.f32 %v1391_v0, %v8679_v45  ;;  %v9228_v44 = vadd.f32 %v1392_v2, %v8679_v45  ;;  %v1236_v63 = vpack.c.b16 %v1226_v18, %v1225_v43  ;;  %v6759_v60 = vmul.f32 -1.442695, %v9220_v46 }
 0x1e3   : > { %v1953_v17 = vpack.c.b16 %v1938_v30, %v1937_v50  ;;  %8036 = vpow2.f32 %v6760_v22  ;;  %v1394_v23 = vmul.f32 %v6770_v48, %v8665_v35  ;;  %v9238_v39 = vadd.f32 %v1393_v57, %v8679_v45 }
 0x1e4   : > { %v8033_v21 = vpop.eup %8032  ;;  %v6783_v16 = vmul.f32 -1.442695, %v9224_v8  ;;  %v1389_v59 = vmul.f32 %v6765_v51, %v8665_v35  ;;  %8038 = vpow2.f32 %v6759_v60  ;;  %v6784_v32 = vmul.f32 -1.442695, %v9228_v44 }
 0x1e5   : > { %v8035_v31 = vpop.eup %8034  ;;  %1961 = vrot.lane.b32.xlu0 %v1953_v17, %s8338_s13  ;;  %v9234_v34 = vadd.f32 1.0, %v8033_v21  ;;  %1249 = vrot.lane.b32.xlu1 %v1236_v63, %s8340_s15  ;;  %v1390_v33 = vmul.f32 %v6766_v42, %v8665_v35  ;;  %v1181_v29 = vpack.c.b16 %v1172_v4, %v1171_v25  ;;  %v9250_v49 = vadd.f32 %v1394_v23, %v8679_v45 }
 0x1e6   : > { %v9242_v11 = vadd.f32 1.0, %v8035_v31  ;;  %v9254_v61 = vadd.f32 %v1389_v59, %v8679_v45  ;;  %v6785_v58 = vmul.f32 -1.442695, %v9238_v39  ;;  %v9284_v4 = vmul.f32 %v6773_v54, %v8665_v35 }
 0x1e7   : > { %8040 = vrcp.f32 %v9234_v34  ;;  %v1522_v37 = vand.u32 2147483648, %v9234_v34  ;;  %v1520_v9 = vand.u32 2147483647, %v9234_v34  ;;  %v9260_v14 = vadd.f32 %v1390_v33, %v8679_v45 }
 0x1e8   : > { %8042 = vrcp.f32 %v9242_v11  ;;  %v1537_v24 = vand.u32 2147483648, %v9242_v11  ;;  %v1535_v50 = vand.u32 2147483647, %v9242_v11  ;;  %vm1516_vm0 = vweird.f32 %v9234_v34 }
 0x1e9   : > { %8044 = vpow2.f32 %v6783_v16  ;;  %v8037_v43 = vpop.eup %8036  ;;  %1195 = vrot.lane.b32.xlu2 %v1181_v29, %s8338_s13  ;;  %v1523_v55 = vor.u32 1.1754944e-38, %v1522_v37  ;;  %v6786_v0 = vmul.f32 -1.442695, %v9250_v49  ;;  %vm1531_vm10 = vweird.f32 %v9242_v11 }
 0x1ea   : > { %8046 = vpow2.f32 %v6784_v32  ;;  %v9263_v18 = vadd.f32 1.0, %v8037_v43  ;;  %v8039_v27 = vpop.eup %8038  ;;  %v1538_v2 = vor.u32 1.1754944e-38, %v1537_v24  ;;  %v9273_v57 = vmul.f32 -1.442695, %v9254_v61 }
 0x1eb   : > { %v9269_v48 = vadd.f32 1.0, %v8039_v27  ;;  %vm9276_vm12 = vcmp.eq.f32.partialorder %v1520_v9, 8.507059e+37  ;;  %v9281_v25 = vmul.f32 -1.442695, %v9260_v14  ;;  %vm9287_vm13 = vcmp.eq.f32.partialorder %v1535_v50, 8.507059e+37 }
 0x1ec   : > { %8048 = vrcp.f32 %v9263_v18  ;;  %v1785_v60 = vrot.slane %v9182_v36, 1  ;;  %v1793_v23 = vrot.slane %v9189_v41, 1  ;;  %v935_v59 = vand.u32 2147483647, %v9263_v18 }
 0x1ed   : > { %v8041_v30 = vpop.eup %8040  ;;  %8050 = vpow2.f32 %v6785_v58  ;;  %v937_v32 = vand.u32 2147483648, %v9263_v18  ;;  %v922_v29 = vand.u32 2147483648, %v9269_v48  ;;  %v920_v9 = vand.u32 2147483647, %v9269_v48 }
 0x1ee   : > { %v8043_v22 = vpop.eup %8042  ;;  %v1512_v51 = vmul.f32 %v8041_v30, %v9234_v34  ;;  %8052 = vrcp.f32 %v9269_v48  ;;  %vm1517_vm14 = vweird.f32 %v8041_v30  ;;  %vm931_vm1 = vweird.f32 %v9263_v18 }
 0x1ef   : > { %v8045_v42 = vpop.eup %8044  ;;  %v1527_v21 = vmul.f32 %v8043_v22, %v9242_v11  ;;  %8054 = vpow2.f32 %v6786_v0  ;;  %vm1532_vm2 = vweird.f32 %v8043_v22  ;;  %v9306_v54 = vsel %vm1022_vm15, %v1785_v60, %v1793_v23  ;;  %vm1518_vm5 = vmor %vm1516_vm0, %vm1517_vm14 }
 0x1f0   : > { %v8047_v31 = vpop.eup %8046  ;;  %v1513_v16 = vsub.f32 1.0, %v1512_v51  ;;  %v9297_v37 = vadd.f32 1.0, %v8045_v42  ;;  %vm916_vm3 = vweird.f32 %v9269_v48  ;;  %vm9312_vm4 = vcmp.eq.f32.partialorder %v935_v59, 8.507059e+37  ;;  %vm1533_vm6 = vmor %vm1531_vm10, %vm1532_vm2 }
 0x1f1   : > { %v1528_v33 = vsub.f32 1.0, %v1527_v21  ;;  %v9299_v24 = vadd.f32 1.0, %v8047_v31  ;;  %v938_v21 = vor.u32 1.1754944e-38, %v937_v32  ;;  %vm9328_vm7 = vcmp.eq.f32.partialorder %v920_v9, 8.507059e+37 }
 0x1f2   : > { %v1514_v43 = vmul.f32 %v8041_v30, %v1513_v16  ;;  %v8049_v58 = vpop.eup %8048  ;;  %8056 = vrcp.f32 %v9297_v37  ;;  %vm1576_vm0 = vweird.f32 %v9297_v37 }
 0x1f3   : > { %v1529_v50 = vmul.f32 %v8043_v22, %v1528_v33  ;;  %v9308_v27 = vpop.eup %8050  ;;  %v927_v51 = vmul.f32 %v8049_v58, %v9263_v18  ;;  %v923_v33 = vor.u32 1.1754944e-38, %v922_v29  ;;  %8058 = vrcp.f32 %v9299_v24 }
 0x1f4   : > { %v1515_v0 = vadd.f32 %v8041_v30, %v1514_v43  ;;  %v8053_v31 = vpop.eup %8052  ;;  %v1809_v43 = vsel %vm1022_vm15, %v1793_v23, %v1785_v60  ;;  %v1580_v29 = vand.u32 2147483647, %v9297_v37  ;;  %vm932_vm8 = vweird.f32 %v8049_v58 }
 0x1f5   : > { %v1530_v16 = vadd.f32 %v8043_v22, %v1529_v50  ;;  %v9322_v20 = vpop.eup %8054  ;;  %v912_v59 = vmul.f32 %v8053_v31, %v9269_v48  ;;  %v928_v34 = vsub.f32 1.0, %v927_v51  ;;  %vm917_vm9 = vweird.f32 %v8053_v31  ;;  %vm933_vm10 = vmor %vm931_vm1, %vm932_vm8 }
 0x1f6   : > { %v1519_v41 = vsel %vm1518_vm5, %v8041_v30, %v1515_v0  ;;  %v1582_v30 = vand.u32 2147483648, %v9297_v37  ;;  %vm918_vm14 = vmor %vm916_vm3, %vm917_vm9  ;;  %8060 = vpow2.f32 %v9273_v57 }
 0x1f7   : > { %v1524_v50 = vsel %vm9276_vm12, %v1523_v55, %v1519_v41  ;;  %v1534_v60 = vsel %vm1533_vm6, %v8043_v22, %v1530_v16  ;;  %v913_v9 = vsub.f32 1.0, %v912_v59  ;;  %v929_v0 = vmul.f32 %v8049_v58, %v928_v34 }
 0x1f8   : > { %v1539_v11 = vsel %vm9287_vm13, %v1538_v2, %v1534_v60  ;;  %v9339_v23 = vmul.f32 %v1524_v50, %v9036_v62  ;;  %v8057_v36 = vpop.eup %8056  ;;  %v1595_v41 = vand.u32 2147483647, %v9299_v24  ;;  %vm9352_vm12 = vcmp.eq.f32.partialorder %v1580_v29, 8.507059e+37 }
 0x1f9   : > { %v9342_v51 = vmul.f32 %v1539_v11, %v9044_v7  ;;  %v914_v22 = vmul.f32 %v8053_v31, %v913_v9  ;;  %v930_v17 = vadd.f32 %v8049_v58, %v929_v0  ;;  %v1572_v2 = vmul.f32 %v8057_v36, %v9297_v37  ;;  %v8059_v63 = vpop.eup %8058 }
 0x1fa   : > { %v1786_v55 = vrot.slane %v9339_v23, 1  ;;  %v1583_v16 = vor.u32 1.1754944e-38, %v1582_v30  ;;  %vm1591_vm13 = vweird.f32 %v9299_v24  ;;  %v1597_v59 = vand.u32 2147483648, %v9299_v24 }
 0x1fb   : > { %v1794_v62 = vrot.slane %v9342_v51, 1  ;;  %v9360_v34 = vsel %vm12276_vm11, 0.0, %v1809_v43  ;;  %v915_v50 = vadd.f32 %v8053_v31, %v914_v22  ;;  %v934_v60 = vsel %vm933_vm10, %v8049_v58, %v930_v17 }
 0x1fc   : > { %v1573_v11 = vsub.f32 1.0, %v1572_v2  ;;  %v1587_v9 = vmul.f32 %v8059_v63, %v9299_v24  ;;  %v939_v30 = vsel %vm9312_vm4, %v938_v21, %v934_v60  ;;  %vm1577_vm1 = vweird.f32 %v8057_v36 }
 0x1fd   : > { %v1802_v18 = vsel %vm1022_vm15, %v1786_v55, %v1794_v62  ;;  %v1810_v29 = vsel %vm1022_vm15, %v1794_v62, %v1786_v55  ;;  %vm9372_vm2 = vcmp.eq.f32.partialorder %v1595_v41, 8.507059e+37  ;;  %v919_v22 = vsel %vm918_vm14, %v8053_v31, %v915_v50  ;;  %vm1578_vm4 = vmor %vm1576_vm0, %vm1577_vm1 }
 0x1fe   : > { %v1820_v58 = vsel %vm12276_vm11, 0.0, %v1810_v29  ;;  %v1867_v0 = vpack.c.bf16 %v1802_v18, %v1802_v18  ;;  %v9379_v17 = vmul.f32 %v939_v30, %v9212_v38  ;;  %v924_v48 = vsel %vm9328_vm7, %v923_v33, %v919_v22 }
 0x1ff   : > { %v1868_v55 = vpack.c.bf16 %v1820_v58, %v1820_v58  ;;  %v1574_v2 = vmul.f32 %v8057_v36, %v1573_v11  ;;  %v1588_v42 = vsub.f32 1.0, %v1587_v9  ;;  %v9384_v41 = vmul.f32 %v924_v48, %v9220_v46 }
 0x200   : > { %v1995_v21 = vunpack.c.l.b16 %v1867_v0  ;;  %v1021_v62 = vrot.slane %v9379_v17, 1  ;;  %v1086_v60 = vpack.c.bf16 %v9379_v17, %v9379_v17  ;;  %vm1592_vm3 = vweird.f32 %v8059_v63 }
 0x201   : > { %v1996_v18 = vunpack.c.l.b16 %v1868_v55  ;;  %v1575_v31 = vadd.f32 %v8057_v36, %v1574_v2  ;;  %v1589_v50 = vmul.f32 %v8059_v63, %v1588_v42  ;;  %v1013_v38 = vrot.slane %v9384_v41, 1  ;;  %vm1593_vm5 = vmor %vm1591_vm13, %vm1592_vm3 }
 0x202   : > { %v1085_v33 = vpack.c.bf16 %v9384_v41, %v9384_v41  ;;  %v1174_v32 = vunpack.c.l.b16 %v1086_v60  ;;  %v1598_v46 = vor.u32 1.1754944e-38, %v1597_v59  ;;  %v1851_v30 = vpack.c.bf16 %v9339_v23, %v9339_v23 }
 0x203   : > { %v2010_v11 = vpack.c.b16 %v1996_v18, %v1995_v21  ;;  %v1579_v9 = vsel %vm1578_vm4, %v8057_v36, %v1575_v31  ;;  %v1590_v29 = vadd.f32 %v8059_v63, %v1589_v50  ;;  %v1030_v58 = vsel %vm1022_vm15, %v1013_v38, %v1021_v62 }
 0x204   : > { %v1038_v0 = vsel %vm1022_vm15, %v1021_v62, %v1013_v38  ;;  %v1173_v22 = vunpack.c.l.b16 %v1085_v33  ;;  %v1584_v55 = vsel %vm9352_vm12, %v1583_v16, %v1579_v9  ;;  %v1101_v37 = vpack.c.bf16 %v1030_v58, %v1030_v58 }
 0x205   : > { %2019 = vrot.lane.b32.xlu0 %v2010_v11, %s8340_s15  ;;  %v1054_v36 = vsel %vm12276_vm11, 0.0, %v1038_v0  ;;  %v1594_v59 = vsel %vm1593_vm5, %v8059_v63, %v1590_v29  ;;  %v9409_v48 = vmul.f32 %v1584_v55, %v9224_v8  ;;  %v1852_v16 = vpack.c.bf16 %v9342_v51, %v9342_v51  ;;  %v6774_v8 = vld [vmem:[%s8480_s20 + $0xe8] sm:$0xff] }
 0x206   : > { %v1102_v2 = vpack.c.bf16 %v1054_v36, %v1054_v36  ;;  %v1182_v42 = vpack.c.b16 %v1174_v32, %v1173_v22  ;;  %v1599_v7 = vsel %vm9372_vm2, %v1598_v46, %v1594_v59  ;;  %v1229_v24 = vunpack.c.l.b16 %v1101_v37  ;;  %v8061_v22 = vpop.eup %8060  ;;  %v6775_v37 = vld [vmem:[%s8480_s20 + $0xf0] sm:$0xff] }
 0x207   : > { %v9416_v21 = vmul.f32 %v1599_v7, %v9228_v44  ;;  %v1855_v62 = vpack.c.bf16 %v9409_v48, %v9409_v48  ;;  %v1865_v63 = vpack.c.bf16 %v9306_v54, %v9306_v54  ;;  %v1866_v43 = vpack.c.bf16 %v9360_v34, %v9360_v34  ;;  %v6776_v7 = vld [vmem:[%s8480_s20 + $0xf8] sm:$0xff] }
 0x208   : > { %v1230_v60 = vunpack.c.l.b16 %v1102_v2  ;;  %1197 = vrot.lane.b32.xlu1 %v1182_v42, %s8338_s13  ;;  %v9427_v18 = vadd.f32 1.0, %v9308_v27  ;;  %v9430_v31 = vadd.f32 1.0, %v9322_v20  ;;  %v1398_v32 = vmul.f32 %v6774_v8, %v8665_v35 }
 0x209   : > { %v1856_v44 = vpack.c.bf16 %v9416_v21, %v9416_v21  ;;  %v1943_v50 = vunpack.c.l.b16 %v1855_v62  ;;  %v1993_v38 = vunpack.c.l.b16 %v1865_v63  ;;  %v1994_v33 = vunpack.c.l.b16 %v1866_v43 }
 0x20a   : > { %v1238_v54 = vpack.c.b16 %v1230_v60, %v1229_v24  ;;  %8062 = vrcp.f32 %v9427_v18  ;;  %v1939_v46 = vunpack.c.l.b16 %v1851_v30  ;;  %v1940_v27 = vunpack.c.l.b16 %v1852_v16 }
 0x20b   : > { %v1944_v34 = vunpack.c.l.b16 %v1856_v44  ;;  %8064 = vrcp.f32 %v9430_v31  ;;  %v1610_v20 = vand.u32 2147483647, %v9427_v18  ;;  %v2009_v9 = vpack.c.b16 %v1994_v33, %v1993_v38  ;;  %v6771_v33 = vld [vmem:[%s8480_s20 + $0xd0] sm:$0xff] }
 0x20c   : > { %1253 = vrot.lane.b32.xlu2 %v1238_v54, %s8340_s15  ;;  %v1612_v57 = vand.u32 2147483648, %v9427_v18  ;;  %8066 = vpow2.f32 %v9281_v25  ;;  %v1625_v29 = vand.u32 2147483647, %v9430_v31  ;;  %v1627_v58 = vand.u32 2147483648, %v9430_v31 }
 0x20d   : > { %v1956_v11 = vpack.c.b16 %v1944_v34, %v1943_v50  ;;  %v9446_v30 = vadd.f32 %v9284_v4, %v8679_v45  ;;  %v9449_v0 = vadd.f32 %v1398_v32, %v8679_v45  ;;  %v1954_v25 = vpack.c.b16 %v1940_v27, %v1939_v46  ;;  %v6772_v27 = vld [vmem:[%s8480_s20 + $0xd8] sm:$0xff] }
 0x20e   : > { %vm1606_vm6 = vweird.f32 %v9427_v18  ;;  %v9457_v2 = vadd.f32 1.0, %v8061_v22  ;;  %vm9463_vm7 = vcmp.eq.f32.partialorder %v1610_v20, 8.507059e+37  ;;  %v1613_v63 = vor.u32 1.1754944e-38, %v1612_v57 }
 0x20f   : > { %1967 = vrot.lane.b32.xlu0 %v1956_v11, %s8338_s13  ;;  %v6789_v4 = vmul.f32 -1.442695, %v9446_v30  ;;  %v6790_v42 = vmul.f32 -1.442695, %v9449_v0  ;;  %vm1621_vm8 = vweird.f32 %v9430_v31  ;;  %vm9469_vm9 = vcmp.eq.f32.partialorder %v1625_v29, 8.507059e+37 }
 0x210   : > { %v8063_v59 = vpop.eup %8062  ;;  %2017 = vrot.lane.b32.xlu1 %v2009_v9, %s8340_s15  ;;  %v1628_v43 = vor.u32 1.1754944e-38, %v1627_v58  ;;  %8068 = vrcp.f32 %v9457_v2  ;;  %v1399_v44 = vmul.f32 %v6775_v37, %v8665_v35  ;;  %v1400_v54 = vmul.f32 %v6776_v7, %v8665_v35 }
 0x211   : > { %v8065_v16 = vpop.eup %8064  ;;  %v1602_v24 = vmul.f32 %v8063_v59, %v9427_v18  ;;  %vm1607_vm0 = vweird.f32 %v8063_v59  ;;  %8070 = vpow2.f32 %v6789_v4  ;;  %v1552_v46 = vand.u32 2147483648, %v9457_v2 }
 0x212   : > { %v1617_v8 = vmul.f32 %v8065_v16, %v9430_v31  ;;  %v8067_v50 = vpop.eup %8066  ;;  %8072 = vpow2.f32 %v6790_v42  ;;  %v1550_v11 = vand.u32 2147483647, %v9457_v2  ;;  %v1788_v9 = vrot.slane %v9409_v48, 1  ;;  %vm1608_vm12 = vmor %vm1606_vm6, %vm1607_vm0 }
 0x213   : > { %v1603_v38 = vsub.f32 1.0, %v1602_v24  ;;  %v9478_v34 = vadd.f32 1.0, %v8067_v50  ;;  %v1796_v57 = vrot.slane %v9416_v21, 1  ;;  %vm1622_vm10 = vweird.f32 %v8065_v16 }
 0x214   : > { %1963 = vrot.lane.b32.xlu2 %v1954_v25, %s8338_s13  ;;  %v1618_v32 = vsub.f32 1.0, %v1617_v8  ;;  %v9487_v58 = vmul.f32 %v6771_v33, %v8665_v35  ;;  %v9490_v25 = vadd.f32 %v1399_v44, %v8679_v45  ;;  %v9493_v37 = vadd.f32 %v1400_v54, %v8679_v45  ;;  %vm1623_vm14 = vmor %vm1621_vm8, %vm1622_vm10 }
 0x215   : > { %v1604_v20 = vmul.f32 %v8063_v59, %v1603_v38  ;;  %8074 = vrcp.f32 %v9478_v34  ;;  %v9496_v4 = vmul.f32 %v6772_v27, %v8665_v35  ;;  %vm1546_vm13 = vweird.f32 %v9457_v2 }
 0x216   : > { %v1619_v29 = vmul.f32 %v8065_v16, %v1618_v32  ;;  %v8069_v42 = vpop.eup %8068  ;;  %v1553_v24 = vor.u32 1.1754944e-38, %v1552_v46  ;;  %v1565_v8 = vand.u32 2147483647, %v9478_v34  ;;  %vm9507_vm1 = vcmp.eq.f32.partialorder %v1550_v11, 8.507059e+37 }
 0x217   : > { %v1605_v22 = vadd.f32 %v8063_v59, %v1604_v20  ;;  %v8071_v50 = vpop.eup %8070  ;;  %v1542_v35 = vmul.f32 %v8069_v42, %v9457_v2  ;;  %v1567_v18 = vand.u32 2147483648, %v9478_v34  ;;  %v1812_v54 = vsel %vm1022_vm15, %v1796_v57, %v1788_v9 }
 0x218   : > { %v1620_v7 = vadd.f32 %v8065_v16, %v1619_v29  ;;  %v8073_v33 = vpop.eup %8072  ;;  %v9516_v46 = vadd.f32 1.0, %v8071_v50  ;;  %v9520_v31 = vsel %vm1022_vm15, %v1788_v9, %v1796_v57  ;;  %vm1561_vm2 = vweird.f32 %v9478_v34 }
 0x219   : > { %v1609_v44 = vsel %vm1608_vm12, %v8063_v59, %v1605_v22  ;;  %v1543_v11 = vsub.f32 1.0, %v1542_v35  ;;  %v9527_v29 = vadd.f32 1.0, %v8073_v33  ;;  %vm1547_vm3 = vweird.f32 %v8069_v42 }
 0x21a   : > { %v1614_v32 = vsel %vm9463_vm7, %v1613_v63, %v1609_v44  ;;  %v1624_v59 = vsel %vm1623_vm14, %v8065_v16, %v1620_v7  ;;  %8076 = vrcp.f32 %v9516_v46  ;;  %v9536_v16 = vsel %vm12276_vm11, 0.0, %v1812_v54  ;;  %vm1548_vm5 = vmor %vm1546_vm13, %vm1547_vm3 }
 0x21b   : > { %v1629_v27 = vsel %vm9469_vm9, %v1628_v43, %v1624_v59  ;;  %v9525_v20 = vmul.f32 %v1614_v32, %v9238_v39  ;;  %v8075_v22 = vpop.eup %8074  ;;  %v1544_v60 = vmul.f32 %v8069_v42, %v1543_v11  ;;  %vm9540_vm4 = vcmp.eq.f32.partialorder %v1565_v8, 8.507059e+37 }
 0x21c   : > { %v9530_v62 = vmul.f32 %v1629_v27, %v9250_v49  ;;  %v1557_v39 = vmul.f32 %v8075_v22, %v9478_v34  ;;  %v1568_v9 = vor.u32 1.1754944e-38, %v1567_v18  ;;  %8078 = vrcp.f32 %v9527_v29 }
 0x21d   : > { %v1789_v63 = vrot.slane %v9525_v20, 1  ;;  %v1871_v57 = vpack.c.bf16 %v9520_v31, %v9520_v31  ;;  %v1545_v7 = vadd.f32 %v8069_v42, %v1544_v60  ;;  %v1670_v44 = vand.u32 2147483647, %v9516_v46 }
 0x21e   : > { %v1797_v49 = vrot.slane %v9530_v62, 1  ;;  %v1558_v50 = vsub.f32 1.0, %v1557_v39  ;;  %vm1562_vm6 = vweird.f32 %v8075_v22  ;;  %v1672_v18 = vand.u32 2147483648, %v9516_v46 }
 0x21f   : > { %v1549_v59 = vsel %vm1548_vm5, %v8069_v42, %v1545_v7  ;;  %vm1666_vm7 = vweird.f32 %v9516_v46  ;;  %vm1563_vm8 = vmor %vm1561_vm2, %vm1562_vm6  ;;  %vm9571_vm9 = vcmp.eq.f32.partialorder %v1670_v44, 8.507059e+37  ;;  %vm1681_vm0 = vweird.f32 %v9527_v29 }
 0x220   : > { %v1805_v8 = vsel %vm1022_vm15, %v1789_v63, %v1797_v49  ;;  %v1813_v54 = vsel %vm1022_vm15, %v1797_v49, %v1789_v63  ;;  %v1559_v27 = vmul.f32 %v8075_v22, %v1558_v50  ;;  %v8077_v11 = vpop.eup %8076  ;;  %v1554_v39 = vsel %vm9507_vm1, %v1553_v24, %v1549_v59 }
 0x221   : > { %v1826_v33 = vsel %vm12276_vm11, 0.0, %v1813_v54  ;;  %v1873_v32 = vpack.c.bf16 %v1805_v8, %v1805_v8  ;;  %v1685_v63 = vand.u32 2147483647, %v9527_v29  ;;  %v9565_v36 = vmul.f32 %v1554_v39, %v9254_v61 }
 0x222   : > { %v1874_v60 = vpack.c.bf16 %v1826_v33, %v1826_v33  ;;  %v1560_v49 = vadd.f32 %v8075_v22, %v1559_v27  ;;  %v1662_v55 = vmul.f32 %v8077_v11, %v9516_v46  ;;  %v8079_v54 = vpop.eup %8078  ;;  %v1687_v24 = vand.u32 2147483648, %v9527_v29 }
 0x223   : > { %v2001_v2 = vunpack.c.l.b16 %v1873_v32  ;;  %v1853_v61 = vpack.c.bf16 %v9565_v36, %v9565_v36  ;;  %v1673_v50 = vor.u32 1.1754944e-38, %v1672_v18  ;;  %v1677_v34 = vmul.f32 %v8079_v54, %v9527_v29 }
 0x224   : > { %v2002_v8 = vunpack.c.l.b16 %v1874_v60  ;;  %v1564_v38 = vsel %vm1563_vm8, %v8075_v22, %v1560_v49  ;;  %v1663_v7 = vsub.f32 1.0, %v1662_v55  ;;  %vm9582_vm10 = vcmp.eq.f32.partialorder %v1685_v63, 8.507059e+37 }
 0x225   : > { %v1569_v32 = vsel %vm9540_vm4, %v1568_v9, %v1564_v38  ;;  %vm973_vm12 = vcmp.lt.s32.totalorder %v8747_v12, 1  ;;  %v1787_v22 = vrot.slane %v9565_v36, 1  ;;  %vm1667_vm13 = vweird.f32 %v8077_v11 }
 0x226   : > { %v2013_v33 = vpack.c.b16 %v2002_v8, %v2001_v2  ;;  %v9588_v59 = vmul.f32 %v1569_v32, %v9260_v14  ;;  %v1664_v27 = vmul.f32 %v8077_v11, %v1663_v7  ;;  %v1941_v55 = vunpack.c.l.b16 %v1853_v61  ;;  %vm1668_vm14 = vmor %vm1666_vm7, %vm1667_vm13 }
 0x227   : > { %v1678_v43 = vsub.f32 1.0, %v1677_v34  ;;  %v1688_v9 = vor.u32 1.1754944e-38, %v1687_v24  ;;  %v1857_v18 = vpack.c.bf16 %v9525_v20, %v9525_v20  ;;  %v6791_v14 = vmul.f32 -1.442695, %v9490_v25 }
 0x228   : > { %2025 = vrot.lane.b32.xlu0 %v2013_v33, %s8340_s15  ;;  %v1795_v60 = vrot.slane %v9588_v59, 1  ;;  %v1854_v39 = vpack.c.bf16 %v9588_v59, %v9588_v59  ;;  %v1665_v63 = vadd.f32 %v8077_v11, %v1664_v27  ;;  %vm1682_vm1 = vweird.f32 %v8079_v54 }
 0x229   : > { %v1679_v2 = vmul.f32 %v8079_v54, %v1678_v43  ;;  %v1858_v49 = vpack.c.bf16 %v9530_v62, %v9530_v62  ;;  %v6792_v8 = vmul.f32 -1.442695, %v9493_v37  ;;  %vm1683_vm2 = vmor %vm1681_vm0, %vm1682_vm1  ;;  %8080 = vpow2.f32 %v6791_v14 }
 0x22a   : > { %v1803_v24 = vsel %vm1022_vm15, %v1787_v22, %v1795_v60  ;;  %v1811_v38 = vsel %vm1022_vm15, %v1795_v60, %v1787_v22  ;;  %v1942_v61 = vunpack.c.l.b16 %v1854_v39  ;;  %v1669_v7 = vsel %vm1668_vm14, %v8077_v11, %v1665_v63 }
 0x22b   : > { %v1822_v33 = vsel %vm12276_vm11, 0.0, %v1811_v38  ;;  %v1869_v46 = vpack.c.bf16 %v1803_v24, %v1803_v24  ;;  %v1674_v32 = vsel %vm9571_vm9, %v1673_v50, %v1669_v7  ;;  %v1680_v34 = vadd.f32 %v8079_v54, %v1679_v2 }
 0x22c   : > { %v1870_v27 = vpack.c.bf16 %v1822_v33, %v1822_v33  ;;  %v1955_v43 = vpack.c.b16 %v1942_v61, %v1941_v55  ;;  %v9614_v35 = vmul.f32 %v1674_v32, %v9446_v30  ;;  %8082 = vpow2.f32 %v6792_v8 }
 0x22d   : > { %v1997_v22 = vunpack.c.l.b16 %v1869_v46  ;;  %v1684_v60 = vsel %vm1683_vm2, %v8079_v54, %v1680_v34  ;;  %v9618_v11 = vadd.f32 %v9487_v58, %v8679_v45  ;;  %v9627_v30 = vadd.f32 %v9496_v4, %v8679_v45 }
 0x22e   : > { %v1998_v39 = vunpack.c.l.b16 %v1870_v27  ;;  %1965 = vrot.lane.b32.xlu1 %v1955_v43, %s8338_s13  ;;  %v1689_v42 = vsel %vm9582_vm10, %v1688_v9, %v1684_v60  ;;  %v1861_v29 = vpack.c.bf16 %v9614_v35, %v9614_v35  ;;  %v1999_v58 = vunpack.c.l.b16 %v1871_v57 }
 0x22f   : > { %v9630_v54 = vmul.f32 %v1689_v42, %v9449_v0  ;;  %v6787_v50 = vmul.f32 -1.442695, %v9618_v11  ;;  %v1791_v55 = vrot.slane %v9614_v35, 1  ;;  %v12348_v63 = vpack.c.bf16 %v9536_v16, %v9536_v16  ;;  %v8081_v8 = vpop.eup %8080 }
 0x230   : > { %v2011_v44 = vpack.c.b16 %v1998_v39, %v1997_v22  ;;  %v1949_v9 = vunpack.c.l.b16 %v1861_v29  ;;  %v6788_v45 = vmul.f32 -1.442695, %v9627_v30  ;;  %v12349_v31 = vrot.slane %v8840_v19, 7 }
 0x231   : > { %v2000_v14 = vunpack.c.l.b16 %v12348_v63  ;;  %v1862_v0 = vpack.c.bf16 %v9630_v54, %v9630_v54  ;;  %8084 = vpow2.f32 %v6787_v50  ;;  %v1799_v4 = vrot.slane %v9630_v54, 1 }
 0x232   : > { %v12350_v57 = vrot.slane %v8837_v47, 7  ;;  %2021 = vrot.lane.b32.xlu2 %v2011_v44, %s8340_s15  ;;  %v1945_v16 = vunpack.c.l.b16 %v1857_v18  ;;  %8086 = vpow2.f32 %v6788_v45  ;;  %v12352_v38 = vmov %v12349_v31  ;;  %v8083_v7 = vpop.eup %8082 }
 0x233   : > { %v1950_v33 = vunpack.c.l.b16 %v1862_v0  ;;  %v1946_v46 = vunpack.c.l.b16 %v1858_v49  ;;  %v9657_v32 = vadd.f32 1.0, %v8081_v8  ;;  %v1815_v34 = vsel %vm1022_vm15, %v1799_v4, %v1791_v55  ;;  %v9776_v49 = vpop.permute.xlu1 %1183 }
 0x234   : > { %v975_v2 = vsel %vm973_vm12, %v12350_v57, %v12349_v31  ;;  %v12351_v24 = vmov %v12350_v57  ;;  %v2012_v27 = vpack.c.b16 %v2000_v14, %v1999_v58  ;;  %v9661_v43 = vadd.f32 1.0, %v8083_v7 }
 0x235   : > { %v983_v61 = vsel %vm973_vm12, %v12352_v38, %v12351_v24  ;;  %v1807_v18 = vsel %vm1022_vm15, %v1791_v55, %v1799_v4  ;;  %vm12275_vm3 = vcmp.eq.s32.totalorder %v8747_v12, 0  ;;  %v1959_v47 = vpack.c.b16 %v1950_v33, %v1949_v9 }
 0x236   : > { %8088 = vrcp.f32 %v9657_v32  ;;  %2023 = vrot.lane.b32.xlu1 %v2012_v27, %s8340_s15  ;;  %v1830_v22 = vsel %vm12276_vm11, 0.0, %v1815_v34  ;;  %v1957_v39 = vpack.c.b16 %v1946_v46, %v1945_v16  ;;  %v1702_v42 = vand.u32 2147483648, %v9657_v32  ;;  %v7765_v34 = vld [vmem:[%s12262_s2 + $0x50] sm:$0xff] }
 0x237   : > { %8090 = vrcp.f32 %v9661_v43  ;;  %v8085_v60 = vpop.eup %8084  ;;  %1973 = vrot.lane.b32.xlu0 %v1959_v47, %s8338_s13  ;;  %v1877_v29 = vpack.c.bf16 %v1807_v18, %v1807_v18  ;;  %v992_v58 = vsel %vm12275_vm3, 0.0, %v983_v61  ;;  %v1700_v55 = vand.u32 2147483647, %v9657_v32 }
 0x238   : > { %v8087_v50 = vpop.eup %8086  ;;  %v1717_v44 = vand.u32 2147483648, %v9661_v43  ;;  %v9679_v9 = vadd.f32 1.0, %v8085_v60  ;;  %v1058_v63 = vpack.c.bf16 %v975_v2, %v975_v2  ;;  %v1715_v14 = vand.u32 2147483647, %v9661_v43 }
 0x239   : > { %v9682_v45 = vadd.f32 1.0, %v8087_v50  ;;  %v1878_v0 = vpack.c.bf16 %v1830_v22, %v1830_v22  ;;  %v960_v4 = vrot.slane %v8913_v52, 7  ;;  %vm1696_vm4 = vweird.f32 %v9657_v32 }
 0x23a   : > { %1969 = vrot.lane.b32.xlu2 %v1957_v39, %s8338_s13  ;;  %8092 = vrcp.f32 %v9679_v9  ;;  %v1057_v31 = vpack.c.bf16 %v992_v58, %v992_v58  ;;  %v968_v57 = vrot.slane %v8945_v53, 7  ;;  %v9691_v16 = vor.u32 1.1754944e-38, %v1702_v42 }
 0x23b   : > { %vm1711_vm5 = vweird.f32 %v9661_v43  ;;  %v1642_v2 = vand.u32 2147483648, %v9679_v9  ;;  %8094 = vrcp.f32 %v9682_v45  ;;  %v9696_v52 = vunpack.c.l.b16 %v1877_v29 }
 0x23c   : > { %v9689_v8 = vpop.eup %8088  ;;  %vm9702_vm6 = vcmp.eq.f32.partialorder %v1700_v55, 8.507059e+37  ;;  %v1718_v53 = vor.u32 1.1754944e-38, %v1717_v44  ;;  %v1657_v7 = vand.u32 2147483648, %v9682_v45  ;;  %v9707_v33 = vunpack.c.l.b16 %v1058_v63  ;;  %v1186_v63 = vpop.permute.xlu2 %1185 }
 0x23d   : > { %v9698_v24 = vpop.eup %8090  ;;  %v1692_v38 = vmul.f32 %v9689_v8, %v9657_v32  ;;  %vm9711_vm7 = vcmp.eq.f32.partialorder %v1715_v14, 8.507059e+37  ;;  %v1640_v27 = vand.u32 2147483647, %v9679_v9  ;;  %v1655_v18 = vand.u32 2147483647, %v9682_v45 }
 0x23e   : > { %v1707_v46 = vmul.f32 %v9698_v24, %v9661_v43  ;;  %v9717_v47 = vunpack.c.l.b16 %v1878_v0  ;;  %vm1697_vm8 = vweird.f32 %v9689_v8  ;;  %v1121_v60 = vunpack.c.l.b16 %v1057_v31  ;;  %v7780_v0 = vld [vmem:[%s12262_s2 + $0x88] sm:$0xff] }
 0x23f   : > { %v1693_v22 = vsub.f32 1.0, %v1692_v38  ;;  %v977_v39 = vsel %vm973_vm12, %v960_v4, %v968_v57  ;;  %vm1712_vm9 = vweird.f32 %v9698_v24  ;;  %vm1636_vm0 = vweird.f32 %v9679_v9  ;;  %v7752_v31 = vld [vmem:[%s12262_s2 + $0x28] sm:$0xff]  ;;  %2635 = vmatpush.bf16.msra.mxu2 %v7780_v0  ;;  %vm1698_vm2 = vmor %vm1696_vm4, %vm1697_vm8 }
 0x240   : > { %v1708_v42 = vsub.f32 1.0, %v1707_v46  ;;  %v9724_v29 = vor.u32 1.1754944e-38, %v1642_v2  ;;  %v985_v58 = vsel %vm973_vm12, %v968_v57, %v960_v4  ;;  %v9728_v50 = vpop.eup %8092  ;;  %vm1651_vm10 = vweird.f32 %v9682_v45  ;;  %2456 = vmatpush.bf16.msra.mxu1 %v7752_v31  ;;  %vm1713_vm11 = vmor %vm1711_vm5, %vm1712_vm9 }
 0x241   : > { %v1694_v55 = vmul.f32 %v9689_v8, %v1693_v22  ;;  %v9732_v44 = vor.u32 1.1754944e-38, %v1657_v7  ;;  %v1136_v14 = vpack.c.b16 %v9707_v33, %v1121_v60  ;;  %v1062_v4 = vpack.c.bf16 %v977_v39, %v977_v39  ;;  %v9741_v57 = vpop.eup %8094  ;;  %v9754_v22 = vpop.permute.xlu0 %1187 }
 0x242   : > { %v1709_v2 = vmul.f32 %v9698_v24, %v1708_v42  ;;  %v1632_v38 = vmul.f32 %v9728_v50, %v9679_v9  ;;  %vm9746_vm13 = vcmp.eq.f32.partialorder %v1640_v27, 8.507059e+37  ;;  %v996_v46 = vsel %vm12275_vm3, 0.0, %v985_v58  ;;  %v7779_v27 = vld [vmem:[%s12262_s2 + $0x80] sm:$0xff] }
 0x243   : > { %v1695_v60 = vadd.f32 %v9689_v8, %v1694_v55  ;;  %v1647_v39 = vmul.f32 %v9741_v57, %v9682_v45  ;;  %vm9759_vm14 = vcmp.eq.f32.partialorder %v1655_v18, 8.507059e+37  ;;  %vm1279_vm1 = vcmask 523264   ;;  %v7751_v58 = vld [vmem:[%s12262_s2 + $0x20] sm:$0xff]  ;;  %2636 = vmatpush.bf16.msra.mxu2 %v7779_v27  ;;  %v7749_v45 = vld [vmem:[%s12262_s2 + $0x10] sm:$0xff] }
 0x244   : > { %v967_v55 = vrot.slane %v8816_v28, 7  ;;  %v1710_v18 = vadd.f32 %v9698_v24, %v1709_v2  ;;  %v1633_v0 = vsub.f32 1.0, %v1632_v38  ;;  %vm1637_vm3 = vweird.f32 %v9728_v50  ;;  %v7766_v2 = vld [vmem:[%s12262_s2 + $0x58] sm:$0xff]  ;;  %2457 = vmatpush.bf16.msra.mxu1 %v7751_v58  ;;  %v1242_v27 = vpop.permute.xlu2 %1241 }
 0x245   : > { %v1061_v33 = vpack.c.bf16 %v996_v46, %v996_v46  ;;  %v1699_v31 = vsel %vm1698_vm2, %v9689_v8, %v1695_v60  ;;  %v1648_v28 = vsub.f32 1.0, %v1647_v39  ;;  %v9783_v19 = vunpack.c.l.b16 %v1062_v4  ;;  %2307 = vmatpush.bf16.msra.mxu0 %v7766_v2 }
 0x246   : > { %v959_v32 = vrot.slane %v8813_v56, 7  ;;  %v1704_v38 = vsel %vm9702_vm6, %v9691_v16, %v1699_v31  ;;  %v1714_v8 = vsel %vm1713_vm11, %v9698_v24, %v1710_v18  ;;  %v1634_v46 = vmul.f32 %v9728_v50, %v1633_v0  ;;  %v7778_v16 = vld [vmem:[%s12262_s2 + $0x78] sm:$0xff]  ;;  %vm1638_vm6 = vmor %vm1636_vm0, %vm1637_vm3 }
 0x247   : > { %v9794_v60 = vunpack.c.l.b16 %v1061_v33  ;;  %v1719_v43 = vsel %vm9711_vm7, %v1718_v53, %v1714_v8  ;;  %v9799_v4 = vmul.f32 %v1704_v38, %v9490_v25  ;;  %v1649_v56 = vmul.f32 %v9741_v57, %v1648_v28  ;;  %v7750_v24 = vld [vmem:[%s12262_s2 + $0x18] sm:$0xff]  ;;  %2637 = vmatpush.bf16.msra.mxu2 %v7778_v16  ;;  %v9876_v16 = vpop.permute.xlu1 %1239 }
 0x248   : > { %vm1652_vm4 = vweird.f32 %v9741_v57  ;;  %vm12277_vm5 = vcmask 781312   ;;  %v9810_v61 = vmul.f32 %v1719_v43, %v9493_v37  ;;  %v1635_v25 = vadd.f32 %v9728_v50, %v1634_v46  ;;  %2458 = vmatpush.bf16.msra.mxu1 %v7750_v24 }
 0x249   : > { %vm12361_vm11 = vcmask 261120   ;;  %v963_v33 = vrot.slane %v9114_v15, 7  ;;  %v1792_v39 = vrot.slane %v9799_v4, 1  ;;  %v1650_v37 = vadd.f32 %v9741_v57, %v1649_v56  ;;  %vm1653_vm7 = vmor %vm1651_vm10, %vm1652_vm4  ;;  %2308 = vmatpush.bf16.msra.mxu0 %v7765_v34  ;;  %v9861_v8 = vpop.permute.xlu0 %1245  ;;  %v7776_v34 = vld [vmem:[%s12262_s2 + $0x68] sm:$0xff]  ;;  %v7761_v15 = vld [vmem:[%s12262_s2 + $0x30] sm:$0xff] }
 0x24a   : > { %v1260_v53 = vsel %vm12361_vm11, %v1136_v14, %v1186_v63  ;;  %v1138_v63 = vpack.c.b16 %v9783_v19, %v9794_v60  ;;  %v9828_v14 = vsel %vm973_vm12, %v959_v32, %v967_v55  ;;  %v1800_v58 = vrot.slane %v9810_v61, 1  ;;  %vm12365_vm10 = vmmov %vm12361_vm11 }
 0x24b   : > { %v1639_v18 = vsel %vm1638_vm6, %v9728_v50, %v1635_v25  ;;  %v1863_v9 = vpack.c.bf16 %v9799_v4, %v9799_v4  ;;  %v1283_v0 = vsel %vm1279_vm1, %v1260_v53, %v1242_v27  ;;  %v1654_v31 = vsel %vm1653_vm7, %v9741_v57, %v1650_v37  ;;  %v7777_v50 = vld [vmem:[%s12262_s2 + $0x70] sm:$0xff]  ;;  %vm12372_vm2 = vmmov %vm12365_vm10 }
 0x24c   : > { %v1644_v19 = vsel %vm9746_vm13, %v9724_v29, %v1639_v18  ;;  %v1306_v28 = vunpack.c.l.b16 %v1283_v0  ;;  %v984_v2 = vsel %vm973_vm12, %v967_v55, %v959_v32  ;;  %v1808_v7 = vsel %vm1022_vm15, %v1792_v39, %v1800_v58  ;;  %v7764_v55 = vld [vmem:[%s12262_s2 + $0x48] sm:$0xff]  ;;  %2638 = vmatpush.bf16.msra.mxu2 %v7777_v50  ;;  %2459 = vmatpush.bf16.msra.mxu1 %v7749_v45  ;;  %v7763_v45 = vld [vmem:[%s12262_s2 + $0x40] sm:$0xff]  ;;  %vm12373_vm4 = vmmov %vm12372_vm2 }
 0x24d   : > { %v1816_v29 = vsel %vm1022_vm15, %v1800_v58, %v1792_v39  ;;  %v1659_v57 = vsel %vm9759_vm14, %v9732_v44, %v1654_v31  ;;  %v9859_v38 = vmul.f32 %v1644_v19, %v9618_v11  ;;  %vm12362_vm3 = vcmp.eq.s32.totalorder %v8862_v3, 15  ;;  %v7748_v39 = vld [vmem:[%s12262_s2 + $0x8] sm:$0xff]  ;;  %2309 = vmatpush.bf16.msra.mxu0 %v7764_v55  ;;  %v1190_v31 = vpop.permute.xlu2 %1189  ;;  %vm12376_vm6 = vmmov %vm12372_vm2 }
 0x24e   : > { %v1832_v32 = vsel %vm12362_vm3, 0.0, %v1816_v29  ;;  %v1879_v46 = vpack.c.bf16 %v1808_v7, %v1808_v7  ;;  %v9869_v60 = vmul.f32 %v1659_v57, %v9627_v30  ;;  %v1864_v44 = vpack.c.bf16 %v9810_v61, %v9810_v61  ;;  %vm12364_vm0 = vmmov %vm12362_vm3 }
 0x24f   : > { %v1880_v42 = vpack.c.bf16 %v1832_v32, %v1832_v32  ;;  %v1790_v11 = vrot.slane %v9859_v38, 1  ;;  %v1859_v43 = vpack.c.bf16 %v9859_v38, %v9859_v38  ;;  %v1307_v56 = vunpack.c.h.b16 %v1283_v0 }
 0x250   : > { %v2007_v24 = vunpack.c.l.b16 %v1879_v46  ;;  %v1798_v25 = vrot.slane %v9869_v60, 1  ;;  %v1860_v53 = vpack.c.bf16 %v9869_v60, %v9869_v60  ;;  %v9881_v30 = vunpack.c.l.b16 %v1863_v9  ;;  %2639 = vmatpush.bf16.msra.mxu2 %v7776_v34  ;;  %2460 = vmatpush.bf16.msra.mxu1 %v7748_v39 }
 0x251   : > { %v2008_v37 = vunpack.c.l.b16 %v1880_v42  ;;  %v1947_v27 = vunpack.c.l.b16 %v1859_v43  ;;  %v1322_v58 = vpack.c.b16 %v1306_v28, %v1306_v28  ;;  %v1323_v18 = vpack.c.b16 %v1307_v56, %v1307_v56  ;;  %v7747_v42 = vld [vmem:[%s12262_s2] sm:$0xff]  ;;  %2310 = vmatpush.bf16.msra.mxu0 %v7763_v45 }
 0x252   : > { %v1806_v0 = vsel %vm1022_vm15, %v1790_v11, %v1798_v25  ;;  %v1814_v9 = vsel %vm1022_vm15, %v1798_v25, %v1790_v11  ;;  %v1948_v19 = vunpack.c.l.b16 %v1860_v53  ;;  %vm12363_vm8 = vcmp.eq.s32.totalorder %v8747_v12, 0 }
 0x253   : > { %v994_v50 = vsel %vm12363_vm8, 0.0, %v984_v2  ;;  %vm2280_vm9 = vcmask 785408   ;;  %v2016_v7 = vpack.c.b16 %v2008_v37, %v2007_v24  ;;  %v1828_v28 = vsel %vm12364_vm0, 0.0, %v1814_v9  ;;  %1355 = vst.msk [vmem:[#allocation2 + $0x10] sm:$0xf] %vm12277_vm5, %v1322_v58  ;;  %v7775_v2 = vld [vmem:[%s12262_s2 + $0x60] sm:$0xff]  ;;  %vm12370_vm13 = vmmov %vm12363_vm8 }
 0x254   : > { %v1875_v29 = vpack.c.bf16 %v1806_v0, %v1806_v0  ;;  %v1266_v57 = vsel %vm12365_vm10, %v1138_v63, %v1190_v31  ;;  %v1876_v55 = vpack.c.bf16 %v1828_v28, %v1828_v28  ;;  %v1958_v32 = vpack.c.b16 %v1948_v19, %v1947_v27  ;;  %1356 = vst.msk [vmem:[#allocation2 + $0x14] sm:$0xf] %vm12277_vm5, %v1323_v18  ;;  %v9939_v31 = vpop.permute.xlu0 %1193  ;;  %vm12371_vm14 = vmmov %vm12363_vm8 }
 0x255   : > { %v1059_v46 = vpack.c.bf16 %v994_v50, %v994_v50  ;;  %2031 = vrot.lane.b32.xlu0 %v2016_v7, %s8340_s15  ;;  %v1060_v63 = vpack.c.bf16 %v9828_v14, %v9828_v14  ;;  %v12366_v43 = vrot.slane %v8866_v5, 7  ;;  %v12367_v56 = vrot.slane %v8850_v10, 7  ;;  %v7822_v14 = vld [vmem:[%s12262_s2 + $0x88] sm:$0xff]  ;;  %v7762_v5 = vld [vmem:[%s12262_s2 + $0x38] sm:$0xff]  ;;  %2640 = vmatpush.bf16.msra.mxu2 %v7775_v2  ;;  %vm12375_vm11 = vmmov %vm12363_vm8 }
 0x256   : > { %v2003_v11 = vunpack.c.l.b16 %v1875_v29  ;;  %v8341_v39 = vmov 0   ;;  %v2004_v37 = vunpack.c.l.b16 %v1876_v55  ;;  %1971 = vrot.lane.b32.xlu1 %v1958_v32, %s8338_s13  ;;  %v1287_v9 = vsel %vm1279_vm1, %v1266_v57, %v9861_v8  ;;  %2461 = vmatpush.bf16.msra.mxu1 %v7747_v42  ;;  %v1244_v57 = vpop.permute.xlu1 %1243  ;;  %v9951_v32 = vpop.permute.xlu2 %1247  ;;  %vm12377_vm7 = vmmov %vm12363_vm8 }
 0x257   : > { %v974_v24 = vsel %vm973_vm12, %v12367_v56, %v12366_v43  ;;  %v12368_v25 = vmov %v12367_v56  ;;  %v12369_v53 = vmov %v12366_v43  ;;  %342 = vst.msk [vmem:[#allocation2] sm:$0xf] %vm12277_vm5, %v8341_v39  ;;  %v1123_v27 = vunpack.c.l.b16 %v1059_v46  ;;  %2311 = vmatpush.bf16.msra.mxu0 %v7762_v5  ;;  %vm12378_vm3 = vmmov %vm12377_vm7 }
 0x258   : > { %v982_v34 = vsel %vm973_vm12, %v12369_v53, %v12368_v25  ;;  %v1056_v10 = vpack.c.bf16 %v974_v24, %v974_v24  ;;  %343 = vst.msk [vmem:[#allocation2 + $0x4] sm:$0xf] %vm12277_vm5, %v8341_v39  ;;  %v1124_v18 = vunpack.c.l.b16 %v1060_v63  ;;  %v971_v19 = vrot.slane %v9117_v6, 7  ;;  %v7794_v25 = vld [vmem:[%s12262_s2 + $0x28] sm:$0xff]  ;;  %vm12379_vm8 = vmmov %vm12372_vm2 }
 0x259   : > { %v990_v58 = vsel %vm12370_vm13, 0.0, %v982_v34  ;;  %345 = vst.msk [vmem:[#allocation2 + $0x88] sm:$0xf] %vm12277_vm5, %v8341_v39  ;;  %v2014_v50 = vpack.c.b16 %v2004_v37, %v2003_v11  ;;  %v1310_v45 = vunpack.c.l.b16 %v1287_v9  ;;  %v1311_v28 = vunpack.c.h.b16 %v1287_v9  ;;  %vm12380_vm0 = vmmov %vm12372_vm2 }
 0x25a   : > { %v1055_v0 = vpack.c.bf16 %v990_v58, %v990_v58  ;;  %v1120_v7 = vunpack.c.l.b16 %v1056_v10  ;;  %346 = vst.msk [vmem:[#allocation2 + $0x8c] sm:$0xf] %vm12277_vm5, %v8341_v39  ;;  %v1137_v29 = vpack.c.b16 %v1124_v18, %v1123_v27  ;;  %v980_v8 = vsel %vm973_vm12, %v963_v33, %v971_v19  ;;  %3219 = vmatpush.bf16.msrb.mxu1 %v7822_v14  ;;  %vm12381_vm10 = vmmov %vm12378_vm3 }
 0x25b   : > { %v988_v6 = vsel %vm973_vm12, %v971_v19, %v963_v33  ;;  %2027 = vrot.lane.b32.xlu2 %v2014_v50, %s8340_s15  ;;  %v1326_v2 = vpack.c.b16 %v1310_v45, %v1310_v45  ;;  %v1327_v46 = vpack.c.b16 %v1311_v28, %v1311_v28  ;;  %v1068_v11 = vpack.c.bf16 %v980_v8, %v980_v8  ;;  %v7767_v63 = vld [vmem:[#allocation2 + $0x10] sm:$0xff]  ;;  %vm12382_vm13 = vmmov %vm12378_vm3 }
 0x25c   : > { %v1119_v55 = vunpack.c.l.b16 %v1055_v0  ;;  %v1002_v42 = vsel %vm12371_vm14, 0.0, %v988_v6  ;;  %v1263_v33 = vsel %vm12372_vm2, %v1137_v29, %v9754_v22  ;;  %v962_v24 = vrot.slane %v9000_v13, 7  ;;  %7001 = vmatmul.msk.bf16.vlgmr.msra.gmra.mxu2 %vm2280_vm9, %v7767_v63  ;;  %2312 = vmatpush.bf16.msra.mxu0 %v7761_v15  ;;  %vm12383_vm14 = vmmov %vm12380_vm0 }
 0x25d   : > { %v1067_v56 = vpack.c.bf16 %v1002_v42, %v1002_v42  ;;  %v1952_v53 = vunpack.c.l.b16 %v1864_v44  ;;  %1359 = vst.msk [vmem:[#allocation2 + $0x20] sm:$0xf] %vm12277_vm5, %v1326_v2  ;;  %v1132_v34 = vunpack.c.l.b16 %v1068_v11  ;;  %v970_v39 = vrot.slane %v9019_v1, 7  ;;  %vm12384_vm2 = vmmov %vm12380_vm0 }
 0x25e   : > { %v1135_v43 = vpack.c.b16 %v1120_v7, %v1119_v55  ;;  %v1285_v22 = vsel %vm1279_vm1, %v1263_v33, %v1244_v57  ;;  %1360 = vst.msk [vmem:[#allocation2 + $0x24] sm:$0xf] %vm12277_vm5, %v1327_v46  ;;  %v12374_v44 = vpack.c.b16 %v9717_v47, %v9696_v52  ;;  %v1252_v7 = vpop.permute.xlu0 %1251  ;;  %v1196_v45 = vpop.permute.xlu2 %1195  ;;  %v1738_v28 = vrot.slane %v9339_v23, 7 }
 0x25f   : > { %v1131_v14 = vunpack.c.l.b16 %v1067_v56  ;;  %v7739_v37 = vld [vmem:[#allocation2] sm:$0xff]  ;;  %v1308_v27 = vunpack.c.l.b16 %v1285_v22  ;;  %v1309_v58 = vunpack.c.h.b16 %v1285_v22  ;;  %v987_v10 = vsel %vm973_vm12, %v970_v39, %v962_v24  ;;  %v1192_v46 = vpop.permute.xlu1 %1191 }
 0x260   : > { %v1257_v13 = vsel %vm12373_vm4, %v1135_v43, %v9776_v49  ;;  %2029 = vrot.lane.b32.xlu1 %v12374_v44, %s8340_s15  ;;  %6925 = vmatmul.msk.bf16.vlgmr.msra.gmra.mxu1 %vm2280_vm9, %v7739_v37  ;;  %v1960_v18 = vpack.c.b16 %v1952_v53, %v9881_v30  ;;  %v979_v9 = vsel %vm973_vm12, %v962_v24, %v970_v39  ;;  %v1746_v29 = vrot.slane %v9342_v51, 7  ;;  %vm12387_vm4 = vmmov %vm12378_vm3 }
 0x261   : > { %v1281_v1 = vsel %vm1279_vm1, %v1257_v13, %v9876_v16  ;;  %3041 = vmatpush.bf16.msrb.mxu0 %v7794_v25  ;;  %v1141_v0 = vpack.c.b16 %v1132_v34, %v1131_v14  ;;  %v1324_v52 = vpack.c.b16 %v1308_v27, %v1308_v27  ;;  %v1000_v16 = vsel %vm12375_vm11, 0.0, %v987_v10  ;;  %vm12388_vm11 = vmmov %vm12378_vm3 }
 0x262   : > { %v1304_v5 = vunpack.c.l.b16 %v1281_v1  ;;  %v1305_v49 = vunpack.c.h.b16 %v1281_v1  ;;  %v1325_v50 = vpack.c.b16 %v1309_v58, %v1309_v58  ;;  %v961_v55 = vrot.slane %v9150_v26, 7 }
 0x263   : > { %1975 = vrot.lane.b32.xlu2 %v1960_v18, %s8338_s13  ;;  %1357 = vst.msk [vmem:[#allocation2 + $0x18] sm:$0xf] %vm12277_vm5, %v1324_v52  ;;  %v1275_v30 = vsel %vm12376_vm6, %v1141_v0, %v1196_v45  ;;  %v969_v8 = vrot.slane %v9155_v40, 7  ;;  %v1065_v6 = vpack.c.bf16 %v1000_v16, %v1000_v16  ;;  %v1066_v57 = vpack.c.bf16 %v979_v9, %v979_v9  ;;  %vm12389_vm6 = vmmov %vm12378_vm3 }
 0x264   : > { %v1320_v47 = vpack.c.b16 %v1304_v5, %v1304_v5  ;;  %v1321_v19 = vpack.c.b16 %v1305_v49, %v1305_v49  ;;  %v1293_v2 = vsel %vm1279_vm1, %v1275_v30, %v1252_v7  ;;  %1358 = vst.msk [vmem:[#allocation2 + $0x1c] sm:$0xf] %vm12277_vm5, %v1325_v50  ;;  %v1762_v33 = vsel %vm973_vm12, %v1746_v29, %v1738_v28 }
 0x265   : > { %v1316_v23 = vunpack.c.l.b16 %v1293_v2  ;;  %v1317_v42 = vunpack.c.h.b16 %v1293_v2  ;;  %v978_v11 = vsel %vm973_vm12, %v961_v55, %v969_v8  ;;  %v986_v51 = vsel %vm973_vm12, %v969_v8, %v961_v55 }
 0x266   : > { %1353 = vst.msk [vmem:[#allocation2 + $0x8] sm:$0xf] %vm12277_vm5, %v1320_v47  ;;  %v1064_v26 = vpack.c.bf16 %v978_v11, %v978_v11  ;;  %v998_v63 = vsel %vm12377_vm7, 0.0, %v986_v51  ;;  %v1129_v43 = vunpack.c.l.b16 %v1065_v6  ;;  %v1130_v56 = vunpack.c.l.b16 %v1066_v57  ;;  %v10015_v14 = vpop.permute.xlu2 %1253  ;;  %v10023_v18 = vpop.permute.xlu0 %1961  ;;  %vm12390_vm7 = vmmov %vm12380_vm0 }
 0x267   : > { %1354 = vst.msk [vmem:[#allocation2 + $0xc] sm:$0xf] %vm12277_vm5, %v1321_v19  ;;  %v1332_v15 = vpack.c.b16 %v1316_v23, %v1316_v23  ;;  %v1333_v40 = vpack.c.b16 %v1317_v42, %v1317_v42  ;;  %v1063_v24 = vpack.c.bf16 %v998_v63, %v998_v63  ;;  %v1754_v53 = vsel %vm973_vm12, %v1738_v28, %v1746_v29  ;;  %v1250_v0 = vpop.permute.xlu1 %1249  ;;  %v7793_v63 = vld [vmem:[%s12262_s2 + $0x20] sm:$0xff] }
 0x268   : > { %v1128_v25 = vunpack.c.l.b16 %v1064_v26  ;;  %v1771_v34 = vsel %vm12378_vm3, 0.0, %v1762_v33  ;;  %v964_v22 = vrot.slane %v9384_v41, 7  ;;  %v972_v13 = vrot.slane %v9379_v17, 7  ;;  %3042 = vmatpush.bf16.msrb.mxu0 %v7793_v63 }
 0x269   : > { %1365 = vst.msk [vmem:[#allocation2 + $0x38] sm:$0xf] %vm12277_vm5, %v1332_v15  ;;  %v1127_v39 = vunpack.c.l.b16 %v1063_v24  ;;  %v1140_v58 = vpack.c.b16 %v1130_v56, %v1129_v43  ;;  %v1835_v1 = vpack.c.bf16 %v1771_v34, %v1771_v34  ;;  %v1836_v10 = vpack.c.bf16 %v1754_v53, %v1754_v53  ;;  %v7821_v43 = vld [vmem:[%s12262_s2 + $0x80] sm:$0xff] }
 0x26a   : > { %1366 = vst.msk [vmem:[#allocation2 + $0x3c] sm:$0xf] %vm12277_vm5, %v1333_v40  ;;  %v989_v5 = vsel %vm973_vm12, %v972_v13, %v964_v22  ;;  %v981_v19 = vsel %vm973_vm12, %v964_v22, %v972_v13  ;;  %v1744_v57 = vrot.slane %v9799_v4, 7  ;;  %v1752_v2 = vrot.slane %v9810_v61, 7  ;;  %v7808_v4 = vld [vmem:[%s12262_s2 + $0x58] sm:$0xff]  ;;  %3220 = vmatpush.bf16.msrb.mxu1 %v7821_v43 }
 0x26b   : > { %v1139_v44 = vpack.c.b16 %v1128_v25, %v1127_v39  ;;  %v1272_v49 = vsel %vm12379_vm8, %v1140_v58, %v9939_v31  ;;  %v7768_v17 = vld [vmem:[#allocation2 + $0x18] sm:$0xff]  ;;  %v1004_v9 = vsel %vm12381_vm10, 0.0, %v989_v5  ;;  %v1899_v7 = vunpack.c.l.b16 %v1835_v1  ;;  %2892 = vmatpush.bf16.msra.mxu3 %v7808_v4  ;;  %v7807_v25 = vld [vmem:[%s12262_s2 + $0x50] sm:$0xff]  ;;  %vm12391_vm8 = vmmov %vm12380_vm0 }
 0x26c   : > { %v1291_v47 = vsel %vm1279_vm1, %v1272_v49, %v1250_v0  ;;  %7002 = vmatmul.msk.bf16.gmra.mxu2 %vm2280_vm9, %v7768_v17  ;;  %v1900_v45 = vunpack.c.l.b16 %v1836_v10  ;;  %v1069_v30 = vpack.c.bf16 %v1004_v9, %v1004_v9  ;;  %v1760_v51 = vsel %vm973_vm12, %v1744_v57, %v1752_v2  ;;  %v12385_v9 = vld [vmem:[#allocation13_spill] sm:$0xff]  ;;  %vm12393_vm10 = vmmov %vm12384_vm2 }
 0x26d   : > { %v1269_v41 = vsel %vm12380_vm0, %v1139_v44, %v1192_v46  ;;  %v1314_v50 = vunpack.c.l.b16 %v1291_v47  ;;  %v1315_v28 = vunpack.c.h.b16 %v1291_v47  ;;  %v1768_v26 = vsel %vm973_vm12, %v1752_v2, %v1744_v57  ;;  %v12386_v47 = vld [vmem:[#allocation14_spill] sm:$0xff]  ;;  %vm12392_vm0 = vmmov %vm12378_vm3 }
 0x26e   : > { %v7753_v37 = vld [vmem:[#allocation2 + $0x8] sm:$0xff]  ;;  %v1289_v52 = vsel %vm1279_vm1, %v1269_v41, %v9951_v32  ;;  %v1070_v32 = vpack.c.bf16 %v981_v19, %v981_v19  ;;  %v1914_v46 = vpack.c.b16 %v1900_v45, %v1899_v7  ;;  %v1964_v23 = vpop.permute.xlu2 %1963  ;;  %v1133_v42 = vunpack.c.l.b16 %v1069_v30  ;;  %v7741_v41 = vld [vmem:[#allocation2 + $0x10] sm:$0xff] }
 0x26f   : > { %v7740_v27 = vld [vmem:[#allocation2 + $0x8] sm:$0xff]  ;;  %6861 = vmatmul.msk.bf16.vlgmr.msra.gmra.mxu0 %vm2280_vm9, %v7753_v37  ;;  %v1312_v31 = vunpack.c.l.b16 %v1289_v52  ;;  %v1313_v16 = vunpack.c.h.b16 %v1289_v52  ;;  %v1330_v8 = vpack.c.b16 %v1314_v50, %v1314_v50  ;;  %v1331_v6 = vpack.c.b16 %v1315_v28, %v1315_v28  ;;  %2893 = vmatpush.bf16.msra.mxu3 %v7807_v25 }
 0x270   : > { %6926 = vmatmul.msk.bf16.gmra.mxu1 %vm2280_vm9, %v7740_v27  ;;  %v1134_v11 = vunpack.c.l.b16 %v1070_v32  ;;  %v1783_v61 = vsel %vm12382_vm13, 0.0, %v1768_v26  ;;  %v1848_v15 = vpack.c.bf16 %v1760_v51, %v1760_v51  ;;  %v2038_v40 = vsel %vm12383_vm14, %v1914_v46, %v1964_v23  ;;  %v7754_v27 = vld [vmem:[#allocation2 + $0x10] sm:$0xff]  ;;  %vm12394_vm13 = vmmov %vm12384_vm2 }
 0x271   : > { %v1328_v29 = vpack.c.b16 %v1312_v31, %v1312_v31  ;;  %v1329_v55 = vpack.c.b16 %v1313_v16, %v1313_v16  ;;  %1363 = vst.msk [vmem:[#allocation2 + $0x30] sm:$0xf] %vm12277_vm5, %v1330_v8  ;;  %v1847_v56 = vpack.c.bf16 %v1783_v61, %v1783_v61  ;;  %v1742_v58 = vrot.slane %v9859_v38, 7  ;;  %vm12395_vm14 = vmmov %vm12392_vm0 }
 0x272   : > { %1364 = vst.msk [vmem:[#allocation2 + $0x34] sm:$0xf] %vm12277_vm5, %v1331_v6  ;;  %v10060_v53 = vunpack.c.l.b16 %v1848_v15  ;;  %v1142_v22 = vpack.c.b16 %v1134_v11, %v1133_v42  ;;  %v1750_v38 = vrot.slane %v9869_v60, 7  ;;  %v1737_v52 = vrot.slane %v12385_v9, 7 }
 0x273   : > { %1361 = vst.msk [vmem:[#allocation2 + $0x28] sm:$0xf] %vm12277_vm5, %v1328_v29  ;;  %v10062_v13 = vunpack.c.l.b16 %v1847_v56  ;;  %v1745_v19 = vrot.slane %v12386_v47, 7  ;;  %v1741_v32 = vrot.slane %v9525_v20, 7  ;;  %v1749_v6 = vrot.slane %v9530_v62, 7 }
 0x274   : > { %1362 = vst.msk [vmem:[#allocation2 + $0x2c] sm:$0xf] %vm12277_vm5, %v1329_v55  ;;  %v1758_v16 = vsel %vm973_vm12, %v1742_v58, %v1750_v38  ;;  %v1766_v50 = vsel %vm973_vm12, %v1750_v38, %v1742_v58  ;;  %v1739_v62 = vrot.slane %v9565_v36, 7  ;;  %v1747_v4 = vrot.slane %v9588_v59, 7  ;;  %v7806_v36 = vld [vmem:[%s12262_s2 + $0x48] sm:$0xff] }
 0x275   : > { %v1920_v5 = vpack.c.b16 %v10060_v53, %v10062_v13  ;;  %v1844_v7 = vpack.c.bf16 %v1758_v16, %v1758_v16  ;;  %v1779_v60 = vsel %vm12387_vm4, 0.0, %v1766_v50  ;;  %v1761_v30 = vsel %vm973_vm12, %v1745_v19, %v1737_v52  ;;  %2894 = vmatpush.bf16.msra.mxu3 %v7806_v36  ;;  %v7755_v50 = vld [vmem:[#allocation2 + $0x18] sm:$0xff]  ;;  %vm12396_vm4 = vmmov %vm12384_vm2 }
 0x276   : > { %v1843_v45 = vpack.c.bf16 %v1779_v60, %v1779_v60  ;;  %v1753_v55 = vsel %vm973_vm12, %v1737_v52, %v1745_v19  ;;  %v1769_v8 = vsel %vm12388_vm11, 0.0, %v1761_v30  ;;  %v1765_v23 = vsel %vm973_vm12, %v1749_v6, %v1741_v32  ;;  %v7804_v60 = vld [vmem:[%s12262_s2 + $0x38] sm:$0xff]  ;;  %vm12397_vm11 = vmmov %vm12384_vm2 }
 0x277   : > { %v2020_v33 = vpop.permute.xlu0 %2019  ;;  %v10085_v28 = vunpack.c.l.b16 %v1844_v7  ;;  %v1833_v2 = vpack.c.bf16 %v1769_v8, %v1769_v8  ;;  %v1834_v46 = vpack.c.bf16 %v1753_v55, %v1753_v55  ;;  %v1757_v26 = vsel %vm973_vm12, %v1741_v32, %v1749_v6  ;;  %v7742_v7 = vld [vmem:[#allocation2 + $0x18] sm:$0xff] }
 0x278   : > { %v2060_v24 = vsel %vm1279_vm1, %v2038_v40, %v2020_v33  ;;  %v10089_v29 = vunpack.c.l.b16 %v1843_v45  ;;  %v1777_v20 = vsel %vm12389_vm6, 0.0, %v1765_v23  ;;  %v1842_v15 = vpack.c.bf16 %v1757_v26, %v1757_v26  ;;  %v7792_v45 = vld [vmem:[%s12262_s2 + $0x18] sm:$0xff]  ;;  %vm12398_vm6 = vmmov %vm12384_vm2 }
 0x279   : > { %v2083_v34 = vunpack.c.l.b16 %v2060_v24  ;;  %v2084_v39 = vunpack.c.h.b16 %v2060_v24  ;;  %v1897_v42 = vunpack.c.l.b16 %v1833_v2  ;;  %v1898_v11 = vunpack.c.l.b16 %v1834_v46  ;;  %v7769_v24 = vld [vmem:[#allocation2 + $0x20] sm:$0xff]  ;;  %v7820_v8 = vld [vmem:[%s12262_s2 + $0x78] sm:$0xff]  ;;  %v7803_v2 = vld [vmem:[%s12262_s2 + $0x30] sm:$0xff]  ;;  %3043 = vmatpush.bf16.msrb.mxu0 %v7792_v45 }
 0x27a   : > { %v1198_v37 = vpop.permute.xlu1 %1197  ;;  %v1918_v57 = vpack.c.b16 %v10085_v28, %v10089_v29  ;;  %v1841_v61 = vpack.c.bf16 %v1777_v20, %v1777_v20  ;;  %v1763_v63 = vsel %vm973_vm12, %v1747_v4, %v1739_v62  ;;  %v1740_v56 = vrot.slane %v9409_v48, 7  ;;  %v7805_v48 = vld [vmem:[%s12262_s2 + $0x40] sm:$0xff]  ;;  %3221 = vmatpush.bf16.msrb.mxu1 %v7820_v8 }
 0x27b   : > { %v2099_v44 = vpack.c.b16 %v2083_v34, %v2083_v34  ;;  %v2100_v1 = vpack.c.b16 %v2084_v39, %v2084_v39  ;;  %v1278_v10 = vsel %vm12384_vm2, %v1142_v22, %v1198_v37  ;;  %v1913_v33 = vpack.c.b16 %v1898_v11, %v1897_v42  ;;  %2895 = vmatpush.bf16.msra.mxu3 %v7805_v48  ;;  %v7819_v48 = vld [vmem:[%s12262_s2 + $0x70] sm:$0xff] }
 0x27c   : > { %v1295_v49 = vsel %vm1279_vm1, %v1278_v10, %v10015_v14  ;;  %v1905_v59 = vunpack.c.l.b16 %v1841_v61  ;;  %v1906_v34 = vunpack.c.l.b16 %v1842_v15  ;;  %v1748_v39 = vrot.slane %v9416_v21, 7  ;;  %7003 = vmatmul.msk.bf16.gmra.mxu2 %vm2280_vm9, %v7769_v24 }
 0x27d   : > { %2132 = vst.msk [vmem:[#allocation2 + $0x50] sm:$0xf] %vm12277_vm5, %v2099_v44  ;;  %v1318_v17 = vunpack.c.l.b16 %v1295_v49  ;;  %v1319_v0 = vunpack.c.h.b16 %v1295_v49  ;;  %v2035_v43 = vsel %vm12390_vm7, %v1913_v33, %v10023_v18  ;;  %v1755_v18 = vsel %vm973_vm12, %v1739_v62, %v1747_v4  ;;  %v7770_v4 = vld [vmem:[#allocation2 + $0x28] sm:$0xff]  ;;  %vm12399_vm7 = vmmov %vm12384_vm2 }
 0x27e   : > { %2133 = vst.msk [vmem:[#allocation2 + $0x54] sm:$0xf] %vm12277_vm5, %v2100_v1  ;;  %v1773_v58 = vsel %vm12378_vm3, 0.0, %v1763_v63  ;;  %v1917_v10 = vpack.c.b16 %v1906_v34, %v1905_v59  ;;  %v1764_v49 = vsel %vm973_vm12, %v1748_v39, %v1740_v56  ;;  %v1756_v9 = vsel %vm973_vm12, %v1740_v56, %v1748_v39  ;;  %v7756_v39 = vld [vmem:[#allocation2 + $0x20] sm:$0xff]  ;;  %3222 = vmatpush.bf16.msrb.mxu1 %v7819_v48  ;;  %vm12400_vm3 = vmmov %vm12384_vm2 }
 0x27f   : > { %6862 = vmatmul.msk.bf16.gmra.mxu0 %vm2280_vm9, %v7754_v27  ;;  %v1334_v31 = vpack.c.b16 %v1318_v17, %v1318_v17  ;;  %v1335_v14 = vpack.c.b16 %v1319_v0, %v1319_v0  ;;  %v1838_v17 = vpack.c.bf16 %v1755_v18, %v1755_v18  ;;  %v1775_v52 = vsel %vm12392_vm0, 0.0, %v1764_v49  ;;  %2896 = vmatpush.bf16.msra.mxu3 %v7804_v60  ;;  %v7790_v18 = vld [vmem:[%s12262_s2 + $0x8] sm:$0xff]  ;;  %vm12402_vm0 = vmmov %vm12384_vm2 }
 0x280   : > { %6927 = vmatmul.msk.bf16.gmra.mxu1 %vm2280_vm9, %v7741_v41  ;;  %v1837_v41 = vpack.c.bf16 %v1773_v58, %v1773_v58  ;;  %v1839_v32 = vpack.c.bf16 %v1775_v52, %v1775_v52  ;;  %v1840_v6 = vpack.c.bf16 %v1756_v9, %v1756_v9 }
 0x281   : > { %1367 = vst.msk [vmem:[#allocation2 + $0x40] sm:$0xf] %vm12277_vm5, %v1334_v31  ;;  %v10109_v40 = vpop.permute.xlu0 %1967  ;;  %v1902_v16 = vunpack.c.l.b16 %v1838_v17  ;;  %v7744_v17 = vld [vmem:[#allocation2 + $0x28] sm:$0xff] }
 0x282   : > { %1368 = vst.msk [vmem:[#allocation2 + $0x44] sm:$0xf] %vm12277_vm5, %v1335_v14  ;;  %v2018_v25 = vpop.permute.xlu1 %2017  ;;  %v1901_v14 = vunpack.c.l.b16 %v1837_v41  ;;  %v1903_v26 = vunpack.c.l.b16 %v1839_v32  ;;  %v1904_v20 = vunpack.c.l.b16 %v1840_v6  ;;  %v7757_v41 = vld [vmem:[#allocation2 + $0x28] sm:$0xff] }
 0x283   : > { %v2058_v22 = vsel %vm1279_vm1, %v2035_v43, %v2018_v25  ;;  %2897 = vmatpush.bf16.msra.mxu3 %v7803_v2 }
 0x284   : > { %v2081_v37 = vunpack.c.l.b16 %v2058_v22  ;;  %v2082_v27 = vunpack.c.h.b16 %v2058_v22  ;;  %v1915_v46 = vpack.c.b16 %v1902_v16, %v1901_v14  ;;  %v1916_v43 = vpack.c.b16 %v1904_v20, %v1903_v26  ;;  %v7743_v22 = vld [vmem:[#allocation2 + $0x20] sm:$0xff] }
 0x285   : > { %v7789_v14 = vld [vmem:[%s12262_s2] sm:$0xff] }
 0x286   : > { %v2097_v1 = vpack.c.b16 %v2081_v37, %v2081_v37  ;;  %v2098_v21 = vpack.c.b16 %v2082_v27, %v2082_v27  ;;  %v2044_v56 = vsel %vm12394_vm13, %v1916_v43, %v10109_v40  ;;  %v7771_v40 = vld [vmem:[#allocation2 + $0x30] sm:$0xff]  ;;  %v7817_v16 = vld [vmem:[%s12262_s2 + $0x60] sm:$0xff]  ;;  %vm12404_vm13 = vmmov %vm12402_vm0 }
 0x287   : > { %v7796_v37 = vld [vmem:[#allocation2 + $0x50] sm:$0xff] }
 0x288   : > { %2130 = vst.msk [vmem:[#allocation2 + $0x48] sm:$0xf] %vm12277_vm5, %v2097_v1  ;;  %v7791_v27 = vld [vmem:[%s12262_s2 + $0x10] sm:$0xff]  ;;  %v1743_v1 = vrot.slane %v9614_v35, 7 }
 0x289   : > { %2131 = vst.msk [vmem:[#allocation2 + $0x4c] sm:$0xf] %vm12277_vm5, %v2098_v21  ;;  %3044 = vmatpush.bf16.msrb.mxu0 %v7791_v27  ;;  %v1751_v21 = vrot.slane %v9630_v54, 7  ;;  %v7772_v54 = vld [vmem:[#allocation2 + $0x38] sm:$0xff] }
 0x28b   : > { %v1767_v49 = vsel %vm973_vm12, %v1751_v21, %v1743_v1 }
 0x28c   : > { %v10101_v51 = vpop.permute.xlu2 %2021  ;;  %7004 = vmatmul.msk.bf16.gmra.mxu2 %vm2280_vm9, %v7770_v4  ;;  %v1781_v35 = vsel %vm12395_vm14, 0.0, %v1767_v49  ;;  %vm12405_vm14 = vmmov %vm12402_vm0 }
 0x28d   : > { %3045 = vmatpush.bf16.msrb.mxu0 %v7790_v18  ;;  %v1845_v52 = vpack.c.bf16 %v1781_v35, %v1781_v35 }
 0x28f   : > { %6863 = vmatmul.msk.bf16.gmra.mxu0 %vm2280_vm9, %v7755_v50  ;;  %v1909_v13 = vunpack.c.l.b16 %v1845_v52 }
 0x290   : > { %6928 = vmatmul.msk.bf16.gmra.mxu1 %vm2280_vm9, %v7742_v7  ;;  %v7795_v11 = vld [vmem:[#allocation2 + $0x48] sm:$0xff] }
 0x291   : > { %7077 = vmatmul.msk.bf16.vlgmr.msra.gmra.mxu3 %vm2280_vm9, %v7795_v11  ;;  %3046 = vmatpush.bf16.msrb.mxu0 %v7789_v14 }
 0x294   : > { %v1970_v44 = vpop.permute.xlu2 %1969 }
 0x295   : > { %v2047_v0 = vsel %vm12391_vm8, %v1917_v10, %v1970_v44  ;;  %v7818_v44 = vld [vmem:[%s12262_s2 + $0x68] sm:$0xff]  ;;  %vm12401_vm8 = vmmov %vm12384_vm2 }
 0x296   : > { %3223 = vmatpush.bf16.msrb.mxu1 %v7818_v44 }
 0x29a   : > { %v2026_v38 = vpop.permute.xlu0 %2025  ;;  %3224 = vmatpush.bf16.msrb.mxu1 %v7817_v16 }
 0x29b   : > { %v2066_v47 = vsel %vm1279_vm1, %v2047_v0, %v2026_v38  ;;  %v1759_v0 = vsel %vm973_vm12, %v1743_v1, %v1751_v21 }
 0x29c   : > { %v2089_v19 = vunpack.c.l.b16 %v2066_v47  ;;  %v2090_v31 = vunpack.c.h.b16 %v2066_v47  ;;  %7005 = vmatmul.msk.bf16.gmra.mxu2 %vm2280_vm9, %v7771_v40  ;;  %v1846_v47 = vpack.c.bf16 %v1759_v0, %v1759_v0  ;;  %v7760_v40 = vld [vmem:[#allocation2 + $0x40] sm:$0xff] }
 0x29e   : > { %v2105_v30 = vpack.c.b16 %v2089_v19, %v2089_v19  ;;  %v2106_v55 = vpack.c.b16 %v2090_v31, %v2090_v31 }
 0x29f   : > { %6864 = vmatmul.msk.bf16.gmra.mxu0 %vm2280_vm9, %v7756_v39 }
 0x2a0   : > { %2138 = vst.msk [vmem:[#allocation2 + $0x68] sm:$0xf] %vm12277_vm5, %v2105_v30  ;;  %v1966_v23 = vpop.permute.xlu1 %1965  ;;  %6929 = vmatmul.msk.bf16.gmra.mxu1 %vm2280_vm9, %v7743_v22 }
 0x2a1   : > { %2139 = vst.msk [vmem:[#allocation2 + $0x6c] sm:$0xf] %vm12277_vm5, %v2106_v55  ;;  %v2041_v42 = vsel %vm12393_vm10, %v1915_v46, %v1966_v23  ;;  %7078 = vmatmul.msk.bf16.gmra.mxu3 %vm2280_vm9, %v7796_v37  ;;  %v7809_v37 = vld [vmem:[#allocation2 + $0x50] sm:$0xff]  ;;  %vm12403_vm10 = vmmov %vm12402_vm0 }
 0x2a2   : > { %v2062_v62 = vsel %vm1279_vm1, %v2041_v42, %v10101_v51  ;;  %v7745_v42 = vld [vmem:[#allocation2 + $0x30] sm:$0xff] }
 0x2a3   : > { %v2085_v61 = vunpack.c.l.b16 %v2062_v62  ;;  %v2086_v15 = vunpack.c.h.b16 %v2062_v62 }
 0x2a5   : > { %v2101_v33 = vpack.c.b16 %v2085_v61, %v2085_v61  ;;  %v2102_v63 = vpack.c.b16 %v2086_v15, %v2086_v15  ;;  %v7773_v61 = vld [vmem:[#allocation2 + $0x40] sm:$0xff] }
 0x2a7   : > { %2134 = vst.msk [vmem:[#allocation2 + $0x58] sm:$0xf] %vm12277_vm5, %v2101_v33  ;;  %v7759_v33 = vld [vmem:[#allocation2 + $0x38] sm:$0xff] }
 0x2a8   : > { %2135 = vst.msk [vmem:[#allocation2 + $0x5c] sm:$0xf] %vm12277_vm5, %v2102_v63  ;;  %v2024_v24 = vpop.permute.xlu1 %2023  ;;  %v7746_v63 = vld [vmem:[#allocation2 + $0x38] sm:$0xff] }
 0x2a9   : > { %v2064_v51 = vsel %vm1279_vm1, %v2044_v56, %v2024_v24  ;;  %v1974_v10 = vpop.permute.xlu0 %1973  ;;  %v7774_v56 = vld [vmem:[#allocation2 + $0x48] sm:$0xff] }
 0x2aa   : > { %v2087_v25 = vunpack.c.l.b16 %v2064_v51  ;;  %v2088_v36 = vunpack.c.h.b16 %v2064_v51  ;;  %v7799_v24 = vld [vmem:[#allocation2 + $0x68] sm:$0xff] }
 0x2ac   : > { %v2103_v59 = vpack.c.b16 %v2087_v25, %v2087_v25  ;;  %v2104_v34 = vpack.c.b16 %v2088_v36, %v2088_v36  ;;  %7006 = vmatmul.msk.bf16.gmra.mxu2 %vm2280_vm9, %v7772_v54 }
 0x2ae   : > { %2136 = vst.msk [vmem:[#allocation2 + $0x60] sm:$0xf] %vm12277_vm5, %v2103_v59 }
 0x2af   : > { %2137 = vst.msk [vmem:[#allocation2 + $0x64] sm:$0xf] %vm12277_vm5, %v2104_v34  ;;  %6865 = vmatmul.msk.bf16.gmra.mxu0 %vm2280_vm9, %v7757_v41  ;;  %v7797_v9 = vld [vmem:[#allocation2 + $0x58] sm:$0xff]  ;;  %v10230_v34 = vld [vmem:[%s12263_s3] ss:$0 sm:$0xff] }
 0x2b0   : > { %6930 = vmatmul.msk.bf16.gmra.mxu1 %vm2280_vm9, %v7744_v17  ;;  %v7810_v54 = vld [vmem:[#allocation2 + $0x58] sm:$0xff] }
 0x2b1   : > { %7079 = vmatmul.msk.bf16.gmra.mxu3 %vm2280_vm9, %v7797_v9 }
 0x2b5   : > { %v2028_v58 = vpop.permute.xlu2 %2027 }
 0x2b6   : > { %v7798_v15 = vld [vmem:[#allocation2 + $0x60] sm:$0xff] }
 0x2bc   : > { %7007 = vmatmul.msk.bf16.gmra.mxu2 %vm2280_vm9, %v7773_v61 }
 0x2bd   : > { %v1976_v38 = vpop.permute.xlu2 %1975 }
 0x2be   : > { %v2056_v19 = vsel %vm12384_vm2, %v1920_v5, %v1976_v38  ;;  %v1910_v5 = vunpack.c.l.b16 %v1846_v47  ;;  %v7781_v38 = vld [vmem:[#allocation2 + $0x40] sm:$0xff]  ;;  %vm12406_vm2 = vmmov %vm12402_vm0 }
 0x2c0   : > { %v1919_v23 = vpack.c.b16 %v1910_v5, %v1909_v13  ;;  %6931 = vmatmul.msk.bf16.gmra.mxu1 %vm2280_vm9, %v7745_v42 }
 0x2c1   : > { %7080 = vmatmul.msk.bf16.gmra.mxu3 %vm2280_vm9, %v7798_v15 }
 0x2c2   : > { %v2053_v28 = vsel %vm12397_vm11, %v1919_v23, %v1974_v10  ;;  %vm12408_vm11 = vmmov %vm12402_vm0 }
 0x2c7   : > { %v2032_v31 = vpop.permute.xlu0 %2031 }
 0x2c8   : > { %v2072_v50 = vsel %vm1279_vm1, %v2056_v19, %v2032_v31  ;;  %v1972_v7 = vpop.permute.xlu1 %1971 }
 0x2c9   : > { %v2095_v60 = vunpack.c.l.b16 %v2072_v50  ;;  %v2096_v45 = vunpack.c.h.b16 %v2072_v50  ;;  %v2050_v53 = vsel %vm12396_vm4, %v1918_v57, %v1972_v7  ;;  %v7758_v57 = vld [vmem:[#allocation2 + $0x30] sm:$0xff]  ;;  %v7782_v50 = vld [vmem:[#allocation2 + $0x48] sm:$0xff]  ;;  %v7811_v7 = vld [vmem:[#allocation2 + $0x60] sm:$0xff] }
 0x2ca   : > { %v2068_v30 = vsel %vm1279_vm1, %v2050_v53, %v2028_v58  ;;  %6866 = vmatmul.msk.bf16.gmra.mxu0 %vm2280_vm9, %v7758_v57  ;;  %vm12407_vm4 = vmmov %vm12402_vm0 }
 0x2cb   : > { %v2111_v55 = vpack.c.b16 %v2095_v60, %v2095_v60  ;;  %v2112_v8 = vpack.c.b16 %v2096_v45, %v2096_v45  ;;  %v2091_v32 = vunpack.c.l.b16 %v2068_v30  ;;  %v2092_v6 = vunpack.c.h.b16 %v2068_v30 }
 0x2cc   : > { %7008 = vmatmul.msk.bf16.gmra.mxu2 %vm2280_vm9, %v7774_v56 }
 0x2cd   : > { %2144 = vst.msk [vmem:[#allocation2 + $0x80] sm:$0xf] %vm12277_vm5, %v2111_v55  ;;  %v2107_v2 = vpack.c.b16 %v2091_v32, %v2091_v32  ;;  %v2108_v46 = vpack.c.b16 %v2092_v6, %v2092_v6  ;;  %v7812_v32 = vld [vmem:[#allocation2 + $0x68] sm:$0xff] }
 0x2ce   : > { %2145 = vst.msk [vmem:[#allocation2 + $0x84] sm:$0xf] %vm12277_vm5, %v2112_v8  ;;  %v7783_v8 = vld [vmem:[#allocation2 + $0x50] sm:$0xff] }
 0x2cf   : > { %2140 = vst.msk [vmem:[#allocation2 + $0x70] sm:$0xf] %vm12277_vm5, %v2107_v2 }
 0x2d0   : > { %2141 = vst.msk [vmem:[#allocation2 + $0x74] sm:$0xf] %vm12277_vm5, %v2108_v46  ;;  %6932 = vmatmul.msk.bf16.gmra.mxu1 %vm2280_vm9, %v7746_v63 }
 0x2d1   : > { %7081 = vmatmul.msk.bf16.gmra.mxu3 %vm2280_vm9, %v7799_v24 }
 0x2d2   : > { %v2030_v29 = vpop.permute.xlu1 %2029 }
 0x2d3   : > { %v2070_v11 = vsel %vm1279_vm1, %v2053_v28, %v2030_v29 }
 0x2d4   : > { %v2093_v26 = vunpack.c.l.b16 %v2070_v11  ;;  %v2094_v20 = vunpack.c.h.b16 %v2070_v11 }
 0x2d5   : > { %v7802_v45 = vld [vmem:[#allocation2 + $0x80] sm:$0xff] }
 0x2d6   : > { %v2109_v62 = vpack.c.b16 %v2093_v26, %v2093_v26  ;;  %v2110_v4 = vpack.c.b16 %v2094_v20, %v2094_v20 }
 0x2d7   : > { %v7800_v44 = vld [vmem:[#allocation2 + $0x70] sm:$0xff] }
 0x2d8   : > { %2142 = vst.msk [vmem:[#allocation2 + $0x78] sm:$0xf] %vm12277_vm5, %v2109_v62  ;;  %v7784_v62 = vld [vmem:[#allocation2 + $0x58] sm:$0xff] }
 0x2d9   : > { %2143 = vst.msk [vmem:[#allocation2 + $0x7c] sm:$0xf] %vm12277_vm5, %v2110_v4  ;;  %v7813_v4 = vld [vmem:[#allocation2 + $0x70] sm:$0xff] }
 0x2da   : > { %6867 = vmatmul.msk.bf16.gmra.mxu0 %vm2280_vm9, %v7759_v33 }
 0x2dd   : > { %v2463_v43 = vpop.f32.mrf.mxu1 }
 0x2df   : > { %v2642_v51 = vpop.f32.mrf.mxu2 }
 0x2e0   : > { %7217 = vmatmul.msk.bf16.vlgmr.msrb.gmra.mxu1 %vm2280_vm9, %v7809_v37  ;;  %v7801_v19 = vld [vmem:[#allocation2 + $0x78] sm:$0xff] }
 0x2e1   : > { %7082 = vmatmul.msk.bf16.gmra.mxu3 %vm2280_vm9, %v7800_v44 }
 0x2e5   : > { %v2465_v25 = vpop.f32.mrf.mxu1 }
 0x2e7   : > { %v2644_v27 = vpop.f32.mrf.mxu2 }
 0x2ea   : > { %6868 = vmatmul.msk.bf16.gmra.mxu0 %vm2280_vm9, %v7760_v40  ;;  %v7814_v40 = vld [vmem:[#allocation2 + $0x78] sm:$0xff] }
 0x2ec   : > { %v2314_v36 = vpop.f32.mrf.mxu0 }
 0x2ed   : > { %v2464_v59 = vadd.f32 %v2463_v43, %v2314_v36  ;;  %v2468_v58 = vpop.f32.mrf.mxu1 }
 0x2ef   : > { %v2682_v39 = vadd.f32 %v2642_v51, %v2464_v59  ;;  %v2647_v10 = vpop.f32.mrf.mxu2 }
 0x2f0   : > { %7218 = vmatmul.msk.bf16.gmra.mxu1 %vm2280_vm9, %v7810_v54 }
 0x2f1   : > { %v2701_v22 = vadd.f32 %v10230_v34, %v2682_v39  ;;  %7083 = vmatmul.msk.bf16.gmra.mxu3 %vm2280_vm9, %v7801_v19 }
 0x2f3   : > { %2717 = vst.msk [vmem:[#allocation3] sm:$0xff] %vm12398_vm6, %v2701_v22  ;;  %v7785_v22 = vld [vmem:[#allocation2 + $0x60] sm:$0xff]  ;;  %vm12409_vm6 = vmmov %vm12402_vm0 }
 0x2f4   : > { %v2316_v48 = vpop.f32.mrf.mxu0 }
 0x2f5   : > { %v2466_v18 = vadd.f32 %v2465_v25, %v2316_v48  ;;  %v2470_v0 = vpop.f32.mrf.mxu1 }
 0x2f7   : > { %v2683_v1 = vadd.f32 %v2644_v27, %v2466_v18  ;;  %v2649_v47 = vpop.f32.mrf.mxu2 }
 0x2f9   : > { %v2702_v21 = vadd.f32 %v10230_v34, %v2683_v1 }
 0x2fa   : > { %7141 = vmatmul.msk.bf16.vlgmr.msrb.gmra.mxu0 %vm2280_vm9, %v7781_v38 }
 0x2fb   : > { %2718 = vst.msk [vmem:[#allocation3 + $0x8] sm:$0xff] %vm12399_vm7, %v2702_v21  ;;  %vm12410_vm7 = vmmov %vm12402_vm0 }
 0x2fc   : > { %v2319_v49 = vpop.f32.mrf.mxu0 }
 0x2fd   : > { %v2469_v41 = vadd.f32 %v2468_v58, %v2319_v49  ;;  %v2473_v16 = vpop.f32.mrf.mxu1 }
 0x2ff   : > { %v2684_v17 = vadd.f32 %v2647_v10, %v2469_v41  ;;  %v2652_v53 = vpop.f32.mrf.mxu2 }
 0x300   : > { %7219 = vmatmul.msk.bf16.gmra.mxu1 %vm2280_vm9, %v7811_v7 }
 0x301   : > { %v2703_v35 = vadd.f32 %v10230_v34, %v2684_v17  ;;  %7084 = vmatmul.msk.bf16.gmra.mxu3 %vm2280_vm9, %v7802_v45 }
 0x303   : > { %2719 = vst.msk [vmem:[#allocation3 + $0x10] sm:$0xff] %vm12400_vm3, %v2703_v35  ;;  %v7815_v35 = vld [vmem:[#allocation2 + $0x80] sm:$0xff]  ;;  %vm12411_vm3 = vmmov %vm12402_vm0 }
 0x304   : > { %v2321_v9 = vpop.f32.mrf.mxu0 }
 0x305   : > { %v2471_v52 = vadd.f32 %v2470_v0, %v2321_v9  ;;  %v2475_v60 = vpop.f32.mrf.mxu1  ;;  %v7786_v0 = vld [vmem:[#allocation2 + $0x68] sm:$0xff] }
 0x307   : > { %v2685_v31 = vadd.f32 %v2649_v47, %v2471_v52  ;;  %v2654_v2 = vpop.f32.mrf.mxu2 }
 0x309   : > { %v2704_v14 = vadd.f32 %v10230_v34, %v2685_v31 }
 0x30a   : > { %7142 = vmatmul.msk.bf16.gmra.mxu0 %vm2280_vm9, %v7782_v50  ;;  %v7816_v50 = vld [vmem:[#allocation2 + $0x88] sm:$0xff] }
 0x30b   : > { %2720 = vst.msk [vmem:[#allocation3 + $0x18] sm:$0xff] %vm12401_vm8, %v2704_v14  ;;  %vm12412_vm8 = vmmov %vm12402_vm0 }
 0x30c   : > { %v2324_v13 = vpop.f32.mrf.mxu0 }
 0x30d   : > { %v2478_v5 = vpop.f32.mrf.mxu1  ;;  %v2474_v30 = vadd.f32 %v2473_v16, %v2324_v13  ;;  %v7787_v13 = vld [vmem:[#allocation2 + $0x70] sm:$0xff] }
 0x30f   : > { %v2686_v55 = vadd.f32 %v2652_v53, %v2474_v30  ;;  %v2657_v42 = vpop.f32.mrf.mxu2 }
 0x310   : > { %7220 = vmatmul.msk.bf16.gmra.mxu1 %vm2280_vm9, %v7812_v32 }
 0x311   : > { %v2705_v6 = vadd.f32 %v10230_v34, %v2686_v55 }
 0x313   : > { %2721 = vst.msk [vmem:[#allocation3 + $0x20] sm:$0xff] %vm12402_vm0, %v2705_v6 }
 0x314   : > { %v2326_v46 = vpop.f32.mrf.mxu0  ;;  %v2899_v45 = vpop.f32.mrf.mxu3 }
 0x315   : > { %v2476_v23 = vadd.f32 %v2475_v60, %v2326_v46  ;;  %v2480_v28 = vpop.f32.mrf.mxu1 }
 0x317   : > { %v2687_v29 = vadd.f32 %v2654_v2, %v2476_v23  ;;  %v2659_v61 = vpop.f32.mrf.mxu2 }
 0x319   : > { %v2706_v57 = vadd.f32 %v10230_v34, %v2687_v29 }
 0x31a   : > { %7143 = vmatmul.msk.bf16.gmra.mxu0 %vm2280_vm9, %v7783_v8 }
 0x31b   : > { %2722 = vst.msk [vmem:[#allocation3 + $0x28] sm:$0xff] %vm12403_vm10, %v2706_v57  ;;  %vm12413_vm10 = vmmov %vm12402_vm0 }
 0x31c   : > { %v2329_v11 = vpop.f32.mrf.mxu0  ;;  %v2901_v2 = vpop.f32.mrf.mxu3 }
 0x31d   : > { %v2483_v26 = vpop.f32.mrf.mxu1  ;;  %v2479_v20 = vadd.f32 %v2478_v5, %v2329_v11  ;;  %v7788_v11 = vld [vmem:[#allocation2 + $0x78] sm:$0xff] }
 0x31f   : > { %v2688_v15 = vadd.f32 %v2657_v42, %v2479_v20  ;;  %v2662_v24 = vpop.f32.mrf.mxu2 }
 0x320   : > { %7221 = vmatmul.msk.bf16.gmra.mxu1 %vm2280_vm9, %v7813_v4 }
 0x321   : > { %v2707_v33 = vadd.f32 %v10230_v34, %v2688_v15 }
 0x323   : > { %2723 = vst.msk [vmem:[#allocation3 + $0x30] sm:$0xff] %vm12404_vm13, %v2707_v33  ;;  %vm12414_vm13 = vmmov %vm12402_vm0 }
 0x324   : > { %v2331_v63 = vpop.f32.mrf.mxu0  ;;  %v2904_v20 = vpop.f32.mrf.mxu3 }
 0x325   : > { %v2485_v43 = vpop.f32.mrf.mxu1  ;;  %v2481_v56 = vadd.f32 %v2480_v28, %v2331_v63 }
 0x327   : > { %v2689_v51 = vadd.f32 %v2659_v61, %v2481_v56  ;;  %v2664_v37 = vpop.f32.mrf.mxu2 }
 0x329   : > { %v2708_v25 = vadd.f32 %v10230_v34, %v2689_v51 }
 0x32a   : > { %7144 = vmatmul.msk.bf16.gmra.mxu0 %vm2280_vm9, %v7784_v62 }
 0x32b   : > { %2724 = vst.msk [vmem:[#allocation3 + $0x38] sm:$0xff] %vm12405_vm14, %v2708_v25  ;;  %vm12415_vm14 = vmmov %vm12402_vm0 }
 0x32c   : > { %v2334_v36 = vpop.f32.mrf.mxu0  ;;  %v2906_v56 = vpop.f32.mrf.mxu3 }
 0x32d   : > { %v2488_v59 = vpop.f32.mrf.mxu1  ;;  %v2484_v39 = vadd.f32 %v2483_v26, %v2334_v36 }
 0x32f   : > { %v2690_v27 = vadd.f32 %v2662_v24, %v2484_v39  ;;  %v2667_v1 = vpop.f32.mrf.mxu2 }
 0x330   : > { %7222 = vmatmul.msk.bf16.gmra.mxu1 %vm2280_vm9, %v7814_v40 }
 0x331   : > { %v2709_v48 = vadd.f32 %v10230_v34, %v2690_v27 }
 0x333   : > { %2725 = vst.msk [vmem:[#allocation3 + $0x40] sm:$0xff] %vm12406_vm2, %v2709_v48  ;;  %vm12416_vm2 = vmmov %vm12402_vm0 }
 0x334   : > { %v2336_v18 = vpop.f32.mrf.mxu0 }
 0x335   : > { %v2490_v58 = vpop.f32.mrf.mxu1  ;;  %v2486_v44 = vadd.f32 %v2485_v43, %v2336_v18 }
 0x337   : > { %v2691_v21 = vadd.f32 %v2664_v37, %v2486_v44  ;;  %v2669_v38 = vpop.f32.mrf.mxu2  ;;  %v2909_v37 = vpop.f32.mrf.mxu3 }
 0x339   : > { %v2710_v10 = vadd.f32 %v10230_v34, %v2691_v21 }
 0x33a   : > { %7145 = vmatmul.msk.bf16.gmra.mxu0 %vm2280_vm9, %v7785_v22 }
 0x33b   : > { %2726 = vst.msk [vmem:[#allocation3 + $0x48] sm:$0xff] %vm12407_vm4, %v2710_v10  ;;  %vm12417_vm4 = vmmov %vm12402_vm0 }
 0x33d   : > { %v2493_v41 = vpop.f32.mrf.mxu1 }
 0x33f   : > { %v2672_v14 = vpop.f32.mrf.mxu2  ;;  %v2911_v21 = vpop.f32.mrf.mxu3 }
 0x340   : > { %7223 = vmatmul.msk.bf16.gmra.mxu1 %vm2280_vm9, %v7815_v35 }
 0x345   : > { %v2495_v47 = vpop.f32.mrf.mxu1 }
 0x347   : > { %v2339_v49 = vpop.f32.mrf.mxu0  ;;  %v2674_v55 = vpop.f32.mrf.mxu2 }
 0x348   : > { %v2489_v17 = vadd.f32 %v2488_v59, %v2339_v49 }
 0x34a   : > { %v2692_v54 = vadd.f32 %v2667_v1, %v2489_v17  ;;  %7146 = vmatmul.msk.bf16.gmra.mxu0 %vm2280_vm9, %v7786_v0 }
 0x34c   : > { %v2711_v9 = vadd.f32 %v10230_v34, %v2692_v54 }
 0x34d   : > { %v2498_v60 = vpop.f32.mrf.mxu1 }
 0x34e   : > { %2727 = vst.msk [vmem:[#allocation3 + $0x50] sm:$0xff] %vm12408_vm11, %v2711_v9  ;;  %vm12418_vm11 = vmmov %vm12402_vm0 }
 0x34f   : > { %v2341_v52 = vpop.f32.mrf.mxu0  ;;  %v2677_v28 = vpop.f32.mrf.mxu2 }
 0x350   : > { %v2491_v19 = vadd.f32 %v2490_v58, %v2341_v52  ;;  %7224 = vmatmul.msk.bf16.gmra.mxu1 %vm2280_vm9, %v7816_v50 }
 0x352   : > { %v2693_v31 = vadd.f32 %v2669_v38, %v2491_v19  ;;  %v2914_v38 = vpop.f32.mrf.mxu3 }
 0x354   : > { %v2712_v16 = vadd.f32 %v10230_v34, %v2693_v31 }
 0x355   : > { %v2500_v32 = vpop.f32.mrf.mxu1 }
 0x356   : > { %2728 = vst.msk [vmem:[#allocation3 + $0x58] sm:$0xff] %vm12409_vm6, %v2712_v16  ;;  %vm12419_vm6 = vmmov %vm12402_vm0 }
 0x357   : > { %v2344_v7 = vpop.f32.mrf.mxu0  ;;  %v2679_v33 = vpop.f32.mrf.mxu2 }
 0x358   : > { %v2494_v53 = vadd.f32 %v2493_v41, %v2344_v7 }
 0x35a   : > { %v2694_v5 = vadd.f32 %v2672_v14, %v2494_v53  ;;  %7147 = vmatmul.msk.bf16.gmra.mxu0 %vm2280_vm9, %v7787_v13  ;;  %v2916_v31 = vpop.f32.mrf.mxu3 }
 0x35c   : > { %v2713_v30 = vadd.f32 %v10230_v34, %v2694_v5 }
 0x35d   : > { %v3226_v57 = vpop.f32.mrf.mxu1 }
 0x35e   : > { %2729 = vst.msk [vmem:[#allocation3 + $0x60] sm:$0xff] %vm12410_vm7, %v2713_v30  ;;  %vm12420_vm7 = vmmov %vm12402_vm0 }
 0x35f   : > { %v2346_v8 = vpop.f32.mrf.mxu0 }
 0x360   : > { %v2496_v6 = vadd.f32 %v2495_v47, %v2346_v8 }
 0x362   : > { %v2695_v46 = vadd.f32 %v2674_v55, %v2496_v6  ;;  %v2919_v13 = vpop.f32.mrf.mxu3 }
 0x364   : > { %v2714_v23 = vadd.f32 %v10230_v34, %v2695_v46 }
 0x365   : > { %v3228_v61 = vpop.f32.mrf.mxu1 }
 0x366   : > { %2730 = vst.msk [vmem:[#allocation3 + $0x68] sm:$0xff] %vm12411_vm3, %v2714_v23  ;;  %vm12421_vm3 = vmmov %vm12402_vm0 }
 0x367   : > { %v2349_v29 = vpop.f32.mrf.mxu0 }
 0x368   : > { %v2499_v42 = vadd.f32 %v2498_v60, %v2349_v29 }
 0x36a   : > { %v2696_v26 = vadd.f32 %v2677_v28, %v2499_v42  ;;  %7148 = vmatmul.msk.bf16.gmra.mxu0 %vm2280_vm9, %v7788_v11 }
 0x36c   : > { %v2715_v62 = vadd.f32 %v10230_v34, %v2696_v26 }
 0x36d   : > { %v3231_v51 = vpop.f32.mrf.mxu1 }
 0x36e   : > { %2731 = vst.msk [vmem:[#allocation3 + $0x70] sm:$0xff] %vm12412_vm8, %v2715_v62  ;;  %vm12422_vm8 = vmmov %vm12402_vm0 }
 0x36f   : > { %v2351_v4 = vpop.f32.mrf.mxu0 }
 0x370   : > { %v2501_v15 = vadd.f32 %v2500_v32, %v2351_v4 }
 0x372   : > { %v2697_v63 = vadd.f32 %v2679_v33, %v2501_v15 }
 0x374   : > { %v2716_v43 = vadd.f32 %v10230_v34, %v2697_v63 }
 0x375   : > { %v3233_v22 = vpop.f32.mrf.mxu1 }
 0x376   : > { %2732 = vst.msk [vmem:[#allocation3 + $0x78] sm:$0xff] %vm12402_vm0, %v2716_v43 }
 0x377   : > { %v3048_v24 = vpop.f32.mrf.mxu0 }
 0x378   : > { %v3049_v25 = vadd.f32 %v3048_v24, %v2899_v45 }
 0x37a   : > { %v3266_v36 = vadd.f32 %v3226_v57, %v3049_v25 }
 0x37c   : > { %v3282_v59 = vadd.f32 %v10230_v34, %v3266_v36  ;;  %v10306_v36 = vld [vmem:[#allocation3 + $0x8] sm:$0xff] }
 0x37d   : > { %v3236_v58 = vpop.f32.mrf.mxu1 }
 0x37e   : > { %3299 = vst.msk [vmem:[#allocation3 + $0x80] sm:$0xff] %vm12413_vm10, %v3282_v59  ;;  %vm12423_vm10 = vmmov %vm12402_vm0 }
 0x37f   : > { %v3050_v39 = vpop.f32.mrf.mxu0 }
 0x380   : > { %v3051_v40 = vadd.f32 %v3050_v39, %v2901_v2  ;;  %v2921_v2 = vpop.f32.mrf.mxu3  ;;  %v10308_v39 = vld [vmem:[#allocation3] sm:$0xff] }
 0x382   : > { %v3267_v27 = vadd.f32 %v3228_v61, %v3051_v40  ;;  %v10310_v40 = vld [vmem:[#allocation3 + $0x10] sm:$0xff] }
 0x384   : > { %v3283_v48 = vadd.f32 %v10230_v34, %v3267_v27 }
 0x385   : > { %v3238_v41 = vpop.f32.mrf.mxu1 }
 0x386   : > { %3300 = vst.msk [vmem:[#allocation3 + $0x88] sm:$0xff] %vm12414_vm13, %v3283_v48  ;;  %v3332_v48 = vsel %vm12423_vm10, %v10306_v36, 0.0  ;;  %vm12424_vm13 = vmmov %vm12402_vm0 }
 0x387   : > { %v3053_v18 = vpop.f32.mrf.mxu0  ;;  %vm12433_vm10 = vmmov %vm12402_vm0 }
 0x388   : > { %v3054_v44 = vadd.f32 %v3053_v18, %v2904_v20  ;;  %v2924_v11 = vpop.f32.mrf.mxu3  ;;  %v3369_v18 = vmul.f32 %v10308_v39, %v10308_v39 }
 0x38a   : > { %v3268_v1 = vadd.f32 %v3231_v51, %v3054_v44  ;;  %v10319_v44 = vld [vmem:[#allocation3 + $0x18] sm:$0xff] }
 0x38c   : > { %v3284_v10 = vadd.f32 %v10230_v34, %v3268_v1  ;;  %v3371_v1 = vmul.f32 %v10310_v40, %v10310_v40 }
 0x38d   : > { %v3241_v52 = vpop.f32.mrf.mxu1 }
 0x38e   : > { %3301 = vst.msk [vmem:[#allocation3 + $0x90] sm:$0xff] %vm12415_vm14, %v3284_v10  ;;  %vm12425_vm14 = vmmov %vm12402_vm0 }
 0x38f   : > { %v3055_v49 = vpop.f32.mrf.mxu0 }
 0x390   : > { %v3056_v17 = vadd.f32 %v3055_v49, %v2906_v56  ;;  %v2926_v15 = vpop.f32.mrf.mxu3 }
 0x392   : > { %v3269_v0 = vadd.f32 %v3233_v22, %v3056_v17 }
 0x394   : > { %v3285_v35 = vadd.f32 %v10230_v34, %v3269_v0 }
 0x395   : > { %v3243_v7 = vpop.f32.mrf.mxu1 }
 0x396   : > { %3302 = vst.msk [vmem:[#allocation3 + $0x98] sm:$0xff] %vm12416_vm2, %v3285_v35  ;;  %vm12426_vm2 = vmmov %vm12402_vm0 }
 0x397   : > { %v3058_v54 = vpop.f32.mrf.mxu0  ;;  %v3334_v10 = vsel %vm12426_vm2, %v10310_v40, 0.0  ;;  %vm12436_vm2 = vmmov %vm12402_vm0 }
 0x398   : > { %v3059_v9 = vadd.f32 %v3058_v54, %v2909_v37  ;;  %v2929_v59 = vpop.f32.mrf.mxu3  ;;  %v3370_v37 = vmul.f32 %v10306_v36, %v10306_v36 }
 0x39a   : > { %v3270_v47 = vadd.f32 %v3236_v58, %v3059_v9 }
 0x39c   : > { %v3286_v19 = vadd.f32 %v10230_v34, %v3270_v47 }
 0x39d   : > { %v3246_v55 = vpop.f32.mrf.mxu1 }
 0x39e   : > { %3303 = vst.msk [vmem:[#allocation3 + $0xa0] sm:$0xff] %vm12417_vm4, %v3286_v19  ;;  %vm12427_vm4 = vmmov %vm12402_vm0 }
 0x39f   : > { %v3060_v14 = vpop.f32.mrf.mxu0  ;;  %v3336_v35 = vsel %vm12427_vm4, %v10319_v44, 0.0  ;;  %vm12437_vm4 = vmmov %vm12402_vm0 }
 0x3a0   : > { %v3061_v16 = vadd.f32 %v3060_v14, %v2911_v21  ;;  %v3331_v21 = vsel %vm12425_vm14, %v10308_v39, 0.0  ;;  %vm12435_vm14 = vmmov %vm12402_vm0 }
 0x3a1   : > { %v3333_v17 = vadd.f32 %v3332_v48, %v3331_v21 }
 0x3a2   : > { %v3271_v50 = vadd.f32 %v3238_v41, %v3061_v16  ;;  %v10328_v41 = vld [vmem:[#allocation3 + $0x20] sm:$0xff] }
 0x3a3   : > { %v3335_v47 = vadd.f32 %v3334_v10, %v3333_v17  ;;  %v3373_v14 = vmul.f32 %v10328_v41, %v10328_v41 }
 0x3a4   : > { %v3287_v60 = vadd.f32 %v10230_v34, %v3271_v50  ;;  %v2931_v50 = vpop.f32.mrf.mxu3 }
 0x3a5   : > { %v3248_v23 = vpop.f32.mrf.mxu1 }
 0x3a6   : > { %3304 = vst.msk [vmem:[#allocation3 + $0xa8] sm:$0xff] %vm12418_vm11, %v3287_v60  ;;  %vm12428_vm11 = vmmov %vm12402_vm0  ;;  %v3337_v60 = vadd.f32 %v3336_v35, %v3335_v47 }
 0x3a7   : > { %v3063_v45 = vpop.f32.mrf.mxu0  ;;  %v3386_v54 = vsel %vm12428_vm11, %v3370_v37, 0.0  ;;  %vm12438_vm11 = vmmov %vm12402_vm0 }
 0x3a8   : > { %v3064_v53 = vadd.f32 %v3063_v45, %v2914_v38  ;;  %v3372_v38 = vmul.f32 %v10319_v44, %v10319_v44 }
 0x3aa   : > { %v3272_v5 = vadd.f32 %v3241_v52, %v3064_v53  ;;  %v10336_v52 = vld [vmem:[#allocation3 + $0x28] sm:$0xff] }
 0x3ac   : > { %v3288_v30 = vadd.f32 %v10230_v34, %v3272_v5  ;;  %v3390_v5 = vsel %vm12402_vm0, %v3372_v38, 0.0  ;;  %v2934_v35 = vpop.f32.mrf.mxu3  ;;  %v10387_v38 = vld [vmem:[#allocation3 + $0x58] sm:$0xff] }
 0x3ad   : > { %v3251_v62 = vpop.f32.mrf.mxu1 }
 0x3ae   : > { %3305 = vst.msk [vmem:[#allocation3 + $0xb0] sm:$0xff] %vm12419_vm6, %v3288_v30  ;;  %vm12429_vm6 = vmmov %vm12402_vm0  ;;  %v3423_v30 = vld [vmem:[#allocation3 + $0x80] sm:$0xff] }
 0x3af   : > { %v3065_v8 = vpop.f32.mrf.mxu0  ;;  %v3385_v9 = vsel %vm12429_vm6, %v3369_v18, 0.0  ;;  %vm12439_vm6 = vmmov %vm12402_vm0 }
 0x3b0   : > { %v3066_v32 = vadd.f32 %v3065_v8, %v2916_v31  ;;  %v3387_v45 = vadd.f32 %v3386_v54, %v3385_v9  ;;  %v10349_v8 = vld [vmem:[#allocation3 + $0x38] sm:$0xff] }
 0x3b2   : > { %v3273_v6 = vadd.f32 %v3243_v7, %v3066_v32  ;;  %v10343_v7 = vld [vmem:[#allocation3 + $0x30] sm:$0xff] }
 0x3b4   : > { %v3289_v46 = vadd.f32 %v10230_v34, %v3273_v6  ;;  %v3374_v6 = vmul.f32 %v10336_v52, %v10336_v52 }
 0x3b5   : > { %v3253_v56 = vpop.f32.mrf.mxu1 }
 0x3b6   : > { %3306 = vst.msk [vmem:[#allocation3 + $0xb8] sm:$0xff] %vm12420_vm7, %v3289_v46  ;;  %vm12430_vm7 = vmmov %vm12402_vm0 }
 0x3b7   : > { %v3068_v28 = vpop.f32.mrf.mxu0  ;;  %v3338_v31 = vsel %vm12430_vm7, %v10328_v41, 0.0  ;;  %vm12440_vm7 = vmmov %vm12402_vm0 }
 0x3b8   : > { %v3069_v29 = vadd.f32 %v3068_v28, %v2919_v13  ;;  %v3339_v32 = vadd.f32 %v3338_v31, %v3337_v60  ;;  %v3425_v28 = vld [vmem:[#allocation3 + $0x90] sm:$0xff] }
 0x3ba   : > { %v3274_v57 = vadd.f32 %v3246_v55, %v3069_v29  ;;  %v3424_v55 = vld [vmem:[#allocation3 + $0x88] sm:$0xff] }
 0x3bc   : > { %v3290_v42 = vadd.f32 %v10230_v34, %v3274_v57 }
 0x3bd   : > { %v3256_v58 = vpop.f32.mrf.mxu1 }
 0x3be   : > { %3307 = vst.msk [vmem:[#allocation3 + $0xc0] sm:$0xff] %vm12421_vm3, %v3290_v42  ;;  %vm12431_vm3 = vmmov %vm12402_vm0  ;;  %v10357_v42 = vld [vmem:[#allocation3 + $0x40] sm:$0xff] }
 0x3bf   : > { %v3070_v26 = vpop.f32.mrf.mxu0  ;;  %v3388_v16 = vsel %vm12431_vm3, %v3371_v1, 0.0  ;;  %vm12441_vm3 = vmmov %vm12402_vm0  ;;  %v3377_v18 = vmul.f32 %v10357_v42, %v10357_v42  ;;  %v10380_v1 = vld [vmem:[#allocation3 + $0xa0] sm:$0xff] }
 0x3c0   : > { %v3071_v20 = vadd.f32 %v3070_v26, %v2921_v2  ;;  %v3389_v2 = vadd.f32 %v3388_v16, %v3387_v45  ;;  %v3375_v26 = vmul.f32 %v10343_v7, %v10343_v7  ;;  %v3442_v37 = vsel %vm12441_vm3, %v3425_v28, 0.0  ;;  %vm12451_vm3 = vmmov %vm12402_vm0 }
 0x3c2   : > { %v3275_v4 = vadd.f32 %v3248_v23, %v3071_v20  ;;  %v3392_v23 = vsel %vm12435_vm14, %v3373_v14, 0.0  ;;  %v3391_v20 = vadd.f32 %v3390_v5, %v3389_v2  ;;  %v3478_v14 = vmul.f32 %v3424_v55, %v3424_v55  ;;  %vm12445_vm14 = vmmov %vm12402_vm0 }
 0x3c4   : > { %v3291_v61 = vadd.f32 %v10230_v34, %v3275_v4 }
 0x3c5   : > { %v3258_v29 = vpop.f32.mrf.mxu1 }
 0x3c6   : > { %3308 = vst.msk [vmem:[#allocation3 + $0xc8] sm:$0xff] %vm12422_vm8, %v3291_v61  ;;  %vm12432_vm8 = vmmov %vm12402_vm0  ;;  %v3344_v61 = vsel %vm12436_vm2, %v10349_v8, 0.0 }
 0x3c7   : > { %v3073_v33 = vpop.f32.mrf.mxu0  ;;  %v3340_v13 = vsel %vm12432_vm8, %v10336_v52, 0.0  ;;  %vm12442_vm8 = vmmov %vm12402_vm0 }
 0x3c8   : > { %v3074_v63 = vadd.f32 %v3073_v33, %v2924_v11  ;;  %v3341_v11 = vadd.f32 %v3340_v13, %v3339_v32  ;;  %v10364_v33 = vld [vmem:[#allocation3 + $0x48] sm:$0xff]  ;;  %vm12446_vm2 = vmmov %vm12402_vm0  ;;  %v10399_v13 = vld [vmem:[#allocation3 + $0x60] sm:$0xff] }
 0x3c9   : > { %v3378_v9 = vmul.f32 %v10364_v33, %v10364_v33 }
 0x3ca   : > { %v3276_v43 = vadd.f32 %v3251_v62, %v3074_v63  ;;  %v3477_v62 = vmul.f32 %v3423_v30, %v3423_v30 }
 0x3cc   : > { %v3292_v24 = vadd.f32 %v10230_v34, %v3276_v43  ;;  %v3376_v43 = vmul.f32 %v10349_v8, %v10349_v8 }
 0x3cd   : > { %v3261_v45 = vpop.f32.mrf.mxu1 }
 0x3ce   : > { %3309 = vst.msk [vmem:[#allocation3 + $0xd0] sm:$0xff] %vm12402_vm0, %v3292_v24  ;;  %v3394_v24 = vsel %vm12438_vm11, %v3374_v6, 0.0  ;;  %vm12448_vm11 = vmmov %vm12402_vm0 }
 0x3cf   : > { %v3075_v51 = vpop.f32.mrf.mxu0  ;;  %v3400_v32 = vsel %vm12448_vm11, %v3377_v18, 0.0  ;;  %vm12458_vm11 = vmmov %vm12402_vm0 }
 0x3d0   : > { %v3076_v25 = vadd.f32 %v3075_v51, %v2926_v15  ;;  %v3440_v15 = vsel %vm12437_vm4, %v3424_v55, 0.0  ;;  %v10369_v51 = vld [vmem:[#allocation3 + $0x98] sm:$0xff]  ;;  %vm12447_vm4 = vmmov %vm12402_vm0  ;;  %v3429_v55 = vld [vmem:[#allocation3 + $0xb0] sm:$0xff] }
 0x3d1   : > { %v3446_v60 = vsel %vm12447_vm4, %v10380_v1, 0.0  ;;  %vm12457_vm4 = vmmov %vm12402_vm0 }
 0x3d2   : > { %v3277_v22 = vadd.f32 %v3253_v56, %v3076_v25  ;;  %v3393_v56 = vadd.f32 %v3392_v23, %v3391_v20  ;;  %v3402_v20 = vsel %vm12451_vm3, %v3378_v9, 0.0  ;;  %vm12461_vm3 = vmmov %vm12402_vm0 }
 0x3d4   : > { %v3293_v27 = vadd.f32 %v10230_v34, %v3277_v22  ;;  %v3439_v22 = vsel %vm12440_vm7, %v3423_v30, 0.0  ;;  %v3395_v17 = vadd.f32 %v3394_v24, %v3393_v56  ;;  %vm12450_vm7 = vmmov %vm12402_vm0  ;;  %v3450_v56 = vsel %vm12402_vm0, %v3429_v55, 0.0 }
 0x3d5   : > { %v3441_v21 = vadd.f32 %v3440_v15, %v3439_v22  ;;  %v3431_v22 = vld [vmem:[#allocation3 + $0xc0] sm:$0xff] }
 0x3d6   : > { %3310 = vst.msk [vmem:[#allocation3 + $0xd8] sm:$0xff] %vm12424_vm13, %v3293_v27  ;;  %vm12434_vm13 = vmmov %vm12402_vm0  ;;  %v10375_v27 = vld [vmem:[#allocation3 + $0x50] sm:$0xff] }
 0x3d7   : > { %v3078_v49 = vpop.f32.mrf.mxu0  ;;  %v3342_v46 = vsel %vm12434_vm13, %v10343_v7, 0.0  ;;  %vm12444_vm13 = vmmov %vm12402_vm0  ;;  %v3443_v31 = vadd.f32 %v3442_v37, %v3441_v21  ;;  %v3350_v16 = vsel %vm12446_vm2, %v10375_v27, 0.0  ;;  %v3379_v30 = vmul.f32 %v10375_v27, %v10375_v27 }
 0x3d8   : > { %v3079_v0 = vadd.f32 %v3078_v49, %v2929_v59  ;;  %v3343_v63 = vadd.f32 %v3342_v46, %v3341_v11  ;;  %v3346_v59 = vsel %vm12439_vm6, %v10357_v42, 0.0  ;;  %v3348_v49 = vsel %vm12402_vm0, %v10364_v33, 0.0  ;;  %vm12449_vm6 = vmmov %vm12402_vm0  ;;  %v10408_v11 = vld [vmem:[#allocation3 + $0x68] sm:$0xff] }
 0x3d9   : > { %v3398_v47 = vsel %vm12444_vm13, %v3376_v43, 0.0  ;;  %v3352_v46 = vsel %vm12449_vm6, %v10387_v38, 0.0  ;;  %vm12454_vm13 = vmmov %vm12402_vm0 }
 0x3da   : > { %v3278_v19 = vadd.f32 %v3256_v58, %v3079_v0  ;;  %v3345_v48 = vadd.f32 %v3344_v61, %v3343_v63  ;;  %v3396_v58 = vsel %vm12442_vm8, %v3375_v26, 0.0  ;;  %vm12452_vm8 = vmmov %vm12402_vm0 }
 0x3db   : > { %v3354_v63 = vsel %vm12452_vm8, %v10399_v13, 0.0  ;;  %vm12456_vm2 = vmmov %vm12402_vm0 }
 0x3dc   : > { %v3294_v53 = vadd.f32 %v10230_v34, %v3278_v19  ;;  %v3347_v54 = vadd.f32 %v3346_v59, %v3345_v48  ;;  %v10392_v19 = vld [vmem:[#allocation3 + $0xa8] sm:$0xff]  ;;  %vm12459_vm6 = vmmov %vm12402_vm0 }
 0x3dd   : > { %vm12462_vm8 = vmmov %vm12402_vm0 }
 0x3de   : > { %3311 = vst.msk [vmem:[#allocation3 + $0xe0] sm:$0xff] %vm12433_vm10, %v3294_v53  ;;  %vm12443_vm10 = vmmov %vm12402_vm0  ;;  %v3349_v5 = vadd.f32 %v3348_v49, %v3347_v54  ;;  %v10423_v49 = vld [vmem:[#allocation3 + $0x78] sm:$0xff] }
 0x3df   : > { %v3080_v57 = vpop.f32.mrf.mxu0  ;;  %v3444_v0 = vsel %vm12443_vm10, %v10369_v51, 0.0  ;;  %vm12453_vm10 = vmmov %vm12402_vm0 }
 0x3e0   : > { %v3081_v4 = vadd.f32 %v3080_v57, %v2931_v50  ;;  %v3397_v50 = vadd.f32 %v3396_v58, %v3395_v17  ;;  %v3445_v6 = vadd.f32 %v3444_v0, %v3443_v31  ;;  %v3479_v57 = vmul.f32 %v3425_v28, %v3425_v28  ;;  %v3432_v17 = vld [vmem:[#allocation3 + $0xc8] sm:$0xff] }
 0x3e1   : > { %v3351_v26 = vadd.f32 %v3350_v16, %v3349_v5  ;;  %v3493_v24 = vsel %vm12453_vm10, %v3477_v62, 0.0  ;;  %v3404_v28 = vsel %vm12454_vm13, %v3379_v30, 0.0  ;;  %v3454_v31 = vsel %vm12461_vm3, %v3431_v22, 0.0  ;;  %v2936_v16 = vpop.f32.mrf.mxu3  ;;  %vm12463_vm10 = vmmov %vm12402_vm0 }
 0x3e2   : > { %v3279_v25 = vadd.f32 %v3258_v29, %v3081_v4  ;;  %v3399_v23 = vadd.f32 %v3398_v47, %v3397_v50  ;;  %v3448_v29 = vsel %vm12450_vm7, %v10392_v19, 0.0  ;;  %v3430_v4 = vld [vmem:[#allocation3 + $0xb8] sm:$0xff]  ;;  %v3447_v61 = vadd.f32 %v3446_v60, %v3445_v6  ;;  %vm12460_vm7 = vmmov %vm12402_vm0 }
 0x3e3   : > { %v3353_v59 = vadd.f32 %v3352_v46, %v3351_v26  ;;  %v3452_v21 = vsel %vm12456_vm2, %v3430_v4, 0.0  ;;  %v3496_v54 = vsel %vm12458_vm11, %v3479_v57, 0.0  ;;  %v3380_v60 = vmul.f32 %v10387_v38, %v10387_v38  ;;  %vm12464_vm13 = vmmov %vm12402_vm0 }
 0x3e4   : > { %v3295_v10 = vadd.f32 %v10230_v34, %v3279_v25  ;;  %v3401_v43 = vadd.f32 %v3400_v32, %v3399_v23  ;;  %v10415_v25 = vld [vmem:[#allocation3 + $0x70] sm:$0xff]  ;;  %v3449_v37 = vadd.f32 %v3448_v29, %v3447_v61  ;;  %v3360_v30 = vsel %vm12462_vm8, %v10423_v49, 0.0  ;;  %v3434_v23 = vld [vmem:[#allocation3 + $0xd8] sm:$0xff]  ;;  %vm12466_vm2 = vmmov %vm12402_vm0 }
 0x3e5   : > { %v3355_v62 = vadd.f32 %v3354_v63, %v3353_v59  ;;  %v3358_v9 = vsel %vm12460_vm7, %v10415_v25, 0.0  ;;  %v3456_v32 = vsel %vm12402_vm0, %v3432_v17, 0.0  ;;  %v3482_v57 = vmul.f32 %v10392_v19, %v10392_v19  ;;  %vm12468_vm11 = vmmov %vm12402_vm0 }
 0x3e6   : > { %3312 = vst.msk [vmem:[#allocation3 + $0xe8] sm:$0xff] %vm12445_vm14, %v3295_v10  ;;  %vm12455_vm14 = vmmov %vm12402_vm0  ;;  %v3403_v58 = vadd.f32 %v3402_v20, %v3401_v43  ;;  %v3494_v10 = vsel %vm12457_vm4, %v3478_v14, 0.0  ;;  %v3451_v0 = vadd.f32 %v3450_v56, %v3449_v37  ;;  %v3435_v43 = vld [vmem:[#allocation3 + $0xe0] sm:$0xff]  ;;  %v3406_v37 = vsel %vm12466_vm2, %v3380_v60, 0.0 }
 0x3e7   : > { %v3083_v53 = vpop.f32.mrf.mxu0  ;;  %v3356_v18 = vsel %vm12455_vm14, %v10408_v11, 0.0  ;;  %v3495_v6 = vadd.f32 %v3494_v10, %v3493_v24  ;;  %v3483_v24 = vmul.f32 %v3429_v55, %v3429_v55  ;;  %vm12465_vm14 = vmmov %vm12402_vm0  ;;  %v3484_v10 = vmul.f32 %v3430_v4, %v3430_v4 }
 0x3e8   : > { %v3084_v2 = vadd.f32 %v3083_v53, %v2934_v35  ;;  %v3480_v35 = vmul.f32 %v10369_v51, %v10369_v51  ;;  %v3405_v47 = vadd.f32 %v3404_v28, %v3403_v58  ;;  %v3357_v50 = vadd.f32 %v3356_v18, %v3355_v62  ;;  %vm12467_vm4 = vmmov %vm12402_vm0 }
 0x3e9   : > { %v3453_v53 = vadd.f32 %v3452_v21, %v3451_v0  ;;  %v3481_v51 = vmul.f32 %v10380_v1, %v10380_v1  ;;  %v3381_v1 = vmul.f32 %v10399_v13, %v10399_v13  ;;  %v3460_v19 = vsel %vm12467_vm4, %v3434_v23, 0.0  ;;  %vm12470_vm7 = vmmov %vm12402_vm0 }
 0x3ea   : > { %v3280_v15 = vadd.f32 %v3261_v45, %v3084_v2  ;;  %v3433_v45 = vld [vmem:[#allocation3 + $0xd0] sm:$0xff]  ;;  %v3263_v2 = vpop.f32.mrf.mxu1  ;;  %v3359_v46 = vadd.f32 %v3358_v9, %v3357_v50  ;;  %v3498_v26 = vsel %vm12463_vm10, %v3480_v35, 0.0  ;;  %v3382_v18 = vmul.f32 %v10408_v11, %v10408_v11  ;;  %vm12471_vm3 = vmmov %vm12402_vm0 }
 0x3eb   : > { %v3455_v29 = vadd.f32 %v3454_v31, %v3453_v53  ;;  %v3458_v61 = vsel %vm12464_vm13, %v3433_v45, 0.0  ;;  %v3500_v59 = vsel %vm12465_vm14, %v3481_v51, 0.0  ;;  %v3502_v62 = vsel %vm12468_vm11, %v3482_v57, 0.0  ;;  %vm12472_vm8 = vmmov %vm12402_vm0 }
 0x3ec   : > { %v3296_v48 = vadd.f32 %v10230_v34, %v3280_v15  ;;  %v3497_v15 = vadd.f32 %v3496_v54, %v3495_v6  ;;  %v3361_v63 = vadd.f32 %v3360_v30, %v3359_v46  ;;  %v3383_v55 = vmul.f32 %v10415_v25, %v10415_v25  ;;  %vm12473_vm10 = vmmov %vm12402_vm0 }
 0x3ed   : > { %v3457_v56 = vadd.f32 %v3456_v32, %v3455_v29  ;;  %v3436_v58 = vld [vmem:[#allocation3 + $0xe8] sm:$0xff]  ;;  %v3462_v0 = vsel %vm12471_vm3, %v3435_v43, 0.0  ;;  %v3384_v4 = vmul.f32 %v10423_v49, %v10423_v49  ;;  %v3407_v50 = vadd.f32 %v3406_v37, %v3405_v47  ;;  %vm12474_vm13 = vmmov %vm12402_vm0 }
 0x3ee   : > { %3313 = vst.msk [vmem:[#allocation3 + $0xf0] sm:$0xff] %vm12459_vm6, %v3296_v48  ;;  %v3499_v48 = vadd.f32 %v3498_v26, %v3497_v15  ;;  %vm12469_vm6 = vmmov %vm12402_vm0  ;;  %v3362_v54 = vrot.slane %v3361_v63, 4  ;;  %v3464_v60 = vsel %vm12402_vm0, %v3436_v58, 0.0  ;;  %v3410_v51 = vsel %vm12473_vm10, %v3382_v18, 0.0 }
 0x3ef   : > { %v3085_v14 = vpop.f32.mrf.mxu0  ;;  %v3459_v21 = vadd.f32 %v3458_v61, %v3457_v56  ;;  %v3486_v30 = vmul.f32 %v3432_v17, %v3432_v17  ;;  %v3506_v32 = vsel %vm12474_vm13, %v3484_v10, 0.0  ;;  %vm12475_vm14 = vmmov %vm12402_vm0  ;;  %v3487_v26 = vmul.f32 %v3433_v45, %v3433_v45 }
 0x3f0   : > { %v3086_v5 = vadd.f32 %v3085_v14, %v2936_v16  ;;  %v3501_v35 = vadd.f32 %v3500_v59, %v3499_v48  ;;  %v3485_v16 = vmul.f32 %v3431_v22, %v3431_v22  ;;  %v3504_v14 = vsel %vm12472_vm8, %v3483_v24, 0.0  ;;  %vm12476_vm2 = vmmov %vm12402_vm0 }
 0x3f1   : > { %v3461_v31 = vadd.f32 %v3460_v19, %v3459_v21  ;;  %v3363_v29 = vadd.f32 %v3362_v54, %v3361_v63  ;;  %vm12477_vm4 = vmmov %vm12402_vm0  ;;  %v3488_v17 = vmul.f32 %v3434_v23, %v3434_v23  ;;  %v3489_v63 = vmul.f32 %v3435_v43, %v3435_v43 }
 0x3f2   : > { %v3281_v20 = vadd.f32 %v3263_v2, %v3086_v5  ;;  %v3503_v53 = vadd.f32 %v3502_v62, %v3501_v35  ;;  %v3412_v2 = vsel %vm12475_vm14, %v3383_v55, 0.0  ;;  %v3508_v47 = vsel %vm12477_vm4, %v3485_v16, 0.0  ;;  %vm12478_vm11 = vmmov %vm12402_vm0 }
 0x3f3   : > { %v3463_v5 = vadd.f32 %v3462_v0, %v3461_v31  ;;  %v3414_v61 = vsel %vm12478_vm11, %v3384_v4, 0.0  ;;  %v3364_v19 = vrot.slane %v3363_v29, 2  ;;  %vm12481_vm3 = vmmov %vm12402_vm0  ;;  %v3490_v62 = vmul.f32 %v3436_v58, %v3436_v58 }
 0x3f4   : > { %v3297_v28 = vadd.f32 %v10230_v34, %v3281_v20  ;;  %v3408_v34 = vsel %vm12470_vm7, %v3381_v1, 0.0  ;;  %v3505_v46 = vadd.f32 %v3504_v14, %v3503_v53  ;;  %vm12480_vm7 = vmmov %vm12402_vm0  ;;  %v3512_v45 = vsel %vm12481_vm3, %v3487_v26, 0.0 }
 0x3f5   : > { %v3437_v9 = vld [vmem:[#allocation3 + $0xf0] sm:$0xff]  ;;  %v3409_v6 = vadd.f32 %v3408_v34, %v3407_v50  ;;  %v3465_v57 = vadd.f32 %v3464_v60, %v3463_v5  ;;  %vm12482_vm8 = vmmov %vm12402_vm0  ;;  %v3365_v0 = vadd.f32 %v3364_v19, %v3363_v29  ;;  %v3516_v54 = vsel %vm12402_vm0, %v3489_v63, 0.0 }
 0x3f6   : > { %3314 = vst.msk [vmem:[#allocation3 + $0xf8] sm:$0xff] %vm12469_vm6, %v3297_v28  ;;  %v3466_v22 = vsel %vm12476_vm2, %v3437_v9, 0.0  ;;  %v3507_v1 = vadd.f32 %v3506_v32, %v3505_v46  ;;  %vm12479_vm6 = vmmov %vm12402_vm0  ;;  %v3514_v55 = vsel %vm12482_vm8, %v3488_v17, 0.0  ;;  %v3491_v35 = vmul.f32 %v3437_v9, %v3437_v9 }
 0x3f7   : > { %v3411_v20 = vadd.f32 %v3410_v51, %v3409_v6  ;;  %v3467_v56 = vadd.f32 %v3466_v22, %v3465_v57  ;;  %v3510_v24 = vsel %vm12479_vm6, %v3486_v30, 0.0  ;;  %vm12483_vm10 = vmmov %vm12402_vm0  ;;  %v3366_v60 = vrot.slane %v3365_v0, 1 }
 0x3f8   : > { %v3509_v37 = vadd.f32 %v3508_v47, %v3507_v1  ;;  %v3518_v43 = vsel %vm12483_vm10, %v3490_v62, 0.0  ;;  %vm12484_vm13 = vmmov %vm12402_vm0 }
 0x3f9   : > { %v3413_v59 = vadd.f32 %v3412_v2, %v3411_v20  ;;  %v3520_v51 = vsel %vm12484_vm13, %v3491_v35, 0.0  ;;  %vm12485_vm14 = vmmov %vm12402_vm0  ;;  %v3367_v9 = vadd.f32 %v3366_v60, %v3365_v0  ;;  %v12486_v0 = vld [vmem:[#allocation12_spill] sm:$0xff] }
 0x3fa   : > { %v3511_v21 = vadd.f32 %v3510_v24, %v3509_v37 }
 0x3fb   : > { %v3415_v18 = vadd.f32 %v3414_v61, %v3413_v59 }
 0x3fc   : > { %v3513_v34 = vadd.f32 %v3512_v45, %v3511_v21 }
 0x3fd   : > { %v3438_v15 = vld [vmem:[#allocation3 + $0xf8] sm:$0xff]  ;;  %v3416_v31 = vrot.slane %v3415_v18, 4 }
 0x3fe   : > { %v3468_v28 = vsel %vm12480_vm7, %v3438_v15, 0.0  ;;  %v3515_v16 = vadd.f32 %v3514_v55, %v3513_v34  ;;  %v3492_v4 = vmul.f32 %v3438_v15, %v3438_v15 }
 0x3ff   : > { %v3469_v48 = vadd.f32 %v3468_v28, %v3467_v56  ;;  %v3417_v58 = vadd.f32 %v3416_v31, %v3415_v18 }
 0x400   : > { %v3517_v50 = vadd.f32 %v3516_v54, %v3515_v16  ;;  %v3522_v32 = vsel %vm12485_vm14, %v3492_v4, 0.0  ;;  %v8237_v4 = vld [vmem:[%s8657_s10] sm:$0x1] }
 0x401   : > { %v3470_v10 = vrot.slane %v3469_v48, 4  ;;  %v3418_v22 = vrot.slane %v3417_v58, 2 }
 0x402   : > { %v3519_v5 = vadd.f32 %v3518_v43, %v3517_v50 }
 0x403   : > { %v3471_v23 = vadd.f32 %v3470_v10, %v3469_v48  ;;  %v3419_v47 = vadd.f32 %v3418_v22, %v3417_v58 }
 0x404   : > { %v3521_v6 = vadd.f32 %v3520_v51, %v3519_v5 }
 0x405   : > { %v3472_v14 = vrot.slane %v3471_v23, 2  ;;  %v3420_v61 = vrot.slane %v3419_v47, 1 }
 0x406   : > { %v3523_v46 = vadd.f32 %v3522_v32, %v3521_v6 }
 0x407   : > { %v3473_v53 = vadd.f32 %v3472_v14, %v3471_v23  ;;  %v3421_v17 = vadd.f32 %v3420_v61, %v3419_v47 }
 0x408   : > { %v3524_v57 = vrot.slane %v3523_v46, 4 }
 0x409   : > { %v3474_v30 = vrot.slane %v3473_v53, 1 }
 0x40a   : > { %v3525_v20 = vadd.f32 %v3524_v57, %v3523_v46 }
 0x40b   : > { %v3475_v2 = vadd.f32 %v3474_v30, %v3473_v53 }
 0x40c   : > { %v3526_v1 = vrot.slane %v3525_v20, 2 }
 0x40d   : > { %v3476_v29 = vadd.f32 %v3475_v2, %v3367_v9 }
 0x40e   : > { %v3527_v15 = vadd.f32 %v3526_v1, %v3525_v20 }
 0x40f   : > { %v3531_v26 = vmul.f32 0.00390625, %v3476_v29 }
 0x410   : > { %v3528_v56 = vrot.slane %v3527_v15, 1 }
 0x411   : > { %3552 = vrot.lane.b32.xlu1 %v3531_v26, %s8340_s15  ;;  %v3533_v28 = vmul.f32 %v3531_v26, %v3531_v26 }
 0x412   : > { %v3529_v24 = vadd.f32 %v3528_v56, %v3527_v15 }
 0x414   : > { %v3530_v59 = vadd.f32 %v3529_v24, %v3421_v17  ;;  %v7850_v17 = vld [vmem:[%s12264_s4 + $0x58] sm:$0xff]  ;;  %v7836_v24 = vld [vmem:[%s12264_s4 + $0x28] sm:$0xff] }
 0x415   : > { %5268 = vmatpush.bf16.msrb.mxu2 %v7850_v17  ;;  %5417 = vmatpush.bf16.msrb.mxu3 %v7836_v24 }
 0x416   : > { %v3532_v37 = vmul.f32 0.00390625, %v3530_v59 }
 0x418   : > { %v3534_v19 = vsub.f32 %v3532_v37, %v3533_v28 }
 0x41a   : > { %v3535_v48 = vadd.f32 1e-05, %v3534_v19 }
 0x41c   : > { %8096 = vrsqrt.f32 %v3535_v48  ;;  %vm3542_vm4 = vweird.f32 %v3535_v48 }
 0x422   : > { %v8097_v63 = vpop.eup %8096 }
 0x423   : > { %v3537_v45 = vmul.f32 %v8097_v63, %v3535_v48  ;;  %vm3543_vm2 = vweird.f32 %v8097_v63 }
 0x424   : > { %vm3544_vm11 = vmor %vm3542_vm4, %vm3543_vm2 }
 0x425   : > { %v3538_v18 = vmul.f32 %v8097_v63, %v3537_v45 }
 0x427   : > { %v3539_v21 = vmul.f32 0.5, %v3538_v18 }
 0x429   : > { %v3540_v10 = vsub.f32 1.5, %v3539_v21 }
 0x42b   : > { %v3541_v62 = vmul.f32 %v8097_v63, %v3540_v10 }
 0x42d   : > { %v3545_v55 = vsel %vm3544_vm11, %v8097_v63, %v3541_v62 }
 0x42e   : > { %3547 = vrot.lane.b32.xlu2 %v3545_v55, %s8340_s15 }
 0x483   : > { %v3553_v34 = vpop.permute.xlu1 %3552 }
 0x484   : > { %v3555_v23 = vmul.f32 %v3553_v34, %v12486_v0 }
 0x488   : > { %v3548_v35 = vpop.permute.xlu2 %3547 }
 0x489   : > { %v3550_v54 = vmul.f32 %v3548_v35, %v12486_v0  ;;  %v3556_v31 = vmul.f32 %v3555_v23, %v3548_v35 }
 0x48b   : > { %v3563_v16 = vperm.slane %v3550_v54, 0  ;;  %3558 = vrot.lane.b32.xlu0 %v3556_v31, %s8338_s13 }
 0x48d   : > { %3564 = vrot.lane.b32.xlu1 %v3563_v16, %s8340_s15 }
 0x4fd   : > { %v3559_v14 = vpop.permute.xlu0 %3558 }
 0x4fe   : > { %v3561_v43 = vsub.f32 %v8237_v4, %v3559_v14 }
 0x4ff   : > { %v10483_v60 = vpop.permute.xlu1 %3564 }
 0x500   : > { %v3584_v50 = vperm.slane %v3561_v43, 0  ;;  %v3569_v53 = vmul.f32 %v10483_v60, %v10310_v40  ;;  %v3570_v51 = vmul.f32 %v10483_v60, %v10319_v44  ;;  %v3567_v40 = vmul.f32 %v10483_v60, %v10308_v39 }
 0x501   : > { %v3568_v44 = vmul.f32 %v10483_v60, %v10306_v36  ;;  %v3571_v1 = vmul.f32 %v10483_v60, %v10328_v41  ;;  %v3572_v61 = vmul.f32 %v10483_v60, %v10336_v52 }
 0x502   : > { %3585 = vrot.lane.b32.xlu2 %v3584_v50, %s8338_s13 }
 0x55c   : > { %v10489_v58 = vpop.permute.xlu2 %3585 }
 0x55d   : > { %v10492_v5 = vadd.f32 %v10489_v58, %v3569_v53  ;;  %v10495_v30 = vadd.f32 %v10489_v58, %v3570_v51  ;;  %v10504_v9 = vadd.f32 %v10489_v58, %v3567_v40  ;;  %v10507_v2 = vadd.f32 %v10489_v58, %v3568_v44 }
 0x55e   : > { %v10527_v41 = vadd.f32 %v10489_v58, %v3571_v1  ;;  %v10530_v52 = vadd.f32 %v10489_v58, %v3572_v61 }
 0x55f   : > { %v7227_v32 = vmul.f32 -1.442695, %v10492_v5  ;;  %v7228_v6 = vmul.f32 -1.442695, %v10495_v30  ;;  %v7225_v22 = vmul.f32 -1.442695, %v10504_v9 }
 0x560   : > { %v7226_v46 = vmul.f32 -1.442695, %v10507_v2  ;;  %v7229_v62 = vmul.f32 -1.442695, %v10527_v41  ;;  %v7230_v55 = vmul.f32 -1.442695, %v10530_v52 }
 0x561   : > { %8098 = vpow2.f32 %v7227_v32 }
 0x562   : > { %8100 = vpow2.f32 %v7228_v6 }
 0x563   : > { %8102 = vpow2.f32 %v7225_v22 }
 0x564   : > { %8104 = vpow2.f32 %v7226_v46 }
 0x567   : > { %v8099_v29 = vpop.eup %8098 }
 0x568   : > { %v8101_v57 = vpop.eup %8100  ;;  %v3654_v26 = vadd.f32 1.0, %v8099_v29 }
 0x569   : > { %v3655_v47 = vadd.f32 1.0, %v8101_v57  ;;  %v8103_v39 = vpop.eup %8102 }
 0x56a   : > { %8106 = vrcp.f32 %v3654_v26  ;;  %v8105_v36 = vpop.eup %8104  ;;  %v10511_v20 = vadd.f32 1.0, %v8103_v39  ;;  %v3707_v37 = vand.u32 2147483647, %v3654_v26  ;;  %v3709_v63 = vand.u32 2147483648, %v3654_v26 }
 0x56b   : > { %8108 = vrcp.f32 %v3655_v47  ;;  %v10517_v56 = vadd.f32 1.0, %v8105_v36  ;;  %v3722_v45 = vand.u32 2147483647, %v3655_v47  ;;  %vm3703_vm6 = vweird.f32 %v3654_v26 }
 0x56c   : > { %8110 = vrcp.f32 %v10511_v20  ;;  %v3724_v21 = vand.u32 2147483648, %v3655_v47  ;;  %vm10535_vm3 = vcmp.eq.f32.partialorder %v3707_v37, 8.507059e+37  ;;  %vm3718_vm8 = vweird.f32 %v3655_v47 }
 0x56d   : > { %8112 = vrcp.f32 %v10517_v56  ;;  %v3710_v54 = vor.u32 1.1754944e-38, %v3709_v63  ;;  %vm10539_vm10 = vcmp.eq.f32.partialorder %v3722_v45, 8.507059e+37  ;;  %vm3673_vm2 = vweird.f32 %v10511_v20 }
 0x56e   : > { %8114 = vpow2.f32 %v7229_v62  ;;  %v3725_v14 = vor.u32 1.1754944e-38, %v3724_v21  ;;  %v3677_v53 = vand.u32 2147483647, %v10511_v20  ;;  %v3679_v51 = vand.u32 2147483648, %v10511_v20 }
 0x56f   : > { %8116 = vpow2.f32 %v7230_v55  ;;  %vm3688_vm4 = vweird.f32 %v10517_v56  ;;  %v3692_v29 = vand.u32 2147483647, %v10517_v56 }
 0x570   : > { %v8107_v15 = vpop.eup %8106 }
 0x571   : > { %v8109_v59 = vpop.eup %8108  ;;  %v3699_v28 = vmul.f32 %v8107_v15, %v3654_v26  ;;  %vm3704_vm7 = vweird.f32 %v8107_v15 }
 0x572   : > { %v3714_v19 = vmul.f32 %v8109_v59, %v3655_v47  ;;  %vm3719_vm0 = vweird.f32 %v8109_v59  ;;  %v8111_v23 = vpop.eup %8110  ;;  %vm3705_vm13 = vmor %vm3703_vm6, %vm3704_vm7  ;;  %vm10563_vm6 = vcmp.eq.f32.partialorder %v3677_v53, 8.507059e+37 }
 0x573   : > { %v3700_v48 = vsub.f32 1.0, %v3699_v28  ;;  %v3669_v4 = vmul.f32 %v8111_v23, %v10511_v20  ;;  %v8113_v43 = vpop.eup %8112  ;;  %vm3720_vm14 = vmor %vm3718_vm8, %vm3719_vm0  ;;  %vm3674_vm11 = vweird.f32 %v8111_v23  ;;  %v3680_v28 = vor.u32 1.1754944e-38, %v3679_v51 }
 0x574   : > { %v3715_v18 = vsub.f32 1.0, %v3714_v19  ;;  %v3684_v44 = vmul.f32 %v8113_v43, %v10517_v56  ;;  %v8115_v39 = vpop.eup %8114  ;;  %vm3689_vm7 = vweird.f32 %v8113_v43  ;;  %vm3693_vm8 = vcmp.eq.f32.partialorder %v3692_v29, 8.507059e+37 }
 0x575   : > { %v3701_v10 = vmul.f32 %v8107_v15, %v3700_v48  ;;  %v3670_v40 = vsub.f32 1.0, %v3669_v4  ;;  %v8117_v61 = vpop.eup %8116  ;;  %v10570_v24 = vadd.f32 1.0, %v8115_v39  ;;  %vm3690_vm0 = vmor %vm3688_vm4, %vm3689_vm7 }
 0x576   : > { %v3716_v0 = vmul.f32 %v8109_v59, %v3715_v18  ;;  %v3685_v47 = vsub.f32 1.0, %v3684_v44  ;;  %v10574_v37 = vadd.f32 1.0, %v8117_v61 }
 0x577   : > { %v3702_v35 = vadd.f32 %v8107_v15, %v3701_v10  ;;  %v3671_v26 = vmul.f32 %v8111_v23, %v3670_v40  ;;  %8118 = vrcp.f32 %v10570_v24 }
 0x578   : > { %v3717_v16 = vadd.f32 %v8109_v59, %v3716_v0  ;;  %v3686_v17 = vmul.f32 %v8113_v43, %v3685_v47  ;;  %8120 = vrcp.f32 %v10574_v37  ;;  %v3739_v0 = vand.u32 2147483648, %v10570_v24 }
 0x579   : > { %v3706_v50 = vsel %vm3705_vm13, %v8107_v15, %v3702_v35  ;;  %vm12493_vm13 = vcmp.eq.s32.totalorder %v8862_v3, 15  ;;  %vm3748_vm7 = vweird.f32 %v10574_v37 }
 0x57a   : > { %v3711_v32 = vsel %vm10535_vm3, %v3710_v54, %v3706_v50  ;;  %v3721_v6 = vsel %vm3720_vm14, %v8109_v59, %v3717_v16  ;;  %vm3675_vm3 = vmor %vm3673_vm2, %vm3674_vm11  ;;  %v3687_v63 = vadd.f32 %v8113_v43, %v3686_v17  ;;  %v3575_v54 = vmul.f32 %v10483_v60, %v10357_v42 }
 0x57b   : > { %v3726_v22 = vsel %vm10539_vm10, %v3725_v14, %v3721_v6  ;;  %v10554_v46 = vmul.f32 %v3711_v32, %v10492_v5  ;;  %v3694_v5 = vand.u32 2147483648, %v10517_v56  ;;  %vm3733_vm10 = vweird.f32 %v10570_v24  ;;  %vm12494_vm14 = vmmov %vm12493_vm13 }
 0x57c   : > { %v10559_v57 = vmul.f32 %v3726_v22, %v10495_v30  ;;  %v3672_v30 = vadd.f32 %v8111_v23, %v3671_v26  ;;  %v3691_v62 = vsel %vm3690_vm0, %v8113_v43, %v3687_v63  ;;  %v3737_v42 = vand.u32 2147483647, %v10570_v24  ;;  %vm12495_vm0 = vmmov %vm12493_vm13 }
 0x57d   : > { %v4038_v36 = vpack.c.bf16 %v10554_v46, %v10554_v46  ;;  %v3695_v18 = vor.u32 1.1754944e-38, %v3694_v5  ;;  %v3973_v20 = vrot.slane %v10554_v46, 1  ;;  %v8119_v16 = vpop.eup %8118  ;;  %v3740_v53 = vor.u32 1.1754944e-38, %v3739_v0 }
 0x57e   : > { %v4039_v15 = vpack.c.bf16 %v10559_v57, %v10559_v57  ;;  %v3676_v48 = vsel %vm3675_vm3, %v8111_v23, %v3672_v30  ;;  %v3981_v21 = vrot.slane %v10559_v57, 1  ;;  %v3729_v50 = vmul.f32 %v8119_v16, %v10570_v24  ;;  %v8121_v6 = vpop.eup %8120 }
 0x57f   : > { %v4126_v59 = vunpack.c.l.b16 %v4038_v36  ;;  %v3681_v45 = vsel %vm10563_vm6, %v3680_v28, %v3676_v48  ;;  %v3696_v34 = vsel %vm3693_vm8, %v3695_v18, %v3691_v62  ;;  %v10613_v32 = vadd.f32 %v10489_v58, %v3575_v54 }
 0x580   : > { %v4127_v19 = vunpack.c.l.b16 %v4039_v15  ;;  %v10585_v55 = vmul.f32 %v3681_v45, %v10504_v9  ;;  %v10591_v56 = vmul.f32 %v3696_v34, %v10507_v2  ;;  %v3989_v9 = vsel %vm1022_vm15, %v3973_v20, %v3981_v21 }
 0x581   : > { %v3997_v31 = vsel %vm1022_vm15, %v3981_v21, %v3973_v20  ;;  %v3576_v2 = vmul.f32 %v10483_v60, %v10364_v33  ;;  %v4054_v22 = vpack.c.bf16 %v3989_v9, %v3989_v9  ;;  %v3730_v47 = vsub.f32 1.0, %v3729_v50 }
 0x582   : > { %v4141_v10 = vpack.c.b16 %v4127_v19, %v4126_v59  ;;  %v4036_v23 = vpack.c.bf16 %v10585_v55, %v10585_v55  ;;  %v3972_v35 = vrot.slane %v10585_v55, 1  ;;  %v4037_v14 = vpack.c.bf16 %v10591_v56, %v10591_v56 }
 0x583   : > { %v3980_v43 = vrot.slane %v10591_v56, 1  ;;  %v4007_v51 = vsel %vm12493_vm13, 0.0, %v3997_v31  ;;  %v3744_v39 = vmul.f32 %v8121_v6, %v10574_v37  ;;  %v3752_v5 = vand.u32 2147483647, %v10574_v37 }
 0x584   : > { %4150 = vrot.lane.b32.xlu2 %v4141_v10, %s8338_s13  ;;  %v4124_v4 = vunpack.c.l.b16 %v4036_v23  ;;  %v4125_v33 = vunpack.c.l.b16 %v4037_v14  ;;  %v4055_v61 = vpack.c.bf16 %v4007_v51, %v4007_v51  ;;  %v3731_v30 = vmul.f32 %v8119_v16, %v3730_v47 }
 0x585   : > { %v3988_v40 = vsel %vm1022_vm15, %v3972_v35, %v3980_v43  ;;  %v3996_v44 = vsel %vm1022_vm15, %v3980_v43, %v3972_v35  ;;  %vm3734_vm2 = vweird.f32 %v8119_v16  ;;  %v3745_v17 = vsub.f32 1.0, %v3744_v39 }
 0x586   : > { %v4005_v29 = vsel %vm12494_vm14, 0.0, %v3996_v44  ;;  %v4052_v26 = vpack.c.bf16 %v3988_v40, %v3988_v40  ;;  %v4140_v36 = vpack.c.b16 %v4125_v33, %v4124_v4  ;;  %v3754_v28 = vand.u32 2147483648, %v10574_v37  ;;  %vm3735_vm11 = vmor %vm3733_vm10, %vm3734_vm2 }
 0x587   : > { %v4053_v1 = vpack.c.bf16 %v4005_v29, %v4005_v29  ;;  %v10626_v19 = vadd.f32 %v10489_v58, %v3576_v2  ;;  %v7233_v48 = vmul.f32 -1.442695, %v10613_v32  ;;  %v3732_v63 = vadd.f32 %v8119_v16, %v3731_v30 }
 0x588   : > { %v4180_v15 = vunpack.c.l.b16 %v4052_v26  ;;  %4148 = vrot.lane.b32.xlu0 %v4140_v36, %s8338_s13  ;;  %v3746_v45 = vmul.f32 %v8121_v6, %v3745_v17  ;;  %vm3749_vm4 = vweird.f32 %v8121_v6  ;;  %v4182_v18 = vunpack.c.l.b16 %v4054_v22 }
 0x589   : > { %v4181_v59 = vunpack.c.l.b16 %v4053_v1  ;;  %v4183_v21 = vunpack.c.l.b16 %v4055_v61  ;;  %8122 = vpow2.f32 %v7233_v48  ;;  %v7234_v10 = vmul.f32 -1.442695, %v10626_v19  ;;  %vm3750_vm3 = vmor %vm3748_vm7, %vm3749_vm4 }
 0x58a   : > { %v3736_v62 = vsel %vm3735_vm11, %v8119_v16, %v3732_v63  ;;  %vm3738_vm6 = vcmp.eq.f32.partialorder %v3737_v42, 8.507059e+37  ;;  %v3747_v34 = vadd.f32 %v8121_v6, %v3746_v45  ;;  %v3755_v23 = vor.u32 1.1754944e-38, %v3754_v28 }
 0x58b   : > { %v4196_v20 = vpack.c.b16 %v4181_v59, %v4180_v15  ;;  %v3741_v0 = vsel %vm3738_vm6, %v3740_v53, %v3736_v62  ;;  %8124 = vpow2.f32 %v7234_v10  ;;  %vm3753_vm8 = vcmp.eq.f32.partialorder %v3752_v5, 8.507059e+37 }
 0x58c   : > { %v3751_v35 = vsel %vm3750_vm3, %v8121_v6, %v3747_v34  ;;  %v10635_v24 = vmul.f32 %v3741_v0, %v10527_v41  ;;  %v4197_v9 = vpack.c.b16 %v4183_v21, %v4182_v18  ;;  %v3573_v31 = vmul.f32 %v10483_v60, %v10343_v7 }
 0x58d   : > { %4204 = vrot.lane.b32.xlu1 %v4196_v20, %s8340_s15  ;;  %v3756_v54 = vsel %vm3753_vm8, %v3755_v23, %v3751_v35  ;;  %v3574_v2 = vmul.f32 %v10483_v60, %v10349_v8  ;;  %v3577_v59 = vmul.f32 %v10483_v60, %v10375_v27  ;;  %v3578_v45 = vmul.f32 %v10483_v60, %v10387_v38 }
 0x58e   : > { %v10642_v37 = vmul.f32 %v3756_v54, %v10530_v52  ;;  %v3974_v16 = vrot.slane %v10635_v24, 1  ;;  %v4040_v14 = vpack.c.bf16 %v10635_v24, %v10635_v24  ;;  %v10649_v41 = vadd.f32 %v10489_v58, %v3573_v31 }
 0x58f   : > { %v8123_v4 = vpop.eup %8122  ;;  %v10652_v43 = vadd.f32 %v10489_v58, %v3574_v2  ;;  %v10676_v23 = vadd.f32 %v10489_v58, %v3577_v59  ;;  %v10682_v54 = vadd.f32 %v10489_v58, %v3578_v45 }
 0x590   : > { %4206 = vrot.lane.b32.xlu0 %v4197_v9, %s8340_s15  ;;  %v3982_v7 = vrot.slane %v10642_v37, 1  ;;  %v4041_v8 = vpack.c.bf16 %v10642_v37, %v10642_v37  ;;  %v4128_v52 = vunpack.c.l.b16 %v4040_v14  ;;  %v3660_v42 = vadd.f32 1.0, %v8123_v4 }
 0x591   : > { %v8125_v50 = vpop.eup %8124  ;;  %v7231_v22 = vmul.f32 -1.442695, %v10649_v41  ;;  %v7232_v47 = vmul.f32 -1.442695, %v10652_v43  ;;  %v7235_v14 = vmul.f32 -1.442695, %v10676_v23 }
 0x592   : > { %v3990_v53 = vsel %vm1022_vm15, %v3974_v16, %v3982_v7  ;;  %v3998_v51 = vsel %vm1022_vm15, %v3982_v7, %v3974_v16  ;;  %v4129_v6 = vunpack.c.l.b16 %v4041_v8  ;;  %v3661_v33 = vadd.f32 1.0, %v8125_v50 }
 0x593   : > { %v4009_v40 = vsel %vm12495_vm0, 0.0, %v3998_v51  ;;  %v4056_v44 = vpack.c.bf16 %v3990_v53, %v3990_v53  ;;  %8126 = vrcp.f32 %v3660_v42  ;;  %vm3793_vm10 = vweird.f32 %v3660_v42 }
 0x594   : > { %v4057_v29 = vpack.c.bf16 %v4009_v40, %v4009_v40  ;;  %v4142_v26 = vpack.c.b16 %v4129_v6, %v4128_v52  ;;  %8128 = vrcp.f32 %v3661_v33  ;;  %v3797_v48 = vand.u32 2147483647, %v3660_v42 }
 0x595   : > { %v4184_v39 = vunpack.c.l.b16 %v4056_v44  ;;  %8130 = vpow2.f32 %v7231_v22  ;;  %v3799_v63 = vand.u32 2147483648, %v3660_v42  ;;  %v3812_v62 = vand.u32 2147483647, %v3661_v33 }
 0x596   : > { %v4185_v36 = vunpack.c.l.b16 %v4057_v29  ;;  %4152 = vrot.lane.b32.xlu1 %v4142_v26, %s8338_s13  ;;  %8132 = vpow2.f32 %v7232_v47  ;;  %v3814_v34 = vand.u32 2147483648, %v3661_v33  ;;  %vm3798_vm4 = vcmp.eq.f32.partialorder %v3797_v48, 8.507059e+37  ;;  %v4334_v29 = vld [vmem:[#allocation3 + $0x90] sm:$0xff]  ;;  %v4335_v26 = vld [vmem:[#allocation3 + $0x98] sm:$0xff] }
 0x597   : > { %v3800_v38 = vor.u32 1.1754944e-38, %v3799_v63  ;;  %vm3808_vm11 = vweird.f32 %v3661_v33  ;;  %vm3813_vm7 = vcmp.eq.f32.partialorder %v3812_v62, 8.507059e+37  ;;  %v7236_v52 = vmul.f32 -1.442695, %v10682_v54 }
 0x598   : > { %v4198_v1 = vpack.c.b16 %v4185_v36, %v4184_v39  ;;  %v3815_v16 = vor.u32 1.1754944e-38, %v3814_v34  ;;  %v3581_v51 = vmul.f32 %v10483_v60, %v10415_v25  ;;  %v10703_v40 = vmul.f32 %v10483_v60, %v10399_v13 }
 0x599   : > { %v8127_v5 = vpop.eup %8126  ;;  %v10710_v25 = vmul.f32 %v10483_v60, %v10408_v11  ;;  %v10717_v13 = vmul.f32 %v4335_v26, %v10483_v60 }
 0x59a   : > { %4208 = vrot.lane.b32.xlu2 %v4198_v1, %s8340_s15  ;;  %v3789_v61 = vmul.f32 %v8127_v5, %v3660_v42  ;;  %v8129_v15 = vpop.eup %8128  ;;  %vm3794_vm13 = vweird.f32 %v8127_v5 }
 0x59b   : > { %v3804_v17 = vmul.f32 %v8129_v15, %v3661_v33  ;;  %v8131_v28 = vpop.eup %8130  ;;  %vm3809_vm14 = vweird.f32 %v8129_v15  ;;  %vm3795_vm2 = vmor %vm3793_vm10, %vm3794_vm13 }
 0x59c   : > { %v3790_v30 = vsub.f32 1.0, %v3789_v61  ;;  %v8133_v18 = vpop.eup %8132  ;;  %v10671_v10 = vadd.f32 1.0, %v8131_v28  ;;  %vm3810_vm6 = vmor %vm3808_vm11, %vm3809_vm14 }
 0x59d   : > { %v3805_v21 = vsub.f32 1.0, %v3804_v17  ;;  %v10673_v0 = vadd.f32 1.0, %v8133_v18 }
 0x59e   : > { %v3791_v20 = vmul.f32 %v8127_v5, %v3790_v30  ;;  %8134 = vrcp.f32 %v10671_v10  ;;  %vm3763_vm3 = vweird.f32 %v10671_v10  ;;  %v3767_v36 = vand.u32 2147483647, %v10671_v10 }
 0x59f   : > { %v3806_v35 = vmul.f32 %v8129_v15, %v3805_v21  ;;  %8136 = vrcp.f32 %v10673_v0  ;;  %v3769_v1 = vand.u32 2147483648, %v10671_v10  ;;  %v3784_v30 = vand.u32 2147483648, %v10673_v0  ;;  %v7835_v21 = vld [vmem:[%s12264_s4 + $0x20] sm:$0xff] }
 0x5a0   : > { %v3792_v27 = vadd.f32 %v8127_v5, %v3791_v20  ;;  %8138 = vpow2.f32 %v7235_v14  ;;  %vm3778_vm10 = vweird.f32 %v10673_v0  ;;  %v7849_v20 = vld [vmem:[%s12264_s4 + $0x50] sm:$0xff]  ;;  %vm3768_vm14 = vcmp.eq.f32.partialorder %v3767_v36, 8.507059e+37  ;;  %5418 = vmatpush.bf16.msrb.mxu3 %v7835_v21 }
 0x5a1   : > { %v3807_v31 = vadd.f32 %v8129_v15, %v3806_v35  ;;  %8140 = vpow2.f32 %v7236_v52  ;;  %v3770_v62 = vor.u32 1.1754944e-38, %v3769_v1  ;;  %v3785_v35 = vor.u32 1.1754944e-38, %v3784_v30  ;;  %5269 = vmatpush.bf16.msrb.mxu2 %v7849_v20 }
 0x5a2   : > { %v3796_v9 = vsel %vm3795_vm2, %v8127_v5, %v3792_v27 }
 0x5a3   : > { %v3801_v2 = vsel %vm3798_vm4, %v3800_v38, %v3796_v9  ;;  %v3811_v4 = vsel %vm3810_vm6, %v8129_v15, %v3807_v31  ;;  %v3782_v15 = vand.u32 2147483647, %v10673_v0  ;;  %vm12496_vm6 = vcmp.eq.s32.totalorder %v8862_v3, 15 }
 0x5a4   : > { %v10686_v7 = vmul.f32 %v3801_v2, %v10613_v32  ;;  %v3816_v8 = vsel %vm3813_vm7, %v3815_v16, %v3811_v4  ;;  %v8135_v42 = vpop.eup %8134  ;;  %v10699_v32 = vmul.f32 %v10483_v60, %v10423_v49  ;;  %v10714_v49 = vmul.f32 %v4334_v29, %v10483_v60 }
 0x5a5   : > { %v10690_v50 = vmul.f32 %v3816_v8, %v10626_v19  ;;  %v8137_v6 = vpop.eup %8136  ;;  %v3759_v33 = vmul.f32 %v8135_v42, %v10671_v10  ;;  %vm3764_vm8 = vweird.f32 %v8135_v42  ;;  %vm3783_vm4 = vcmp.eq.f32.partialorder %v3782_v15, 8.507059e+37 }
 0x5a6   : > { %v4044_v53 = vpack.c.bf16 %v10686_v7, %v10686_v7  ;;  %v3774_v22 = vmul.f32 %v8137_v6, %v10673_v0  ;;  %v8139_v61 = vpop.eup %8138  ;;  %vm3779_vm0 = vweird.f32 %v8137_v6  ;;  %v3976_v45 = vrot.slane %v10686_v7, 1  ;;  %vm3765_vm13 = vmor %vm3763_vm3, %vm3764_vm8 }
 0x5a7   : > { %v4045_v19 = vpack.c.bf16 %v10690_v50, %v10690_v50  ;;  %v3760_v47 = vsub.f32 1.0, %v3759_v33  ;;  %v10723_v28 = vadd.f32 1.0, %v8139_v61  ;;  %v8141_v48 = vpop.eup %8140  ;;  %v3984_v18 = vrot.slane %v10690_v50, 1  ;;  %vm3780_vm2 = vmor %vm3778_vm10, %vm3779_vm0 }
 0x5a8   : > { %v4132_v44 = vunpack.c.l.b16 %v4044_v53  ;;  %v3775_v5 = vsub.f32 1.0, %v3774_v22  ;;  %v10738_v0 = vadd.f32 1.0, %v8141_v48  ;;  %vm12499_vm8 = vmmov %vm12496_vm6 }
 0x5a9   : > { %v4133_v39 = vunpack.c.l.b16 %v4045_v19  ;;  %v3761_v11 = vmul.f32 %v8135_v42, %v3760_v47  ;;  %8142 = vrcp.f32 %v10723_v28  ;;  %v3829_v31 = vand.u32 2147483648, %v10723_v28 }
 0x5aa   : > { %v3776_v59 = vmul.f32 %v8137_v6, %v3775_v5  ;;  %8144 = vrcp.f32 %v10738_v0  ;;  %v3827_v16 = vand.u32 2147483647, %v10723_v28  ;;  %v3992_v14 = vsel %vm1022_vm15, %v3976_v45, %v3984_v18 }
 0x5ab   : > { %v4144_v17 = vpack.c.b16 %v4133_v39, %v4132_v44  ;;  %v3762_v63 = vadd.f32 %v8135_v42, %v3761_v11  ;;  %v3844_v8 = vand.u32 2147483648, %v10738_v0  ;;  %v4000_v52 = vsel %vm1022_vm15, %v3984_v18, %v3976_v45 }
 0x5ac   : > { %v3777_v34 = vadd.f32 %v8137_v6, %v3776_v59  ;;  %vm3823_vm11 = vweird.f32 %v10723_v28  ;;  %v3830_v44 = vor.u32 1.1754944e-38, %v3829_v31  ;;  %v4060_v22 = vpack.c.bf16 %v3992_v14, %v3992_v14 }
 0x5ad   : > { %4156 = vrot.lane.b32.xlu2 %v4144_v17, %s8338_s13  ;;  %v3766_v27 = vsel %vm3765_vm13, %v8135_v42, %v3762_v63  ;;  %v10757_v42 = vadd.f32 %v10489_v58, %v3581_v51  ;;  %vm10769_vm7 = vcmp.eq.f32.partialorder %v3827_v16, 8.507059e+37  ;;  %vm3838_vm3 = vweird.f32 %v10738_v0 }
 0x5ae   : > { %v3771_v38 = vsel %vm3768_vm14, %v3770_v62, %v3766_v27  ;;  %v3781_v9 = vsel %vm3780_vm2, %v8137_v6, %v3777_v34  ;;  %v4013_v6 = vsel %vm12496_vm6, 0.0, %v4000_v52  ;;  %v3842_v47 = vand.u32 2147483647, %v10738_v0 }
 0x5af   : > { %v3786_v10 = vsel %vm3783_vm4, %v3785_v35, %v3781_v9  ;;  %v10745_v2 = vmul.f32 %v3771_v38, %v10649_v41  ;;  %v3845_v39 = vor.u32 1.1754944e-38, %v3844_v8  ;;  %v4061_v11 = vpack.c.bf16 %v4013_v6, %v4013_v6  ;;  %vm12500_vm4 = vmmov %vm12496_vm6 }
 0x5b0   : > { %v10751_v4 = vmul.f32 %v3786_v10, %v10652_v43  ;;  %v8143_v43 = vpop.eup %8142  ;;  %v4188_v45 = vunpack.c.l.b16 %v4060_v22  ;;  %v10784_v62 = vadd.f32 %v10489_v58, %v10699_v32  ;;  %v7239_v35 = vmul.f32 -1.442695, %v10757_v42  ;;  %v4336_v22 = vld [vmem:[#allocation3 + $0xa0] sm:$0xff] }
 0x5b1   : > { %v4042_v41 = vpack.c.bf16 %v10745_v2, %v10745_v2  ;;  %v3975_v53 = vrot.slane %v10745_v2, 1  ;;  %v3819_v29 = vmul.f32 %v8143_v43, %v10723_v28  ;;  %v8145_v36 = vpop.eup %8144  ;;  %vm3824_vm0 = vweird.f32 %v8143_v43 }
 0x5b2   : > { %v4043_v33 = vpack.c.bf16 %v10751_v4, %v10751_v4  ;;  %v3983_v19 = vrot.slane %v10751_v4, 1  ;;  %v3834_v59 = vmul.f32 %v8145_v36, %v10738_v0  ;;  %vm3839_vm10 = vweird.f32 %v8145_v36  ;;  %vm3825_vm13 = vmor %vm3823_vm11, %vm3824_vm0 }
 0x5b3   : > { %v4130_v51 = vunpack.c.l.b16 %v4042_v41  ;;  %v3820_v17 = vsub.f32 1.0, %v3819_v29  ;;  %v4189_v27 = vunpack.c.l.b16 %v4061_v11  ;;  %v7240_v31 = vmul.f32 -1.442695, %v10784_v62  ;;  %vm3840_vm14 = vmor %vm3838_vm3, %vm3839_vm10 }
 0x5b4   : > { %v4131_v1 = vunpack.c.l.b16 %v4043_v33  ;;  %v3991_v5 = vsel %vm1022_vm15, %v3975_v53, %v3983_v19  ;;  %v3999_v61 = vsel %vm1022_vm15, %v3983_v19, %v3975_v53  ;;  %v3835_v21 = vsub.f32 1.0, %v3834_v59 }
 0x5b5   : > { %v4011_v15 = vsel %vm12499_vm8, 0.0, %v3999_v61  ;;  %v4058_v30 = vpack.c.bf16 %v3991_v5, %v3991_v5  ;;  %v3821_v20 = vmul.f32 %v8143_v43, %v3820_v17  ;;  %v10791_v10 = vadd.f32 %v10489_v58, %v10703_v40  ;;  %v4332_v17 = vld [vmem:[#allocation3 + $0x80] sm:$0xff] }
 0x5b6   : > { %v4143_v48 = vpack.c.b16 %v4131_v1, %v4130_v51  ;;  %v4059_v63 = vpack.c.bf16 %v4011_v15, %v4011_v15  ;;  %v3836_v9 = vmul.f32 %v8145_v36, %v3835_v21  ;;  %8146 = vpow2.f32 %v7239_v35 }
 0x5b7   : > { %v4186_v18 = vunpack.c.l.b16 %v4058_v30  ;;  %v3822_v38 = vadd.f32 %v8143_v43, %v3821_v20  ;;  %v10798_v32 = vadd.f32 %v10489_v58, %v10710_v25  ;;  %v10802_v14 = vadd.f32 %v10714_v49, %v10489_v58 }
 0x5b8   : > { %4154 = vrot.lane.b32.xlu0 %v4143_v48, %s8338_s13  ;;  %v4187_v34 = vunpack.c.l.b16 %v4059_v63  ;;  %v3837_v52 = vadd.f32 %v8145_v36, %v3836_v9  ;;  %8148 = vpow2.f32 %v7240_v31  ;;  %v7237_v40 = vmul.f32 -1.442695, %v10791_v10 }
 0x5b9   : > { %v3826_v8 = vsel %vm3825_vm13, %v8143_v43, %v3822_v38  ;;  %v7238_v25 = vmul.f32 -1.442695, %v10798_v32  ;;  %v10814_v49 = vadd.f32 %v10717_v13, %v10489_v58  ;;  %v7243_v41 = vmul.f32 -1.442695, %v10802_v14  ;;  %v4338_v38 = vld [vmem:[#allocation3 + $0xb0] sm:$0xff] }
 0x5ba   : > { %v4199_v16 = vpack.c.b16 %v4187_v34, %v4186_v18  ;;  %v3831_v28 = vsel %vm10769_vm7, %v3830_v44, %v3826_v8  ;;  %v3841_v53 = vsel %vm3840_vm14, %v8145_v36, %v3837_v52  ;;  %vm3843_vm2 = vcmp.eq.f32.partialorder %v3842_v47, 8.507059e+37  ;;  %v4337_v36 = vld [vmem:[#allocation3 + $0xa8] sm:$0xff]  ;;  %v4339_v52 = vld [vmem:[#allocation3 + $0xb8] sm:$0xff] }
 0x5bb   : > { %v10818_v6 = vmul.f32 %v3831_v28, %v10676_v23  ;;  %v3846_v43 = vsel %vm3843_vm2, %v3845_v39, %v3841_v53  ;;  %v4200_v33 = vpack.c.b16 %v4189_v27, %v4188_v45  ;;  %8150 = vpow2.f32 %v7237_v40  ;;  %v4333_v18 = vld [vmem:[#allocation3 + $0x88] sm:$0xff] }
 0x5bc   : > { %4210 = vrot.lane.b32.xlu1 %v4199_v16, %s8340_s15  ;;  %v7244_v19 = vmul.f32 -1.442695, %v10814_v49  ;;  %v10822_v0 = vmul.f32 %v3846_v43, %v10682_v54  ;;  %8152 = vpow2.f32 %v7238_v25  ;;  %v8147_v51 = vpop.eup %8146  ;;  %v4352_v23 = vmul.f32 %v4336_v22, %v10483_v60  ;;  %v4342_v43 = vld [vmem:[#allocation3 + $0xd0] sm:$0xff] }
 0x5bd   : > { %v3977_v44 = vrot.slane %v10818_v6, 1  ;;  %v4046_v13 = vpack.c.bf16 %v10818_v6, %v10818_v6  ;;  %8154 = vpow2.f32 %v7243_v41  ;;  %v10832_v39 = vadd.f32 1.0, %v8147_v51 }
 0x5be   : > { %v8149_v29 = vpop.eup %8148  ;;  %v3985_v26 = vrot.slane %v10822_v0, 1  ;;  %v4047_v54 = vpack.c.bf16 %v10822_v0, %v10822_v0  ;;  %8156 = vpow2.f32 %v7244_v19  ;;  %v4353_v5 = vmul.f32 %v4337_v36, %v10483_v60 }
 0x5bf   : > { %v4134_v47 = vunpack.c.l.b16 %v4046_v13  ;;  %v10834_v1 = vadd.f32 1.0, %v8149_v29  ;;  %v10838_v61 = vadd.f32 %v4352_v23, %v10489_v58  ;;  %8158 = vrcp.f32 %v10832_v39 }
 0x5c0   : > { %4212 = vrot.lane.b32.xlu0 %v4200_v33, %s8340_s15  ;;  %v3993_v11 = vsel %vm1022_vm15, %v3977_v44, %v3985_v26  ;;  %v4001_v15 = vsel %vm1022_vm15, %v3985_v26, %v3977_v44  ;;  %v4135_v30 = vunpack.c.l.b16 %v4047_v54  ;;  %v10848_v45 = vadd.f32 %v4353_v5, %v10489_v58 }
 0x5c1   : > { %v8151_v59 = vpop.eup %8150  ;;  %v4015_v48 = vsel %vm12500_vm4, 0.0, %v4001_v15  ;;  %v4062_v63 = vpack.c.bf16 %v3993_v11, %v3993_v11  ;;  %v10851_v20 = vmul.f32 %v4332_v17, %v10483_v60  ;;  %8160 = vrcp.f32 %v10834_v1 }
 0x5c2   : > { %v8153_v21 = vpop.eup %8152  ;;  %v4063_v34 = vpack.c.bf16 %v4015_v48, %v4015_v48  ;;  %v4145_v27 = vpack.c.b16 %v4135_v30, %v4134_v47  ;;  %v10855_v35 = vmul.f32 %v4333_v18, %v10483_v60  ;;  %v3887_v16 = vand.u32 2147483647, %v10832_v39 }
 0x5c3   : > { %v8155_v9 = vpop.eup %8154  ;;  %v4190_v31 = vunpack.c.l.b16 %v4062_v63  ;;  %v7245_v8 = vmul.f32 -1.442695, %v10838_v61  ;;  %v10860_v40 = vmul.f32 %v4338_v38, %v10483_v60  ;;  %v3889_v25 = vand.u32 2147483648, %v10832_v39 }
 0x5c4   : > { %v4191_v28 = vunpack.c.l.b16 %v4063_v34  ;;  %4158 = vrot.lane.b32.xlu1 %v4145_v27, %s8338_s13  ;;  %v10864_v41 = vadd.f32 1.0, %v8151_v59  ;;  %v10867_v53 = vmul.f32 %v4339_v52, %v10483_v60  ;;  %v8157_v33 = vpop.eup %8156  ;;  %v3902_v19 = vand.u32 2147483647, %v10834_v1 }
 0x5c5   : > { %v10870_v44 = vadd.f32 1.0, %v8153_v21  ;;  %v10873_v13 = vmul.f32 -1.442695, %v10848_v45  ;;  %v10876_v22 = vmul.f32 %v4342_v43, %v10483_v60  ;;  %v8159_v51 = vpop.eup %8158  ;;  %v3904_v29 = vand.u32 2147483648, %v10834_v1 }
 0x5c6   : > { %v4201_v23 = vpack.c.b16 %v4191_v28, %v4190_v31  ;;  %8162 = vrcp.f32 %v10864_v41  ;;  %v10880_v26 = vadd.f32 1.0, %v8155_v9  ;;  %v3879_v54 = vmul.f32 %v8159_v51, %v10832_v39 }
 0x5c7   : > { %vm3883_vm11 = vweird.f32 %v10832_v39  ;;  %vm10884_vm6 = vcmp.eq.f32.partialorder %v3887_v16, 8.507059e+37  ;;  %8164 = vpow2.f32 %v7245_v8  ;;  %v8161_v36 = vpop.eup %8160  ;;  %v3890_v5 = vor.u32 1.1754944e-38, %v3889_v25 }
 0x5c8   : > { %4214 = vrot.lane.b32.xlu2 %v4201_v23, %s8340_s15  ;;  %vm3898_vm7 = vweird.f32 %v10834_v1  ;;  %8166 = vrcp.f32 %v10870_v44  ;;  %v10891_v11 = vadd.f32 1.0, %v8157_v33  ;;  %v3880_v15 = vsub.f32 1.0, %v3879_v54 }
 0x5c9   : > { %v3894_v30 = vmul.f32 %v8161_v36, %v10834_v1  ;;  %v3857_v17 = vand.u32 2147483647, %v10864_v41  ;;  %v3859_v59 = vand.u32 2147483648, %v10864_v41  ;;  %vm10896_vm3 = vcmp.eq.f32.partialorder %v3902_v19, 8.507059e+37 }
 0x5ca   : > { %v3905_v63 = vor.u32 1.1754944e-38, %v3904_v29  ;;  %v3874_v18 = vand.u32 2147483648, %v10870_v44  ;;  %8168 = vrcp.f32 %v10880_v26  ;;  %v3881_v21 = vmul.f32 %v8159_v51, %v3880_v15 }
 0x5cb   : > { %vm3884_vm8 = vweird.f32 %v8159_v51  ;;  %v3895_v34 = vsub.f32 1.0, %v3894_v30  ;;  %v3872_v27 = vand.u32 2147483647, %v10870_v44  ;;  %vm3899_vm0 = vweird.f32 %v8161_v36 }
 0x5cc   : > { %v8163_v38 = vpop.eup %8162  ;;  %vm3853_vm10 = vweird.f32 %v10864_v41  ;;  %v4485_v9 = vand.u32 2147483648, %v10880_v26  ;;  %8170 = vrcp.f32 %v10891_v11  ;;  %v3882_v16 = vadd.f32 %v8159_v51, %v3881_v21  ;;  %vm3885_vm2 = vmor %vm3883_vm11, %vm3884_vm8 }
 0x5cd   : > { %v8165_v31 = vpop.eup %8164  ;;  %v3896_v8 = vmul.f32 %v8161_v36, %v3895_v34  ;;  %v3849_v52 = vmul.f32 %v8163_v38, %v10864_v41  ;;  %vm10907_vm13 = vcmp.eq.f32.partialorder %v3857_v17, 8.507059e+37  ;;  %v3860_v25 = vor.u32 1.1754944e-38, %v3859_v59  ;;  %vm3900_vm11 = vmor %vm3898_vm7, %vm3899_vm0 }
 0x5ce   : > { %vm3868_vm14 = vweird.f32 %v10870_v44  ;;  %v8167_v43 = vpop.eup %8166  ;;  %v3875_v33 = vor.u32 1.1754944e-38, %v3874_v18  ;;  %v4483_v19 = vand.u32 2147483647, %v10880_v26  ;;  %v4498_v23 = vand.u32 2147483647, %v10891_v11 }
 0x5cf   : > { %v4500_v29 = vand.u32 2147483648, %v10891_v11  ;;  %v3886_v54 = vsel %vm3885_vm2, %v8159_v51, %v3882_v16  ;;  %v3897_v15 = vadd.f32 %v8161_v36, %v3896_v8  ;;  %v3850_v30 = vsub.f32 1.0, %v3849_v52 }
 0x5d0   : > { %v3864_v17 = vmul.f32 %v8167_v43, %v10870_v44  ;;  %vm10919_vm4 = vcmp.eq.f32.partialorder %v3872_v27, 8.507059e+37  ;;  %v10923_v21 = vpop.eup %8168  ;;  %v3891_v39 = vsel %vm10884_vm6, %v3890_v5, %v3886_v54  ;;  %vm3854_vm8 = vweird.f32 %v8163_v38 }
 0x5d1   : > { %vm3869_vm5 = vweird.f32 %v8167_v43  ;;  %vm4479_vm2 = vweird.f32 %v10880_v26  ;;  %v4486_v51 = vor.u32 1.1754944e-38, %v4485_v9  ;;  %v3901_v18 = vsel %vm3900_vm11, %v8161_v36, %v3897_v15  ;;  %vm3855_vm7 = vmor %vm3853_vm10, %vm3854_vm8 }
 0x5d2   : > { %v10932_v34 = vmul.f32 %v3891_v39, %v10757_v42  ;;  %v3851_v27 = vmul.f32 %v8163_v38, %v3850_v30  ;;  %v3865_v16 = vsub.f32 1.0, %v3864_v17  ;;  %v10934_v8 = vpop.eup %8170  ;;  %v3906_v47 = vsel %vm10896_vm3, %v3905_v63, %v3901_v18  ;;  %vm3870_vm10 = vmor %vm3868_vm14, %vm3869_vm5 }
 0x5d3   : > { %v4475_v1 = vmul.f32 %v10923_v21, %v10880_v26  ;;  %v4501_v5 = vor.u32 1.1754944e-38, %v4500_v29  ;;  %8172 = vpow2.f32 %v10873_v13  ;;  %v10942_v52 = vmul.f32 %v3906_v47, %v10784_v62 }
 0x5d4   : > { %v4050_v42 = vpack.c.bf16 %v10932_v34, %v10932_v34  ;;  %v3852_v36 = vadd.f32 %v8163_v38, %v3851_v27  ;;  %v3866_v9 = vmul.f32 %v8167_v43, %v3865_v16  ;;  %vm10946_vm6 = vcmp.eq.f32.partialorder %v4483_v19, 8.507059e+37 }
 0x5d5   : > { %v3979_v48 = vrot.slane %v10932_v34, 1  ;;  %v4476_v63 = vsub.f32 1.0, %v4475_v1  ;;  %vm4480_vm3 = vweird.f32 %v10923_v21  ;;  %v4490_v62 = vmul.f32 %v10934_v8, %v10891_v11 }
 0x5d6   : > { %vm4494_vm0 = vweird.f32 %v10891_v11  ;;  %v4051_v13 = vpack.c.bf16 %v10942_v52, %v10942_v52  ;;  %v4138_v19 = vunpack.c.l.b16 %v4050_v42  ;;  %v3856_v29 = vsel %vm3855_vm7, %v8163_v38, %v3852_v36  ;;  %vm4481_vm5 = vmor %vm4479_vm2, %vm4480_vm3 }
 0x5d7   : > { %v3867_v15 = vadd.f32 %v8167_v43, %v3866_v9  ;;  %v3861_v41 = vsel %vm10907_vm13, %v3860_v25, %v3856_v29  ;;  %v3987_v30 = vrot.slane %v10942_v52, 1  ;;  %v4477_v17 = vmul.f32 %v10923_v21, %v4476_v63 }
 0x5d8   : > { %v4491_v39 = vsub.f32 1.0, %v4490_v62  ;;  %vm10967_vm11 = vcmp.eq.f32.partialorder %v4498_v23, 8.507059e+37  ;;  %v4139_v27 = vunpack.c.l.b16 %v4051_v13  ;;  %v10972_v38 = vmul.f32 %v3861_v41, %v10791_v10 }
 0x5d9   : > { %v3871_v16 = vsel %vm3870_vm10, %v8167_v43, %v3867_v15  ;;  %v10974_v28 = vadd.f32 1.0, %v8165_v31  ;;  %v8173_v25 = vpop.eup %8172  ;;  %v3995_v47 = vsel %vm1022_vm15, %v3979_v48, %v3987_v30  ;;  %v4003_v23 = vsel %vm1022_vm15, %v3987_v30, %v3979_v48 }
 0x5da   : > { %12513 = vst [vmem:[#allocation13_spill] sm:$0xff] %v10972_v38  ;;  %v3876_v44 = vsel %vm10919_vm4, %v3875_v33, %v3871_v16  ;;  %v4478_v1 = vadd.f32 %v10923_v21, %v4477_v17  ;;  %v4147_v42 = vpack.c.b16 %v4139_v27, %v4138_v19  ;;  %v4048_v10 = vpack.c.bf16 %v10972_v38, %v10972_v38 }
 0x5db   : > { %v10984_v43 = vmul.f32 %v3876_v44, %v10798_v32  ;;  %v3978_v31 = vrot.slane %v10972_v38, 1  ;;  %vm12515_vm13 = vcmp.eq.s32.totalorder %v8862_v3, 15  ;;  %v4492_v36 = vmul.f32 %v10934_v8, %v4491_v39 }
 0x5dc   : > { %v4019_v33 = vsel %vm12515_vm13, 0.0, %v4003_v23  ;;  %v4482_v59 = vsel %vm4481_vm5, %v10923_v21, %v4478_v1  ;;  %vm4495_vm14 = vweird.f32 %v10934_v8  ;;  %4162 = vrot.lane.b32.xlu2 %v4147_v42, %s8338_s13  ;;  %v4136_v9 = vunpack.c.l.b16 %v4048_v10  ;;  %vm12516_vm8 = vmmov %vm12515_vm13 }
 0x5dd   : > { %12514 = vst [vmem:[#allocation14_spill] sm:$0xff] %v10984_v43  ;;  %v4049_v32 = vpack.c.bf16 %v10984_v43, %v10984_v43  ;;  %v3986_v48 = vrot.slane %v10984_v43, 1  ;;  %v11002_v63 = vadd.f32 1.0, %v8173_v25  ;;  %v4066_v26 = vpack.c.bf16 %v3995_v47, %v3995_v47  ;;  %vm4496_vm4 = vmor %vm4494_vm0, %vm4495_vm14 }
 0x5de   : > { %v4487_v62 = vsel %vm10946_vm6, %v4486_v51, %v4482_v59  ;;  %v4493_v21 = vadd.f32 %v10934_v8, %v4492_v36  ;;  %8174 = vrcp.f32 %v10974_v28  ;;  %v4067_v15 = vpack.c.bf16 %v4019_v33, %v4019_v33  ;;  %vm12519_vm2 = vmmov %vm12516_vm8 }
 0x5df   : > { %v4137_v13 = vunpack.c.l.b16 %v4049_v32  ;;  %v3994_v19 = vsel %vm1022_vm15, %v3978_v31, %v3986_v48  ;;  %v4002_v29 = vsel %vm1022_vm15, %v3986_v48, %v3978_v31  ;;  %v11018_v30 = vmul.f32 %v4487_v62, %v10802_v14  ;;  %v4343_v14 = vld [vmem:[#allocation3 + $0xd8] sm:$0xff] }
 0x5e0   : > { %v4017_v41 = vsel %vm12516_vm8, 0.0, %v4002_v29  ;;  %v4064_v54 = vpack.c.bf16 %v3994_v19, %v3994_v19  ;;  %v4497_v51 = vsel %vm4496_vm4, %v10934_v8, %v4493_v21  ;;  %v11024_v16 = vadd.f32 %v10851_v20, %v10489_v58 }
 0x5e1   : > { %12517 = vst [vmem:[#allocation12_spill] sm:$0xff] %v11018_v30  ;;  %v4146_v17 = vpack.c.b16 %v4137_v13, %v4136_v9  ;;  %v4065_v39 = vpack.c.bf16 %v4017_v41, %v4017_v41  ;;  %v4502_v27 = vsel %vm10967_vm11, %v4501_v5, %v4497_v51  ;;  %v4749_v44 = vrot.slane %v11018_v30, 1 }
 0x5e2   : > { %v4192_v11 = vunpack.c.l.b16 %v4064_v54  ;;  %v11027_v25 = vmul.f32 %v4502_v27, %v10814_v49  ;;  %v4814_v8 = vpack.c.bf16 %v11018_v30, %v11018_v30  ;;  %v4194_v23 = vunpack.c.l.b16 %v4066_v26 }
 0x5e3   : > { %4160 = vrot.lane.b32.xlu0 %v4146_v17, %s8338_s13  ;;  %v4193_v47 = vunpack.c.l.b16 %v4065_v39  ;;  %v11035_v5 = vadd.f32 %v10855_v35, %v10489_v58  ;;  %v4359_v20 = vmul.f32 %v4343_v14, %v10483_v60  ;;  %v4195_v1 = vunpack.c.l.b16 %v4067_v15 }
 0x5e4   : > { %12518 = vst [vmem:[#allocation15_spill] sm:$0xff] %v11027_v25  ;;  %v8175_v18 = vpop.eup %8174  ;;  %v4757_v49 = vrot.slane %v11027_v25, 1  ;;  %v4815_v42 = vpack.c.bf16 %v11027_v25, %v11027_v25  ;;  %8176 = vrcp.f32 %v11002_v63  ;;  %v4513_v33 = vand.u32 2147483647, %v10974_v28 }
 0x5e5   : > { %v4202_v10 = vpack.c.b16 %v4193_v47, %v4192_v11  ;;  %v4505_v31 = vmul.f32 %v8175_v18, %v10974_v28  ;;  %v7241_v59 = vmul.f32 -1.442695, %v11024_v16  ;;  %v4902_v32 = vunpack.c.l.b16 %v4814_v8 }
 0x5e6   : > { %v4765_v35 = vsel %vm1022_vm15, %v4749_v44, %v4757_v49  ;;  %v4773_v36 = vsel %vm1022_vm15, %v4757_v49, %v4749_v44  ;;  %v4515_v9 = vand.u32 2147483648, %v10974_v28  ;;  %v4903_v62 = vunpack.c.l.b16 %v4815_v42 }
 0x5e7   : > { %4216 = vrot.lane.b32.xlu1 %v4202_v10, %s8340_s15  ;;  %v4783_v48 = vsel %vm12519_vm2, 0.0, %v4773_v36  ;;  %v4830_v26 = vpack.c.bf16 %v4765_v35, %v4765_v35  ;;  %v4506_v21 = vsub.f32 1.0, %v4505_v31  ;;  %v4203_v13 = vpack.c.b16 %v4195_v1, %v4194_v23 }
 0x5e8   : > { %v4831_v19 = vpack.c.bf16 %v4783_v48, %v4783_v48  ;;  %vm4509_vm6 = vweird.f32 %v10974_v28  ;;  %vm4510_vm7 = vweird.f32 %v8175_v18  ;;  %8178 = vpow2.f32 %v7241_v59  ;;  %v7848_v28 = vld [vmem:[%s12264_s4 + $0x48] sm:$0xff]  ;;  %v4341_v48 = vld [vmem:[#allocation3 + $0xc8] sm:$0xff] }
 0x5e9   : > { %v4958_v29 = vunpack.c.l.b16 %v4830_v26  ;;  %v4507_v15 = vmul.f32 %v8175_v18, %v4506_v21  ;;  %v7242_v41 = vmul.f32 -1.442695, %v11035_v5  ;;  %vm11055_vm3 = vcmp.eq.f32.partialorder %v4513_v33, 8.507059e+37  ;;  %vm4511_vm0 = vmor %vm4509_vm6, %vm4510_vm7  ;;  %5270 = vmatpush.bf16.msrb.mxu2 %v7848_v28 }
 0x5ea   : > { %v8177_v54 = vpop.eup %8176  ;;  %v4959_v51 = vunpack.c.l.b16 %v4831_v19  ;;  %v4516_v39 = vor.u32 1.1754944e-38, %v4515_v9  ;;  %v11061_v27 = vadd.f32 %v10860_v40, %v10489_v58  ;;  %v4917_v11 = vpack.c.b16 %v4903_v62, %v4902_v32  ;;  %v4340_v32 = vld [vmem:[#allocation3 + $0xc0] sm:$0xff] }
 0x5eb   : > { %4218 = vrot.lane.b32.xlu0 %v4203_v13, %s8340_s15  ;;  %v4508_v44 = vadd.f32 %v8175_v18, %v4507_v15  ;;  %v4520_v8 = vmul.f32 %v8177_v54, %v11002_v63  ;;  %8180 = vpow2.f32 %v7242_v41  ;;  %v11070_v47 = vadd.f32 %v10867_v53, %v10489_v58  ;;  %v7834_v53 = vld [vmem:[%s12264_s4 + $0x18] sm:$0xff]  ;;  %v4344_v41 = vld [vmem:[#allocation3 + $0xe0] sm:$0xff] }
 0x5ec   : > { %v4973_v14 = vpack.c.b16 %v4959_v51, %v4958_v29  ;;  %v7247_v23 = vmul.f32 -1.442695, %v11061_v27  ;;  %v11075_v40 = vadd.f32 %v10876_v22, %v10489_v58  ;;  %v4528_v42 = vand.u32 2147483647, %v11002_v63  ;;  %5419 = vmatpush.bf16.msrb.mxu3 %v7834_v53 }
 0x5ed   : > { %v4512_v1 = vsel %vm4511_vm0, %v8175_v18, %v4508_v44  ;;  %v4521_v49 = vsub.f32 1.0, %v4520_v8  ;;  %v4530_v10 = vand.u32 2147483648, %v11002_v63  ;;  %vm4525_vm10 = vweird.f32 %v8177_v54 }
 0x5ee   : > { %4982 = vrot.lane.b32.xlu2 %v4973_v14, %s8340_s15  ;;  %v4517_v22 = vsel %vm11055_vm3, %v4516_v39, %v4512_v1  ;;  %8182 = vpow2.f32 %v7247_v23  ;;  %v7248_v18 = vmul.f32 -1.442695, %v11070_v47  ;;  %v8179_v31 = vpop.eup %8178  ;;  %v11094_v35 = vadd.f32 %v4359_v20, %v10489_v58  ;;  %v4345_v39 = vld [vmem:[#allocation3 + $0xe8] sm:$0xff] }
 0x5ef   : > { %4926 = vrot.lane.b32.xlu1 %v4917_v11, %s8338_s13  ;;  %v4522_v33 = vmul.f32 %v8177_v54, %v4521_v49  ;;  %v11091_v59 = vmul.f32 %v4517_v22, %v10838_v61  ;;  %v7251_v36 = vmul.f32 -1.442695, %v11075_v40  ;;  %v11097_v9 = vadd.f32 1.0, %v8179_v31 }
 0x5f0   : > { %8184 = vpow2.f32 %v7248_v18  ;;  %v4356_v26 = vmul.f32 %v4340_v32, %v10483_v60  ;;  %vm4524_vm11 = vweird.f32 %v11002_v63  ;;  %v4531_v61 = vor.u32 1.1754944e-38, %v4530_v10 }
 0x5f1   : > { %12522 = vst [vmem:[#allocation16_spill] sm:$0xff] %v11091_v59  ;;  %v8181_v62 = vpop.eup %8180  ;;  %v4523_v21 = vadd.f32 %v8177_v54, %v4522_v33  ;;  %v4357_v13 = vmul.f32 %v4341_v48, %v10483_v60  ;;  %vm4526_vm5 = vmor %vm4524_vm11, %vm4525_vm10  ;;  %v4816_v20 = vpack.c.bf16 %v11091_v59, %v11091_v59  ;;  %8186 = vrcp.f32 %v11097_v9 }
 0x5f2   : > { %v11105_v19 = vadd.f32 1.0, %v8181_v62  ;;  %v11109_v29 = vadd.f32 %v4356_v26, %v10489_v58  ;;  %vm4529_vm13 = vcmp.eq.f32.partialorder %v4528_v42, 8.507059e+37  ;;  %8188 = vpow2.f32 %v7251_v36 }
 0x5f3   : > { %v4527_v15 = vsel %vm4526_vm5, %v8177_v54, %v4523_v21  ;;  %v7252_v63 = vmul.f32 -1.442695, %v11094_v35  ;;  %v11114_v11 = vmul.f32 %v4344_v41, %v10483_v60  ;;  %v4453_v8 = vand.u32 2147483647, %v11097_v9 }
 0x5f4   : > { %v8183_v51 = vpop.eup %8182  ;;  %v4532_v17 = vsel %vm4529_vm13, %v4531_v61, %v4527_v15  ;;  %8190 = vrcp.f32 %v11105_v19  ;;  %v11121_v54 = vadd.f32 %v4357_v13, %v10489_v58  ;;  %v11124_v14 = vmul.f32 %v4345_v39, %v10483_v60 }
 0x5f5   : > { %v11117_v44 = vmul.f32 %v4532_v17, %v10848_v45  ;;  %v4904_v1 = vunpack.c.l.b16 %v4816_v20  ;;  %v4455_v49 = vand.u32 2147483648, %v11097_v9  ;;  %v11127_v42 = vadd.f32 1.0, %v8183_v51 }
 0x5f6   : > { %v8185_v23 = vpop.eup %8184  ;;  %v7249_v10 = vmul.f32 -1.442695, %v11109_v29  ;;  %v4468_v28 = vand.u32 2147483647, %v11105_v19  ;;  %8192 = vpow2.f32 %v7252_v63  ;;  %vm4449_vm14 = vweird.f32 %v11097_v9 }
 0x5f7   : > { %12523 = vst [vmem:[#allocation17_spill] sm:$0xff] %v11117_v44  ;;  %v4817_v45 = vpack.c.bf16 %v11117_v44, %v11117_v44  ;;  %v11133_v53 = vadd.f32 1.0, %v8185_v23  ;;  %v8187_v22 = vpop.eup %8186  ;;  %v4470_v18 = vand.u32 2147483648, %v11105_v19  ;;  %8194 = vrcp.f32 %v11127_v42 }
 0x5f8   : > { %v4750_v31 = vrot.slane %v11091_v59, 1  ;;  %v8189_v33 = vpop.eup %8188  ;;  %v4445_v32 = vmul.f32 %v8187_v22, %v11097_v9  ;;  %vm11140_vm4 = vcmp.eq.f32.partialorder %v4453_v8, 8.507059e+37  ;;  %vm4464_vm8 = vweird.f32 %v11105_v19 }
 0x5f9   : > { %v4905_v36 = vunpack.c.l.b16 %v4817_v45  ;;  %8196 = vrcp.f32 %v11133_v53  ;;  %v4456_v62 = vor.u32 1.1754944e-38, %v4455_v49  ;;  %v4545_v21 = vand.u32 2147483648, %v11127_v42 }
 0x5fa   : > { %v8191_v26 = vpop.eup %8190  ;;  %8198 = vpow2.f32 %v7249_v10  ;;  %v7250_v61 = vmul.f32 -1.442695, %v11121_v54  ;;  %v4446_v20 = vsub.f32 1.0, %v4445_v32  ;;  %vm11149_vm2 = vcmp.eq.f32.partialorder %v4468_v28, 8.507059e+37 }
 0x5fb   : > { %v4918_v13 = vpack.c.b16 %v4905_v36, %v4904_v1  ;;  %v4460_v15 = vmul.f32 %v8191_v26, %v11105_v19  ;;  %v4543_v41 = vand.u32 2147483647, %v11127_v42  ;;  %v4471_v51 = vor.u32 1.1754944e-38, %v4470_v18 }
 0x5fc   : > { %v4558_v17 = vand.u32 2147483647, %v11133_v53  ;;  %v4758_v39 = vrot.slane %v11117_v44, 1  ;;  %v11156_v8 = vadd.f32 1.0, %v8189_v33  ;;  %v8193_v23 = vpop.eup %8192  ;;  %v4447_v1 = vmul.f32 %v8187_v22, %v4446_v20 }
 0x5fd   : > { %4928 = vrot.lane.b32.xlu2 %v4918_v13, %s8338_s13  ;;  %vm4450_vm6 = vweird.f32 %v8187_v22  ;;  %v4461_v49 = vsub.f32 1.0, %v4460_v15  ;;  %vm4539_vm7 = vweird.f32 %v11127_v42  ;;  %v8195_v10 = vpop.eup %8194  ;;  %vm4465_vm3 = vweird.f32 %v8191_v26 }
 0x5fe   : > { %v4546_v45 = vor.u32 1.1754944e-38, %v4545_v21  ;;  %vm4554_vm0 = vweird.f32 %v11133_v53  ;;  %8200 = vrcp.f32 %v11156_v8  ;;  %v4448_v18 = vadd.f32 %v8187_v22, %v4447_v1  ;;  %vm4451_vm11 = vmor %vm4449_vm14, %vm4450_vm6 }
 0x5ff   : > { %v8197_v28 = vpop.eup %8196  ;;  %v4462_v36 = vmul.f32 %v8191_v26, %v4461_v49  ;;  %v4535_v33 = vmul.f32 %v8195_v10, %v11127_v42  ;;  %vm11163_vm10 = vcmp.eq.f32.partialorder %v4543_v41, 8.507059e+37  ;;  %v4766_v13 = vsel %vm1022_vm15, %v4750_v31, %v4758_v39  ;;  %vm4466_vm13 = vmor %vm4464_vm8, %vm4465_vm3 }
 0x600   : > { %v11169_v20 = vpop.eup %8198  ;;  %v4550_v21 = vmul.f32 %v8197_v28, %v11133_v53  ;;  %vm11175_vm5 = vcmp.eq.f32.partialorder %v4558_v17, 8.507059e+37  ;;  %v4560_v41 = vand.u32 2147483648, %v11133_v53  ;;  %v4774_v1 = vsel %vm1022_vm15, %v4758_v39, %v4750_v31 }
 0x601   : > { %v11182_v49 = vadd.f32 1.0, %v8193_v23  ;;  %v4452_v44 = vsel %vm4451_vm11, %v8187_v22, %v4448_v18  ;;  %v4463_v59 = vadd.f32 %v8191_v26, %v4462_v36  ;;  %v4536_v30 = vsub.f32 1.0, %v4535_v33 }
 0x602   : > { %8202 = vpow2.f32 %v7250_v61  ;;  %v4457_v9 = vsel %vm11140_vm4, %v4456_v62, %v4452_v44  ;;  %vm4540_vm14 = vweird.f32 %v8195_v10  ;;  %v4551_v17 = vsub.f32 1.0, %v4550_v21 }
 0x603   : > { %v4832_v25 = vpack.c.bf16 %v4766_v13, %v4766_v13  ;;  %v4467_v43 = vsel %vm4466_vm13, %v8191_v26, %v4463_v59  ;;  %v11190_v38 = vmul.f32 %v4457_v9, %v11024_v16  ;;  %v4537_v31 = vmul.f32 %v8195_v10, %v4536_v30  ;;  %vm4541_vm8 = vmor %vm4539_vm7, %vm4540_vm14 }
 0x604   : > { %vm12532_vm6 = vcmp.eq.s32.totalorder %v8862_v3, 15  ;;  %v11194_v39 = vpop.eup %8200  ;;  %v4472_v44 = vsel %vm11149_vm2, %v4471_v51, %v4467_v43  ;;  %v4552_v48 = vmul.f32 %v8197_v28, %v4551_v17  ;;  %vm4555_vm4 = vweird.f32 %v8197_v28 }
 0x605   : > { %v4785_v22 = vsel %vm12532_vm6, 0.0, %v4774_v1  ;;  %v4561_v19 = vor.u32 1.1754944e-38, %v4560_v41  ;;  %v11199_v62 = vmul.f32 %v4472_v44, %v11035_v5  ;;  %v4812_v59 = vpack.c.bf16 %v11190_v38, %v11190_v38  ;;  %vm4556_vm2 = vmor %vm4554_vm0, %vm4555_vm4 }
 0x606   : > { %v4748_v16 = vrot.slane %v11190_v38, 1  ;;  %v4538_v30 = vadd.f32 %v8195_v10, %v4537_v31  ;;  %v4553_v26 = vadd.f32 %v8197_v28, %v4552_v48  ;;  %v4833_v61 = vpack.c.bf16 %v4785_v22, %v4785_v22  ;;  %vm12533_vm3 = vmmov %vm12532_vm6 }
 0x607   : > { %v11207_v63 = vunpack.c.l.b16 %v4832_v25  ;;  %v4595_v43 = vmul.f32 %v11194_v39, %v11156_v8  ;;  %v4813_v5 = vpack.c.bf16 %v11199_v62, %v11199_v62  ;;  %v4900_v23 = vunpack.c.l.b16 %v4812_v59 }
 0x608   : > { %v8203_v51 = vpop.eup %8202  ;;  %v4756_v18 = vrot.slane %v11199_v62, 1  ;;  %v4542_v36 = vsel %vm4541_vm8, %v8195_v10, %v4538_v30  ;;  %v4557_v25 = vsel %vm4556_vm2, %v8197_v28, %v4553_v26  ;;  %vm4599_vm7 = vweird.f32 %v11156_v8 }
 0x609   : > { %v4547_v42 = vsel %vm11163_vm10, %v4546_v45, %v4542_v36  ;;  %v4596_v33 = vsub.f32 1.0, %v4595_v43  ;;  %v4901_v13 = vunpack.c.l.b16 %v4813_v5  ;;  %v4562_v10 = vsel %vm11175_vm5, %v4561_v19, %v4557_v25  ;;  %vm12534_vm10 = vmmov %vm12533_vm3 }
 0x60a   : > { %v4764_v21 = vsel %vm1022_vm15, %v4748_v16, %v4756_v18  ;;  %v4772_v41 = vsel %vm1022_vm15, %v4756_v18, %v4748_v16  ;;  %v11229_v45 = vmul.f32 %v4547_v42, %v11061_v27  ;;  %v11232_v28 = vmul.f32 %v4562_v10, %v11070_v47 }
 0x60b   : > { %v4781_v53 = vsel %vm12533_vm3, 0.0, %v4772_v41  ;;  %v4828_v1 = vpack.c.bf16 %v4764_v21, %v4764_v21  ;;  %v4916_v32 = vpack.c.b16 %v4901_v13, %v4900_v23  ;;  %v4597_v17 = vmul.f32 %v11194_v39, %v4596_v33 }
 0x60c   : > { %v4829_v9 = vpack.c.bf16 %v4781_v53, %v4781_v53  ;;  %v4603_v31 = vand.u32 2147483647, %v11156_v8  ;;  %v4751_v15 = vrot.slane %v11229_v45, 1  ;;  %v4759_v44 = vrot.slane %v11232_v28, 1 }
 0x60d   : > { %v4956_v22 = vunpack.c.l.b16 %v4828_v1  ;;  %vm4600_vm0 = vweird.f32 %v11194_v39  ;;  %4924 = vrot.lane.b32.xlu0 %v4916_v32, %s8338_s13  ;;  %v4598_v48 = vadd.f32 %v11194_v39, %v4597_v17  ;;  %v4605_v47 = vand.u32 2147483648, %v11156_v8  ;;  %v4346_v17 = vld [vmem:[#allocation3 + $0xf0] sm:$0xff] }
 0x60e   : > { %v4957_v27 = vunpack.c.l.b16 %v4829_v9  ;;  %8204 = vrcp.f32 %v11182_v49  ;;  %v4767_v19 = vsel %vm1022_vm15, %v4751_v15, %v4759_v44  ;;  %v4775_v59 = vsel %vm1022_vm15, %v4759_v44, %v4751_v15  ;;  %vm11255_vm11 = vmor %vm4599_vm7, %vm4600_vm0 }
 0x60f   : > { %v4818_v16 = vpack.c.bf16 %v11229_v45, %v11229_v45  ;;  %v4819_v30 = vpack.c.bf16 %v11232_v28, %v11232_v28  ;;  %v4787_v43 = vsel %vm12534_vm10, 0.0, %v4775_v59  ;;  %v4834_v5 = vpack.c.bf16 %v4767_v19, %v4767_v19 }
 0x610   : > { %v4972_v26 = vpack.c.b16 %v4957_v27, %v4956_v22  ;;  %v4961_v23 = vunpack.c.l.b16 %v4833_v61  ;;  %v4835_v36 = vpack.c.bf16 %v4787_v43, %v4787_v43  ;;  %v4602_v42 = vsel %vm11255_vm11, %v11194_v39, %v4598_v48  ;;  %v7833_v39 = vld [vmem:[%s12264_s4 + $0x10] sm:$0xff] }
 0x611   : > { %v11264_v25 = vadd.f32 %v11114_v11, %v10489_v58  ;;  %v4962_v33 = vunpack.c.l.b16 %v4834_v5  ;;  %v4606_v13 = vor.u32 1.1754944e-38, %v4605_v47  ;;  %v11268_v61 = vadd.f32 1.0, %v11169_v20  ;;  %v7847_v11 = vld [vmem:[%s12264_s4 + $0x40] sm:$0xff]  ;;  %5420 = vmatpush.bf16.msrb.mxu3 %v7833_v39 }
 0x612   : > { %4980 = vrot.lane.b32.xlu1 %v4972_v26, %s8340_s15  ;;  %v11272_v8 = vadd.f32 %v11124_v14, %v10489_v58  ;;  %v4963_v21 = vunpack.c.l.b16 %v4835_v36  ;;  %v4906_v41 = vunpack.c.l.b16 %v4818_v16  ;;  %v4907_v10 = vunpack.c.l.b16 %v4819_v30  ;;  %5271 = vmatpush.bf16.msrb.mxu2 %v7847_v11  ;;  %v4347_v16 = vld [vmem:[#allocation3 + $0xf8] sm:$0xff] }
 0x613   : > { %vm4604_vm5 = vcmp.eq.f32.partialorder %v4603_v31, 8.507059e+37  ;;  %v4974_v20 = vpack.c.b16 %v4961_v23, %v11207_v63  ;;  %v11281_v32 = vadd.f32 1.0, %v8203_v51  ;;  %8206 = vrcp.f32 %v11268_v61 }
 0x614   : > { %v8205_v53 = vpop.eup %8204  ;;  %v4607_v1 = vsel %vm4604_vm5, %v4606_v13, %v4602_v42  ;;  %v4975_v14 = vpack.c.b16 %v4963_v21, %v4962_v33  ;;  %v4618_v31 = vand.u32 2147483647, %v11182_v49  ;;  %v4362_v22 = vmul.f32 %v4346_v17, %v10483_v60 }
 0x615   : > { %v4610_v9 = vmul.f32 %v8205_v53, %v11182_v49  ;;  %4984 = vrot.lane.b32.xlu0 %v4974_v20, %s8340_s15  ;;  %8208 = vrcp.f32 %v11281_v32  ;;  %v4919_v63 = vpack.c.b16 %v4907_v10, %v4906_v41  ;;  %v4620_v15 = vand.u32 2147483648, %v11182_v49 }
 0x616   : > { %4986 = vrot.lane.b32.xlu2 %v4975_v14, %s8340_s15  ;;  %v11292_v44 = vmul.f32 %v4607_v1, %v11075_v40  ;;  %v4573_v27 = vand.u32 2147483647, %v11268_v61  ;;  %v7253_v48 = vmul.f32 -1.442695, %v11264_v25  ;;  %v7254_v47 = vmul.f32 -1.442695, %v11272_v8 }
 0x617   : > { %v4611_v51 = vsub.f32 1.0, %v4610_v9  ;;  %v11298_v19 = vadd.f32 %v4362_v22, %v10489_v58  ;;  %vm4615_vm13 = vweird.f32 %v8205_v53  ;;  %vm4614_vm14 = vweird.f32 %v11182_v49 }
 0x618   : > { %vm11302_vm6 = vcmp.eq.f32.partialorder %v4618_v31, 8.507059e+37  ;;  %8210 = vpow2.f32 %v7253_v48  ;;  %v4363_v26 = vmul.f32 %v4347_v16, %v10483_v60  ;;  %v4621_v5 = vor.u32 1.1754944e-38, %v4620_v15  ;;  %vm4616_vm4 = vmor %vm4614_vm14, %vm4615_vm13 }
 0x619   : > { %v4612_v59 = vmul.f32 %v8205_v53, %v4611_v51  ;;  %v8207_v30 = vpop.eup %8206  ;;  %8212 = vpow2.f32 %v7254_v47  ;;  %v4822_v36 = vpack.c.bf16 %v11292_v44, %v11292_v44  ;;  %vm4569_vm8 = vweird.f32 %v11268_v61 }
 0x61a   : > { %4930 = vrot.lane.b32.xlu1 %v4919_v63, %s8338_s13  ;;  %v4565_v23 = vmul.f32 %v8207_v30, %v11268_v61  ;;  %vm11311_vm2 = vcmp.eq.f32.partialorder %v4573_v27, 8.507059e+37  ;;  %v7255_v42 = vmul.f32 -1.442695, %v11298_v19  ;;  %v4575_v13 = vand.u32 2147483648, %v11268_v61 }
 0x61b   : > { %v4613_v43 = vadd.f32 %v8205_v53, %v4612_v59  ;;  %v8209_v18 = vpop.eup %8208  ;;  %vm4584_vm7 = vweird.f32 %v11281_v32  ;;  %v4588_v10 = vand.u32 2147483647, %v11281_v32  ;;  %v11323_v11 = vadd.f32 %v4363_v26, %v10489_v58 }
 0x61c   : > { %v4566_v60 = vsub.f32 1.0, %v4565_v23  ;;  %v4580_v21 = vmul.f32 %v8209_v18, %v11281_v32  ;;  %vm4570_vm3 = vweird.f32 %v8207_v30  ;;  %v4910_v14 = vunpack.c.l.b16 %v4822_v36 }
 0x61d   : > { %v4617_v33 = vsel %vm4616_vm4, %v8205_v53, %v4613_v43  ;;  %vm4585_vm0 = vweird.f32 %v8209_v18  ;;  %v4590_v9 = vand.u32 2147483648, %v11281_v32  ;;  %8214 = vpow2.f32 %v7255_v42  ;;  %vm4571_vm10 = vmor %vm4569_vm8, %vm4570_vm3 }
 0x61e   : > { %v4622_v41 = vsel %vm11302_vm6, %v4621_v5, %v4617_v33  ;;  %v4567_v20 = vmul.f32 %v8207_v30, %v4566_v60  ;;  %v4581_v53 = vsub.f32 1.0, %v4580_v21  ;;  %v8211_v1 = vpop.eup %8210  ;;  %vm11335_vm11 = vcmp.eq.f32.partialorder %v4588_v10, 8.507059e+37  ;;  %vm4586_vm5 = vmor %vm4584_vm7, %vm4585_vm0 }
 0x61f   : > { %v11326_v39 = vmul.f32 %v4622_v41, %v11094_v35  ;;  %v8213_v17 = vpop.eup %8212  ;;  %v11331_v58 = vadd.f32 1.0, %v8211_v1  ;;  %v4576_v35 = vor.u32 1.1754944e-38, %v4575_v13  ;;  %v7256_v27 = vmul.f32 -1.442695, %v11323_v11 }
 0x620   : > { %v4568_v22 = vadd.f32 %v8207_v30, %v4567_v20  ;;  %v4582_v63 = vmul.f32 %v8209_v18, %v4581_v53  ;;  %v11339_v15 = vadd.f32 1.0, %v8213_v17  ;;  %v4591_v61 = vor.u32 1.1754944e-38, %v4590_v9 }
 0x621   : > { %v4823_v31 = vpack.c.bf16 %v11326_v39, %v11326_v39  ;;  %8216 = vrcp.f32 %v11331_v58  ;;  %v4753_v40 = vrot.slane %v11292_v44, 1  ;;  %v4761_v26 = vrot.slane %v11326_v39, 1 }
 0x622   : > { %v4572_v47 = vsel %vm4571_vm10, %v8207_v30, %v4568_v22  ;;  %v4583_v59 = vadd.f32 %v8209_v18, %v4582_v63  ;;  %8218 = vrcp.f32 %v11339_v15  ;;  %vm4629_vm13 = vweird.f32 %v11331_v58 }
 0x623   : > { %v4911_v48 = vunpack.c.l.b16 %v4823_v31  ;;  %v4577_v16 = vsel %vm11311_vm2, %v4576_v35, %v4572_v47  ;;  %v8215_v30 = vpop.eup %8214  ;;  %8220 = vpow2.f32 %v7256_v27  ;;  %v4635_v42 = vand.u32 2147483648, %v11331_v58 }
 0x624   : > { %v4587_v5 = vsel %vm4586_vm5, %v8209_v18, %v4583_v59  ;;  %v11351_v23 = vmul.f32 %v4577_v16, %v11109_v29  ;;  %v4633_v29 = vand.u32 2147483647, %v11331_v58  ;;  %v4769_v33 = vsel %vm1022_vm15, %v4753_v40, %v4761_v26 }
 0x625   : > { %v4921_v43 = vpack.c.b16 %v4911_v48, %v4910_v14  ;;  %v4592_v36 = vsel %vm11335_vm11, %v4591_v61, %v4587_v5  ;;  %v4777_v60 = vsel %vm1022_vm15, %v4761_v26, %v4753_v40  ;;  %v4648_v10 = vand.u32 2147483647, %v11339_v15 }
 0x626   : > { %v11358_v32 = vmul.f32 %v4592_v36, %v11121_v54  ;;  %v4820_v49 = vpack.c.bf16 %v11351_v23, %v11351_v23  ;;  %v4752_v18 = vrot.slane %v11351_v23, 1  ;;  %v4650_v53 = vand.u32 2147483648, %v11339_v15 }
 0x627   : > { %4934 = vrot.lane.b32.xlu2 %v4921_v43, %s8338_s13  ;;  %v8217_v13 = vpop.eup %8216  ;;  %vm12543_vm14 = vcmp.eq.s32.totalorder %v8862_v3, 15  ;;  %v11378_v14 = vadd.f32 1.0, %v8215_v30  ;;  %v4838_v63 = vpack.c.bf16 %v4769_v33, %v4769_v33  ;;  %v7832_v33 = vld [vmem:[%s12264_s4 + $0x8] sm:$0xff]  ;;  %vm11399_vm8 = vcmp.eq.f32.partialorder %v4633_v29, 8.507059e+37 }
 0x628   : > { %v4821_v54 = vpack.c.bf16 %v11358_v32, %v11358_v32  ;;  %v4908_v21 = vunpack.c.l.b16 %v4820_v49  ;;  %v4760_v41 = vrot.slane %v11358_v32, 1  ;;  %v4625_v20 = vmul.f32 %v8217_v13, %v11331_v58  ;;  %v8219_v9 = vpop.eup %8218  ;;  %vm12544_vm6 = vmmov %vm12543_vm14  ;;  %5421 = vmatpush.bf16.msrb.mxu3 %v7832_v33 }
 0x629   : > { %v4791_v1 = vsel %vm12543_vm14, 0.0, %v4777_v60  ;;  %v8221_v35 = vpop.eup %8220  ;;  %v4640_v47 = vmul.f32 %v8219_v9, %v11339_v15  ;;  %vm4630_vm4 = vweird.f32 %v8217_v13  ;;  %v4966_v5 = vunpack.c.l.b16 %v4838_v63  ;;  %v11397_v60 = vpop.permute.xlu0 %4148  ;;  %v7831_v63 = vld [vmem:[%s12264_s4] sm:$0xff] }
 0x62a   : > { %v4909_v17 = vunpack.c.l.b16 %v4821_v54  ;;  %v4768_v31 = vsel %vm1022_vm15, %v4752_v18, %v4760_v41  ;;  %v4776_v22 = vsel %vm1022_vm15, %v4760_v41, %v4752_v18  ;;  %v4626_v48 = vsub.f32 1.0, %v4625_v20  ;;  %v7846_v18 = vld [vmem:[%s12264_s4 + $0x38] sm:$0xff]  ;;  %v7864_v20 = vld [vmem:[%s12264_s4 + $0x88] sm:$0xff]  ;;  %vm11409_vm7 = vmor %vm4629_vm13, %vm4630_vm4 }
 0x62b   : > { %v4789_v51 = vsel %vm12544_vm6, 0.0, %v4776_v22  ;;  %v4836_v27 = vpack.c.bf16 %v4768_v31, %v4768_v31  ;;  %v4839_v61 = vpack.c.bf16 %v4791_v1, %v4791_v1  ;;  %v4641_v43 = vsub.f32 1.0, %v4640_v47  ;;  %5272 = vmatpush.bf16.msrb.mxu2 %v7846_v18  ;;  %v7845_v22 = vld [vmem:[%s12264_s4 + $0x30] sm:$0xff]  ;;  %5595 = vmatpush.bf16.msra.mxu0 %v7864_v20 }
 0x62c   : > { %v4920_v59 = vpack.c.b16 %v4909_v17, %v4908_v21  ;;  %v4837_v16 = vpack.c.bf16 %v4789_v51, %v4789_v51  ;;  %v4627_v26 = vmul.f32 %v8217_v13, %v4626_v48  ;;  %v11388_v49 = vadd.f32 1.0, %v8221_v35  ;;  %v11425_v51 = vpop.permute.xlu2 %4150  ;;  %5422 = vmatpush.bf16.msrb.mxu3 %v7831_v63  ;;  %v11469_v17 = vpop.permute.xlu1 %4204 }
 0x62d   : > { %v4964_v40 = vunpack.c.l.b16 %v4836_v27  ;;  %v4967_v36 = vunpack.c.l.b16 %v4839_v61  ;;  %8222 = vrcp.f32 %v11378_v14  ;;  %v4642_v41 = vmul.f32 %v8219_v9, %v4641_v43  ;;  %v7863_v27 = vld [vmem:[%s12264_s4 + $0x80] sm:$0xff] }
 0x62e   : > { %4932 = vrot.lane.b32.xlu0 %v4920_v59, %s8338_s13  ;;  %v4965_v30 = vunpack.c.l.b16 %v4837_v16  ;;  %v4628_v54 = vadd.f32 %v8217_v13, %v4627_v26  ;;  %vm4645_vm2 = vweird.f32 %v8219_v9  ;;  %v4636_v31 = vor.u32 1.1754944e-38, %v4635_v42 }
 0x62f   : > { %v4665_v29 = vand.u32 2147483648, %v11378_v14  ;;  %8224 = vrcp.f32 %v11388_v49  ;;  %v4643_v35 = vadd.f32 %v8219_v9, %v4642_v41  ;;  %vm4644_vm3 = vweird.f32 %v11339_v15  ;;  %5273 = vmatpush.bf16.msrb.mxu2 %v7845_v22  ;;  %5596 = vmatpush.bf16.msra.mxu0 %v7863_v27 }
 0x630   : > { %v4976_v1 = vpack.c.b16 %v4965_v30, %v4964_v40  ;;  %v4632_v58 = vsel %vm11409_vm7, %v8217_v13, %v4628_v54  ;;  %v4663_v42 = vand.u32 2147483647, %v11378_v14  ;;  %vm4646_vm0 = vmor %vm4644_vm3, %vm4645_vm2  ;;  %vm4649_vm10 = vcmp.eq.f32.partialorder %v4648_v10, 8.507059e+37  ;;  %v7823_v40 = vld [vmem:[#allocation2] sm:$0xff] }
 0x631   : > { %v4637_v48 = vsel %vm11399_vm8, %v4636_v31, %v4632_v58  ;;  %v4651_v13 = vor.u32 1.1754944e-38, %v4650_v53  ;;  %v4977_v47 = vpack.c.b16 %v4967_v36, %v4966_v5  ;;  %v4647_v15 = vsel %vm4646_vm0, %v8219_v9, %v4643_v35  ;;  %v7862_v5 = vld [vmem:[%s12264_s4 + $0x78] sm:$0xff]  ;;  %7389 = vmatmul.msk.bf16.vlgmr.msrb.gmra.mxu3 %vm2280_vm9, %v7823_v40  ;;  %v11471_v31 = vpop.permute.xlu0 %4206 }
 0x632   : > { %4988 = vrot.lane.b32.xlu1 %v4976_v1, %s8340_s15  ;;  %v11435_v59 = vmul.f32 %v4637_v48, %v11264_v25  ;;  %vm4659_vm11 = vweird.f32 %v11378_v14  ;;  %v3933_v16 = vrot.slane %v10559_v57, 7  ;;  %v3925_v61 = vrot.slane %v10554_v46, 7 }
 0x633   : > { %v8223_v26 = vpop.eup %8222  ;;  %v4652_v43 = vsel %vm4649_vm10, %v4651_v13, %v4647_v15  ;;  %v4666_v30 = vor.u32 1.1754944e-38, %v4665_v29  ;;  %v4678_v18 = vand.u32 2147483647, %v11388_v49  ;;  %v4680_v10 = vand.u32 2147483648, %v11388_v49  ;;  %5597 = vmatpush.bf16.msra.mxu0 %v7862_v5  ;;  %v7861_v5 = vld [vmem:[%s12264_s4 + $0x70] sm:$0xff] }
 0x634   : > { %v11443_v53 = vmul.f32 %v4652_v43, %v11272_v8  ;;  %v4754_v25 = vrot.slane %v11435_v59, 1  ;;  %v4824_v57 = vpack.c.bf16 %v11435_v59, %v11435_v59  ;;  %v4655_v46 = vmul.f32 %v8223_v26, %v11378_v14 }
 0x635   : > { %vm11449_vm5 = vcmp.eq.f32.partialorder %v4663_v42, 8.507059e+37  ;;  %v11456_v36 = vpop.eup %8224  ;;  %vm4660_vm13 = vweird.f32 %v8223_v26  ;;  %vm4674_vm14 = vweird.f32 %v11388_v49  ;;  %v3941_v8 = vsel %vm973_vm12, %v3925_v61, %v3933_v16 }
 0x636   : > { %4990 = vrot.lane.b32.xlu0 %v4977_v47, %s8340_s15  ;;  %v3949_v33 = vsel %vm973_vm12, %v3933_v16, %v3925_v61  ;;  %v3928_v54 = vrot.slane %v10686_v7, 7  ;;  %v4762_v21 = vrot.slane %v11443_v53, 1  ;;  %v4825_v41 = vpack.c.bf16 %v11443_v53, %v11443_v53  ;;  %vm4661_vm8 = vmor %vm4659_vm11, %vm4660_vm13 }
 0x637   : > { %v4912_v20 = vunpack.c.l.b16 %v4824_v57  ;;  %v4656_v1 = vsub.f32 1.0, %v4655_v46  ;;  %v4670_v29 = vmul.f32 %v11456_v36, %v11388_v49  ;;  %vm12551_vm6 = vcmp.eq.s32.totalorder %v8747_v12, 0  ;;  %5598 = vmatpush.bf16.msra.mxu0 %v7861_v5  ;;  %v7892_v49 = vld [vmem:[%s12264_s4 + $0x58] sm:$0xff] }
 0x638   : > { %v3958_v22 = vsel %vm12551_vm6, 0.0, %v3949_v33  ;;  %v4023_v7 = vpack.c.bf16 %v3941_v8, %v3941_v8  ;;  %v3936_v63 = vrot.slane %v10690_v50, 7  ;;  %v4770_v58 = vsel %vm1022_vm15, %v4754_v25, %v4762_v21  ;;  %v11484_v50 = vpop.permute.xlu2 %4208  ;;  %v7878_v8 = vld [vmem:[%s12264_s4 + $0x28] sm:$0xff]  ;;  %vm12555_vm3 = vmmov %vm12551_vm6  ;;  %5851 = vmatpush.bf16.msra.mxu1 %v7892_v49 }
 0x639   : > { %v4778_v35 = vsel %vm1022_vm15, %v4762_v21, %v4754_v25  ;;  %v4913_v42 = vunpack.c.l.b16 %v4825_v41  ;;  %v4657_v27 = vmul.f32 %v8223_v26, %v4656_v1  ;;  %vm12552_vm4 = vcmp.eq.s32.totalorder %v8862_v3, 15  ;;  %6000 = vmatpush.bf16.msra.mxu2 %v7878_v8  ;;  %vm12557_vm11 = vmmov %vm12555_vm3 }
 0x63a   : > { %v4793_v48 = vsel %vm12552_vm4, 0.0, %v4778_v35  ;;  %v4840_v13 = vpack.c.bf16 %v4770_v58, %v4770_v58  ;;  %v4671_v47 = vsub.f32 1.0, %v4670_v29  ;;  %v4022_v15 = vpack.c.bf16 %v3958_v22, %v3958_v22 }
 0x63b   : > { %v4841_v16 = vpack.c.bf16 %v4793_v48, %v4793_v48  ;;  %v4922_v61 = vpack.c.b16 %v4913_v42, %v4912_v20  ;;  %v4658_v40 = vadd.f32 %v8223_v26, %v4657_v27  ;;  %v4087_v43 = vunpack.c.l.b16 %v4023_v7  ;;  %v7906_v42 = vld [vmem:[%s12264_s4 + $0x88] sm:$0xff]  ;;  %v11539_v27 = vpop.permute.xlu0 %4154 }
 0x63c   : > { %v4968_v57 = vunpack.c.l.b16 %v4840_v13  ;;  %v4672_v25 = vmul.f32 %v11456_v36, %v4671_v47  ;;  %vm4675_vm2 = vweird.f32 %v11456_v36  ;;  %v4086_v46 = vunpack.c.l.b16 %v4022_v15  ;;  %6177 = vmatpush.bf16.msra.mxu3 %v7906_v42 }
 0x63d   : > { %v4969_v33 = vunpack.c.l.b16 %v4841_v16  ;;  %4936 = vrot.lane.b32.xlu1 %v4922_v61, %s8338_s13  ;;  %v4662_v21 = vsel %vm4661_vm8, %v8223_v26, %v4658_v40  ;;  %v3944_v14 = vsel %vm973_vm12, %v3928_v54, %v3936_v63  ;;  %v3952_v41 = vsel %vm973_vm12, %v3936_v63, %v3928_v54  ;;  %v7860_v26 = vld [vmem:[%s12264_s4 + $0x68] sm:$0xff]  ;;  %vm4676_vm0 = vmor %vm4674_vm14, %vm4675_vm2 }
 0x63e   : > { %v4667_v20 = vsel %vm11449_vm5, %v4666_v30, %v4662_v21  ;;  %v4673_v1 = vadd.f32 %v11456_v36, %v4672_v25  ;;  %vm11505_vm7 = vcmp.eq.f32.partialorder %v4678_v18, 8.507059e+37  ;;  %v3964_v22 = vsel %vm12555_vm3, 0.0, %v3952_v41  ;;  %5599 = vmatpush.bf16.msra.mxu0 %v7860_v26  ;;  %vm12558_vm5 = vmmov %vm12552_vm4 }
 0x63f   : > { %v4978_v7 = vpack.c.b16 %v4969_v33, %v4968_v57  ;;  %v4681_v30 = vor.u32 1.1754944e-38, %v4680_v10  ;;  %v11519_v18 = vmul.f32 %v4667_v20, %v11298_v19  ;;  %v4101_v9 = vpack.c.b16 %v4087_v43, %v4086_v46  ;;  %vm12561_vm14 = vmmov %vm12555_vm3 }
 0x640   : > { %v4677_v54 = vsel %vm4676_vm0, %v11456_v36, %v4673_v1  ;;  %v4029_v63 = vpack.c.bf16 %v3944_v14, %v3944_v14  ;;  %v3932_v58 = vrot.slane %v10591_v56, 7  ;;  %v3924_v35 = vrot.slane %v10585_v55, 7  ;;  %v11537_v36 = vpop.permute.xlu1 %4152  ;;  %v4157_v33 = vpop.permute.xlu2 %4156  ;;  %vm12564_vm8 = vmmov %vm12555_vm3 }
 0x641   : > { %4992 = vrot.lane.b32.xlu2 %v4978_v7, %s8340_s15  ;;  %v4682_v19 = vsel %vm11505_vm7, %v4681_v30, %v4677_v54  ;;  %v4826_v10 = vpack.c.bf16 %v11519_v18, %v11519_v18  ;;  %vm12556_vm10 = vcmask 261120   ;;  %v4028_v55 = vpack.c.bf16 %v3964_v22, %v3964_v22 }
 0x642   : > { %v4225_v56 = vsel %vm12556_vm10, %v4101_v9, %v11425_v51  ;;  %v11542_v48 = vmul.f32 %v4682_v19, %v11323_v11  ;;  %v4755_v13 = vrot.slane %v11519_v18, 1  ;;  %v3940_v47 = vsel %vm973_vm12, %v3924_v35, %v3932_v58  ;;  %v7859_v51 = vld [vmem:[%s12264_s4 + $0x60] sm:$0xff]  ;;  %vm12560_vm13 = vmmov %vm12556_vm10 }
 0x643   : > { %v3948_v15 = vsel %vm973_vm12, %v3932_v58, %v3924_v35  ;;  %v4914_v16 = vunpack.c.l.b16 %v4826_v10  ;;  %v4021_v11 = vpack.c.bf16 %v3940_v47, %v3940_v47  ;;  %v3931_v40 = vrot.slane %v10932_v34, 7  ;;  %5600 = vmatpush.bf16.msra.mxu0 %v7859_v51 }
 0x644   : > { %v3956_v61 = vsel %vm12557_vm11, 0.0, %v3948_v15  ;;  %v4827_v43 = vpack.c.bf16 %v11542_v48, %v11542_v48  ;;  %v4763_v57 = vrot.slane %v11542_v48, 1  ;;  %v3939_v46 = vrot.slane %v10942_v52, 7 }
 0x645   : > { %v4020_v25 = vpack.c.bf16 %v3956_v61, %v3956_v61  ;;  %v4092_v5 = vunpack.c.l.b16 %v4028_v55  ;;  %v4093_v8 = vunpack.c.l.b16 %v4029_v63  ;;  %v4085_v21 = vunpack.c.l.b16 %v4021_v11 }
 0x646   : > { %v4247_v14 = vsel %vm1279_vm1, %v4225_v56, %v11471_v31  ;;  %v4915_v41 = vunpack.c.l.b16 %v4827_v43  ;;  %v4771_v34 = vsel %vm1022_vm15, %v4755_v13, %v4763_v57  ;;  %v4779_v20 = vsel %vm1022_vm15, %v4763_v57, %v4755_v13  ;;  %vm12559_vm15 = vmmov %vm12556_vm10 }
 0x647   : > { %v4084_v1 = vunpack.c.l.b16 %v4020_v25  ;;  %v4795_v29 = vsel %vm12558_vm5, 0.0, %v4779_v20  ;;  %v4842_v52 = vpack.c.bf16 %v4771_v34, %v4771_v34  ;;  %v3955_v30 = vsel %vm973_vm12, %v3939_v46, %v3931_v40  ;;  %vm12571_vm5 = vmmov %vm12556_vm10 }
 0x648   : > { %v4923_v22 = vpack.c.b16 %v4915_v41, %v4914_v16  ;;  %v4843_v26 = vpack.c.bf16 %v4795_v29, %v4795_v29  ;;  %v4104_v9 = vpack.c.b16 %v4093_v8, %v4092_v5  ;;  %v4270_v54 = vunpack.c.l.b16 %v4247_v14  ;;  %v11579_v55 = vpop.permute.xlu1 %4210  ;;  %v11593_v57 = vpop.permute.xlu2 %4214 }
 0x649   : > { %v4100_v7 = vpack.c.b16 %v4085_v21, %v4084_v1  ;;  %v4970_v31 = vunpack.c.l.b16 %v4842_v52  ;;  %v3926_v63 = vrot.slane %v10635_v24, 7  ;;  %v4271_v3 = vunpack.c.h.b16 %v4247_v14  ;;  %v4213_v24 = vpop.permute.xlu0 %4212 }
 0x64a   : > { %4938 = vrot.lane.b32.xlu0 %v4923_v22, %s8338_s13  ;;  %v4971_v58 = vunpack.c.l.b16 %v4843_v26  ;;  %v3934_v42 = vrot.slane %v10642_v37, 7  ;;  %v4234_v49 = vsel %vm12560_vm13, %v4104_v9, %v4157_v33  ;;  %v3970_v10 = vsel %vm12561_vm14, 0.0, %v3955_v30  ;;  %vm12573_vm13 = vmmov %vm12555_vm3 }
 0x64b   : > { %v4222_v35 = vsel %vm12559_vm15, %v4100_v7, %v11397_v60  ;;  %v4286_v56 = vpack.c.b16 %v4270_v54, %v4270_v54  ;;  %v4287_v51 = vpack.c.b16 %v4271_v3, %v4271_v3  ;;  %v3947_v60 = vsel %vm973_vm12, %v3931_v40, %v3939_v46  ;;  %vm12572_vm15 = vmmov %vm12555_vm3 }
 0x64c   : > { %v4245_v19 = vsel %vm1279_vm1, %v4222_v35, %v11469_v17  ;;  %v4979_v13 = vpack.c.b16 %v4971_v58, %v4970_v31  ;;  %vm12562_vm6 = vcmask 781312   ;;  %v3942_v37 = vsel %vm973_vm12, %v3926_v63, %v3934_v42 }
 0x64d   : > { %v4268_v47 = vunpack.c.l.b16 %v4245_v19  ;;  %v4269_v15 = vunpack.c.h.b16 %v4245_v19  ;;  %4318 = vst.msk [vmem:[#allocation2 + $0x10] sm:$0xf] %vm12562_vm6, %v4286_v56  ;;  %v3950_v17 = vsel %vm973_vm12, %v3934_v42, %v3926_v63  ;;  %v3927_v16 = vrot.slane %v10745_v2, 7  ;;  %vm12563_vm4 = vmmov %vm12562_vm6  ;;  %v12569_v19 = vld [vmem:[#allocation13_spill] sm:$0xff]  ;;  %v12570_v56 = vld [vmem:[#allocation14_spill] sm:$0xff] }
 0x64e   : > { %4994 = vrot.lane.b32.xlu1 %v4979_v13, %s8340_s15  ;;  %4319 = vst.msk [vmem:[#allocation2 + $0x14] sm:$0xf] %vm12563_vm4, %v4287_v51  ;;  %v3960_v43 = vsel %vm12564_vm8, 0.0, %v3950_v17  ;;  %v4025_v40 = vpack.c.bf16 %v3942_v37, %v3942_v37  ;;  %v4034_v25 = vpack.c.bf16 %v3970_v10, %v3970_v10  ;;  %v3935_v5 = vrot.slane %v10751_v4, 7  ;;  %vm12565_vm2 = vmmov %vm12563_vm4 }
 0x64f   : > { %v4284_v61 = vpack.c.b16 %v4268_v47, %v4268_v47  ;;  %v4285_v11 = vpack.c.b16 %v4269_v15, %v4269_v15  ;;  %v4024_v46 = vpack.c.bf16 %v3960_v43, %v3960_v43  ;;  %v4253_v8 = vsel %vm1279_vm1, %v4234_v49, %v4213_v24  ;;  %vm12566_vm7 = vmmov %vm12565_vm2 }
 0x650   : > { %v4035_v2 = vpack.c.bf16 %v3947_v60, %v3947_v60  ;;  %v4089_v33 = vunpack.c.l.b16 %v4025_v40  ;;  %v4276_v21 = vunpack.c.l.b16 %v4253_v8  ;;  %v4277_v14 = vunpack.c.h.b16 %v4253_v8  ;;  %vm12567_vm0 = vmmov %vm12565_vm2  ;;  %v4159_v3 = vpop.permute.xlu1 %4158  ;;  %v4163_v37 = vpop.permute.xlu2 %4162 }
 0x651   : > { %4316 = vst.msk [vmem:[#allocation2 + $0x8] sm:$0xf] %vm12565_vm2, %v4284_v61  ;;  %v4088_v41 = vunpack.c.l.b16 %v4024_v46  ;;  %v3943_v34 = vsel %vm973_vm12, %v3927_v16, %v3935_v5  ;;  %v3951_v20 = vsel %vm973_vm12, %v3935_v5, %v3927_v16  ;;  %v4098_v7 = vunpack.c.l.b16 %v4034_v25  ;;  %vm12568_vm11 = vmmov %vm12567_vm0 }
 0x652   : > { %4317 = vst.msk [vmem:[#allocation2 + $0xc] sm:$0xf] %vm12566_vm7, %v4285_v11  ;;  %v3962_v4 = vsel %vm12555_vm3, 0.0, %v3951_v20  ;;  %v4027_v1 = vpack.c.bf16 %v3943_v34, %v3943_v34  ;;  %v4292_v29 = vpack.c.b16 %v4276_v21, %v4276_v21  ;;  %v4293_v52 = vpack.c.b16 %v4277_v14, %v4277_v14  ;;  %vm12574_vm14 = vmmov %vm12567_vm0 }
 0x653   : > { %v4102_v22 = vpack.c.b16 %v4089_v33, %v4088_v41  ;;  %v4026_v26 = vpack.c.bf16 %v3962_v4, %v3962_v4  ;;  %v4099_v30 = vunpack.c.l.b16 %v4035_v2  ;;  %v3929_v9 = vrot.slane %v10818_v6, 7  ;;  %vm12575_vm6 = vmmov %vm12571_vm5 }
 0x654   : > { %v4091_v31 = vunpack.c.l.b16 %v4027_v1  ;;  %4324 = vst.msk [vmem:[#allocation2 + $0x28] sm:$0xf] %vm12567_vm0, %v4292_v29  ;;  %v3937_v35 = vrot.slane %v10822_v0, 7  ;;  %v3930_v10 = vrot.slane %v12569_v19, 7  ;;  %v3938_v24 = vrot.slane %v12570_v56, 7  ;;  %vm12576_vm4 = vmmov %vm12567_vm0  ;;  %v7891_v19 = vld [vmem:[%s12264_s4 + $0x50] sm:$0xff] }
 0x655   : > { %v4228_v54 = vsel %vm12556_vm10, %v4102_v22, %v11537_v36  ;;  %v4090_v63 = vunpack.c.l.b16 %v4026_v26  ;;  %v7851_v58 = vld [vmem:[#allocation2 + $0x10] sm:$0xff]  ;;  %4325 = vst.msk [vmem:[#allocation2 + $0x2c] sm:$0xf] %vm12568_vm11, %v4293_v52  ;;  %v4161_v42 = vpop.permute.xlu0 %4160  ;;  %v4107_v36 = vpack.c.b16 %v4099_v30, %v4098_v7  ;;  %vm12577_vm8 = vmmov %vm12567_vm0  ;;  %5852 = vmatpush.bf16.msra.mxu1 %v7891_v19 }
 0x656   : > { %v4249_v49 = vsel %vm1279_vm1, %v4228_v54, %v11484_v50  ;;  %7465 = vmatmul.msk.bf16.vlgmr.msra.gmra.mxu0 %vm2280_vm9, %v7851_v58  ;;  %v3945_v0 = vsel %vm973_vm12, %v3929_v9, %v3937_v35  ;;  %v3953_v60 = vsel %vm973_vm12, %v3937_v35, %v3929_v9  ;;  %v3954_v50 = vsel %vm973_vm12, %v3938_v24, %v3930_v10  ;;  %vm12578_vm2 = vmmov %vm12567_vm0  ;;  %v7877_v35 = vld [vmem:[%s12264_s4 + $0x20] sm:$0xff] }
 0x657   : > { %v4272_v13 = vunpack.c.l.b16 %v4249_v49  ;;  %v4273_v6 = vunpack.c.h.b16 %v4249_v49  ;;  %v4103_v47 = vpack.c.b16 %v4091_v31, %v4090_v63  ;;  %v3946_v11 = vsel %vm973_vm12, %v3930_v10, %v3938_v24  ;;  %v12579_v31 = vld [vmem:[#allocation15_spill] sm:$0xff]  ;;  %vm12580_vm7 = vmmov %vm12571_vm5  ;;  %v7905_v49 = vld [vmem:[%s12264_s4 + $0x80] sm:$0xff]  ;;  %6001 = vmatpush.bf16.msra.mxu2 %v7877_v35 }
 0x658   : > { %v3966_v40 = vsel %vm12572_vm15, 0.0, %v3953_v60  ;;  %v4031_v25 = vpack.c.bf16 %v3945_v0, %v3945_v0  ;;  %v3968_v46 = vsel %vm12573_vm13, 0.0, %v3954_v50  ;;  %v4243_v33 = vsel %vm12575_vm6, %v4107_v36, %v4163_v37  ;;  %vm12581_vm3 = vmmov %vm12571_vm5  ;;  %6178 = vmatpush.bf16.msra.mxu3 %v7905_v49 }
 0x659   : > { %v7837_v15 = vld [vmem:[#allocation2 + $0x8] sm:$0xff]  ;;  %v4288_v17 = vpack.c.b16 %v4272_v13, %v4272_v13  ;;  %v4289_v16 = vpack.c.b16 %v4273_v6, %v4273_v6  ;;  %v4231_v61 = vsel %vm12571_vm5, %v4103_v47, %v11539_v27  ;;  %v4030_v8 = vpack.c.bf16 %v3966_v40, %v3966_v40  ;;  %v4217_v22 = vpop.permute.xlu1 %4216  ;;  %vm12583_vm10 = vmmov %vm12567_vm0 }
 0x65a   : > { %v7824_v51 = vld [vmem:[#allocation2 + $0x8] sm:$0xff]  ;;  %v4251_v43 = vsel %vm1279_vm1, %v4231_v61, %v11579_v55  ;;  %7325 = vmatmul.msk.bf16.vlgmr.msrb.gmra.mxu2 %vm2280_vm9, %v7837_v15  ;;  %v4032_v2 = vpack.c.bf16 %v3968_v46, %v3968_v46  ;;  %v4095_v55 = vunpack.c.l.b16 %v4031_v25  ;;  %v4033_v21 = vpack.c.bf16 %v3946_v11, %v3946_v11  ;;  %vm12584_vm11 = vmmov %vm12573_vm13  ;;  %v7838_v11 = vld [vmem:[#allocation2 + $0x10] sm:$0xff] }
 0x65b   : > { %7390 = vmatmul.msk.bf16.gmra.mxu3 %vm2280_vm9, %v7824_v51  ;;  %4320 = vst.msk [vmem:[#allocation2 + $0x18] sm:$0xf] %vm12574_vm14, %v4288_v17  ;;  %v4274_v27 = vunpack.c.l.b16 %v4251_v43  ;;  %v4275_v5 = vunpack.c.h.b16 %v4251_v43  ;;  %v4094_v34 = vunpack.c.l.b16 %v4030_v8  ;;  %v4709_v9 = vrot.slane %v12579_v31, 7  ;;  %vm12585_vm5 = vmmov %vm12567_vm0  ;;  %v7825_v43 = vld [vmem:[#allocation2 + $0x10] sm:$0xff] }
 0x65c   : > { %4321 = vst.msk [vmem:[#allocation2 + $0x1c] sm:$0xf] %vm12576_vm4, %v4289_v16  ;;  %v4096_v20 = vunpack.c.l.b16 %v4032_v2  ;;  %v4097_v1 = vunpack.c.l.b16 %v4033_v21  ;;  %vm12586_vm15 = vmmov %vm12567_vm0  ;;  %v4708_v21 = vrot.slane %v11199_v62, 7 }
 0x65d   : > { %v4290_v14 = vpack.c.b16 %v4274_v27, %v4274_v27  ;;  %v4291_v41 = vpack.c.b16 %v4275_v5, %v4275_v5  ;;  %v4219_v4 = vpop.permute.xlu0 %4218  ;;  %v4105_v52 = vpack.c.b16 %v4095_v55, %v4094_v34  ;;  %vm12587_vm13 = vmmov %vm12567_vm0  ;;  %v4983_v5 = vpop.permute.xlu2 %4982 }
 0x65e   : > { %v4259_v29 = vsel %vm1279_vm1, %v4243_v33, %v4219_v4  ;;  %v4106_v30 = vpack.c.b16 %v4097_v1, %v4096_v20  ;;  %vm12588_vm14 = vmmov %vm12567_vm0  ;;  %v4714_v4 = vrot.slane %v11443_v53, 7  ;;  %v4707_v1 = vrot.slane %v11519_v18, 7 }
 0x65f   : > { %4322 = vst.msk [vmem:[#allocation2 + $0x20] sm:$0xf] %vm12577_vm8, %v4290_v14  ;;  %v4282_v26 = vunpack.c.l.b16 %v4259_v29  ;;  %v4283_v7 = vunpack.c.h.b16 %v4259_v29  ;;  %v4237_v54 = vsel %vm12580_vm7, %v4105_v52, %v4159_v3  ;;  %v12582_v3 = vld [vmem:[#allocation12_spill] sm:$0xff]  ;;  %vm12589_vm6 = vmmov %vm12581_vm3  ;;  %v4700_v14 = vrot.slane %v11190_v38, 7 }
 0x660   : > { %4323 = vst.msk [vmem:[#allocation2 + $0x24] sm:$0xf] %vm12578_vm2, %v4291_v41  ;;  %v4255_v10 = vsel %vm1279_vm1, %v4237_v54, %v11593_v57  ;;  %v4240_v56 = vsel %vm12581_vm3, %v4106_v30, %v4161_v42  ;;  %v4701_v24 = vrot.slane %v12582_v3, 7  ;;  %v4706_v41 = vrot.slane %v11435_v59, 7  ;;  %v12590_v52 = vld [vmem:[#allocation16_spill] sm:$0xff]  ;;  %vm12592_vm4 = vmmov %vm12567_vm0 }
 0x661   : > { %v4298_v63 = vpack.c.b16 %v4282_v26, %v4282_v26  ;;  %v4299_v58 = vpack.c.b16 %v4283_v7, %v4283_v7  ;;  %v4278_v13 = vunpack.c.l.b16 %v4255_v10  ;;  %v4279_v6 = vunpack.c.h.b16 %v4255_v10  ;;  %v4927_v46 = vpop.permute.xlu1 %4926  ;;  %v12591_v26 = vld [vmem:[#allocation17_spill] sm:$0xff]  ;;  %vm12593_vm8 = vmmov %vm12567_vm0 }
 0x662   : > { %v4257_v47 = vsel %vm1279_vm1, %v4240_v56, %v4217_v22  ;;  %v4717_v51 = vsel %vm973_vm12, %v4701_v24, %v4709_v9  ;;  %v4725_v57 = vsel %vm973_vm12, %v4709_v9, %v4701_v24  ;;  %v4715_v29 = vrot.slane %v11542_v48, 7  ;;  %vm12594_vm2 = vmmov %vm12584_vm11 }
 0x663   : > { %4330 = vst.msk [vmem:[#allocation2 + $0x40] sm:$0xf] %vm12567_vm0, %v4298_v63  ;;  %v4280_v36 = vunpack.c.l.b16 %v4257_v47  ;;  %v4281_v15 = vunpack.c.h.b16 %v4257_v47  ;;  %v4294_v42 = vpack.c.b16 %v4278_v13, %v4278_v13  ;;  %v4295_v0 = vpack.c.b16 %v4279_v6, %v4279_v6  ;;  %v7852_v60 = vld [vmem:[#allocation2 + $0x18] sm:$0xff]  ;;  %vm12595_vm7 = vmmov %vm12594_vm2 }
 0x664   : > { %4331 = vst.msk [vmem:[#allocation2 + $0x44] sm:$0xf] %vm12583_vm10, %v4299_v58  ;;  %v4734_v50 = vsel %vm12584_vm11, 0.0, %v4725_v57  ;;  %v4799_v61 = vpack.c.bf16 %v4717_v51, %v4717_v51  ;;  %v4702_v22 = vrot.slane %v12590_v52, 7  ;;  %v4710_v7 = vrot.slane %v12591_v26, 7  ;;  %vm12596_vm3 = vmmov %vm12594_vm2 }
 0x665   : > { %v4296_v37 = vpack.c.b16 %v4280_v36, %v4280_v36  ;;  %v4297_v17 = vpack.c.b16 %v4281_v15, %v4281_v15  ;;  %v4798_v16 = vpack.c.bf16 %v4734_v50, %v4734_v50  ;;  %4326 = vst.msk [vmem:[#allocation2 + $0x30] sm:$0xf] %vm12585_vm5, %v4294_v42  ;;  %v4722_v62 = vsel %vm973_vm12, %v4706_v41, %v4714_v4  ;;  %vm12597_vm0 = vmmov %vm12594_vm2  ;;  %v7839_v42 = vld [vmem:[#allocation2 + $0x18] sm:$0xff] }
 0x666   : > { %7466 = vmatmul.msk.bf16.gmra.mxu0 %vm2280_vm9, %v7852_v60  ;;  %4327 = vst.msk [vmem:[#allocation2 + $0x34] sm:$0xf] %vm12586_vm15, %v4295_v0  ;;  %v4863_v25 = vunpack.c.l.b16 %v4799_v61  ;;  %v4730_v38 = vsel %vm973_vm12, %v4714_v4, %v4706_v41  ;;  %v4724_v59 = vsel %vm973_vm12, %v4708_v21, %v4700_v14  ;;  %v4809_v18 = vpack.c.bf16 %v4722_v62, %v4722_v62  ;;  %v7876_v61 = vld [vmem:[%s12264_s4 + $0x18] sm:$0xff]  ;;  %vm12598_vm10 = vmmov %vm12597_vm0 }
 0x667   : > { %v4862_v40 = vunpack.c.l.b16 %v4798_v16  ;;  %4328 = vst.msk [vmem:[#allocation2 + $0x38] sm:$0xf] %vm12587_vm13, %v4296_v37  ;;  %v4744_v53 = vsel %vm12594_vm2, 0.0, %v4730_v38  ;;  %v4723_v48 = vsel %vm973_vm12, %v4707_v1, %v4715_v29  ;;  %v4731_v31 = vsel %vm973_vm12, %v4715_v29, %v4707_v1  ;;  %v7853_v0 = vld [vmem:[#allocation2 + $0x20] sm:$0xff]  ;;  %6002 = vmatpush.bf16.msra.mxu2 %v7876_v61  ;;  %vm12599_vm11 = vmmov %vm12589_vm6  ;;  %v7828_v61 = vld [vmem:[#allocation2 + $0x28] sm:$0xff] }
 0x668   : > { %4329 = vst.msk [vmem:[#allocation2 + $0x3c] sm:$0xf] %vm12588_vm14, %v4297_v17  ;;  %v4808_v30 = vpack.c.bf16 %v4744_v53, %v4744_v53  ;;  %v4811_v9 = vpack.c.bf16 %v4723_v48, %v4723_v48  ;;  %v4716_v54 = vsel %vm973_vm12, %v4700_v14, %v4708_v21  ;;  %v11697_v63 = vunpack.c.l.b16 %v4809_v18  ;;  %v7888_v21 = vld [vmem:[%s12264_s4 + $0x38] sm:$0xff]  ;;  %vm12600_vm5 = vmmov %vm12589_vm6 }
 0x669   : > { %v4877_v27 = vpack.c.b16 %v4863_v25, %v4862_v40  ;;  %v4746_v58 = vsel %vm12595_vm7, 0.0, %v4731_v31  ;;  %v4732_v35 = vsel %vm12596_vm3, 0.0, %v4724_v59  ;;  %v4726_v56 = vsel %vm973_vm12, %v4710_v7, %v4702_v22  ;;  %vm12601_vm15 = vmmov %vm12592_vm4 }
 0x66a   : > { %7326 = vmatmul.msk.bf16.gmra.mxu2 %vm2280_vm9, %v7838_v11  ;;  %v11703_v49 = vunpack.c.l.b16 %v4808_v30  ;;  %v4810_v19 = vpack.c.bf16 %v4746_v58, %v4746_v58  ;;  %v11705_v10 = vunpack.c.l.b16 %v4811_v9  ;;  %v4703_v3 = vrot.slane %v11229_v45, 7  ;;  %v7826_v45 = vld [vmem:[#allocation2 + $0x18] sm:$0xff]  ;;  %v7889_v11 = vld [vmem:[%s12264_s4 + $0x40] sm:$0xff]  ;;  %vm12602_vm13 = vmmov %vm12592_vm4 }
 0x66b   : > { %7391 = vmatmul.msk.bf16.gmra.mxu3 %vm2280_vm9, %v7825_v43  ;;  %v5001_v8 = vsel %vm12589_vm6, %v4877_v27, %v4927_v46  ;;  %v4711_v24 = vrot.slane %v11232_v28, 7  ;;  %v4796_v47 = vpack.c.bf16 %v4732_v35, %v4732_v35  ;;  %v4797_v36 = vpack.c.bf16 %v4716_v54, %v4716_v54  ;;  %v7890_v28 = vld [vmem:[%s12264_s4 + $0x48] sm:$0xff]  ;;  %v7840_v54 = vld [vmem:[#allocation2 + $0x20] sm:$0xff]  ;;  %vm12603_vm14 = vmmov %vm12600_vm5 }
 0x66c   : > { %v5023_v2 = vsel %vm1279_vm1, %v5001_v8, %v4983_v5  ;;  %v4882_v13 = vpack.c.b16 %v11697_v63, %v11703_v49  ;;  %v11713_v6 = vunpack.c.l.b16 %v4810_v19  ;;  %v4718_v15 = vsel %vm973_vm12, %v4702_v22, %v4710_v7  ;;  %5853 = vmatpush.bf16.msra.mxu1 %v7890_v28  ;;  %v7904_v8 = vld [vmem:[%s12264_s4 + $0x78] sm:$0xff]  ;;  %v7887_v22 = vld [vmem:[%s12264_s4 + $0x30] sm:$0xff]  ;;  %v7827_v58 = vld [vmem:[#allocation2 + $0x20] sm:$0xff] }
 0x66d   : > { %v5046_v33 = vunpack.c.l.b16 %v5023_v2  ;;  %v5047_v55 = vunpack.c.h.b16 %v5023_v2  ;;  %v4736_v51 = vsel %vm12597_vm0, 0.0, %v4726_v56  ;;  %v4727_v60 = vsel %vm973_vm12, %v4711_v24, %v4703_v3  ;;  %v4929_v2 = vpop.permute.xlu2 %4928  ;;  %6179 = vmatpush.bf16.msra.mxu3 %v7904_v8  ;;  %v7854_v56 = vld [vmem:[#allocation2 + $0x28] sm:$0xff]  ;;  %vm12604_vm6 = vmmov %vm12592_vm4 }
 0x66e   : > { %v4883_v57 = vpack.c.b16 %v11705_v10, %v11713_v6  ;;  %v4800_v50 = vpack.c.bf16 %v4736_v51, %v4736_v51  ;;  %v4801_v37 = vpack.c.bf16 %v4718_v15, %v4718_v15  ;;  %v4860_v17 = vunpack.c.l.b16 %v4796_v47  ;;  %vm12606_vm2 = vmmov %vm12592_vm4  ;;  %v7844_v10 = vld [vmem:[#allocation2 + $0x40] sm:$0xff] }
 0x66f   : > { %v5062_v34 = vpack.c.b16 %v5046_v33, %v5046_v33  ;;  %v5063_v20 = vpack.c.b16 %v5047_v55, %v5047_v55  ;;  %v4861_v16 = vunpack.c.l.b16 %v4797_v36  ;;  %v4719_v40 = vsel %vm973_vm12, %v4703_v3, %v4711_v24  ;;  %vm12607_vm7 = vmmov %vm12597_vm0  ;;  %v7843_v49 = vld [vmem:[#allocation2 + $0x38] sm:$0xff] }
 0x670   : > { %v4738_v25 = vsel %vm12598_vm10, 0.0, %v4727_v60  ;;  %v4864_v46 = vunpack.c.l.b16 %v4800_v50  ;;  %v4865_v27 = vunpack.c.l.b16 %v4801_v37  ;;  %5854 = vmatpush.bf16.msra.mxu1 %v7889_v11  ;;  %v4803_v55 = vpack.c.bf16 %v4719_v40, %v4719_v40  ;;  %vm12608_vm3 = vmmov %vm12597_vm0  ;;  %v7875_v11 = vld [vmem:[%s12264_s4 + $0x10] sm:$0xff] }
 0x671   : > { %5094 = vst.msk [vmem:[#allocation2 + $0x50] sm:$0xf] %vm12592_vm4, %v5062_v34  ;;  %v4876_v5 = vpack.c.b16 %v4861_v16, %v4860_v17  ;;  %v4802_v33 = vpack.c.bf16 %v4738_v25, %v4738_v25  ;;  %v4704_v51 = vrot.slane %v11351_v23, 7  ;;  %v4705_v28 = vrot.slane %v11292_v44, 7  ;;  %6003 = vmatpush.bf16.msra.mxu2 %v7875_v11  ;;  %vm12610_vm0 = vmmov %vm12600_vm5 }
 0x672   : > { %5095 = vst.msk [vmem:[#allocation2 + $0x54] sm:$0xf] %vm12593_vm8, %v5063_v20  ;;  %v4878_v20 = vpack.c.b16 %v4865_v27, %v4864_v46  ;;  %v4867_v52 = vunpack.c.l.b16 %v4803_v55  ;;  %vm12605_vm8 = vmmov %vm12592_vm4 }
 0x673   : > { %v4866_v29 = vunpack.c.l.b16 %v4802_v33  ;;  %vm12611_vm10 = vmmov %vm12606_vm2 }
 0x674   : > { %5855 = vmatpush.bf16.msra.mxu1 %v7888_v21  ;;  %v5004_v26 = vsel %vm12600_vm5, %v4878_v20, %v4929_v2 }
 0x675   : > { %v4879_v48 = vpack.c.b16 %v4867_v52, %v4866_v29  ;;  %v4987_v35 = vpop.permute.xlu2 %4986 }
 0x676   : > { %7467 = vmatmul.msk.bf16.gmra.mxu0 %vm2280_vm9, %v7853_v0  ;;  %v4713_v0 = vrot.slane %v11326_v39, 7  ;;  %v7841_v39 = vld [vmem:[#allocation2 + $0x28] sm:$0xff] }
 0x678   : > { %5856 = vmatpush.bf16.msra.mxu1 %v7887_v22  ;;  %v4721_v16 = vsel %vm973_vm12, %v4705_v28, %v4713_v0 }
 0x679   : > { %v4807_v40 = vpack.c.bf16 %v4721_v16, %v4721_v16  ;;  %v7880_v20 = vld [vmem:[#allocation2 + $0x50] sm:$0xff] }
 0x67a   : > { %7327 = vmatmul.msk.bf16.gmra.mxu2 %vm2280_vm9, %v7839_v42  ;;  %v4712_v42 = vrot.slane %v11358_v32, 7  ;;  %v4729_v32 = vsel %vm973_vm12, %v4713_v0, %v4705_v28  ;;  %v7893_v6 = vld [vmem:[#allocation2 + $0x50] sm:$0xff] }
 0x67b   : > { %7392 = vmatmul.msk.bf16.gmra.mxu3 %vm2280_vm9, %v7826_v45  ;;  %v4742_v44 = vsel %vm12608_vm3, 0.0, %v4729_v32  ;;  %v4871_v8 = vunpack.c.l.b16 %v4807_v40  ;;  %vm12622_vm3 = vmmov %vm12610_vm0 }
 0x67c   : > { %v4728_v60 = vsel %vm973_vm12, %v4712_v42, %v4704_v51  ;;  %v4720_v50 = vsel %vm973_vm12, %v4704_v51, %v4712_v42  ;;  %vm12609_vm12 = vmmov %vm12600_vm5  ;;  %v7856_v51 = vld [vmem:[#allocation2 + $0x38] sm:$0xff] }
 0x67d   : > { %v4740_v23 = vsel %vm12607_vm7, 0.0, %v4728_v60  ;;  %v4805_v17 = vpack.c.bf16 %v4720_v50, %v4720_v50  ;;  %vm12613_vm5 = vmmov %vm12606_vm2 }
 0x67e   : > { %v4804_v37 = vpack.c.bf16 %v4740_v23, %v4740_v23  ;;  %vm12621_vm7 = vmmov %vm12610_vm0 }
 0x67f   : > { %v4925_v43 = vpop.permute.xlu0 %4924  ;;  %v4869_v46 = vunpack.c.l.b16 %v4805_v17 }
 0x680   : > { %v4998_v14 = vsel %vm12599_vm11, %v4876_v5, %v4925_v43  ;;  %v4806_v43 = vpack.c.bf16 %v4742_v44, %v4742_v44  ;;  %v4868_v25 = vunpack.c.l.b16 %v4804_v37  ;;  %vm12612_vm11 = vmmov %vm12606_vm2  ;;  %v7857_v37 = vld [vmem:[#allocation2 + $0x40] sm:$0xff] }
 0x681   : > { %v4935_v55 = vpop.permute.xlu2 %4934 }
 0x682   : > { %v4870_v5 = vunpack.c.l.b16 %v4806_v43  ;;  %v4880_v12 = vpack.c.b16 %v4869_v46, %v4868_v25  ;;  %v11839_v46 = vld [vmem:[%s12265_s5] ss:$0 sm:$0xff] }
 0x684   : > { %v4981_v41 = vpop.permute.xlu1 %4980 }
 0x685   : > { %v5021_v34 = vsel %vm1279_vm1, %v4998_v14, %v4981_v41  ;;  %v4881_v14 = vpack.c.b16 %v4871_v8, %v4870_v5 }
 0x686   : > { %v5044_v4 = vunpack.c.l.b16 %v5021_v34  ;;  %v5045_v1 = vunpack.c.h.b16 %v5021_v34  ;;  %7468 = vmatmul.msk.bf16.gmra.mxu0 %vm2280_vm9, %v7854_v56 }
 0x687   : > { %v4985_v38 = vpop.permute.xlu0 %4984 }
 0x688   : > { %v5060_v7 = vpack.c.b16 %v5044_v4, %v5044_v4  ;;  %v5061_v62 = vpack.c.b16 %v5045_v1, %v5045_v1  ;;  %v5025_v59 = vsel %vm1279_vm1, %v5004_v26, %v4985_v38  ;;  %v7903_v4 = vld [vmem:[%s12264_s4 + $0x70] sm:$0xff]  ;;  %v5013_v1 = vsel %vm12610_vm0, %v4881_v14, %v4935_v55  ;;  %v7902_v38 = vld [vmem:[%s12264_s4 + $0x68] sm:$0xff] }
 0x689   : > { %v5048_v53 = vunpack.c.l.b16 %v5025_v59  ;;  %v5049_v18 = vunpack.c.h.b16 %v5025_v59  ;;  %v7855_v26 = vld [vmem:[#allocation2 + $0x30] sm:$0xff]  ;;  %6180 = vmatpush.bf16.msra.mxu3 %v7903_v4 }
 0x68a   : > { %5092 = vst.msk [vmem:[#allocation2 + $0x48] sm:$0xf] %vm12601_vm15, %v5060_v7  ;;  %7328 = vmatmul.msk.bf16.gmra.mxu2 %vm2280_vm9, %v7840_v54  ;;  %v7901_v54 = vld [vmem:[%s12264_s4 + $0x60] sm:$0xff]  ;;  %vm12614_vm15 = vmmov %vm12606_vm2 }
 0x68b   : > { %5093 = vst.msk [vmem:[#allocation2 + $0x4c] sm:$0xf] %vm12602_vm13, %v5061_v62  ;;  %v5064_v30 = vpack.c.b16 %v5048_v53, %v5048_v53  ;;  %v5065_v31 = vpack.c.b16 %v5049_v18, %v5049_v18  ;;  %7393 = vmatmul.msk.bf16.gmra.mxu3 %vm2280_vm9, %v7827_v58  ;;  %v7874_v62 = vld [vmem:[%s12264_s4 + $0x8] sm:$0xff]  ;;  %vm12615_vm13 = vmmov %vm12610_vm0 }
 0x68c   : > { %v4931_v9 = vpop.permute.xlu1 %4930  ;;  %6004 = vmatpush.bf16.msra.mxu2 %v7874_v62 }
 0x68d   : > { %v5007_v19 = vsel %vm12603_vm14, %v4879_v48, %v4931_v9  ;;  %5096 = vst.msk [vmem:[#allocation2 + $0x58] sm:$0xf] %vm12604_vm6, %v5064_v30  ;;  %v7873_v30 = vld [vmem:[%s12264_s4] sm:$0xff]  ;;  %v7829_v9 = vld [vmem:[#allocation2 + $0x30] sm:$0xff]  ;;  %6181 = vmatpush.bf16.msra.mxu3 %v7902_v38  ;;  %vm12616_vm14 = vmmov %vm12606_vm2 }
 0x68e   : > { %v5027_v3 = vsel %vm1279_vm1, %v5007_v19, %v4987_v35  ;;  %5097 = vst.msk [vmem:[#allocation2 + $0x5c] sm:$0xf] %vm12592_vm4, %v5065_v31  ;;  %v7842_v31 = vld [vmem:[#allocation2 + $0x30] sm:$0xff]  ;;  %vm12617_vm6 = vmmov %vm12606_vm2 }
 0x68f   : > { %v5050_v24 = vunpack.c.l.b16 %v5027_v3  ;;  %v5051_v47 = vunpack.c.h.b16 %v5027_v3  ;;  %vm12618_vm4 = vmmov %vm12610_vm0 }
 0x690   : > { %6005 = vmatpush.bf16.msra.mxu2 %v7873_v30  ;;  %v7867_v30 = vld [vmem:[#allocation2 + $0x50] sm:$0xff] }
 0x691   : > { %v5066_v36 = vpack.c.b16 %v5050_v24, %v5050_v24  ;;  %v5067_v15 = vpack.c.b16 %v5051_v47, %v5051_v47  ;;  %6182 = vmatpush.bf16.msra.mxu3 %v7901_v54 }
 0x692   : > { %v7879_v45 = vld [vmem:[#allocation2 + $0x48] sm:$0xff] }
 0x693   : > { %5098 = vst.msk [vmem:[#allocation2 + $0x60] sm:$0xf] %vm12605_vm8, %v5066_v36  ;;  %7541 = vmatmul.msk.bf16.vlgmr.msra.gmra.mxu1 %vm2280_vm9, %v7879_v45  ;;  %vm12619_vm8 = vmmov %vm12606_vm2 }
 0x694   : > { %5099 = vst.msk [vmem:[#allocation2 + $0x64] sm:$0xf] %vm12606_vm2, %v5067_v15 }
 0x695   : > { %v7881_v15 = vld [vmem:[#allocation2 + $0x58] sm:$0xff] }
 0x696   : > { %7469 = vmatmul.msk.bf16.gmra.mxu0 %vm2280_vm9, %v7855_v26  ;;  %v7894_v11 = vld [vmem:[#allocation2 + $0x58] sm:$0xff] }
 0x69a   : > { %7329 = vmatmul.msk.bf16.gmra.mxu2 %vm2280_vm9, %v7841_v39  ;;  %v7858_v39 = vld [vmem:[#allocation2 + $0x48] sm:$0xff] }
 0x69b   : > { %7394 = vmatmul.msk.bf16.gmra.mxu3 %vm2280_vm9, %v7828_v61  ;;  %v4993_v35 = vpop.permute.xlu2 %4992  ;;  %v7882_v32 = vld [vmem:[#allocation2 + $0x60] sm:$0xff] }
 0x69c   : > { %v7865_v61 = vld [vmem:[#allocation2 + $0x40] sm:$0xff] }
 0x6a0   : > { %v4933_v27 = vpop.permute.xlu0 %4932 }
 0x6a1   : > { %v5010_v2 = vsel %vm12609_vm12, %v4880_v12, %v4933_v27  ;;  %vm12623_vm12 = vmmov %vm12610_vm0 }
 0x6a3   : > { %7542 = vmatmul.msk.bf16.gmra.mxu1 %vm2280_vm9, %v7880_v20  ;;  %v7895_v20 = vld [vmem:[#allocation2 + $0x60] sm:$0xff] }
 0x6a4   : > { %v4989_v33 = vpop.permute.xlu1 %4988 }
 0x6a5   : > { %v5029_v21 = vsel %vm1279_vm1, %v5010_v2, %v4989_v33 }
 0x6a6   : > { %v5052_v41 = vunpack.c.l.b16 %v5029_v21  ;;  %v5053_v34 = vunpack.c.h.b16 %v5029_v21  ;;  %7470 = vmatmul.msk.bf16.gmra.mxu0 %vm2280_vm9, %v7856_v51 }
 0x6a8   : > { %v5068_v29 = vpack.c.b16 %v5052_v41, %v5052_v41  ;;  %v5069_v52 = vpack.c.b16 %v5053_v34, %v5053_v34  ;;  %v4991_v22 = vpop.permute.xlu0 %4990  ;;  %v7866_v34 = vld [vmem:[#allocation2 + $0x48] sm:$0xff] }
 0x6a9   : > { %v5031_v7 = vsel %vm1279_vm1, %v5013_v1, %v4991_v22 }
 0x6aa   : > { %5100 = vst.msk [vmem:[#allocation2 + $0x68] sm:$0xf] %vm12611_vm10, %v5068_v29  ;;  %v5054_v59 = vunpack.c.l.b16 %v5031_v7  ;;  %v5055_v53 = vunpack.c.h.b16 %v5031_v7  ;;  %7330 = vmatmul.msk.bf16.gmra.mxu2 %vm2280_vm9, %v7842_v31  ;;  %vm12624_vm10 = vmmov %vm12610_vm0 }
 0x6ab   : > { %5101 = vst.msk [vmem:[#allocation2 + $0x6c] sm:$0xf] %vm12612_vm11, %v5069_v52  ;;  %7395 = vmatmul.msk.bf16.gmra.mxu3 %vm2280_vm9, %v7829_v9  ;;  %vm12625_vm11 = vmmov %vm12610_vm0 }
 0x6ac   : > { %v5070_v18 = vpack.c.b16 %v5054_v59, %v5054_v59  ;;  %v5071_v48 = vpack.c.b16 %v5055_v53, %v5055_v53 }
 0x6ae   : > { %5102 = vst.msk [vmem:[#allocation2 + $0x70] sm:$0xf] %vm12613_vm5, %v5070_v18  ;;  %vm12626_vm5 = vmmov %vm12610_vm0 }
 0x6af   : > { %5103 = vst.msk [vmem:[#allocation2 + $0x74] sm:$0xf] %vm12614_vm15, %v5071_v48  ;;  %v4937_v58 = vpop.permute.xlu1 %4936  ;;  %vm12627_vm15 = vmmov %vm12610_vm0 }
 0x6b0   : > { %v5016_v19 = vsel %vm12615_vm13, %v4882_v13, %v4937_v58  ;;  %v7830_v13 = vld [vmem:[#allocation2 + $0x38] sm:$0xff]  ;;  %vm12628_vm13 = vmmov %vm12610_vm0 }
 0x6b1   : > { %v5033_v56 = vsel %vm1279_vm1, %v5016_v19, %v4993_v35 }
 0x6b2   : > { %v5056_v3 = vunpack.c.l.b16 %v5033_v56  ;;  %v5057_v24 = vunpack.c.h.b16 %v5033_v56  ;;  %v7883_v44 = vld [vmem:[#allocation2 + $0x68] sm:$0xff] }
 0x6b3   : > { %7543 = vmatmul.msk.bf16.gmra.mxu1 %vm2280_vm9, %v7881_v15  ;;  %v7896_v31 = vld [vmem:[#allocation2 + $0x68] sm:$0xff] }
 0x6b4   : > { %v5072_v47 = vpack.c.b16 %v5056_v3, %v5056_v3  ;;  %v5073_v36 = vpack.c.b16 %v5057_v24, %v5057_v24  ;;  %v5424_v17 = vpop.f32.mrf.mxu3 }
 0x6b6   : > { %5104 = vst.msk [vmem:[#allocation2 + $0x78] sm:$0xf] %vm12616_vm14, %v5072_v47  ;;  %7471 = vmatmul.msk.bf16.gmra.mxu0 %vm2280_vm9, %v7857_v37  ;;  %v7884_v55 = vld [vmem:[#allocation2 + $0x70] sm:$0xff]  ;;  %vm12629_vm14 = vmmov %vm12610_vm0 }
 0x6b7   : > { %5105 = vst.msk [vmem:[#allocation2 + $0x7c] sm:$0xf] %vm12617_vm6, %v5073_v36  ;;  %vm12630_vm6 = vmmov %vm12610_vm0 }
 0x6ba   : > { %7331 = vmatmul.msk.bf16.gmra.mxu2 %vm2280_vm9, %v7843_v49  ;;  %v7897_v49 = vld [vmem:[#allocation2 + $0x70] sm:$0xff] }
 0x6bb   : > { %7396 = vmatmul.msk.bf16.gmra.mxu3 %vm2280_vm9, %v7830_v13 }
 0x6bc   : > { %v4939_v63 = vpop.permute.xlu0 %4938 }
 0x6bd   : > { %v5019_v42 = vsel %vm12618_vm4, %v4883_v57, %v4939_v63  ;;  %v5426_v57 = vpop.f32.mrf.mxu3  ;;  %v7868_v63 = vld [vmem:[#allocation2 + $0x58] sm:$0xff]  ;;  %vm12631_vm4 = vmmov %vm12610_vm0 }
 0x6be   : > { %v7885_v59 = vld [vmem:[#allocation2 + $0x78] sm:$0xff] }
 0x6c0   : > { %v4995_v45 = vpop.permute.xlu1 %4994 }
 0x6c1   : > { %v5035_v28 = vsel %vm1279_vm1, %v5019_v42, %v4995_v45  ;;  %vm12620_vm1 = vmmov %vm12610_vm0 }
 0x6c2   : > { %v5058_v0 = vunpack.c.l.b16 %v5035_v28  ;;  %v5059_v60 = vunpack.c.h.b16 %v5035_v28 }
 0x6c3   : > { %7544 = vmatmul.msk.bf16.gmra.mxu1 %vm2280_vm9, %v7882_v32 }
 0x6c4   : > { %v5074_v50 = vpack.c.b16 %v5058_v0, %v5058_v0  ;;  %v5075_v23 = vpack.c.b16 %v5059_v60, %v5059_v60 }
 0x6c6   : > { %5106 = vst.msk [vmem:[#allocation2 + $0x80] sm:$0xf] %vm12619_vm8, %v5074_v50  ;;  %7472 = vmatmul.msk.bf16.gmra.mxu0 %vm2280_vm9, %v7858_v39  ;;  %vm12632_vm8 = vmmov %vm12610_vm0 }
 0x6c7   : > { %5107 = vst.msk [vmem:[#allocation2 + $0x84] sm:$0xf] %vm12606_vm2, %v5075_v23  ;;  %vm12633_vm2 = vmmov %vm12610_vm0 }
 0x6ca   : > { %7332 = vmatmul.msk.bf16.gmra.mxu2 %vm2280_vm9, %v7844_v10 }
 0x6cb   : > { %7681 = vmatmul.msk.bf16.vlgmr.msra.gmra.mxu3 %vm2280_vm9, %v7893_v6  ;;  %v7869_v6 = vld [vmem:[#allocation2 + $0x60] sm:$0xff] }
 0x6ce   : > { %v7886_v3 = vld [vmem:[#allocation2 + $0x80] sm:$0xff] }
 0x6d3   : > { %v5602_v16 = vpop.f32.mrf.mxu0  ;;  %7545 = vmatmul.msk.bf16.gmra.mxu1 %vm2280_vm9, %v7883_v44 }
 0x6da   : > { %7605 = vmatmul.msk.bf16.vlgmr.msra.gmra.mxu2 %vm2280_vm9, %v7865_v61 }
 0x6db   : > { %v5604_v27 = vpop.f32.mrf.mxu0  ;;  %7682 = vmatmul.msk.bf16.gmra.mxu3 %vm2280_vm9, %v7894_v11 }
 0x6dd   : > { %v5275_v43 = vpop.f32.mrf.mxu2 }
 0x6de   : > { %v5429_v40 = vpop.f32.mrf.mxu3  ;;  %v5425_v25 = vadd.f32 %v5424_v17, %v5275_v43 }
 0x6e0   : > { %v5642_v5 = vadd.f32 %v5602_v16, %v5425_v25 }
 0x6e2   : > { %v5661_v8 = vadd.f32 %v11839_v46, %v5642_v5  ;;  %v7870_v5 = vld [vmem:[#allocation2 + $0x68] sm:$0xff] }
 0x6e3   : > { %v5607_v14 = vpop.f32.mrf.mxu0  ;;  %7546 = vmatmul.msk.bf16.gmra.mxu1 %vm2280_vm9, %v7884_v55 }
 0x6e4   : > { %5677 = vst.msk [vmem:[#allocation3] sm:$0xff] %vm12620_vm1, %v5661_v8  ;;  %v7899_v8 = vld [vmem:[#allocation2 + $0x80] sm:$0xff]  ;;  %vm12635_vm1 = vmmov %vm12610_vm0 }
 0x6e5   : > { %v5277_v12 = vpop.f32.mrf.mxu2 }
 0x6e6   : > { %v5431_v2 = vpop.f32.mrf.mxu3  ;;  %v5427_v33 = vadd.f32 %v5426_v57, %v5277_v12  ;;  %v7898_v57 = vld [vmem:[#allocation2 + $0x78] sm:$0xff] }
 0x6e8   : > { %v5643_v21 = vadd.f32 %v5604_v27, %v5427_v33 }
 0x6ea   : > { %v5662_v41 = vadd.f32 %v11839_v46, %v5643_v21  ;;  %7606 = vmatmul.msk.bf16.gmra.mxu2 %vm2280_vm9, %v7866_v34 }
 0x6eb   : > { %7683 = vmatmul.msk.bf16.gmra.mxu3 %vm2280_vm9, %v7895_v20  ;;  %v5609_v26 = vpop.f32.mrf.mxu0 }
 0x6ec   : > { %5678 = vst.msk [vmem:[#allocation3 + $0x8] sm:$0xff] %vm12621_vm7, %v5662_v41  ;;  %vm12636_vm7 = vmmov %vm12610_vm0 }
 0x6ed   : > { %v5280_v4 = vpop.f32.mrf.mxu2 }
 0x6ee   : > { %v5434_v1 = vpop.f32.mrf.mxu3  ;;  %v5430_v29 = vadd.f32 %v5429_v40, %v5280_v4 }
 0x6f0   : > { %v5644_v52 = vadd.f32 %v5607_v14, %v5430_v29  ;;  %v7900_v29 = vld [vmem:[#allocation2 + $0x88] sm:$0xff] }
 0x6f2   : > { %v5663_v22 = vadd.f32 %v11839_v46, %v5644_v52 }
 0x6f3   : > { %7547 = vmatmul.msk.bf16.gmra.mxu1 %vm2280_vm9, %v7885_v59  ;;  %v5612_v48 = vpop.f32.mrf.mxu0 }
 0x6f4   : > { %5679 = vst.msk [vmem:[#allocation3 + $0x10] sm:$0xff] %vm12622_vm3, %v5663_v22  ;;  %v7871_v22 = vld [vmem:[#allocation2 + $0x70] sm:$0xff]  ;;  %vm12637_vm3 = vmmov %vm12610_vm0 }
 0x6f5   : > { %v5282_v7 = vpop.f32.mrf.mxu2 }
 0x6f6   : > { %v5432_v62 = vadd.f32 %v5431_v2, %v5282_v7  ;;  %v5436_v38 = vpop.f32.mrf.mxu3 }
 0x6f8   : > { %v5645_v53 = vadd.f32 %v5609_v26, %v5432_v62 }
 0x6fa   : > { %v5664_v18 = vadd.f32 %v11839_v46, %v5645_v53  ;;  %7607 = vmatmul.msk.bf16.gmra.mxu2 %vm2280_vm9, %v7867_v30 }
 0x6fb   : > { %7684 = vmatmul.msk.bf16.gmra.mxu3 %vm2280_vm9, %v7896_v31  ;;  %v5614_v56 = vpop.f32.mrf.mxu0 }
 0x6fc   : > { %5680 = vst.msk [vmem:[#allocation3 + $0x18] sm:$0xff] %vm12623_vm12, %v5664_v18  ;;  %vm12638_vm12 = vmmov %vm12610_vm0 }
 0x6fd   : > { %v5285_v9 = vpop.f32.mrf.mxu2 }
 0x6fe   : > { %v5439_v54 = vpop.f32.mrf.mxu3  ;;  %v5435_v58 = vadd.f32 %v5434_v1, %v5285_v9 }
 0x700   : > { %v5646_v35 = vadd.f32 %v5612_v48, %v5435_v58 }
 0x702   : > { %v5665_v19 = vadd.f32 %v11839_v46, %v5646_v35 }
 0x703   : > { %7548 = vmatmul.msk.bf16.gmra.mxu1 %vm2280_vm9, %v7886_v3  ;;  %v5617_v13 = vpop.f32.mrf.mxu0 }
 0x704   : > { %5681 = vst.msk [vmem:[#allocation3 + $0x20] sm:$0xff] %vm12610_vm0, %v5665_v19  ;;  %v7872_v19 = vld [vmem:[#allocation2 + $0x78] sm:$0xff] }
 0x705   : > { %v5287_v24 = vpop.f32.mrf.mxu2 }
 0x706   : > { %v5441_v47 = vpop.f32.mrf.mxu3  ;;  %v5437_v36 = vadd.f32 %v5436_v38, %v5287_v24 }
 0x708   : > { %v5647_v15 = vadd.f32 %v5614_v56, %v5437_v36 }
 0x70a   : > { %v5666_v51 = vadd.f32 %v11839_v46, %v5647_v15  ;;  %7608 = vmatmul.msk.bf16.gmra.mxu2 %vm2280_vm9, %v7868_v63 }
 0x70b   : > { %7685 = vmatmul.msk.bf16.gmra.mxu3 %vm2280_vm9, %v7897_v49  ;;  %v5619_v37 = vpop.f32.mrf.mxu0 }
 0x70c   : > { %5682 = vst.msk [vmem:[#allocation3 + $0x28] sm:$0xff] %vm12624_vm10, %v5666_v51  ;;  %vm12639_vm10 = vmmov %vm12610_vm0 }
 0x70d   : > { %v5290_v42 = vpop.f32.mrf.mxu2 }
 0x70e   : > { %v5440_v45 = vadd.f32 %v5439_v54, %v5290_v42  ;;  %v5444_v28 = vpop.f32.mrf.mxu3 }
 0x710   : > { %v5648_v0 = vadd.f32 %v5617_v13, %v5440_v45  ;;  %v5858_v53 = vpop.f32.mrf.mxu1 }
 0x712   : > { %v5667_v60 = vadd.f32 %v11839_v46, %v5648_v0 }
 0x713   : > { %v5622_v61 = vpop.f32.mrf.mxu0 }
 0x714   : > { %5683 = vst.msk [vmem:[#allocation3 + $0x30] sm:$0xff] %vm12625_vm11, %v5667_v60  ;;  %vm12640_vm11 = vmmov %vm12610_vm0 }
 0x715   : > { %v5292_v50 = vpop.f32.mrf.mxu2 }
 0x716   : > { %v5442_v23 = vadd.f32 %v5441_v47, %v5292_v50  ;;  %v5446_v32 = vpop.f32.mrf.mxu3 }
 0x718   : > { %v5649_v17 = vadd.f32 %v5619_v37, %v5442_v23  ;;  %v5860_v35 = vpop.f32.mrf.mxu1 }
 0x71a   : > { %v5668_v10 = vadd.f32 %v11839_v46, %v5649_v17  ;;  %7609 = vmatmul.msk.bf16.gmra.mxu2 %vm2280_vm9, %v7869_v6 }
 0x71b   : > { %7686 = vmatmul.msk.bf16.gmra.mxu3 %vm2280_vm9, %v7898_v57  ;;  %v5624_v12 = vpop.f32.mrf.mxu0  ;;  %v7908_v57 = vld [vmem:[%s12266_s6 + $0x8] sm:$0xff] }
 0x71c   : > { %5684 = vst.msk [vmem:[#allocation3 + $0x38] sm:$0xff] %vm12626_vm5, %v5668_v10  ;;  %6407 = vmatpush.bf16.msrb.mxu0 %v7908_v57  ;;  %vm12641_vm5 = vmmov %vm12610_vm0 }
 0x71d   : > { %v5295_v16 = vpop.f32.mrf.mxu2 }
 0x71e   : > { %v5449_v44 = vpop.f32.mrf.mxu3  ;;  %v5445_v39 = vadd.f32 %v5444_v28, %v5295_v16 }
 0x720   : > { %v5650_v11 = vadd.f32 %v5622_v61, %v5445_v39  ;;  %v5863_v51 = vpop.f32.mrf.mxu1 }
 0x722   : > { %v5669_v43 = vadd.f32 %v11839_v46, %v5650_v11 }
 0x723   : > { %v5627_v41 = vpop.f32.mrf.mxu0 }
 0x724   : > { %5685 = vst.msk [vmem:[#allocation3 + $0x40] sm:$0xff] %vm12627_vm15, %v5669_v43  ;;  %vm12642_vm15 = vmmov %vm12610_vm0 }
 0x725   : > { %v5297_v40 = vpop.f32.mrf.mxu2 }
 0x726   : > { %v5451_v25 = vpop.f32.mrf.mxu3  ;;  %v5447_v27 = vadd.f32 %v5446_v32, %v5297_v40 }
 0x728   : > { %v5651_v2 = vadd.f32 %v5624_v12, %v5447_v27  ;;  %v5865_v50 = vpop.f32.mrf.mxu1 }
 0x72a   : > { %7610 = vmatmul.msk.bf16.gmra.mxu2 %vm2280_vm9, %v7870_v5  ;;  %v5670_v33 = vadd.f32 %v11839_v46, %v5651_v2 }
 0x72b   : > { %7687 = vmatmul.msk.bf16.gmra.mxu3 %vm2280_vm9, %v7899_v8  ;;  %v5629_v26 = vpop.f32.mrf.mxu0 }
 0x72c   : > { %5686 = vst.msk [vmem:[#allocation3 + $0x48] sm:$0xff] %vm12628_vm13, %v5670_v33  ;;  %vm12643_vm13 = vmmov %vm12610_vm0 }
 0x72d   : > { %v5300_v55 = vpop.f32.mrf.mxu2 }
 0x72e   : > { %v5454_v21 = vpop.f32.mrf.mxu3  ;;  %v5450_v14 = vadd.f32 %v5449_v44, %v5300_v55 }
 0x730   : > { %v5652_v34 = vadd.f32 %v5627_v41, %v5450_v14  ;;  %v5868_v61 = vpop.f32.mrf.mxu1 }
 0x732   : > { %v5671_v20 = vadd.f32 %v11839_v46, %v5652_v34 }
 0x733   : > { %v5632_v48 = vpop.f32.mrf.mxu0 }
 0x734   : > { %5687 = vst.msk [vmem:[#allocation3 + $0x50] sm:$0xff] %vm12629_vm14, %v5671_v20  ;;  %vm12644_vm14 = vmmov %vm12610_vm0 }
 0x735   : > { %v5302_v4 = vpop.f32.mrf.mxu2 }
 0x736   : > { %v5456_v1 = vpop.f32.mrf.mxu3  ;;  %v5452_v52 = vadd.f32 %v5451_v25, %v5302_v4 }
 0x738   : > { %v5653_v7 = vadd.f32 %v5629_v26, %v5452_v52  ;;  %v5870_v8 = vpop.f32.mrf.mxu1 }
 0x73a   : > { %7611 = vmatmul.msk.bf16.gmra.mxu2 %vm2280_vm9, %v7871_v22  ;;  %v5672_v62 = vadd.f32 %v11839_v46, %v5653_v7 }
 0x73b   : > { %7688 = vmatmul.msk.bf16.gmra.mxu3 %vm2280_vm9, %v7900_v29  ;;  %v5634_v56 = vpop.f32.mrf.mxu0 }
 0x73c   : > { %5688 = vst.msk [vmem:[#allocation3 + $0x58] sm:$0xff] %vm12630_vm6, %v5672_v62  ;;  %vm12645_vm6 = vmmov %vm12610_vm0 }
 0x73d   : > { %v5305_v38 = vpop.f32.mrf.mxu2 }
 0x73e   : > { %v5459_v59 = vpop.f32.mrf.mxu3  ;;  %v5455_v18 = vadd.f32 %v5454_v21, %v5305_v38 }
 0x740   : > { %v5654_v30 = vadd.f32 %v5632_v48, %v5455_v18  ;;  %v5873_v41 = vpop.f32.mrf.mxu1 }
 0x742   : > { %v5673_v31 = vadd.f32 %v11839_v46, %v5654_v30 }
 0x743   : > { %v5637_v63 = vpop.f32.mrf.mxu0 }
 0x744   : > { %5689 = vst.msk [vmem:[#allocation3 + $0x60] sm:$0xff] %vm12631_vm4, %v5673_v31  ;;  %vm12646_vm4 = vmmov %vm12610_vm0 }
 0x745   : > { %v5307_v9 = vpop.f32.mrf.mxu2 }
 0x746   : > { %v5461_v54 = vpop.f32.mrf.mxu3  ;;  %v5457_v58 = vadd.f32 %v5456_v1, %v5307_v9 }
 0x748   : > { %v5655_v3 = vadd.f32 %v5634_v56, %v5457_v58  ;;  %v5875_v52 = vpop.f32.mrf.mxu1 }
 0x74a   : > { %7612 = vmatmul.msk.bf16.gmra.mxu2 %vm2280_vm9, %v7872_v19  ;;  %v5674_v24 = vadd.f32 %v11839_v46, %v5655_v3  ;;  %vm12634_vm9 = vmmov %vm12610_vm0 }
 0x74b   : > { %v5639_v0 = vpop.f32.mrf.mxu0 }
 0x74c   : > { %5690 = vst.msk [vmem:[#allocation3 + $0x68] sm:$0xff] %vm12632_vm8, %v5674_v24  ;;  %vm12647_vm8 = vmmov %vm12610_vm0 }
 0x74d   : > { %v5310_v47 = vpop.f32.mrf.mxu2 }
 0x74e   : > { %v6184_v36 = vpop.f32.mrf.mxu3  ;;  %v5460_v15 = vadd.f32 %v5459_v59, %v5310_v47 }
 0x750   : > { %v5656_v49 = vadd.f32 %v5637_v63, %v5460_v15  ;;  %v5878_v18 = vpop.f32.mrf.mxu1 }
 0x752   : > { %v5675_v13 = vadd.f32 %v11839_v46, %v5656_v49 }
 0x754   : > { %5691 = vst.msk [vmem:[#allocation3 + $0x70] sm:$0xff] %vm12633_vm2, %v5675_v13  ;;  %vm12648_vm2 = vmmov %vm12610_vm0 }
 0x755   : > { %v5312_v42 = vpop.f32.mrf.mxu2 }
 0x756   : > { %v6186_v45 = vpop.f32.mrf.mxu3  ;;  %v5462_v28 = vadd.f32 %v5461_v54, %v5312_v42 }
 0x758   : > { %v5657_v60 = vadd.f32 %v5639_v0, %v5462_v28 }
 0x75a   : > { %v5676_v23 = vadd.f32 %v11839_v46, %v5657_v60 }
 0x75c   : > { %5692 = vst.msk [vmem:[#allocation3 + $0x78] sm:$0xff] %vm12634_vm9, %v5676_v23  ;;  %vm12649_vm9 = vmmov %vm12610_vm0 }
 0x75d   : > { %v6007_v32 = vpop.f32.mrf.mxu2 }
 0x75e   : > { %v6189_v37 = vpop.f32.mrf.mxu3  ;;  %v6008_v17 = vadd.f32 %v6007_v32, %v5858_v53 }
 0x760   : > { %v6224_v10 = vadd.f32 %v6184_v36, %v6008_v17 }
 0x762   : > { %v6240_v6 = vadd.f32 %v11839_v46, %v6224_v10  ;;  %v11919_v10 = vld [vmem:[#allocation3 + $0x8] sm:$0xff] }
 0x764   : > { %6256 = vst.msk [vmem:[#allocation3 + $0x80] sm:$0xff] %vm12635_vm1, %v6240_v6  ;;  %vm12650_vm1 = vmmov %vm12610_vm0 }
 0x765   : > { %v6009_v16 = vpop.f32.mrf.mxu2 }
 0x766   : > { %v6191_v44 = vpop.f32.mrf.mxu3  ;;  %v6010_v39 = vadd.f32 %v6009_v16, %v5860_v35  ;;  %v5880_v35 = vpop.f32.mrf.mxu1  ;;  %v11921_v16 = vld [vmem:[#allocation3] sm:$0xff] }
 0x768   : > { %v6225_v11 = vadd.f32 %v6186_v45, %v6010_v39  ;;  %v6289_v39 = vsel %vm12645_vm6, %v11919_v10, 0.0  ;;  %vm12660_vm6 = vmmov %vm12610_vm0 }
 0x76a   : > { %v6241_v43 = vadd.f32 %v11839_v46, %v6225_v11  ;;  %v11928_v11 = vld [vmem:[#allocation3 + $0x18] sm:$0xff] }
 0x76c   : > { %6257 = vst.msk [vmem:[#allocation3 + $0x88] sm:$0xff] %vm12636_vm7, %v6241_v43  ;;  %vm12651_vm7 = vmmov %vm12610_vm0 }
 0x76d   : > { %v6012_v40 = vpop.f32.mrf.mxu2 }
 0x76e   : > { %v6194_v25 = vpop.f32.mrf.mxu3  ;;  %v6013_v27 = vadd.f32 %v6012_v40, %v5863_v51  ;;  %v5883_v15 = vpop.f32.mrf.mxu1  ;;  %v7907_v51 = vld [vmem:[%s12266_s6] sm:$0xff]  ;;  %v6288_v40 = vsel %vm12646_vm4, %v11921_v16, 0.0  ;;  %vm12661_vm4 = vmmov %vm12610_vm0 }
 0x76f   : > { %6408 = vmatpush.bf16.msrb.mxu0 %v7907_v51 }
 0x770   : > { %v6226_v5 = vadd.f32 %v6189_v37, %v6013_v27  ;;  %v6290_v27 = vadd.f32 %v6289_v39, %v6288_v40 }
 0x772   : > { %v6242_v12 = vadd.f32 %v11839_v46, %v6226_v5  ;;  %v11935_v5 = vld [vmem:[#allocation3 + $0x20] sm:$0xff] }
 0x774   : > { %6258 = vst.msk [vmem:[#allocation3 + $0x90] sm:$0xff] %vm12637_vm3, %v6242_v12  ;;  %v6293_v12 = vsel %vm12649_vm9, %v11928_v11, 0.0  ;;  %vm12652_vm3 = vmmov %vm12610_vm0 }
 0x775   : > { %v6014_v2 = vpop.f32.mrf.mxu2  ;;  %vm12664_vm9 = vmmov %vm12610_vm0 }
 0x776   : > { %v6196_v33 = vpop.f32.mrf.mxu3  ;;  %v6015_v55 = vadd.f32 %v6014_v2, %v5865_v50  ;;  %v5885_v28 = vpop.f32.mrf.mxu1 }
 0x778   : > { %v6227_v21 = vadd.f32 %v6191_v44, %v6015_v55  ;;  %v11923_v44 = vld [vmem:[#allocation3 + $0x10] sm:$0xff]  ;;  %v11939_v55 = vld [vmem:[#allocation3 + $0x28] sm:$0xff] }
 0x77a   : > { %v6243_v14 = vadd.f32 %v11839_v46, %v6227_v21 }
 0x77c   : > { %6259 = vst.msk [vmem:[#allocation3 + $0x98] sm:$0xff] %vm12638_vm12, %v6243_v14  ;;  %v6295_v14 = vsel %vm12650_vm1, %v11935_v5, 0.0  ;;  %vm12653_vm12 = vmmov %vm12610_vm0 }
 0x77d   : > { %v6017_v34 = vpop.f32.mrf.mxu2  ;;  %vm12665_vm1 = vmmov %vm12610_vm0 }
 0x77e   : > { %v6018_v20 = vadd.f32 %v6017_v34, %v5868_v61  ;;  %v6199_v4 = vpop.f32.mrf.mxu3  ;;  %v5888_v6 = vpop.f32.mrf.mxu1  ;;  %v11943_v34 = vld [vmem:[#allocation3 + $0x30] sm:$0xff] }
 0x780   : > { %v6228_v1 = vadd.f32 %v6194_v25, %v6018_v20  ;;  %v6291_v25 = vsel %vm12647_vm8, %v11923_v44, 0.0  ;;  %vm12662_vm8 = vmmov %vm12610_vm0 }
 0x782   : > { %v6244_v29 = vadd.f32 %v11839_v46, %v6228_v1  ;;  %v6297_v1 = vsel %vm12651_vm7, %v11939_v55, 0.0  ;;  %vm12666_vm7 = vmmov %vm12610_vm0 }
 0x784   : > { %6260 = vst.msk [vmem:[#allocation3 + $0xa0] sm:$0xff] %vm12610_vm0, %v6244_v29  ;;  %v11948_v29 = vld [vmem:[#allocation3 + $0x88] sm:$0xff] }
 0x785   : > { %v6019_v22 = vpop.f32.mrf.mxu2 }
 0x786   : > { %v6020_v26 = vadd.f32 %v6019_v22, %v5870_v8  ;;  %v6201_v62 = vpop.f32.mrf.mxu3 }
 0x788   : > { %v6229_v7 = vadd.f32 %v6196_v33, %v6020_v26  ;;  %v6292_v33 = vadd.f32 %v6291_v25, %v6290_v27  ;;  %v6299_v26 = vsel %vm12653_vm12, %v11943_v34, 0.0  ;;  %v12003_v25 = vld [vmem:[#allocation3 + $0x68] sm:$0xff]  ;;  %vm12668_vm12 = vmmov %vm12610_vm0 }
 0x78a   : > { %v6245_v38 = vadd.f32 %v11839_v46, %v6229_v7  ;;  %v6294_v20 = vadd.f32 %v6293_v12, %v6292_v33  ;;  %v11955_v7 = vld [vmem:[#allocation3 + $0x80] sm:$0xff] }
 0x78c   : > { %6261 = vst.msk [vmem:[#allocation3 + $0xa8] sm:$0xff] %vm12639_vm10, %v6245_v38  ;;  %v6296_v22 = vadd.f32 %v6295_v14, %v6294_v20  ;;  %vm12654_vm10 = vmmov %vm12610_vm0  ;;  %v12011_v14 = vld [vmem:[#allocation3 + $0x70] sm:$0xff] }
 0x78d   : > { %v6022_v59 = vpop.f32.mrf.mxu2 }
 0x78e   : > { %v6023_v53 = vadd.f32 %v6022_v59, %v5873_v41  ;;  %v6204_v31 = vpop.f32.mrf.mxu3  ;;  %v5890_v41 = vpop.f32.mrf.mxu1 }
 0x790   : > { %v6230_v48 = vadd.f32 %v6199_v4, %v6023_v53  ;;  %v11959_v53 = vld [vmem:[#allocation3 + $0x40] sm:$0xff] }
 0x792   : > { %v6246_v30 = vadd.f32 %v11839_v46, %v6230_v48 }
 0x794   : > { %6262 = vst.msk [vmem:[#allocation3 + $0xb0] sm:$0xff] %vm12640_vm11, %v6246_v30  ;;  %vm12655_vm11 = vmmov %vm12610_vm0 }
 0x795   : > { %v6024_v9 = vpop.f32.mrf.mxu2 }
 0x796   : > { %v6025_v54 = vadd.f32 %v6024_v9, %v5875_v52  ;;  %v6206_v56 = vpop.f32.mrf.mxu3  ;;  %v11950_v52 = vld [vmem:[#allocation3 + $0x38] sm:$0xff] }
 0x797   : > { %v6301_v30 = vsel %vm12610_vm0, %v11950_v52, 0.0  ;;  %v11965_v9 = vld [vmem:[#allocation3 + $0x98] sm:$0xff] }
 0x798   : > { %v6231_v58 = vadd.f32 %v6201_v62, %v6025_v54  ;;  %v11957_v62 = vld [vmem:[#allocation3 + $0x90] sm:$0xff]  ;;  %v11967_v54 = vld [vmem:[#allocation3 + $0x48] sm:$0xff] }
 0x79a   : > { %v6247_v19 = vadd.f32 %v11839_v46, %v6231_v58 }
 0x79c   : > { %6263 = vst.msk [vmem:[#allocation3 + $0xb8] sm:$0xff] %vm12641_vm5, %v6247_v19  ;;  %v6303_v19 = vsel %vm12655_vm11, %v11959_v53, 0.0  ;;  %vm12656_vm5 = vmmov %vm12610_vm0 }
 0x79d   : > { %v6027_v3 = vpop.f32.mrf.mxu2  ;;  %vm12670_vm11 = vmmov %vm12610_vm0 }
 0x79e   : > { %v6028_v24 = vadd.f32 %v6027_v3, %v5878_v18  ;;  %v6209_v13 = vpop.f32.mrf.mxu3  ;;  %v6298_v18 = vadd.f32 %v6297_v1, %v6296_v22 }
 0x7a0   : > { %v6232_v47 = vadd.f32 %v6204_v31, %v6028_v24  ;;  %v6343_v31 = vsel %vm12654_vm10, %v11948_v29, 0.0  ;;  %v6300_v58 = vadd.f32 %v6299_v26, %v6298_v18  ;;  %v11975_v24 = vld [vmem:[#allocation3 + $0xa0] sm:$0xff]  ;;  %vm12669_vm10 = vmmov %vm12610_vm0 }
 0x7a2   : > { %v6248_v36 = vadd.f32 %v11839_v46, %v6232_v47  ;;  %v11977_v47 = vld [vmem:[#allocation3 + $0x50] sm:$0xff] }
 0x7a3   : > { %v12001_v40 = vld [vmem:[#allocation3 + $0xb8] sm:$0xff] }
 0x7a4   : > { %6264 = vst.msk [vmem:[#allocation3 + $0xc0] sm:$0xff] %vm12642_vm15, %v6248_v36  ;;  %vm12657_vm15 = vmmov %vm12610_vm0  ;;  %v6302_v36 = vadd.f32 %v6301_v30, %v6300_v58  ;;  %v6355_v22 = vsel %vm12668_vm12, %v12001_v40, 0.0 }
 0x7a5   : > { %v6029_v63 = vpop.f32.mrf.mxu2  ;;  %v6345_v3 = vsel %vm12657_vm15, %v11957_v62, 0.0  ;;  %vm12672_vm15 = vmmov %vm12610_vm0 }
 0x7a6   : > { %v6030_v49 = vadd.f32 %v6029_v63, %v5880_v35  ;;  %v6211_v23 = vpop.f32.mrf.mxu3 }
 0x7a8   : > { %v6233_v42 = vadd.f32 %v6206_v56, %v6030_v49  ;;  %v6342_v56 = vsel %vm12656_vm5, %v11955_v7, 0.0  ;;  %vm12671_vm5 = vmmov %vm12610_vm0 }
 0x7aa   : > { %v6249_v45 = vadd.f32 %v11839_v46, %v6233_v42  ;;  %v11984_v42 = vld [vmem:[#allocation3 + $0xa8] sm:$0xff] }
 0x7ac   : > { %6265 = vst.msk [vmem:[#allocation3 + $0xc8] sm:$0xff] %vm12643_vm13, %v6249_v45  ;;  %vm12658_vm13 = vmmov %vm12610_vm0  ;;  %v11986_v45 = vld [vmem:[#allocation3 + $0x58] sm:$0xff] }
 0x7ad   : > { %v6032_v0 = vpop.f32.mrf.mxu2  ;;  %v6305_v63 = vsel %vm12658_vm13, %v11967_v54, 0.0  ;;  %vm12673_vm13 = vmmov %vm12610_vm0 }
 0x7ae   : > { %v6033_v60 = vadd.f32 %v6032_v0, %v5883_v15  ;;  %v6214_v43 = vpop.f32.mrf.mxu3  ;;  %v6344_v15 = vadd.f32 %v6343_v31, %v6342_v56 }
 0x7b0   : > { %v6234_v50 = vadd.f32 %v6209_v13, %v6033_v60  ;;  %v5893_v13 = vpop.f32.mrf.mxu1  ;;  %v6346_v0 = vadd.f32 %v6345_v3, %v6344_v15  ;;  %v6307_v60 = vsel %vm12661_vm4, %v11977_v47, 0.0  ;;  %vm12675_vm4 = vmmov %vm12610_vm0 }
 0x7b2   : > { %v6250_v32 = vadd.f32 %v11839_v46, %v6234_v50  ;;  %v6349_v50 = vsel %vm12662_vm8, %v11975_v24, 0.0  ;;  %vm12676_vm8 = vmmov %vm12610_vm0 }
 0x7b3   : > { %v12018_v26 = vld [vmem:[#allocation3 + $0xc8] sm:$0xff] }
 0x7b4   : > { %6266 = vst.msk [vmem:[#allocation3 + $0xd0] sm:$0xff] %vm12644_vm14, %v6250_v32  ;;  %vm12659_vm14 = vmmov %vm12610_vm0  ;;  %v6359_v15 = vsel %vm12672_vm15, %v12018_v26, 0.0 }
 0x7b5   : > { %v6034_v37 = vpop.f32.mrf.mxu2  ;;  %v6347_v49 = vsel %vm12659_vm14, %v11965_v9, 0.0  ;;  %vm12674_vm14 = vmmov %vm12610_vm0 }
 0x7b6   : > { %v6035_v17 = vadd.f32 %v6034_v37, %v5885_v28  ;;  %v6216_v38 = vpop.f32.mrf.mxu3  ;;  %v6304_v28 = vadd.f32 %v6303_v19, %v6302_v36 }
 0x7b8   : > { %v6235_v57 = vadd.f32 %v6211_v23, %v6035_v17  ;;  %v11993_v23 = vld [vmem:[#allocation3 + $0xb0] sm:$0xff]  ;;  %v11995_v17 = vld [vmem:[#allocation3 + $0x60] sm:$0xff]  ;;  %v5895_v31 = vpop.f32.mrf.mxu1 }
 0x7b9   : > { %v6353_v33 = vsel %vm12666_vm7, %v11993_v23, 0.0  ;;  %vm12680_vm7 = vmmov %vm12610_vm0 }
 0x7ba   : > { %v6251_v61 = vadd.f32 %v11839_v46, %v6235_v57  ;;  %v6348_v57 = vadd.f32 %v6347_v49, %v6346_v0 }
 0x7bb   : > { %v12027_v58 = vld [vmem:[#allocation3 + $0xd0] sm:$0xff] }
 0x7bc   : > { %6267 = vst.msk [vmem:[#allocation3 + $0xd8] sm:$0xff] %vm12648_vm2, %v6251_v61  ;;  %vm12663_vm2 = vmmov %vm12610_vm0  ;;  %v6361_v0 = vsel %vm12673_vm13, %v12027_v58, 0.0 }
 0x7bd   : > { %v6037_v8 = vpop.f32.mrf.mxu2  ;;  %v6309_v61 = vsel %vm12663_vm2, %v11986_v45, 0.0  ;;  %vm12677_vm2 = vmmov %vm12610_vm0 }
 0x7be   : > { %v6038_v2 = vadd.f32 %v6037_v8, %v5888_v6  ;;  %v6219_v32 = vpop.f32.mrf.mxu3  ;;  %v6306_v6 = vadd.f32 %v6305_v63, %v6304_v28  ;;  %v6350_v8 = vadd.f32 %v6349_v50, %v6348_v57 }
 0x7c0   : > { %v6236_v21 = vadd.f32 %v6214_v43, %v6038_v2  ;;  %v6351_v43 = vsel %vm12664_vm9, %v11984_v42, 0.0  ;;  %v6308_v27 = vadd.f32 %v6307_v60, %v6306_v6  ;;  %v6311_v2 = vsel %vm12665_vm1, %v11995_v17, 0.0  ;;  %vm12678_vm9 = vmmov %vm12610_vm0 }
 0x7c1   : > { %v6352_v20 = vadd.f32 %v6351_v43, %v6350_v8  ;;  %vm12679_vm1 = vmmov %vm12610_vm0 }
 0x7c2   : > { %v6252_v4 = vadd.f32 %v11839_v46, %v6236_v21  ;;  %v12009_v21 = vld [vmem:[#allocation3 + $0xc0] sm:$0xff] }
 0x7c3   : > { %v6354_v18 = vadd.f32 %v6353_v33, %v6352_v20  ;;  %v6357_v30 = vsel %vm12670_vm11, %v12009_v21, 0.0  ;;  %vm6436_vm11 = vcmask 15360  }
 0x7c4   : > { %6268 = vst.msk [vmem:[#allocation3 + $0xe0] sm:$0xff] %vm12652_vm3, %v6252_v4  ;;  %vm12667_vm3 = vmmov %vm12610_vm0 }
 0x7c5   : > { %v6039_v59 = vpop.f32.mrf.mxu2  ;;  %v6313_v1 = vsel %vm12667_vm3, %v12003_v25, 0.0  ;;  %v6356_v56 = vadd.f32 %v6355_v22, %v6354_v18 }
 0x7c6   : > { %v6040_v48 = vadd.f32 %v6039_v59, %v5890_v41  ;;  %v6310_v41 = vadd.f32 %v6309_v61, %v6308_v27  ;;  %v6221_v63 = vpop.f32.mrf.mxu3 }
 0x7c8   : > { %v6237_v35 = vadd.f32 %v6216_v38, %v6040_v48  ;;  %v12020_v38 = vld [vmem:[#allocation3 + $0x78] sm:$0xff]  ;;  %v6312_v59 = vadd.f32 %v6311_v2, %v6310_v41  ;;  %v6315_v48 = vsel %vm12669_vm10, %v12011_v14, 0.0 }
 0x7c9   : > { %v6317_v36 = vsel %vm12671_vm5, %v12020_v38, 0.0 }
 0x7ca   : > { %v6253_v51 = vadd.f32 %v11839_v46, %v6237_v35  ;;  %v6314_v19 = vadd.f32 %v6313_v1, %v6312_v59 }
 0x7cb   : > { %v12037_v60 = vld [vmem:[#allocation3 + $0xe0] sm:$0xff] }
 0x7cc   : > { %6269 = vst.msk [vmem:[#allocation3 + $0xe8] sm:$0xff] %vm12660_vm6, %v6253_v51  ;;  %v12033_v51 = vld [vmem:[#allocation3 + $0xd8] sm:$0xff]  ;;  %v6316_v49 = vadd.f32 %v6315_v48, %v6314_v19  ;;  %vm6440_vm6 = vcmask 1040384   ;;  %v6365_v61 = vsel %vm12676_vm8, %v12037_v60, 0.0  ;;  %vm12683_vm8 = vmmov %vm12679_vm1 }
 0x7cd   : > { %v6042_v37 = vpop.f32.mrf.mxu2  ;;  %v6363_v6 = vsel %vm12674_vm14, %v12033_v51, 0.0 }
 0x7ce   : > { %v6043_v39 = vadd.f32 %v6042_v37, %v5893_v13  ;;  %v6358_v13 = vadd.f32 %v6357_v30, %v6356_v56  ;;  %v6318_v50 = vadd.f32 %v6317_v36, %v6316_v49 }
 0x7d0   : > { %v6238_v12 = vadd.f32 %v6219_v32, %v6043_v39  ;;  %v6360_v32 = vadd.f32 %v6359_v15, %v6358_v13  ;;  %v6319_v27 = vrot.slane %v6318_v50, 4 }
 0x7d2   : > { %v6254_v4 = vadd.f32 %v11839_v46, %v6238_v12  ;;  %v6362_v39 = vadd.f32 %v6361_v0, %v6360_v32  ;;  %v6320_v20 = vadd.f32 %v6319_v27, %v6318_v50 }
 0x7d3   : > { %v12042_v57 = vld [vmem:[#allocation3 + $0xe8] sm:$0xff] }
 0x7d4   : > { %6270 = vst.msk [vmem:[#allocation3 + $0xf0] sm:$0xff] %vm12610_vm0, %v6254_v4  ;;  %v6364_v8 = vadd.f32 %v6363_v6, %v6362_v39  ;;  %v6367_v12 = vsel %vm12677_vm2, %v12042_v57, 0.0  ;;  %v6321_v18 = vrot.slane %v6320_v20, 2  ;;  %vm12684_vm2 = vmmov %vm12679_vm1 }
 0x7d5   : > { %v6044_v35 = vpop.f32.mrf.mxu2 }
 0x7d6   : > { %v6045_v3 = vadd.f32 %v6044_v35, %v5895_v31  ;;  %v6366_v33 = vadd.f32 %v6365_v61, %v6364_v8  ;;  %v6322_v31 = vadd.f32 %v6321_v18, %v6320_v20 }
 0x7d8   : > { %v6239_v28 = vadd.f32 %v6221_v63, %v6045_v3  ;;  %v6368_v4 = vadd.f32 %v6367_v12, %v6366_v33  ;;  %v6323_v56 = vrot.slane %v6322_v31, 1 }
 0x7da   : > { %v6255_v37 = vadd.f32 %v11839_v46, %v6239_v28  ;;  %v6435_v46 = vld [vmem:[%s12267_s7] sm:$0x1]  ;;  %v6324_v15 = vadd.f32 %v6323_v56, %v6322_v31 }
 0x7db   : > { %v12047_v43 = vld [vmem:[#allocation3 + $0xf0] sm:$0xff]  ;;  %v6442_v2 = vsel %vm6440_vm6, %v6435_v46, 0  ;;  %vm12681_vm6 = vmmov %vm12679_vm1 }
 0x7dc   : > { %6271 = vst.msk [vmem:[#allocation3 + $0xf8] sm:$0xff] %vm12675_vm4, %v6255_v37  ;;  %6451 = vmatpush.bf16.msrb.mxu1 %v6442_v2  ;;  %v6369_v41 = vsel %vm12678_vm9, %v12047_v43, 0.0  ;;  %vm12682_vm4 = vmmov %vm12679_vm1 }
 0x7dd   : > { %v6370_v22 = vadd.f32 %v6369_v41, %v6368_v4  ;;  %vm12685_vm9 = vmmov %vm12679_vm1 }
 0x7e3   : > { %v12056_v1 = vld [vmem:[#allocation3 + $0xf8] sm:$0xff] }
 0x7e4   : > { %v6371_v59 = vsel %vm12679_vm1, %v12056_v1, 0.0 }
 0x7e5   : > { %v6372_v48 = vadd.f32 %v6371_v59, %v6370_v22 }
 0x7e7   : > { %v6373_v30 = vrot.slane %v6372_v48, 4 }
 0x7e9   : > { %v6374_v35 = vadd.f32 %v6373_v30, %v6372_v48 }
 0x7eb   : > { %v6375_v19 = vrot.slane %v6374_v35, 2 }
 0x7ed   : > { %v6376_v3 = vadd.f32 %v6375_v19, %v6374_v35 }
 0x7ef   : > { %v6377_v36 = vrot.slane %v6376_v3, 1 }
 0x7f1   : > { %v6378_v63 = vadd.f32 %v6377_v36, %v6376_v3 }
 0x7f3   : > { %v6379_v49 = vadd.f32 %v6378_v63, %v6324_v15 }
 0x7f5   : > { %v6380_v13 = vmul.f32 0.00390625, %v6379_v49 }
 0x7f7   : > { %v6381_v28 = vpack.c.bf16 %v6380_v13, %v6380_v13 }
 0x7f9   : > { %7697 = vmatmul.msk.bf16.vlgmr.msrb.gmra.mxu0 %vm12680_vm7, %v6381_v28  ;;  %vm12686_vm7 = vmmov %vm12679_vm1 }
 0x876   : > { %v6410_v0 = vpop.f32.mrf.mxu0 }
 0x877   : > { %v7698_v50 = vmul.f32 -1.442695, %v6410_v0 }
 0x879   : > { %8226 = vpow2.f32 %v7698_v50 }
 0x87e   : > { %v6412_v32 = vpop.f32.mrf.mxu0 }
 0x87f   : > { %v8227_v37 = vpop.eup %8226 }
 0x880   : > { %v6417_v6 = vadd.f32 1.0, %v8227_v37 }
 0x882   : > { %8228 = vrcp.f32 %v6417_v6  ;;  %v6429_v8 = vand.u32 2147483648, %v6417_v6  ;;  %v6427_v12 = vand.u32 2147483647, %v6417_v6  ;;  %vm6423_vm12 = vweird.f32 %v6417_v6 }
 0x884   : > { %v6430_v33 = vor.u32 1.1754944e-38, %v6429_v8  ;;  %vm6428_vm10 = vcmp.eq.f32.partialorder %v6427_v12, 8.507059e+37  ;;  %v6496_v8 = vld [vmem:[%s8480_s20 + $0x18] sm:$0xff]  ;;  %v6498_v12 = vld [vmem:[%s8480_s20 + $0x28] sm:$0xff] }
 0x888   : > { %v8229_v39 = vpop.eup %8228 }
 0x889   : > { %v6419_v61 = vmul.f32 %v8229_v39, %v6417_v6  ;;  %vm6424_vm3 = vweird.f32 %v8229_v39  ;;  %v6493_v6 = vld [vmem:[%s8480_s20] sm:$0xff] }
 0x88a   : > { %vm6425_vm0 = vmor %vm6423_vm12, %vm6424_vm3 }
 0x88b   : > { %v6420_v27 = vsub.f32 1.0, %v6419_v61  ;;  %v6495_v61 = vld [vmem:[%s8480_s20 + $0x10] sm:$0xff]  ;;  %vm12687_vm3 = vmmov %vm12679_vm1 }
 0x88c   : > { %vm12688_vm12 = vmmov %vm12679_vm1 }
 0x88d   : > { %v6421_v46 = vmul.f32 %v8229_v39, %v6420_v27 }
 0x88f   : > { %v6422_v2 = vadd.f32 %v8229_v39, %v6421_v46 }
 0x891   : > { %v6426_v41 = vsel %vm6425_vm0, %v8229_v39, %v6422_v2  ;;  %v6494_v39 = vld [vmem:[%s8480_s20 + $0x8] sm:$0xff]  ;;  %vm12689_vm0 = vmmov %vm12679_vm1 }
 0x892   : > { %v6431_v20 = vsel %vm6428_vm10, %v6430_v33, %v6426_v41  ;;  %vm12690_vm10 = vmmov %vm12689_vm0 }
 0x893   : > { %v6433_v4 = vmul.f32 %v6431_v20, %v6410_v0  ;;  %v6499_v20 = vld [vmem:[%s8480_s20 + $0x30] sm:$0xff] }
 0x895   : > { %v6434_v22 = vpack.c.bf16 %v6433_v4, %v6433_v4 }
 0x897   : > { %7699 = vmatmul.msk.bf16.vlgmr.msrb.gmra.mxu1 %vm6436_vm11, %v6434_v22  ;;  %vm12691_vm11 = vmmov %vm12689_vm0 }
 0x914   : > { %v6453_v59 = vpop.f32.mrf.mxu1 }
 0x915   : > { %v7700_v18 = vmul.f32 -1.442695, %v6453_v59 }
 0x917   : > { %8230 = vpow2.f32 %v7700_v18 }
 0x91c   : > { %v6455_v48 = vpop.f32.mrf.mxu1 }
 0x91d   : > { %v8231_v30 = vpop.eup %8230 }
 0x91e   : > { %v6460_v31 = vadd.f32 1.0, %v8231_v30  ;;  %v6503_v30 = vld [vmem:[%s8480_s20 + $0x50] sm:$0xff] }
 0x920   : > { %8232 = vrcp.f32 %v6460_v31  ;;  %v6472_v3 = vand.u32 2147483648, %v6460_v31  ;;  %v6470_v15 = vand.u32 2147483647, %v6460_v31  ;;  %vm6466_vm15 = vweird.f32 %v6460_v31 }
 0x922   : > { %v6473_v49 = vor.u32 1.1754944e-38, %v6472_v3  ;;  %vm6471_vm14 = vcmp.eq.f32.partialorder %v6470_v15, 8.507059e+37 }
 0x926   : > { %v8233_v35 = vpop.eup %8232 }
 0x927   : > { %v6462_v19 = vmul.f32 %v8233_v35, %v6460_v31  ;;  %vm6467_vm5 = vweird.f32 %v8233_v35 }
 0x928   : > { %vm6468_vm13 = vmor %vm6466_vm15, %vm6467_vm5 }
 0x929   : > { %v6463_v56 = vsub.f32 1.0, %v6462_v19  ;;  %vm12692_vm5 = vmmov %vm12689_vm0 }
 0x92a   : > { %vm12693_vm15 = vmmov %vm12689_vm0 }
 0x92b   : > { %v6464_v36 = vmul.f32 %v8233_v35, %v6463_v56 }
 0x92d   : > { %v6465_v63 = vadd.f32 %v8233_v35, %v6464_v36 }
 0x92f   : > { %v6469_v13 = vsel %vm6468_vm13, %v8233_v35, %v6465_v63  ;;  %vm12694_vm13 = vmmov %vm12689_vm0 }
 0x930   : > { %v6474_v28 = vsel %vm6471_vm14, %v6473_v49, %v6469_v13  ;;  %vm12695_vm14 = vmmov %vm12689_vm0 }
 0x931   : > { %v12061_v0 = vperm.slane %v6474_v28, 0 }
 0x933   : > { %v6477_v50 = vmul.f32 %v12061_v0, %v11921_v16  ;;  %v6478_v32 = vmul.f32 %v12061_v0, %v11919_v10  ;;  %v6479_v37 = vmul.f32 %v12061_v0, %v11923_v44  ;;  %v6480_v27 = vmul.f32 %v12061_v0, %v11928_v11  ;;  %v6497_v16 = vld [vmem:[%s8480_s20 + $0x20] sm:$0xff] }
 0x934   : > { %v6481_v46 = vmul.f32 %v12061_v0, %v11935_v5  ;;  %v6482_v10 = vmul.f32 %v12061_v0, %v11939_v55  ;;  %v6483_v44 = vmul.f32 %v12061_v0, %v11943_v34  ;;  %v6484_v11 = vmul.f32 %v12061_v0, %v11950_v52  ;;  %v6500_v5 = vld [vmem:[%s8480_s20 + $0x38] sm:$0xff]  ;;  %v6501_v34 = vld [vmem:[%s8480_s20 + $0x40] sm:$0xff] }
 0x935   : > { %v6509_v2 = vadd.f32 %v6493_v6, %v6477_v50  ;;  %v6510_v33 = vadd.f32 %v6494_v39, %v6478_v32  ;;  %v6511_v41 = vadd.f32 %v6495_v61, %v6479_v37  ;;  %v6512_v4 = vadd.f32 %v6496_v8, %v6480_v27 }
 0x936   : > { %v6485_v22 = vmul.f32 %v12061_v0, %v11959_v53  ;;  %v6513_v55 = vadd.f32 %v6497_v16, %v6481_v46  ;;  %v6486_v52 = vmul.f32 %v12061_v0, %v11967_v54  ;;  %v6514_v59 = vadd.f32 %v6498_v12, %v6482_v10  ;;  %v6502_v53 = vld [vmem:[%s8480_s20 + $0x48] sm:$0xff]  ;;  %v6504_v54 = vld [vmem:[%s8480_s20 + $0x58] sm:$0xff] }
 0x937   : > { %6525 = vst.msk [vmem:[%s12091_s24] sm:$0xff] %vm12681_vm6, %v6509_v2  ;;  %v6487_v18 = vmul.f32 %v12061_v0, %v11977_v47  ;;  %v6515_v48 = vadd.f32 %v6499_v20, %v6483_v44  ;;  %v6488_v31 = vmul.f32 %v12061_v0, %v11986_v45  ;;  %v6516_v35 = vadd.f32 %v6500_v5, %v6484_v11  ;;  %v6505_v47 = vld [vmem:[%s8480_s20 + $0x60] sm:$0xff]  ;;  %v6506_v45 = vld [vmem:[%s8480_s20 + $0x68] sm:$0xff]  ;;  %vm12696_vm6 = vmmov %vm12689_vm0 }
 0x938   : > { %6526 = vst.msk [vmem:[%s12091_s24 + $0x8] sm:$0xff] %vm12682_vm4, %v6510_v33  ;;  %v6489_v19 = vmul.f32 %v12061_v0, %v11995_v17  ;;  %v6517_v56 = vadd.f32 %v6501_v34, %v6485_v22  ;;  %v6490_v3 = vmul.f32 %v12061_v0, %v12003_v25  ;;  %v6518_v36 = vadd.f32 %v6502_v53, %v6486_v52  ;;  %v6507_v17 = vld [vmem:[%s8480_s20 + $0x70] sm:$0xff]  ;;  %v6508_v25 = vld [vmem:[%s8480_s20 + $0x78] sm:$0xff]  ;;  %v7709_v20 = vld [vmem:[%s8480_s20 + $0xc0] sm:$0xff] }
 0x939   : > { %6527 = vst.msk [vmem:[%s12091_s24 + $0x10] sm:$0xff] %vm12683_vm8, %v6511_v41  ;;  %v6491_v15 = vmul.f32 %v12061_v0, %v12011_v14  ;;  %v6519_v63 = vadd.f32 %v6503_v30, %v6487_v18  ;;  %v6492_v49 = vmul.f32 %v12061_v0, %v12020_v38  ;;  %v6520_v13 = vadd.f32 %v6504_v54, %v6488_v31  ;;  %v7701_v14 = vld [vmem:[%s8480_s20 + $0x80] sm:$0xff]  ;;  %v7702_v38 = vld [vmem:[%s8480_s20 + $0x88] sm:$0xff]  ;;  %vm12697_vm4 = vmmov %vm12689_vm0 }
 0x93a   : > { %6528 = vst.msk [vmem:[%s12091_s24 + $0x18] sm:$0xff] %vm12684_vm2, %v6512_v4  ;;  %v6557_v28 = vmul.f32 %v12061_v0, %v11955_v7  ;;  %v6521_v50 = vadd.f32 %v6505_v47, %v6489_v19  ;;  %v6558_v32 = vmul.f32 %v12061_v0, %v11948_v29  ;;  %v6522_v37 = vadd.f32 %v6506_v45, %v6490_v3  ;;  %v7703_v7 = vld [vmem:[%s8480_s20 + $0x90] sm:$0xff]  ;;  %v7704_v29 = vld [vmem:[%s8480_s20 + $0x98] sm:$0xff]  ;;  %v7710_v4 = vld [vmem:[%s8480_s20 + $0xc8] sm:$0xff] }
 0x93b   : > { %6529 = vst.msk [vmem:[%s12091_s24 + $0x20] sm:$0xff] %vm12685_vm9, %v6513_v55  ;;  %v6559_v6 = vmul.f32 %v11957_v62, %v12061_v0  ;;  %v6523_v39 = vadd.f32 %v6507_v17, %v6491_v15  ;;  %v6560_v61 = vmul.f32 %v11965_v9, %v12061_v0  ;;  %v6524_v27 = vadd.f32 %v6508_v25, %v6492_v49  ;;  %v7705_v62 = vld [vmem:[%s8480_s20 + $0xa0] sm:$0xff]  ;;  %v7706_v9 = vld [vmem:[%s8480_s20 + $0xa8] sm:$0xff]  ;;  %vm12698_vm8 = vmmov %vm12689_vm0 }
 0x93c   : > { %6530 = vst.msk [vmem:[%s12091_s24 + $0x28] sm:$0xff] %vm12679_vm1, %v6514_v59  ;;  %v6561_v8 = vmul.f32 %v11975_v24, %v12061_v0  ;;  %v6589_v46 = vadd.f32 %v7701_v14, %v6557_v28  ;;  %v6562_v16 = vmul.f32 %v11984_v42, %v12061_v0  ;;  %v6590_v10 = vadd.f32 %v7702_v38, %v6558_v32  ;;  %v7707_v24 = vld [vmem:[%s8480_s20 + $0xb0] sm:$0xff]  ;;  %v7708_v42 = vld [vmem:[%s8480_s20 + $0xb8] sm:$0xff]  ;;  %vm12699_vm2 = vmmov %vm12689_vm0 }
 0x93d   : > { %6531 = vst.msk [vmem:[%s12091_s24 + $0x30] sm:$0xff] %vm12686_vm7, %v6515_v48  ;;  %v6563_v12 = vmul.f32 %v11993_v23, %v12061_v0  ;;  %v6591_v44 = vadd.f32 %v7703_v7, %v6559_v6  ;;  %v6564_v2 = vmul.f32 %v12001_v40, %v12061_v0  ;;  %v6592_v33 = vadd.f32 %v7704_v29, %v6560_v61  ;;  %v7711_v22 = vld [vmem:[%s8480_s20 + $0xd0] sm:$0xff]  ;;  %vm12700_vm9 = vmmov %vm12689_vm0  ;;  %v7713_v59 = vld [vmem:[%s8480_s20 + $0xe0] sm:$0xff] }
 0x93e   : > { %6532 = vst.msk [vmem:[%s12091_s24 + $0x38] sm:$0xff] %vm12687_vm3, %v6516_v35  ;;  %v6565_v41 = vmul.f32 %v12009_v21, %v12061_v0  ;;  %v6593_v23 = vadd.f32 %v7705_v62, %v6561_v8  ;;  %v6566_v11 = vmul.f32 %v12018_v26, %v12061_v0  ;;  %v6594_v40 = vadd.f32 %v7706_v9, %v6562_v16  ;;  %v7712_v26 = vld [vmem:[%s8480_s20 + $0xd8] sm:$0xff]  ;;  %vm12701_vm1 = vmmov %vm12689_vm0  ;;  %v7714_v18 = vld [vmem:[%s8480_s20 + $0xe8] sm:$0xff] }
 0x93f   : > { %6533 = vst.msk [vmem:[%s12091_s24 + $0x40] sm:$0xff] %vm12688_vm12, %v6517_v56  ;;  %v6567_v5 = vmul.f32 %v12027_v58, %v12061_v0  ;;  %v6595_v21 = vadd.f32 %v7707_v24, %v6563_v12  ;;  %v6568_v55 = vmul.f32 %v12033_v51, %v12061_v0  ;;  %v6596_v34 = vadd.f32 %v7708_v42, %v6564_v2  ;;  %vm12702_vm7 = vmmov %vm12689_vm0 }
 0x940   : > { %6534 = vst.msk [vmem:[%s12091_s24 + $0x48] sm:$0xff] %vm12689_vm0, %v6518_v36  ;;  %v6569_v52 = vmul.f32 %v12037_v60, %v12061_v0  ;;  %v6597_v58 = vadd.f32 %v7709_v20, %v6565_v41  ;;  %v6570_v53 = vmul.f32 %v12042_v57, %v12061_v0  ;;  %v6598_v51 = vadd.f32 %v7710_v4, %v6566_v11  ;;  %v7715_v57 = vld [vmem:[%s8480_s20 + $0xf0] sm:$0xff]  ;;  %vm12703_vm3 = vmmov %vm12689_vm0 }
 0x941   : > { %6535 = vst.msk [vmem:[%s12091_s24 + $0x50] sm:$0xff] %vm12690_vm10, %v6519_v63  ;;  %v6571_v48 = vmul.f32 %v12047_v43, %v12061_v0  ;;  %v6599_v60 = vadd.f32 %v7711_v22, %v6567_v5  ;;  %v6572_v30 = vmul.f32 %v12056_v1, %v12061_v0  ;;  %v6600_v31 = vadd.f32 %v7712_v26, %v6568_v55  ;;  %v7716_v43 = vld [vmem:[%s8480_s20 + $0xf8] sm:$0xff]  ;;  %vm12704_vm12 = vmmov %vm12689_vm0  ;;  %s6623_s20 = scalar_lea.sflag [#allocation6], %s8474_s26 }
 0x942   : > { %6536 = vst.msk [vmem:[%s12091_s24 + $0x58] sm:$0xff] %vm12691_vm11, %v6520_v13  ;;  %v6601_v35 = vadd.f32 %v7713_v59, %v6569_v52  ;;  %v6602_v54 = vadd.f32 %v7714_v18, %v6570_v53  ;;  %vm12705_vm10 = vmmov %vm12689_vm0 }
 0x943   : > { %6537 = vst.msk [vmem:[%s12091_s24 + $0x60] sm:$0xff] %vm12692_vm5, %v6521_v50  ;;  %v6603_v19 = vadd.f32 %v7715_v57, %v6571_v48  ;;  %v6604_v1 = vadd.f32 %v7716_v43, %v6572_v30  ;;  %vm12706_vm11 = vmmov %vm12689_vm0 }
 0x944   : > { %6538 = vst.msk [vmem:[%s12091_s24 + $0x68] sm:$0xff] %vm12693_vm15, %v6522_v37  ;;  %vm12707_vm5 = vmmov %vm12689_vm0 }
 0x945   : > { %6539 = vst.msk [vmem:[%s12091_s24 + $0x70] sm:$0xff] %vm12694_vm13, %v6523_v39  ;;  %vm12708_vm15 = vmmov %vm12689_vm0 }
 0x946   : > { %6540 = vst.msk [vmem:[%s12091_s24 + $0x78] sm:$0xff] %vm12695_vm14, %v6524_v27  ;;  %vm12709_vm13 = vmmov %vm12689_vm0 }
 0x947   : > { %7717 = vst.msk [vmem:[%s12091_s24 + $0x80] sm:$0xff] %vm12696_vm6, %v6589_v46  ;;  %vm12710_vm14 = vmmov %vm12689_vm0 }
 0x948   : > { %7718 = vst.msk [vmem:[%s12091_s24 + $0x88] sm:$0xff] %vm12697_vm4, %v6590_v10 }
 0x949   : > { %7719 = vst.msk [vmem:[%s12091_s24 + $0x90] sm:$0xff] %vm12698_vm8, %v6591_v44 }
 0x94a   : > { %7720 = vst.msk [vmem:[%s12091_s24 + $0x98] sm:$0xff] %vm12699_vm2, %v6592_v33 }
 0x94b   : > { %7721 = vst.msk [vmem:[%s12091_s24 + $0xa0] sm:$0xff] %vm12700_vm9, %v6593_v23 }
 0x94c   : > { %7722 = vst.msk [vmem:[%s12091_s24 + $0xa8] sm:$0xff] %vm12701_vm1, %v6594_v40 }
 0x94d   : > { %7723 = vst.msk [vmem:[%s12091_s24 + $0xb0] sm:$0xff] %vm12702_vm7, %v6595_v21 }
 0x94e   : > { %7724 = vst.msk [vmem:[%s12091_s24 + $0xb8] sm:$0xff] %vm12703_vm3, %v6596_v34 }
 0x94f   : > { %7725 = vst.msk [vmem:[%s12091_s24 + $0xc0] sm:$0xff] %vm12704_vm12, %v6597_v58 }
 0x950   : > { %7726 = vst.msk [vmem:[%s12091_s24 + $0xc8] sm:$0xff] %vm12689_vm0, %v6598_v51 }
 0x951   : > { %7727 = vst.msk [vmem:[%s12091_s24 + $0xd0] sm:$0xff] %vm12705_vm10, %v6599_v60 }
 0x952   : > { %7728 = vst.msk [vmem:[%s12091_s24 + $0xd8] sm:$0xff] %vm12706_vm11, %v6600_v31 }
 0x953   : > { %7729 = vst.msk [vmem:[%s12091_s24 + $0xe0] sm:$0xff] %vm12707_vm5, %v6601_v35 }
 0x954   : > { %7730 = vst.msk [vmem:[%s12091_s24 + $0xe8] sm:$0xff] %vm12708_vm15, %v6602_v54 }
 0x955   : > { %7731 = vst.msk [vmem:[%s12091_s24 + $0xf0] sm:$0xff] %vm12709_vm13, %v6603_v19 }
 0x956   : > { %7732 = vst.msk [vmem:[%s12091_s24 + $0xf8] sm:$0xff] %vm12710_vm14, %v6604_v1 }
 0x957   : > { %8295 = shalt.err (!%p8292_p5)
}
 0x958   : > { %s8342_s26 = smov 128   ;;  %s8343_s24 = smov 8  }
 0x959   : > { %7912 = dma.vmem_to_hbm [thread:$0]  (%p8438_p10), %s6636_s25, 4096, %s6638_s12, %s6623_s20, %s8342_s26, %s8342_s26, %s8343_s24  }
 0x95a PF: > { %p7923_p7 = scmp.ge.s32.totalorder %s8334_s30, 2  ;;  %s6652_s29 = sand.u32 1, %s8322_s27  }
 0x95b   : > { %s6653_s9 = scalar_lea.sflag [#allocation6], %s6652_s29 }
 0x95c   : > { %p7919_p8 = pnand %p7923_p7, %p8442_p11 }
 0x95e   : > { %p7920_p9 = pneg %p7919_p8 }
 0x960   : > { %8317 = dma.done.wait (%p7920_p9), %s6653_s9, 4096  }
 0x961   : > { %8319 = vsyncadd (%p7920_p9), %s6653_s9, 4294963200  ;;  %s12711_s14 = sld [smem:[#allocation10_spill]]  ;;  %p21_p1 = scmp.ge.s32.totalorder %s8414_s11, 6  }
 0x962   : > { %s12712_s29 = sld [smem:[#allocation11_spill]]  ;;  %s12713_s27 = smov %s8326_s28 }
 0x963   : > { %s12715_s30 = smov %s8414_s11  ;;  %23 = sbr.rel (!%p21_p1) target bundleno = 5 (0x5), region = 113 }
 0x967   : > { %s12714_s28 = smov %s12711_s14 }
 0x968   :  { %6659 = vsyncpa [#allocation5], 1 }
 0x969   :  { %6661 = vsyncpa [#allocation5 + $0x1], 1 }
 0x96a   :  { %6662 = vsyncpa [#allocation6], 1 }
 0x96b   :  { %6664 = vsyncpa [#allocation6 + $0x1], 1 }

</bundles_post_ra>
